<compile_context>
chip_gen: v7x
topology: tpu7x:2x2x1
jax: 0.10.0
libtpu: 0.0.40
codegen_flags: <defaults>
</compile_context>

<pallas_src>
import functools
import math

import jax
import jax.numpy as jnp
from jax.experimental import pallas as pl
from jax.experimental.pallas import tpu as pltpu


# ----------------------------------------------------------------------------
# small helpers
# ----------------------------------------------------------------------------

def _round_up(x, m):
    return ((x + m - 1) // m) * m


def _pack_taps(w):
    # (KH, KW, Cin, Cout) -> (Cin, KH*KW*Cout), tap-major columns (t = kh*KW+kw).
    KH, KW, Cin, Cout = w.shape
    return jnp.transpose(w.reshape(KH * KW, Cin, Cout), (1, 0, 2)).reshape(
        Cin, KH * KW * Cout)


def _cparams(vmem_mb=48):
    # <= 48 MiB: leaves headroom on v7x (64 MiB physical) and is plenty on
    # v5e/v6e (128 MiB); actual per-batch working sets are ~8-15 MiB.
    return pltpu.CompilerParams(dimension_semantics=("parallel",),
                                vmem_limit_bytes=vmem_mb * 1024 * 1024)


# ----------------------------------------------------------------------------
# Generic 3x3 "same" conv (pad=1) — kn2row: one tap-packed MXU matmul
# ----------------------------------------------------------------------------

def _conv3x3_same_kernel(x_ref, w_ref, b_ref, o_ref, *, H, W, Wp, Cout, act):
    # x_ref: (1, Np, Cin) bf16 -- spatially padded (pad=1) input flattened
    #        row-major over (H+2, Wp=W+2), plus a few zero rows so the shifted
    #        slices below stay in bounds.
    # w_ref: (Cin, 9*Cout) bf16 (taps packed on the output-column axis)
    # b_ref: (1, Cout) f32 ; o_ref: (1, H, W, Cout)
    x = x_ref[0]
    y = jnp.dot(x, w_ref[...], preferred_element_type=jnp.float32)  # (Np, 9*Cout)
    Mo = H * Wp
    acc = jnp.zeros((Mo, Cout), jnp.float32)
    for t in range(9):
        kh, kw = divmod(t, 3)
        off = kh * Wp + kw
        acc = acc + y[off:off + Mo, t * Cout:(t + 1) * Cout]
    acc = acc + b_ref[...]
    if act == "relu":
        acc = jnp.maximum(acc, 0.0)
    elif act == "sigmoid":
        acc = jax.nn.sigmoid(acc)
    out = acc.reshape(H, Wp, Cout)[:, :W, :]     # drop the padded edge columns
    o_ref[0] = out.astype(o_ref.dtype)


def conv3x3_same_pallas(x, w, b, *, act="relu", out_dtype=jnp.bfloat16,
                        vmem_mb=48):
    """3x3, stride 1, padding 1 conv; x: (B,H,W,Cin), w: (3,3,Cin,Cout) HWIO."""
    B, H, W, Cin = x.shape
    Cout = w.shape[-1]
    Wp = W + 2
    xp = jnp.pad(x.astype(jnp.bfloat16), ((0, 0), (1, 1), (1, 1), (0, 0)))
    Np0 = (H + 2) * Wp
    Np = _round_up(Np0 + 2, 8)
    xf = jnp.pad(xp.reshape(B, Np0, Cin), ((0, 0), (0, Np - Np0), (0, 0)))
    wt = _pack_taps(w).astype(jnp.bfloat16)
    kernel = functools.partial(_conv3x3_same_kernel, H=H, W=W, Wp=Wp,
                               Cout=Cout, act=act)
    return pl.pallas_call(
        kernel,
        out_shape=jax.ShapeDtypeStruct((B, H, W, Cout), out_dtype),
        grid=(B,),
        in_specs=[
            pl.BlockSpec((1, Np, Cin), lambda i: (i, 0, 0)),
            pl.BlockSpec((Cin, 9 * Cout), lambda i: (0, 0)),
            pl.BlockSpec((1, Cout), lambda i: (0, 0)),
        ],
        out_specs=pl.BlockSpec((1, H, W, Cout), lambda i: (i, 0, 0, 0)),
        compiler_params=_cparams(vmem_mb),
    )(xf, wt, b.astype(jnp.float32).reshape(1, Cout))


# ----------------------------------------------------------------------------
# Fused: pixel correlation + spatial_pool_agr + channel MLP + attention apply
# ----------------------------------------------------------------------------

def _pixel_branch_kernel(rflat_ref, dT_ref, dflat_ref, hc_ref,
                         w1_ref, b1_ref, w2_ref, b2_ref, w3_ref, b3_ref,
                         w4_ref, b4_ref, cw1_ref, cb1_ref, cw2_ref, cb2_ref,
                         enh_ref, y_ref, t2p_ref, t3p_ref,
                         *, H, W, Cm, chunk):
    f32, bf16 = jnp.float32, jnp.bfloat16
    HWr = rflat_ref.shape[1]
    C = rflat_ref.shape[2]

    # --- pixel correlation fused with sp1's tap-packed matmul, chunked over
    #     rows so the (HW, HW) correlation never fully materializes. ---------
    dT = dT_ref[0]                                          # (C, HWp) bf16
    w1 = w1_ref[...]                                        # (HWp, 9*Cm) bf16
    start = 0
    while start < HWr:
        cur = min(chunk, HWr - start)
        rc = rflat_ref[0, start:start + cur, :]             # (cur, C) bf16
        pc = jnp.dot(rc, dT, preferred_element_type=f32)    # (cur, HWp) f32
        y_ref[start:start + cur, :] = jnp.dot(
            pc.astype(bf16), w1, preferred_element_type=f32)
        start += cur

    # --- sp1 (valid 3x3 conv): shift-add of the 9 packed tap results --------
    Ho1, Wo1 = H - 2, W - 2
    Mo1 = Ho1 * W
    acc1 = jnp.zeros((Mo1, Cm), f32)
    for t in range(9):
        kh, kw = divmod(t, 3)
        off = kh * W + kw
        acc1 = acc1 + y_ref[off:off + Mo1, t * Cm:(t + 1) * Cm]
    acc1 = jnp.maximum(acc1 + b1_ref[...], 0.0)
    t1 = acc1.reshape(Ho1, W, Cm)[:, :Wo1, :].astype(bf16)      # (Ho1, Wo1, Cm)

    # --- sp2 (valid 3x3 conv, tiny: per-tap matmuls) ------------------------
    Ho2, Wo2 = Ho1 - 2, Wo1 - 2
    acc2 = jnp.zeros((Ho2 * Wo2, Cm), f32)
    for kh in range(3):
        for kw in range(3):
            pch = t1[kh:kh + Ho2, kw:kw + Wo2, :].reshape(Ho2 * Wo2, Cm)
            acc2 = acc2 + jnp.dot(pch, w2_ref[kh, kw],
                                  preferred_element_type=f32)
    t2 = jnp.maximum(acc2 + b2_ref[...], 0.0).reshape(Ho2, Wo2, Cm).astype(bf16)

    # --- sp3: ConvTranspose2d(3) == pad-2 3x3 conv + ReLU -------------------
    t2p_ref[...] = jnp.zeros_like(t2p_ref)
    t2p_ref[2:2 + Ho2, 2:2 + Wo2, :] = t2
    Ho3, Wo3 = Ho2 + 2, Wo2 + 2
    acc3 = jnp.zeros((Ho3 * Wo3, Cm), f32)
    for kh in range(3):
        for kw in range(3):
            pch = t2p_ref[kh:kh + Ho3, kw:kw + Wo3, :].reshape(Ho3 * Wo3, Cm)
            acc3 = acc3 + jnp.dot(pch, w3_ref[kh, kw],
                                  preferred_element_type=f32)
    t3 = jnp.maximum(acc3 + b3_ref[...], 0.0).reshape(Ho3, Wo3, Cm).astype(bf16)

    # --- sp4: pad-2 3x3 conv -> 1 channel, sigmoid.  Cout==1 -> VPU multiply
    #     + lane reduction (avoids a width-1 MXU matmul); satt stays in VMEM. -
    t3p_ref[...] = jnp.zeros_like(t3p_ref)
    t3p_ref[2:2 + Ho3, 2:2 + Wo3, :] = t3
    acc4 = jnp.zeros((H, W), f32)
    for kh in range(3):
        for kw in range(3):
            pch = t3p_ref[kh:kh + H, kw:kw + W, :].astype(f32)
            acc4 = acc4 + jnp.sum(pch * w4_ref[kh, kw].reshape(1, 1, Cm),
                                  axis=-1)
    satt = jax.nn.sigmoid(acc4 + b4_ref[...])                  # (H, W) f32

    # --- channel attention: depth correlation + shared MLP (pool(1)s are
    #     identities -> sigmoid(2*MLP(dc))) ----------------------------------
    prod = rflat_ref[0].astype(f32) * dflat_ref[0].astype(f32)  # (HWr, C)
    dc = jnp.sum(prod, axis=0, keepdims=True)                   # (1, C)
    hmid = jnp.maximum(
        jnp.dot(dc, cw1_ref[...], preferred_element_type=f32) + cb1_ref[...],
        0.0)
    catt = jax.nn.sigmoid(2.0 * (
        jnp.dot(hmid, cw2_ref[...], preferred_element_type=f32) + cb2_ref[...]))

    # --- attention application: enhanced = concat(hc*satt, hc*catt) ---------
    hc = hc_ref[0]                                              # (H, W, C) bf16
    sp_part = hc * satt.astype(bf16)[:, :, None]
    ch_part = hc * catt.astype(bf16).reshape(1, 1, C)
    enh_ref[0, :, :, 0:C] = sp_part
    enh_ref[0, :, :, C:2 * C] = ch_part


def pixel_branch_pallas(r, d, hc, p, *, vmem_mb=48):
    """Returns enhanced features (B, H, W, 2C) bf16
    = concat(h_c_conv * spatial_att, h_c_conv * channel_att)."""
    B, H, W, C = r.shape
    HW = H * W
    HWr = _round_up(HW + 2, 8)        # pc rows (+ slack for the shifted slices)
    HWp = _round_up(HW, 128)          # pc lane dim / sp1 Cin (zero padded)
    Cm = p["sp2_w"].shape[-1]
    C4 = p["ca_w1"].shape[-1]
    bf16, f32 = jnp.bfloat16, jnp.float32

    r_flat = jnp.pad(r.reshape(B, HW, C), ((0, 0), (0, HWr - HW), (0, 0)))
    d_flat = jnp.pad(d.reshape(B, HW, C), ((0, 0), (0, HWr - HW), (0, 0)))
    d_T = jnp.transpose(
        jnp.pad(d.reshape(B, HW, C), ((0, 0), (0, HWp - HW), (0, 0))),
        (0, 2, 1))                                              # (B, C, HWp)

    w1p = _pack_taps(jnp.pad(
        p["sp1_w"], ((0, 0), (0, 0), (0, HWp - HW), (0, 0)))).astype(bf16)
    w2 = p["sp2_w"].astype(bf16)
    w3 = p["sp3_w"].astype(bf16)
    w4 = p["sp4_w"].reshape(3, 3, Cm).astype(f32)

    chunk = min(512, HWr)
    kernel = functools.partial(_pixel_branch_kernel, H=H, W=W, Cm=Cm,
                               chunk=chunk)
    return pl.pallas_call(
        kernel,
        out_shape=jax.ShapeDtypeStruct((B, H, W, 2 * C), bf16),
        grid=(B,),
        in_specs=[
            pl.BlockSpec((1, HWr, C), lambda b: (b, 0, 0)),
            pl.BlockSpec((1, C, HWp), lambda b: (b, 0, 0)),
            pl.BlockSpec((1, HWr, C), lambda b: (b, 0, 0)),
            pl.BlockSpec((1, H, W, C), lambda b: (b, 0, 0, 0)),
            pl.BlockSpec((HWp, 9 * Cm), lambda b: (0, 0)),
            pl.BlockSpec((1, Cm), lambda b: (0, 0)),
            pl.BlockSpec((3, 3, Cm, Cm), lambda b: (0, 0, 0, 0)),
            pl.BlockSpec((1, Cm), lambda b: (0, 0)),
            pl.BlockSpec((3, 3, Cm, Cm), lambda b: (0, 0, 0, 0)),
            pl.BlockSpec((1, Cm), lambda b: (0, 0)),
            pl.BlockSpec((3, 3, Cm), lambda b: (0, 0, 0)),
            pl.BlockSpec((1, 1), lambda b: (0, 0)),
            pl.BlockSpec((C, C4), lambda b: (0, 0)),
            pl.BlockSpec((1, C4), lambda b: (0, 0)),
            pl.BlockSpec((C4, C), lambda b: (0, 0)),
            pl.BlockSpec((1, C), lambda b: (0, 0)),
        ],
        out_specs=pl.BlockSpec((1, H, W, 2 * C), lambda b: (b, 0, 0, 0)),
        scratch_shapes=[
            pltpu.VMEM((HWr, 9 * Cm), f32),          # packed sp1 tap results
            pltpu.VMEM((H, W, Cm), bf16),            # sp2 output padded by 2
            pltpu.VMEM((H + 2, W + 2, Cm), bf16),    # sp3 output padded by 2
        ],
        compiler_params=_cparams(vmem_mb),
    )(r_flat, d_T, d_flat, hc,
      w1p, p["sp1_b"].astype(f32).reshape(1, Cm),
      w2, p["sp2_b"].astype(f32).reshape(1, Cm),
      w3, p["sp3_b"].astype(f32).reshape(1, Cm),
      w4, p["sp4_b"].astype(f32).reshape(1, 1),
      p["ca_w1"].astype(f32), p["ca_b1"].astype(f32).reshape(1, C4),
      p["ca_w2"].astype(f32), p["ca_b2"].astype(f32).reshape(1, C))


# ----------------------------------------------------------------------------
# Full forward pass
# ----------------------------------------------------------------------------

def pixel_attention_forward(depth, rgb, p):
    # depth, rgb: (B, C, H, W) float32 (PyTorch NCHW)
    B, C, H, W = depth.shape
    bf16 = jnp.bfloat16
    d = jnp.transpose(depth, (0, 2, 3, 1)).astype(bf16)      # NHWC bf16
    r = jnp.transpose(rgb, (0, 2, 3, 1)).astype(bf16)

    # h_c_convlayer: conv(cat(rgb, depth), 3x3, pad 1) + ReLU.  The concat is
    # done at trace time so every tap's MXU matmul contracts over K = 2C.
    hc = conv3x3_same_pallas(jnp.concatenate([r, d], axis=-1),
                             p["hc_w"], p["hc_b"], act="relu",
                             out_dtype=bf16)

    # fused: pixel correlation (never leaves VMEM) + spatial_pool_agr +
    # depth-correlation channel MLP + attention application.
    enh = pixel_branch_pallas(r, d, hc, p)

    # h_f_convlayer on the already-concatenated enhanced features (K = 2C).
    out = conv3x3_same_pallas(enh, p["hf_w"], p["hf_b"], act="relu",
                              out_dtype=jnp.float32)
    return jnp.transpose(out, (0, 3, 1, 2))                   # back to NCHW

# ----------------------------------------------------------------------------
# Pure-JAX reference with matching bf16 cast points (for the self-check)
# ----------------------------------------------------------------------------

def reference_forward(depth, rgb, p):
    f32, bf16 = jnp.float32, jnp.bfloat16
    d = jnp.transpose(depth, (0, 2, 3, 1)).astype(bf16)
    r = jnp.transpose(rgb, (0, 2, 3, 1)).astype(bf16)
    B, H, W, C = d.shape

    def conv(x, w, b, pad, act=None, out_dtype=f32):
        y = jax.lax.conv_general_dilated(
            x, w, (1, 1), [(pad, pad), (pad, pad)],
            dimension_numbers=("NHWC", "HWIO", "NHWC"),
            preferred_element_type=f32) + b.reshape(1, 1, 1, -1)
        if act == "relu":
            y = jax.nn.relu(y)
        elif act == "sigmoid":
            y = jax.nn.sigmoid(y)
        return y.astype(out_dtype)

    hcc = conv(jnp.concatenate([r, d], -1), p["hc_w"].astype(bf16),
               p["hc_b"], 1, "relu", bf16)

    pc = jnp.einsum("byxc,bpc->byxp", r, d.reshape(B, H * W, C),
                    preferred_element_type=f32).astype(bf16)
    t = conv(pc, p["sp1_w"].astype(bf16), p["sp1_b"], 0, "relu", bf16)
    t = conv(t, p["sp2_w"].astype(bf16), p["sp2_b"], 0, "relu", bf16)
    t3 = conv(t, p["sp3_w"].astype(bf16), p["sp3_b"], 2, "relu", bf16)
    satt = conv(t3.astype(f32), p["sp4_w"], p["sp4_b"], 2, "sigmoid", f32)

    dc = jnp.sum(r.astype(f32) * d.astype(f32), axis=(1, 2))
    h = jax.nn.relu(dc @ p["ca_w1"] + p["ca_b1"])
    catt = jax.nn.sigmoid(2.0 * (h @ p["ca_w2"] + p["ca_b2"]))

    sp = hcc * satt.astype(bf16)
    ch = hcc * catt.astype(bf16)[:, None, None, :]
    enh = jnp.concatenate([sp, ch], -1)
    hf = conv(enh, p["hf_w"].astype(bf16), p["hf_b"], 1, "relu", f32)
    return jnp.transpose(hf, (0, 3, 1, 2))


# ----------------------------------------------------------------------------
# Deterministic parameter initialization (kaiming-normal-like, fan_out)
# ----------------------------------------------------------------------------

def init_params(key, C, H, W, sp_hidden=32):
    HW = H * W
    bn_s = 1.0 / math.sqrt(1.0 + 1e-5)   # eval-mode BatchNorm scale, folded in
    ks = jax.random.split(key, 16)

    def conv_w(k, cin, cout):
        std = math.sqrt(2.0 / (cout * 9))
        return jax.random.normal(k, (3, 3, cin, cout), jnp.float32) * std

    def lin_w(k, cin, cout):
        return jax.random.normal(k, (cin, cout), jnp.float32) * math.sqrt(2.0 / cout)

    def bias(k, n, fan_in):
        bound = 1.0 / math.sqrt(fan_in)
        return jax.random.uniform(k, (n,), jnp.float32, -bound, bound)

    C4 = max(C // 4, 1)
    p = {}
    p["hc_w"] = conv_w(ks[0], 2 * C, C);            p["hc_b"] = bias(ks[1], C, 2 * C * 9)
    p["hf_w"] = conv_w(ks[2], 2 * C, C);            p["hf_b"] = bias(ks[3], C, 2 * C * 9)
    p["sp1_w"] = conv_w(ks[4], HW, sp_hidden) * bn_s
    p["sp1_b"] = bias(ks[5], sp_hidden, HW * 9) * bn_s
    p["sp2_w"] = conv_w(ks[6], sp_hidden, sp_hidden) * bn_s
    p["sp2_b"] = bias(ks[7], sp_hidden, sp_hidden * 9) * bn_s
    # ConvTranspose2d layers synthesized directly in equivalent pad-2-conv form
    p["sp3_w"] = conv_w(ks[8], sp_hidden, sp_hidden) * bn_s
    p["sp3_b"] = bias(ks[9], sp_hidden, sp_hidden * 9) * bn_s
    p["sp4_w"] = conv_w(ks[10], sp_hidden, 1)
    p["sp4_b"] = bias(ks[11], 1, sp_hidden * 9)
    p["ca_w1"] = lin_w(ks[12], C, C4);              p["ca_b1"] = bias(ks[13], C4, C)
    p["ca_w2"] = lin_w(ks[14], C4, C);              p["ca_b2"] = bias(ks[15], C, C4)
    return p


# ----------------------------------------------------------------------------

if __name__ == "__main__":
    # Small shapes consistent with the module (feat_in=C, spatial-branch Cin=H*W).
    # Original: C=64, H=W=44; here C=8, H=W=8.
    B, C, H, W = 2, 8, 8, 8
    key = jax.random.PRNGKey(0)
    k_d, k_r, k_p = jax.random.split(key, 3)
    depth = jax.random.normal(k_d, (B, C, H, W), jnp.float32)
    rgb = jax.random.normal(k_r, (B, C, H, W), jnp.float32)
    params = init_params(k_p, C, H, W, sp_hidden=32)

    out = jax.jit(pixel_attention_forward)(depth, rgb, params)
    out = jax.block_until_ready(out)

    assert out.shape == (B, C, H, W), out.shape
    assert bool(jnp.all(jnp.isfinite(out)))

    ref = reference_forward(depth, rgb, params)
    err = float(jnp.max(jnp.abs(out - ref) / (jnp.abs(ref) + 1e-2)))
    assert err < 5e-2, f"mismatch vs reference: {err}"

    print("KERNEL_OK")
</pallas_src>

<mosaic_0001>
module attributes {stable_mosaic.version = 11 : i64} {
  func.func @_conv3x3_same_kernel(%arg0: i32, %arg1: memref<1x104x16xbf16, #tpu.memory_space<vmem>>, %arg2: memref<16x72xbf16, #tpu.memory_space<vmem>>, %arg3: memref<1x8xf32, #tpu.memory_space<vmem>>, %arg4: memref<1x8x8x8xbf16, #tpu.memory_space<vmem>>) attributes {dimension_semantics = [#tpu.dimension_semantics<parallel>], iteration_bounds = array<i64: 2>, scalar_prefetch = 0 : i64, scratch_operands = 0 : i64, tpu.core_type = #tpu.core_type<tc>, window_params = [{transform_indices = @transform_0, window_bounds = array<i64: 1, 104, 16>}, {pipeline_mode = #tpu.pipeline_mode<synchronous>, transform_indices = @transform_1, window_bounds = array<i64: 16, 72>}, {pipeline_mode = #tpu.pipeline_mode<synchronous>, transform_indices = @transform_2, window_bounds = array<i64: 1, 8>}, {transform_indices = @transform_3, window_bounds = array<i64: 1, 8, 8, 8>}]} {
    %c0 = arith.constant 0 : index
    %c0_0 = arith.constant 0 : index
    %c0_1 = arith.constant 0 : index
    %0 = vector.load %arg1[%c0, %c0_0, %c0_1] : memref<1x104x16xbf16, #tpu.memory_space<vmem>>, vector<1x104x16xbf16>
    %1 = vector.shape_cast %0 : vector<1x104x16xbf16> to vector<104x16xbf16>
    %c0_2 = arith.constant 0 : index
    %c0_3 = arith.constant 0 : index
    %2 = vector.load %arg2[%c0_2, %c0_3] : memref<16x72xbf16, #tpu.memory_space<vmem>>, vector<16x72xbf16>
    %cst = arith.constant dense<0.000000e+00> : vector<104x72xf32>
    %3 = tpu.matmul %1, %2, %cst {dimension_numbers = #tpu.dot_dimension_numbers<[1], [0], [0], [1], [0, 0, 1, 1], [], []>} : vector<104x16xbf16>, vector<16x72xbf16>, vector<104x72xf32> -> vector<104x72xf32>
    %cst_4 = arith.constant 0.000000e+00 : f32
    %4 = vector.broadcast %cst_4 : f32 to vector<80x8xf32>
    %5 = vector.extract_strided_slice %3 {offsets = [0, 0], sizes = [80, 8], strides = [1, 1]} : vector<104x72xf32> to vector<80x8xf32>
    %6 = arith.addf %4, %5 : vector<80x8xf32>
    %7 = vector.extract_strided_slice %3 {offsets = [1, 8], sizes = [80, 8], strides = [1, 1]} : vector<104x72xf32> to vector<80x8xf32>
    %8 = arith.addf %6, %7 : vector<80x8xf32>
    %9 = vector.extract_strided_slice %3 {offsets = [2, 16], sizes = [80, 8], strides = [1, 1]} : vector<104x72xf32> to vector<80x8xf32>
    %10 = arith.addf %8, %9 : vector<80x8xf32>
    %11 = vector.extract_strided_slice %3 {offsets = [10, 24], sizes = [80, 8], strides = [1, 1]} : vector<104x72xf32> to vector<80x8xf32>
    %12 = arith.addf %10, %11 : vector<80x8xf32>
    %13 = vector.extract_strided_slice %3 {offsets = [11, 32], sizes = [80, 8], strides = [1, 1]} : vector<104x72xf32> to vector<80x8xf32>
    %14 = arith.addf %12, %13 : vector<80x8xf32>
    %15 = vector.extract_strided_slice %3 {offsets = [12, 40], sizes = [80, 8], strides = [1, 1]} : vector<104x72xf32> to vector<80x8xf32>
    %16 = arith.addf %14, %15 : vector<80x8xf32>
    %17 = vector.extract_strided_slice %3 {offsets = [20, 48], sizes = [80, 8], strides = [1, 1]} : vector<104x72xf32> to vector<80x8xf32>
    %18 = arith.addf %16, %17 : vector<80x8xf32>
    %19 = vector.extract_strided_slice %3 {offsets = [21, 56], sizes = [80, 8], strides = [1, 1]} : vector<104x72xf32> to vector<80x8xf32>
    %20 = arith.addf %18, %19 : vector<80x8xf32>
    %21 = vector.extract_strided_slice %3 {offsets = [22, 64], sizes = [80, 8], strides = [1, 1]} : vector<104x72xf32> to vector<80x8xf32>
    %22 = arith.addf %20, %21 : vector<80x8xf32>
    %c0_5 = arith.constant 0 : index
    %c0_6 = arith.constant 0 : index
    %23 = vector.load %arg3[%c0_5, %c0_6] : memref<1x8xf32, #tpu.memory_space<vmem>>, vector<1x8xf32>
    %24 = vector.broadcast %23 : vector<1x8xf32> to vector<80x8xf32>
    %25 = arith.addf %22, %24 : vector<80x8xf32>
    %cst_7 = arith.constant 0.000000e+00 : f32
    %26 = vector.broadcast %cst_7 : f32 to vector<80x8xf32>
    %27 = arith.maximumf %25, %26 : vector<80x8xf32>
    %28 = vector.shape_cast %27 : vector<80x8xf32> to vector<8x10x8xf32>
    %29 = vector.extract_strided_slice %28 {offsets = [0, 0, 0], sizes = [8, 8, 8], strides = [1, 1, 1]} : vector<8x10x8xf32> to vector<8x8x8xf32>
    %30 = arith.truncf %29 : vector<8x8x8xf32> to vector<8x8x8xbf16>
    %c0_8 = arith.constant 0 : index
    %c0_9 = arith.constant 0 : index
    %c0_10 = arith.constant 0 : index
    %c0_11 = arith.constant 0 : index
    %31 = vector.load %arg4[%c0_8, %c0_9, %c0_10, %c0_11] : memref<1x8x8x8xbf16, #tpu.memory_space<vmem>>, vector<1x8x8x8xbf16>
    %32 = vector.shape_cast %31 : vector<1x8x8x8xbf16> to vector<8x8x8xbf16>
    %33 = vector.shape_cast %30 : vector<8x8x8xbf16> to vector<1x8x8x8xbf16>
    tpu.vector_store %arg4[%c0_8, %c0_9, %c0_10, %c0_11], %33 {strides = array<i32>} : memref<1x8x8x8xbf16, #tpu.memory_space<vmem>>, vector<1x8x8x8xbf16>,
    return
  }
  func.func @transform_0(%arg0: i32) -> (i32, i32, i32) {
    %c0_i32 = arith.constant 0 : i32
    %c0_i32_0 = arith.constant 0 : i32
    %c0_i32_1 = arith.constant 0 : i32
    return %arg0, %c0_i32, %c0_i32_0 : i32, i32, i32
  }
  func.func @transform_1(%arg0: i32) -> (i32, i32) {
    %c0_i32 = arith.constant 0 : i32
    %c0_i32_0 = arith.constant 0 : i32
    %c0_i32_1 = arith.constant 0 : i32
    return %c0_i32, %c0_i32_0 : i32, i32
  }
  func.func @transform_2(%arg0: i32) -> (i32, i32) {
    %c0_i32 = arith.constant 0 : i32
    %c0_i32_0 = arith.constant 0 : i32
    %c0_i32_1 = arith.constant 0 : i32
    return %c0_i32, %c0_i32_0 : i32, i32
  }
  func.func @transform_3(%arg0: i32) -> (i32, i32, i32, i32) {
    %c0_i32 = arith.constant 0 : i32
    %c0_i32_0 = arith.constant 0 : i32
    %c0_i32_1 = arith.constant 0 : i32
    %c0_i32_2 = arith.constant 0 : i32
    return %arg0, %c0_i32, %c0_i32_0, %c0_i32_1 : i32, i32, i32, i32
  }
}

module attributes {stable_mosaic.version = 11 : i64} {
  func.func @_conv3x3_same_kernel(%arg0: i32, %arg1: memref<1x104x16xbf16, #tpu.memory_space<vmem>>, %arg2: memref<16x72xbf16, #tpu.memory_space<vmem>>, %arg3: memref<1x8xf32, #tpu.memory_space<vmem>>, %arg4: memref<1x8x8x8xf32, #tpu.memory_space<vmem>>) attributes {dimension_semantics = [#tpu.dimension_semantics<parallel>], iteration_bounds = array<i64: 2>, scalar_prefetch = 0 : i64, scratch_operands = 0 : i64, tpu.core_type = #tpu.core_type<tc>, window_params = [{transform_indices = @transform_0, window_bounds = array<i64: 1, 104, 16>}, {pipeline_mode = #tpu.pipeline_mode<synchronous>, transform_indices = @transform_1, window_bounds = array<i64: 16, 72>}, {pipeline_mode = #tpu.pipeline_mode<synchronous>, transform_indices = @transform_2, window_bounds = array<i64: 1, 8>}, {transform_indices = @transform_3, window_bounds = array<i64: 1, 8, 8, 8>}]} {
    %c0 = arith.constant 0 : index
    %c0_0 = arith.constant 0 : index
    %c0_1 = arith.constant 0 : index
    %0 = vector.load %arg1[%c0, %c0_0, %c0_1] : memref<1x104x16xbf16, #tpu.memory_space<vmem>>, vector<1x104x16xbf16>
    %1 = vector.shape_cast %0 : vector<1x104x16xbf16> to vector<104x16xbf16>
    %c0_2 = arith.constant 0 : index
    %c0_3 = arith.constant 0 : index
    %2 = vector.load %arg2[%c0_2, %c0_3] : memref<16x72xbf16, #tpu.memory_space<vmem>>, vector<16x72xbf16>
    %cst = arith.constant dense<0.000000e+00> : vector<104x72xf32>
    %3 = tpu.matmul %1, %2, %cst {dimension_numbers = #tpu.dot_dimension_numbers<[1], [0], [0], [1], [0, 0, 1, 1], [], []>} : vector<104x16xbf16>, vector<16x72xbf16>, vector<104x72xf32> -> vector<104x72xf32>
    %cst_4 = arith.constant 0.000000e+00 : f32
    %4 = vector.broadcast %cst_4 : f32 to vector<80x8xf32>
    %5 = vector.extract_strided_slice %3 {offsets = [0, 0], sizes = [80, 8], strides = [1, 1]} : vector<104x72xf32> to vector<80x8xf32>
    %6 = arith.addf %4, %5 : vector<80x8xf32>
    %7 = vector.extract_strided_slice %3 {offsets = [1, 8], sizes = [80, 8], strides = [1, 1]} : vector<104x72xf32> to vector<80x8xf32>
    %8 = arith.addf %6, %7 : vector<80x8xf32>
    %9 = vector.extract_strided_slice %3 {offsets = [2, 16], sizes = [80, 8], strides = [1, 1]} : vector<104x72xf32> to vector<80x8xf32>
    %10 = arith.addf %8, %9 : vector<80x8xf32>
    %11 = vector.extract_strided_slice %3 {offsets = [10, 24], sizes = [80, 8], strides = [1, 1]} : vector<104x72xf32> to vector<80x8xf32>
    %12 = arith.addf %10, %11 : vector<80x8xf32>
    %13 = vector.extract_strided_slice %3 {offsets = [11, 32], sizes = [80, 8], strides = [1, 1]} : vector<104x72xf32> to vector<80x8xf32>
    %14 = arith.addf %12, %13 : vector<80x8xf32>
    %15 = vector.extract_strided_slice %3 {offsets = [12, 40], sizes = [80, 8], strides = [1, 1]} : vector<104x72xf32> to vector<80x8xf32>
    %16 = arith.addf %14, %15 : vector<80x8xf32>
    %17 = vector.extract_strided_slice %3 {offsets = [20, 48], sizes = [80, 8], strides = [1, 1]} : vector<104x72xf32> to vector<80x8xf32>
    %18 = arith.addf %16, %17 : vector<80x8xf32>
    %19 = vector.extract_strided_slice %3 {offsets = [21, 56], sizes = [80, 8], strides = [1, 1]} : vector<104x72xf32> to vector<80x8xf32>
    %20 = arith.addf %18, %19 : vector<80x8xf32>
    %21 = vector.extract_strided_slice %3 {offsets = [22, 64], sizes = [80, 8], strides = [1, 1]} : vector<104x72xf32> to vector<80x8xf32>
    %22 = arith.addf %20, %21 : vector<80x8xf32>
    %c0_5 = arith.constant 0 : index
    %c0_6 = arith.constant 0 : index
    %23 = vector.load %arg3[%c0_5, %c0_6] : memref<1x8xf32, #tpu.memory_space<vmem>>, vector<1x8xf32>
    %24 = vector.broadcast %23 : vector<1x8xf32> to vector<80x8xf32>
    %25 = arith.addf %22, %24 : vector<80x8xf32>
    %cst_7 = arith.constant 0.000000e+00 : f32
    %26 = vector.broadcast %cst_7 : f32 to vector<80x8xf32>
    %27 = arith.maximumf %25, %26 : vector<80x8xf32>
    %28 = vector.shape_cast %27 : vector<80x8xf32> to vector<8x10x8xf32>
    %29 = vector.extract_strided_slice %28 {offsets = [0, 0, 0], sizes = [8, 8, 8], strides = [1, 1, 1]} : vector<8x10x8xf32> to vector<8x8x8xf32>
    %c0_8 = arith.constant 0 : index
    %c0_9 = arith.constant 0 : index
    %c0_10 = arith.constant 0 : index
    %c0_11 = arith.constant 0 : index
    %30 = vector.load %arg4[%c0_8, %c0_9, %c0_10, %c0_11] : memref<1x8x8x8xf32, #tpu.memory_space<vmem>>, vector<1x8x8x8xf32>
    %31 = vector.shape_cast %30 : vector<1x8x8x8xf32> to vector<8x8x8xf32>
    %32 = vector.shape_cast %29 : vector<8x8x8xf32> to vector<1x8x8x8xf32>
    tpu.vector_store %arg4[%c0_8, %c0_9, %c0_10, %c0_11], %32 {strides = array<i32>} : memref<1x8x8x8xf32, #tpu.memory_space<vmem>>, vector<1x8x8x8xf32>,
    return
  }
  func.func @transform_0(%arg0: i32) -> (i32, i32, i32) {
    %c0_i32 = arith.constant 0 : i32
    %c0_i32_0 = arith.constant 0 : i32
    %c0_i32_1 = arith.constant 0 : i32
    return %arg0, %c0_i32, %c0_i32_0 : i32, i32, i32
  }
  func.func @transform_1(%arg0: i32) -> (i32, i32) {
    %c0_i32 = arith.constant 0 : i32
    %c0_i32_0 = arith.constant 0 : i32
    %c0_i32_1 = arith.constant 0 : i32
    return %c0_i32, %c0_i32_0 : i32, i32
  }
  func.func @transform_2(%arg0: i32) -> (i32, i32) {
    %c0_i32 = arith.constant 0 : i32
    %c0_i32_0 = arith.constant 0 : i32
    %c0_i32_1 = arith.constant 0 : i32
    return %c0_i32, %c0_i32_0 : i32, i32
  }
  func.func @transform_3(%arg0: i32) -> (i32, i32, i32, i32) {
    %c0_i32 = arith.constant 0 : i32
    %c0_i32_0 = arith.constant 0 : i32
    %c0_i32_1 = arith.constant 0 : i32
    %c0_i32_2 = arith.constant 0 : i32
    return %arg0, %c0_i32, %c0_i32_0, %c0_i32_1 : i32, i32, i32, i32
  }
}

module attributes {stable_mosaic.version = 11 : i64} {
  func.func @_pixel_branch_kernel(%arg0: i32, %arg1: memref<1x72x8xbf16, #tpu.memory_space<vmem>>, %arg2: memref<1x8x128xbf16, #tpu.memory_space<vmem>>, %arg3: memref<1x72x8xbf16, #tpu.memory_space<vmem>>, %arg4: memref<1x8x8x8xbf16, #tpu.memory_space<vmem>>, %arg5: memref<128x288xbf16, #tpu.memory_space<vmem>>, %arg6: memref<1x32xf32, #tpu.memory_space<vmem>>, %arg7: memref<3x3x32x32xbf16, #tpu.memory_space<vmem>>, %arg8: memref<1x32xf32, #tpu.memory_space<vmem>>, %arg9: memref<3x3x32x32xbf16, #tpu.memory_space<vmem>>, %arg10: memref<1x32xf32, #tpu.memory_space<vmem>>, %arg11: memref<3x3x32xf32, #tpu.memory_space<vmem>>, %arg12: memref<1x1xf32, #tpu.memory_space<vmem>>, %arg13: memref<8x2xf32, #tpu.memory_space<vmem>>, %arg14: memref<1x2xf32, #tpu.memory_space<vmem>>, %arg15: memref<2x8xf32, #tpu.memory_space<vmem>>, %arg16: memref<1x8xf32, #tpu.memory_space<vmem>>, %arg17: memref<1x8x8x16xbf16, #tpu.memory_space<vmem>>, %arg18: memref<72x288xf32, #tpu.memory_space<vmem>>, %arg19: memref<8x8x32xbf16, #tpu.memory_space<vmem>>, %arg20: memref<10x10x32xbf16, #tpu.memory_space<vmem>>) attributes {dimension_semantics = [#tpu.dimension_semantics<parallel>], iteration_bounds = array<i64: 2>, scalar_prefetch = 0 : i64, scratch_operands = 3 : i64, tpu.core_type = #tpu.core_type<tc>, window_params = [{transform_indices = @transform_0, window_bounds = array<i64: 1, 72, 8>}, {transform_indices = @transform_1, window_bounds = array<i64: 1, 8, 128>}, {transform_indices = @transform_2, window_bounds = array<i64: 1, 72, 8>}, {transform_indices = @transform_3, window_bounds = array<i64: 1, 8, 8, 8>}, {pipeline_mode = #tpu.pipeline_mode<synchronous>, transform_indices = @transform_4, window_bounds = array<i64: 128, 288>}, {pipeline_mode = #tpu.pipeline_mode<synchronous>, transform_indices = @transform_5, window_bounds = array<i64: 1, 32>}, {pipeline_mode = #tpu.pipeline_mode<synchronous>, transform_indices = @transform_6, window_bounds = array<i64: 3, 3, 32, 32>}, {pipeline_mode = #tpu.pipeline_mode<synchronous>, transform_indices = @transform_7, window_bounds = array<i64: 1, 32>}, {pipeline_mode = #tpu.pipeline_mode<synchronous>, transform_indices = @transform_8, window_bounds = array<i64: 3, 3, 32, 32>}, {pipeline_mode = #tpu.pipeline_mode<synchronous>, transform_indices = @transform_9, window_bounds = array<i64: 1, 32>}, {pipeline_mode = #tpu.pipeline_mode<synchronous>, transform_indices = @transform_10, window_bounds = array<i64: 3, 3, 32>}, {pipeline_mode = #tpu.pipeline_mode<synchronous>, transform_indices = @transform_11, window_bounds = array<i64: 1, 1>}, {pipeline_mode = #tpu.pipeline_mode<synchronous>, transform_indices = @transform_12, window_bounds = array<i64: 8, 2>}, {pipeline_mode = #tpu.pipeline_mode<synchronous>, transform_indices = @transform_13, window_bounds = array<i64: 1, 2>}, {pipeline_mode = #tpu.pipeline_mode<synchronous>, transform_indices = @transform_14, window_bounds = array<i64: 2, 8>}, {pipeline_mode = #tpu.pipeline_mode<synchronous>, transform_indices = @transform_15, window_bounds = array<i64: 1, 8>}, {transform_indices = @transform_16, window_bounds = array<i64: 1, 8, 8, 16>}]} {
    %c0 = arith.constant 0 : index
    %c0_0 = arith.constant 0 : index
    %c0_1 = arith.constant 0 : index
    %0 = vector.load %arg2[%c0, %c0_0, %c0_1] : memref<1x8x128xbf16, #tpu.memory_space<vmem>>, vector<1x8x128xbf16>
    %1 = vector.shape_cast %0 : vector<1x8x128xbf16> to vector<8x128xbf16>
    %c0_2 = arith.constant 0 : index
    %c0_3 = arith.constant 0 : index
    %2 = vector.load %arg5[%c0_2, %c0_3] : memref<128x288xbf16, #tpu.memory_space<vmem>>, vector<128x288xbf16>
    %c0_4 = arith.constant 0 : index
    %c0_5 = arith.constant 0 : index
    %c0_6 = arith.constant 0 : index
    %3 = vector.load %arg1[%c0_4, %c0_5, %c0_6] : memref<1x72x8xbf16, #tpu.memory_space<vmem>>, vector<1x72x8xbf16>
    %4 = vector.shape_cast %3 : vector<1x72x8xbf16> to vector<72x8xbf16>
    %cst = arith.constant dense<0.000000e+00> : vector<72x128xf32>
    %5 = tpu.matmul %4, %1, %cst {dimension_numbers = #tpu.dot_dimension_numbers<[1], [0], [0], [1], [0, 0, 1, 1], [], []>} : vector<72x8xbf16>, vector<8x128xbf16>, vector<72x128xf32> -> vector<72x128xf32>
    %6 = arith.truncf %5 : vector<72x128xf32> to vector<72x128xbf16>
    %cst_7 = arith.constant dense<0.000000e+00> : vector<72x288xf32>
    %7 = tpu.matmul %6, %2, %cst_7 {dimension_numbers = #tpu.dot_dimension_numbers<[1], [0], [0], [1], [0, 0, 1, 1], [], []>} : vector<72x128xbf16>, vector<128x288xbf16>, vector<72x288xf32> -> vector<72x288xf32>
    %c0_8 = arith.constant 0 : index
    %c0_9 = arith.constant 0 : index
    %8 = vector.load %arg18[%c0_8, %c0_9] : memref<72x288xf32, #tpu.memory_space<vmem>>, vector<72x288xf32>
    tpu.vector_store %arg18[%c0_8, %c0_9], %7 {strides = array<i32>} : memref<72x288xf32, #tpu.memory_space<vmem>>, vector<72x288xf32>,
    %cst_10 = arith.constant 0.000000e+00 : f32
    %9 = vector.broadcast %cst_10 : f32 to vector<48x32xf32>
    %c0_11 = arith.constant 0 : index
    %c0_12 = arith.constant 0 : index
    %10 = vector.load %arg18[%c0_11, %c0_12] : memref<72x288xf32, #tpu.memory_space<vmem>>, vector<48x32xf32>
    %11 = arith.addf %9, %10 : vector<48x32xf32>
    %c1 = arith.constant 1 : index
    %c32 = arith.constant 32 : index
    %12 = vector.load %arg18[%c1, %c32] : memref<72x288xf32, #tpu.memory_space<vmem>>, vector<48x32xf32>
    %13 = arith.addf %11, %12 : vector<48x32xf32>
    %c2 = arith.constant 2 : index
    %c64 = arith.constant 64 : index
    %14 = vector.load %arg18[%c2, %c64] : memref<72x288xf32, #tpu.memory_space<vmem>>, vector<48x32xf32>
    %15 = arith.addf %13, %14 : vector<48x32xf32>
    %c8 = arith.constant 8 : index
    %c96 = arith.constant 96 : index
    %16 = vector.load %arg18[%c8, %c96] : memref<72x288xf32, #tpu.memory_space<vmem>>, vector<48x32xf32>
    %17 = arith.addf %15, %16 : vector<48x32xf32>
    %c9 = arith.constant 9 : index
    %c128 = arith.constant 128 : index
    %18 = vector.load %arg18[%c9, %c128] : memref<72x288xf32, #tpu.memory_space<vmem>>, vector<48x32xf32>
    %19 = arith.addf %17, %18 : vector<48x32xf32>
    %c10 = arith.constant 10 : index
    %c160 = arith.constant 160 : index
    %20 = vector.load %arg18[%c10, %c160] : memref<72x288xf32, #tpu.memory_space<vmem>>, vector<48x32xf32>
    %21 = arith.addf %19, %20 : vector<48x32xf32>
    %c16 = arith.constant 16 : index
    %c192 = arith.constant 192 : index
    %22 = vector.load %arg18[%c16, %c192] : memref<72x288xf32, #tpu.memory_space<vmem>>, vector<48x32xf32>
    %23 = arith.addf %21, %22 : vector<48x32xf32>
    %c17 = arith.constant 17 : index
    %c224 = arith.constant 224 : index
    %24 = vector.load %arg18[%c17, %c224] : memref<72x288xf32, #tpu.memory_space<vmem>>, vector<48x32xf32>
    %25 = arith.addf %23, %24 : vector<48x32xf32>
    %c18 = arith.constant 18 : index
    %c256 = arith.constant 256 : index
    %26 = vector.load %arg18[%c18, %c256] : memref<72x288xf32, #tpu.memory_space<vmem>>, vector<48x32xf32>
    %27 = arith.addf %25, %26 : vector<48x32xf32>
    %c0_13 = arith.constant 0 : index
    %c0_14 = arith.constant 0 : index
    %28 = vector.load %arg6[%c0_13, %c0_14] : memref<1x32xf32, #tpu.memory_space<vmem>>, vector<1x32xf32>
    %29 = vector.broadcast %28 : vector<1x32xf32> to vector<48x32xf32>
    %30 = arith.addf %27, %29 : vector<48x32xf32>
    %cst_15 = arith.constant 0.000000e+00 : f32
    %31 = vector.broadcast %cst_15 : f32 to vector<48x32xf32>
    %32 = arith.maximumf %30, %31 : vector<48x32xf32>
    %33 = vector.shape_cast %32 : vector<48x32xf32> to vector<6x8x32xf32>
    %34 = vector.extract_strided_slice %33 {offsets = [0, 0, 0], sizes = [6, 6, 32], strides = [1, 1, 1]} : vector<6x8x32xf32> to vector<6x6x32xf32>
    %35 = arith.truncf %34 : vector<6x6x32xf32> to vector<6x6x32xbf16>
    %cst_16 = arith.constant 0.000000e+00 : f32
    %36 = vector.broadcast %cst_16 : f32 to vector<16x32xf32>
    %37 = vector.extract_strided_slice %35 {offsets = [0, 0, 0], sizes = [4, 4, 32], strides = [1, 1, 1]} : vector<6x6x32xbf16> to vector<4x4x32xbf16>
    %38 = vector.shape_cast %37 : vector<4x4x32xbf16> to vector<16x32xbf16>
    %c0_17 = arith.constant 0 : index
    %c0_18 = arith.constant 0 : index
    %c0_19 = arith.constant 0 : index
    %c0_20 = arith.constant 0 : index
    %39 = vector.load %arg7[%c0_17, %c0_18, %c0_19, %c0_20] : memref<3x3x32x32xbf16, #tpu.memory_space<vmem>>, vector<1x1x32x32xbf16>
    %40 = vector.shape_cast %39 : vector<1x1x32x32xbf16> to vector<32x32xbf16>
    %cst_21 = arith.constant dense<0.000000e+00> : vector<16x32xf32>
    %41 = tpu.matmul %38, %40, %cst_21 {dimension_numbers = #tpu.dot_dimension_numbers<[1], [0], [0], [1], [0, 0, 1, 1], [], []>} : vector<16x32xbf16>, vector<32x32xbf16>, vector<16x32xf32> -> vector<16x32xf32>
    %42 = arith.addf %36, %41 : vector<16x32xf32>
    %43 = vector.extract_strided_slice %35 {offsets = [0, 1, 0], sizes = [4, 4, 32], strides = [1, 1, 1]} : vector<6x6x32xbf16> to vector<4x4x32xbf16>
    %44 = vector.shape_cast %43 : vector<4x4x32xbf16> to vector<16x32xbf16>
    %c0_22 = arith.constant 0 : index
    %c1_23 = arith.constant 1 : index
    %c0_24 = arith.constant 0 : index
    %c0_25 = arith.constant 0 : index
    %45 = vector.load %arg7[%c0_22, %c1_23, %c0_24, %c0_25] : memref<3x3x32x32xbf16, #tpu.memory_space<vmem>>, vector<1x1x32x32xbf16>
    %46 = vector.shape_cast %45 : vector<1x1x32x32xbf16> to vector<32x32xbf16>
    %cst_26 = arith.constant dense<0.000000e+00> : vector<16x32xf32>
    %47 = tpu.matmul %44, %46, %cst_26 {dimension_numbers = #tpu.dot_dimension_numbers<[1], [0], [0], [1], [0, 0, 1, 1], [], []>} : vector<16x32xbf16>, vector<32x32xbf16>, vector<16x32xf32> -> vector<16x32xf32>
    %48 = arith.addf %42, %47 : vector<16x32xf32>
    %49 = vector.extract_strided_slice %35 {offsets = [0, 2, 0], sizes = [4, 4, 32], strides = [1, 1, 1]} : vector<6x6x32xbf16> to vector<4x4x32xbf16>
    %50 = vector.shape_cast %49 : vector<4x4x32xbf16> to vector<16x32xbf16>
    %c0_27 = arith.constant 0 : index
    %c2_28 = arith.constant 2 : index
    %c0_29 = arith.constant 0 : index
    %c0_30 = arith.constant 0 : index
    %51 = vector.load %arg7[%c0_27, %c2_28, %c0_29, %c0_30] : memref<3x3x32x32xbf16, #tpu.memory_space<vmem>>, vector<1x1x32x32xbf16>
    %52 = vector.shape_cast %51 : vector<1x1x32x32xbf16> to vector<32x32xbf16>
    %cst_31 = arith.constant dense<0.000000e+00> : vector<16x32xf32>
    %53 = tpu.matmul %50, %52, %cst_31 {dimension_numbers = #tpu.dot_dimension_numbers<[1], [0], [0], [1], [0, 0, 1, 1], [], []>} : vector<16x32xbf16>, vector<32x32xbf16>, vector<16x32xf32> -> vector<16x32xf32>
    %54 = arith.addf %48, %53 : vector<16x32xf32>
    %55 = vector.extract_strided_slice %35 {offsets = [1, 0, 0], sizes = [4, 4, 32], strides = [1, 1, 1]} : vector<6x6x32xbf16> to vector<4x4x32xbf16>
    %56 = vector.shape_cast %55 : vector<4x4x32xbf16> to vector<16x32xbf16>
    %c1_32 = arith.constant 1 : index
    %c0_33 = arith.constant 0 : index
    %c0_34 = arith.constant 0 : index
    %c0_35 = arith.constant 0 : index
    %57 = vector.load %arg7[%c1_32, %c0_33, %c0_34, %c0_35] : memref<3x3x32x32xbf16, #tpu.memory_space<vmem>>, vector<1x1x32x32xbf16>
    %58 = vector.shape_cast %57 : vector<1x1x32x32xbf16> to vector<32x32xbf16>
    %cst_36 = arith.constant dense<0.000000e+00> : vector<16x32xf32>
    %59 = tpu.matmul %56, %58, %cst_36 {dimension_numbers = #tpu.dot_dimension_numbers<[1], [0], [0], [1], [0, 0, 1, 1], [], []>} : vector<16x32xbf16>, vector<32x32xbf16>, vector<16x32xf32> -> vector<16x32xf32>
    %60 = arith.addf %54, %59 : vector<16x32xf32>
    %61 = vector.extract_strided_slice %35 {offsets = [1, 1, 0], sizes = [4, 4, 32], strides = [1, 1, 1]} : vector<6x6x32xbf16> to vector<4x4x32xbf16>
    %62 = vector.shape_cast %61 : vector<4x4x32xbf16> to vector<16x32xbf16>
    %c1_37 = arith.constant 1 : index
    %c1_38 = arith.constant 1 : index
    %c0_39 = arith.constant 0 : index
    %c0_40 = arith.constant 0 : index
    %63 = vector.load %arg7[%c1_37, %c1_38, %c0_39, %c0_40] : memref<3x3x32x32xbf16, #tpu.memory_space<vmem>>, vector<1x1x32x32xbf16>
    %64 = vector.shape_cast %63 : vector<1x1x32x32xbf16> to vector<32x32xbf16>
    %cst_41 = arith.constant dense<0.000000e+00> : vector<16x32xf32>
    %65 = tpu.matmul %62, %64, %cst_41 {dimension_numbers = #tpu.dot_dimension_numbers<[1], [0], [0], [1], [0, 0, 1, 1], [], []>} : vector<16x32xbf16>, vector<32x32xbf16>, vector<16x32xf32> -> vector<16x32xf32>
    %66 = arith.addf %60, %65 : vector<16x32xf32>
    %67 = vector.extract_strided_slice %35 {offsets = [1, 2, 0], sizes = [4, 4, 32], strides = [1, 1, 1]} : vector<6x6x32xbf16> to vector<4x4x32xbf16>
    %68 = vector.shape_cast %67 : vector<4x4x32xbf16> to vector<16x32xbf16>
    %c1_42 = arith.constant 1 : index
    %c2_43 = arith.constant 2 : index
    %c0_44 = arith.constant 0 : index
    %c0_45 = arith.constant 0 : index
    %69 = vector.load %arg7[%c1_42, %c2_43, %c0_44, %c0_45] : memref<3x3x32x32xbf16, #tpu.memory_space<vmem>>, vector<1x1x32x32xbf16>
    %70 = vector.shape_cast %69 : vector<1x1x32x32xbf16> to vector<32x32xbf16>
    %cst_46 = arith.constant dense<0.000000e+00> : vector<16x32xf32>
    %71 = tpu.matmul %68, %70, %cst_46 {dimension_numbers = #tpu.dot_dimension_numbers<[1], [0], [0], [1], [0, 0, 1, 1], [], []>} : vector<16x32xbf16>, vector<32x32xbf16>, vector<16x32xf32> -> vector<16x32xf32>
    %72 = arith.addf %66, %71 : vector<16x32xf32>
    %73 = vector.extract_strided_slice %35 {offsets = [2, 0, 0], sizes = [4, 4, 32], strides = [1, 1, 1]} : vector<6x6x32xbf16> to vector<4x4x32xbf16>
    %74 = vector.shape_cast %73 : vector<4x4x32xbf16> to vector<16x32xbf16>
    %c2_47 = arith.constant 2 : index
    %c0_48 = arith.constant 0 : index
    %c0_49 = arith.constant 0 : index
    %c0_50 = arith.constant 0 : index
    %75 = vector.load %arg7[%c2_47, %c0_48, %c0_49, %c0_50] : memref<3x3x32x32xbf16, #tpu.memory_space<vmem>>, vector<1x1x32x32xbf16>
    %76 = vector.shape_cast %75 : vector<1x1x32x32xbf16> to vector<32x32xbf16>
    %cst_51 = arith.constant dense<0.000000e+00> : vector<16x32xf32>
    %77 = tpu.matmul %74, %76, %cst_51 {dimension_numbers = #tpu.dot_dimension_numbers<[1], [0], [0], [1], [0, 0, 1, 1], [], []>} : vector<16x32xbf16>, vector<32x32xbf16>, vector<16x32xf32> -> vector<16x32xf32>
    %78 = arith.addf %72, %77 : vector<16x32xf32>
    %79 = vector.extract_strided_slice %35 {offsets = [2, 1, 0], sizes = [4, 4, 32], strides = [1, 1, 1]} : vector<6x6x32xbf16> to vector<4x4x32xbf16>
    %80 = vector.shape_cast %79 : vector<4x4x32xbf16> to vector<16x32xbf16>
    %c2_52 = arith.constant 2 : index
    %c1_53 = arith.constant 1 : index
    %c0_54 = arith.constant 0 : index
    %c0_55 = arith.constant 0 : index
    %81 = vector.load %arg7[%c2_52, %c1_53, %c0_54, %c0_55] : memref<3x3x32x32xbf16, #tpu.memory_space<vmem>>, vector<1x1x32x32xbf16>
    %82 = vector.shape_cast %81 : vector<1x1x32x32xbf16> to vector<32x32xbf16>
    %cst_56 = arith.constant dense<0.000000e+00> : vector<16x32xf32>
    %83 = tpu.matmul %80, %82, %cst_56 {dimension_numbers = #tpu.dot_dimension_numbers<[1], [0], [0], [1], [0, 0, 1, 1], [], []>} : vector<16x32xbf16>, vector<32x32xbf16>, vector<16x32xf32> -> vector<16x32xf32>
    %84 = arith.addf %78, %83 : vector<16x32xf32>
    %85 = vector.extract_strided_slice %35 {offsets = [2, 2, 0], sizes = [4, 4, 32], strides = [1, 1, 1]} : vector<6x6x32xbf16> to vector<4x4x32xbf16>
    %86 = vector.shape_cast %85 : vector<4x4x32xbf16> to vector<16x32xbf16>
    %c2_57 = arith.constant 2 : index
    %c2_58 = arith.constant 2 : index
    %c0_59 = arith.constant 0 : index
    %c0_60 = arith.constant 0 : index
    %87 = vector.load %arg7[%c2_57, %c2_58, %c0_59, %c0_60] : memref<3x3x32x32xbf16, #tpu.memory_space<vmem>>, vector<1x1x32x32xbf16>
    %88 = vector.shape_cast %87 : vector<1x1x32x32xbf16> to vector<32x32xbf16>
    %cst_61 = arith.constant dense<0.000000e+00> : vector<16x32xf32>
    %89 = tpu.matmul %86, %88, %cst_61 {dimension_numbers = #tpu.dot_dimension_numbers<[1], [0], [0], [1], [0, 0, 1, 1], [], []>} : vector<16x32xbf16>, vector<32x32xbf16>, vector<16x32xf32> -> vector<16x32xf32>
    %90 = arith.addf %84, %89 : vector<16x32xf32>
    %c0_62 = arith.constant 0 : index
    %c0_63 = arith.constant 0 : index
    %91 = vector.load %arg8[%c0_62, %c0_63] : memref<1x32xf32, #tpu.memory_space<vmem>>, vector<1x32xf32>
    %92 = vector.broadcast %91 : vector<1x32xf32> to vector<16x32xf32>
    %93 = arith.addf %90, %92 : vector<16x32xf32>
    %cst_64 = arith.constant 0.000000e+00 : f32
    %94 = vector.broadcast %cst_64 : f32 to vector<16x32xf32>
    %95 = arith.maximumf %93, %94 : vector<16x32xf32>
    %96 = vector.shape_cast %95 : vector<16x32xf32> to vector<4x4x32xf32>
    %97 = arith.truncf %96 : vector<4x4x32xf32> to vector<4x4x32xbf16>
    %cst_65 = arith.constant 0.000000e+00 : bf16
    %98 = vector.broadcast %cst_65 : bf16 to vector<8x8x32xbf16>
    %c0_66 = arith.constant 0 : index
    %c0_67 = arith.constant 0 : index
    %c0_68 = arith.constant 0 : index
    %99 = vector.load %arg19[%c0_66, %c0_67, %c0_68] : memref<8x8x32xbf16, #tpu.memory_space<vmem>>, vector<8x8x32xbf16>
    tpu.vector_store %arg19[%c0_66, %c0_67, %c0_68], %98 {strides = array<i32>} : memref<8x8x32xbf16, #tpu.memory_space<vmem>>, vector<8x8x32xbf16>,
    %c2_69 = arith.constant 2 : index
    %c2_70 = arith.constant 2 : index
    %c0_71 = arith.constant 0 : index
    %100 = vector.load %arg19[%c2_69, %c2_70, %c0_71] : memref<8x8x32xbf16, #tpu.memory_space<vmem>>, vector<4x4x32xbf16>
    tpu.vector_store %arg19[%c2_69, %c2_70, %c0_71], %97 {strides = array<i32>} : memref<8x8x32xbf16, #tpu.memory_space<vmem>>, vector<4x4x32xbf16>,
    %cst_72 = arith.constant 0.000000e+00 : f32
    %101 = vector.broadcast %cst_72 : f32 to vector<36x32xf32>
    %c0_73 = arith.constant 0 : index
    %c0_74 = arith.constant 0 : index
    %c0_75 = arith.constant 0 : index
    %102 = vector.load %arg19[%c0_73, %c0_74, %c0_75] : memref<8x8x32xbf16, #tpu.memory_space<vmem>>, vector<6x6x32xbf16>
    %103 = vector.shape_cast %102 : vector<6x6x32xbf16> to vector<36x32xbf16>
    %c0_76 = arith.constant 0 : index
    %c0_77 = arith.constant 0 : index
    %c0_78 = arith.constant 0 : index
    %c0_79 = arith.constant 0 : index
    %104 = vector.load %arg9[%c0_76, %c0_77, %c0_78, %c0_79] : memref<3x3x32x32xbf16, #tpu.memory_space<vmem>>, vector<1x1x32x32xbf16>
    %105 = vector.shape_cast %104 : vector<1x1x32x32xbf16> to vector<32x32xbf16>
    %cst_80 = arith.constant dense<0.000000e+00> : vector<36x32xf32>
    %106 = tpu.matmul %103, %105, %cst_80 {dimension_numbers = #tpu.dot_dimension_numbers<[1], [0], [0], [1], [0, 0, 1, 1], [], []>} : vector<36x32xbf16>, vector<32x32xbf16>, vector<36x32xf32> -> vector<36x32xf32>
    %107 = arith.addf %101, %106 : vector<36x32xf32>
    %c0_81 = arith.constant 0 : index
    %c1_82 = arith.constant 1 : index
    %c0_83 = arith.constant 0 : index
    %108 = vector.load %arg19[%c0_81, %c1_82, %c0_83] : memref<8x8x32xbf16, #tpu.memory_space<vmem>>, vector<6x6x32xbf16>
    %109 = vector.shape_cast %108 : vector<6x6x32xbf16> to vector<36x32xbf16>
    %c0_84 = arith.constant 0 : index
    %c1_85 = arith.constant 1 : index
    %c0_86 = arith.constant 0 : index
    %c0_87 = arith.constant 0 : index
    %110 = vector.load %arg9[%c0_84, %c1_85, %c0_86, %c0_87] : memref<3x3x32x32xbf16, #tpu.memory_space<vmem>>, vector<1x1x32x32xbf16>
    %111 = vector.shape_cast %110 : vector<1x1x32x32xbf16> to vector<32x32xbf16>
    %cst_88 = arith.constant dense<0.000000e+00> : vector<36x32xf32>
    %112 = tpu.matmul %109, %111, %cst_88 {dimension_numbers = #tpu.dot_dimension_numbers<[1], [0], [0], [1], [0, 0, 1, 1], [], []>} : vector<36x32xbf16>, vector<32x32xbf16>, vector<36x32xf32> -> vector<36x32xf32>
    %113 = arith.addf %107, %112 : vector<36x32xf32>
    %c0_89 = arith.constant 0 : index
    %c2_90 = arith.constant 2 : index
    %c0_91 = arith.constant 0 : index
    %114 = vector.load %arg19[%c0_89, %c2_90, %c0_91] : memref<8x8x32xbf16, #tpu.memory_space<vmem>>, vector<6x6x32xbf16>
    %115 = vector.shape_cast %114 : vector<6x6x32xbf16> to vector<36x32xbf16>
    %c0_92 = arith.constant 0 : index
    %c2_93 = arith.constant 2 : index
    %c0_94 = arith.constant 0 : index
    %c0_95 = arith.constant 0 : index
    %116 = vector.load %arg9[%c0_92, %c2_93, %c0_94, %c0_95] : memref<3x3x32x32xbf16, #tpu.memory_space<vmem>>, vector<1x1x32x32xbf16>
    %117 = vector.shape_cast %116 : vector<1x1x32x32xbf16> to vector<32x32xbf16>
    %cst_96 = arith.constant dense<0.000000e+00> : vector<36x32xf32>
    %118 = tpu.matmul %115, %117, %cst_96 {dimension_numbers = #tpu.dot_dimension_numbers<[1], [0], [0], [1], [0, 0, 1, 1], [], []>} : vector<36x32xbf16>, vector<32x32xbf16>, vector<36x32xf32> -> vector<36x32xf32>
    %119 = arith.addf %113, %118 : vector<36x32xf32>
    %c1_97 = arith.constant 1 : index
    %c0_98 = arith.constant 0 : index
    %c0_99 = arith.constant 0 : index
    %120 = vector.load %arg19[%c1_97, %c0_98, %c0_99] : memref<8x8x32xbf16, #tpu.memory_space<vmem>>, vector<6x6x32xbf16>
    %121 = vector.shape_cast %120 : vector<6x6x32xbf16> to vector<36x32xbf16>
    %c1_100 = arith.constant 1 : index
    %c0_101 = arith.constant 0 : index
    %c0_102 = arith.constant 0 : index
    %c0_103 = arith.constant 0 : index
    %122 = vector.load %arg9[%c1_100, %c0_101, %c0_102, %c0_103] : memref<3x3x32x32xbf16, #tpu.memory_space<vmem>>, vector<1x1x32x32xbf16>
    %123 = vector.shape_cast %122 : vector<1x1x32x32xbf16> to vector<32x32xbf16>
    %cst_104 = arith.constant dense<0.000000e+00> : vector<36x32xf32>
    %124 = tpu.matmul %121, %123, %cst_104 {dimension_numbers = #tpu.dot_dimension_numbers<[1], [0], [0], [1], [0, 0, 1, 1], [], []>} : vector<36x32xbf16>, vector<32x32xbf16>, vector<36x32xf32> -> vector<36x32xf32>
    %125 = arith.addf %119, %124 : vector<36x32xf32>
    %c1_105 = arith.constant 1 : index
    %c1_106 = arith.constant 1 : index
    %c0_107 = arith.constant 0 : index
    %126 = vector.load %arg19[%c1_105, %c1_106, %c0_107] : memref<8x8x32xbf16, #tpu.memory_space<vmem>>, vector<6x6x32xbf16>
    %127 = vector.shape_cast %126 : vector<6x6x32xbf16> to vector<36x32xbf16>
    %c1_108 = arith.constant 1 : index
    %c1_109 = arith.constant 1 : index
    %c0_110 = arith.constant 0 : index
    %c0_111 = arith.constant 0 : index
    %128 = vector.load %arg9[%c1_108, %c1_109, %c0_110, %c0_111] : memref<3x3x32x32xbf16, #tpu.memory_space<vmem>>, vector<1x1x32x32xbf16>
    %129 = vector.shape_cast %128 : vector<1x1x32x32xbf16> to vector<32x32xbf16>
    %cst_112 = arith.constant dense<0.000000e+00> : vector<36x32xf32>
    %130 = tpu.matmul %127, %129, %cst_112 {dimension_numbers = #tpu.dot_dimension_numbers<[1], [0], [0], [1], [0, 0, 1, 1], [], []>} : vector<36x32xbf16>, vector<32x32xbf16>, vector<36x32xf32> -> vector<36x32xf32>
    %131 = arith.addf %125, %130 : vector<36x32xf32>
    %c1_113 = arith.constant 1 : index
    %c2_114 = arith.constant 2 : index
    %c0_115 = arith.constant 0 : index
    %132 = vector.load %arg19[%c1_113, %c2_114, %c0_115] : memref<8x8x32xbf16, #tpu.memory_space<vmem>>, vector<6x6x32xbf16>
    %133 = vector.shape_cast %132 : vector<6x6x32xbf16> to vector<36x32xbf16>
    %c1_116 = arith.constant 1 : index
    %c2_117 = arith.constant 2 : index
    %c0_118 = arith.constant 0 : index
    %c0_119 = arith.constant 0 : index
    %134 = vector.load %arg9[%c1_116, %c2_117, %c0_118, %c0_119] : memref<3x3x32x32xbf16, #tpu.memory_space<vmem>>, vector<1x1x32x32xbf16>
    %135 = vector.shape_cast %134 : vector<1x1x32x32xbf16> to vector<32x32xbf16>
    %cst_120 = arith.constant dense<0.000000e+00> : vector<36x32xf32>
    %136 = tpu.matmul %133, %135, %cst_120 {dimension_numbers = #tpu.dot_dimension_numbers<[1], [0], [0], [1], [0, 0, 1, 1], [], []>} : vector<36x32xbf16>, vector<32x32xbf16>, vector<36x32xf32> -> vector<36x32xf32>
    %137 = arith.addf %131, %136 : vector<36x32xf32>
    %c2_121 = arith.constant 2 : index
    %c0_122 = arith.constant 0 : index
    %c0_123 = arith.constant 0 : index
    %138 = vector.load %arg19[%c2_121, %c0_122, %c0_123] : memref<8x8x32xbf16, #tpu.memory_space<vmem>>, vector<6x6x32xbf16>
    %139 = vector.shape_cast %138 : vector<6x6x32xbf16> to vector<36x32xbf16>
    %c2_124 = arith.constant 2 : index
    %c0_125 = arith.constant 0 : index
    %c0_126 = arith.constant 0 : index
    %c0_127 = arith.constant 0 : index
    %140 = vector.load %arg9[%c2_124, %c0_125, %c0_126, %c0_127] : memref<3x3x32x32xbf16, #tpu.memory_space<vmem>>, vector<1x1x32x32xbf16>
    %141 = vector.shape_cast %140 : vector<1x1x32x32xbf16> to vector<32x32xbf16>
    %cst_128 = arith.constant dense<0.000000e+00> : vector<36x32xf32>
    %142 = tpu.matmul %139, %141, %cst_128 {dimension_numbers = #tpu.dot_dimension_numbers<[1], [0], [0], [1], [0, 0, 1, 1], [], []>} : vector<36x32xbf16>, vector<32x32xbf16>, vector<36x32xf32> -> vector<36x32xf32>
    %143 = arith.addf %137, %142 : vector<36x32xf32>
    %c2_129 = arith.constant 2 : index
    %c1_130 = arith.constant 1 : index
    %c0_131 = arith.constant 0 : index
    %144 = vector.load %arg19[%c2_129, %c1_130, %c0_131] : memref<8x8x32xbf16, #tpu.memory_space<vmem>>, vector<6x6x32xbf16>
    %145 = vector.shape_cast %144 : vector<6x6x32xbf16> to vector<36x32xbf16>
    %c2_132 = arith.constant 2 : index
    %c1_133 = arith.constant 1 : index
    %c0_134 = arith.constant 0 : index
    %c0_135 = arith.constant 0 : index
    %146 = vector.load %arg9[%c2_132, %c1_133, %c0_134, %c0_135] : memref<3x3x32x32xbf16, #tpu.memory_space<vmem>>, vector<1x1x32x32xbf16>
    %147 = vector.shape_cast %146 : vector<1x1x32x32xbf16> to vector<32x32xbf16>
    %cst_136 = arith.constant dense<0.000000e+00> : vector<36x32xf32>
    %148 = tpu.matmul %145, %147, %cst_136 {dimension_numbers = #tpu.dot_dimension_numbers<[1], [0], [0], [1], [0, 0, 1, 1], [], []>} : vector<36x32xbf16>, vector<32x32xbf16>, vector<36x32xf32> -> vector<36x32xf32>
    %149 = arith.addf %143, %148 : vector<36x32xf32>
    %c2_137 = arith.constant 2 : index
    %c2_138 = arith.constant 2 : index
    %c0_139 = arith.constant 0 : index
    %150 = vector.load %arg19[%c2_137, %c2_138, %c0_139] : memref<8x8x32xbf16, #tpu.memory_space<vmem>>, vector<6x6x32xbf16>
    %151 = vector.shape_cast %150 : vector<6x6x32xbf16> to vector<36x32xbf16>
    %c2_140 = arith.constant 2 : index
    %c2_141 = arith.constant 2 : index
    %c0_142 = arith.constant 0 : index
    %c0_143 = arith.constant 0 : index
    %152 = vector.load %arg9[%c2_140, %c2_141, %c0_142, %c0_143] : memref<3x3x32x32xbf16, #tpu.memory_space<vmem>>, vector<1x1x32x32xbf16>
    %153 = vector.shape_cast %152 : vector<1x1x32x32xbf16> to vector<32x32xbf16>
    %cst_144 = arith.constant dense<0.000000e+00> : vector<36x32xf32>
    %154 = tpu.matmul %151, %153, %cst_144 {dimension_numbers = #tpu.dot_dimension_numbers<[1], [0], [0], [1], [0, 0, 1, 1], [], []>} : vector<36x32xbf16>, vector<32x32xbf16>, vector<36x32xf32> -> vector<36x32xf32>
    %155 = arith.addf %149, %154 : vector<36x32xf32>
    %c0_145 = arith.constant 0 : index
    %c0_146 = arith.constant 0 : index
    %156 = vector.load %arg10[%c0_145, %c0_146] : memref<1x32xf32, #tpu.memory_space<vmem>>, vector<1x32xf32>
    %157 = vector.broadcast %156 : vector<1x32xf32> to vector<36x32xf32>
    %158 = arith.addf %155, %157 : vector<36x32xf32>
    %cst_147 = arith.constant 0.000000e+00 : f32
    %159 = vector.broadcast %cst_147 : f32 to vector<36x32xf32>
    %160 = arith.maximumf %158, %159 : vector<36x32xf32>
    %161 = vector.shape_cast %160 : vector<36x32xf32> to vector<6x6x32xf32>
    %162 = arith.truncf %161 : vector<6x6x32xf32> to vector<6x6x32xbf16>
    %cst_148 = arith.constant 0.000000e+00 : bf16
    %163 = vector.broadcast %cst_148 : bf16 to vector<10x10x32xbf16>
    %c0_149 = arith.constant 0 : index
    %c0_150 = arith.constant 0 : index
    %c0_151 = arith.constant 0 : index
    %164 = vector.load %arg20[%c0_149, %c0_150, %c0_151] : memref<10x10x32xbf16, #tpu.memory_space<vmem>>, vector<10x10x32xbf16>
    tpu.vector_store %arg20[%c0_149, %c0_150, %c0_151], %163 {strides = array<i32>} : memref<10x10x32xbf16, #tpu.memory_space<vmem>>, vector<10x10x32xbf16>,
    %c2_152 = arith.constant 2 : index
    %c2_153 = arith.constant 2 : index
    %c0_154 = arith.constant 0 : index
    %165 = vector.load %arg20[%c2_152, %c2_153, %c0_154] : memref<10x10x32xbf16, #tpu.memory_space<vmem>>, vector<6x6x32xbf16>
    tpu.vector_store %arg20[%c2_152, %c2_153, %c0_154], %162 {strides = array<i32>} : memref<10x10x32xbf16, #tpu.memory_space<vmem>>, vector<6x6x32xbf16>,
    %cst_155 = arith.constant 0.000000e+00 : f32
    %166 = vector.broadcast %cst_155 : f32 to vector<8x8xf32>
    %c0_156 = arith.constant 0 : index
    %c0_157 = arith.constant 0 : index
    %c0_158 = arith.constant 0 : index
    %167 = vector.load %arg20[%c0_156, %c0_157, %c0_158] : memref<10x10x32xbf16, #tpu.memory_space<vmem>>, vector<8x8x32xbf16>
    %168 = arith.extf %167 : vector<8x8x32xbf16> to vector<8x8x32xf32>
    %c0_159 = arith.constant 0 : index
    %c0_160 = arith.constant 0 : index
    %c0_161 = arith.constant 0 : index
    %169 = vector.load %arg11[%c0_159, %c0_160, %c0_161] : memref<3x3x32xf32, #tpu.memory_space<vmem>>, vector<1x1x32xf32>
    %170 = vector.shape_cast %169 : vector<1x1x32xf32> to vector<32xf32>
    %171 = vector.shape_cast %170 : vector<32xf32> to vector<1x1x32xf32>
    %172 = vector.broadcast %171 : vector<1x1x32xf32> to vector<8x8x32xf32>
    %173 = arith.mulf %168, %172 : vector<8x8x32xf32>
    %cst_162 = arith.constant dense<0.000000e+00> : vector<8x8xf32>
    %174 = vector.multi_reduction <add>, %173, %cst_162 [2] : vector<8x8x32xf32> to vector<8x8xf32>
    %175 = arith.addf %166, %174 : vector<8x8xf32>
    %c0_163 = arith.constant 0 : index
    %c1_164 = arith.constant 1 : index
    %c0_165 = arith.constant 0 : index
    %176 = vector.load %arg20[%c0_163, %c1_164, %c0_165] : memref<10x10x32xbf16, #tpu.memory_space<vmem>>, vector<8x8x32xbf16>
    %177 = arith.extf %176 : vector<8x8x32xbf16> to vector<8x8x32xf32>
    %c0_166 = arith.constant 0 : index
    %c1_167 = arith.constant 1 : index
    %c0_168 = arith.constant 0 : index
    %178 = vector.load %arg11[%c0_166, %c1_167, %c0_168] : memref<3x3x32xf32, #tpu.memory_space<vmem>>, vector<1x1x32xf32>
    %179 = vector.shape_cast %178 : vector<1x1x32xf32> to vector<32xf32>
    %180 = vector.shape_cast %179 : vector<32xf32> to vector<1x1x32xf32>
    %181 = vector.broadcast %180 : vector<1x1x32xf32> to vector<8x8x32xf32>
    %182 = arith.mulf %177, %181 : vector<8x8x32xf32>
    %cst_169 = arith.constant dense<0.000000e+00> : vector<8x8xf32>
    %183 = vector.multi_reduction <add>, %182, %cst_169 [2] : vector<8x8x32xf32> to vector<8x8xf32>
    %184 = arith.addf %175, %183 : vector<8x8xf32>
    %c0_170 = arith.constant 0 : index
    %c2_171 = arith.constant 2 : index
    %c0_172 = arith.constant 0 : index
    %185 = vector.load %arg20[%c0_170, %c2_171, %c0_172] : memref<10x10x32xbf16, #tpu.memory_space<vmem>>, vector<8x8x32xbf16>
    %186 = arith.extf %185 : vector<8x8x32xbf16> to vector<8x8x32xf32>
    %c0_173 = arith.constant 0 : index
    %c2_174 = arith.constant 2 : index
    %c0_175 = arith.constant 0 : index
    %187 = vector.load %arg11[%c0_173, %c2_174, %c0_175] : memref<3x3x32xf32, #tpu.memory_space<vmem>>, vector<1x1x32xf32>
    %188 = vector.shape_cast %187 : vector<1x1x32xf32> to vector<32xf32>
    %189 = vector.shape_cast %188 : vector<32xf32> to vector<1x1x32xf32>
    %190 = vector.broadcast %189 : vector<1x1x32xf32> to vector<8x8x32xf32>
    %191 = arith.mulf %186, %190 : vector<8x8x32xf32>
    %cst_176 = arith.constant dense<0.000000e+00> : vector<8x8xf32>
    %192 = vector.multi_reduction <add>, %191, %cst_176 [2] : vector<8x8x32xf32> to vector<8x8xf32>
    %193 = arith.addf %184, %192 : vector<8x8xf32>
    %c1_177 = arith.constant 1 : index
    %c0_178 = arith.constant 0 : index
    %c0_179 = arith.constant 0 : index
    %194 = vector.load %arg20[%c1_177, %c0_178, %c0_179] : memref<10x10x32xbf16, #tpu.memory_space<vmem>>, vector<8x8x32xbf16>
    %195 = arith.extf %194 : vector<8x8x32xbf16> to vector<8x8x32xf32>
    %c1_180 = arith.constant 1 : index
    %c0_181 = arith.constant 0 : index
    %c0_182 = arith.constant 0 : index
    %196 = vector.load %arg11[%c1_180, %c0_181, %c0_182] : memref<3x3x32xf32, #tpu.memory_space<vmem>>, vector<1x1x32xf32>
    %197 = vector.shape_cast %196 : vector<1x1x32xf32> to vector<32xf32>
    %198 = vector.shape_cast %197 : vector<32xf32> to vector<1x1x32xf32>
    %199 = vector.broadcast %198 : vector<1x1x32xf32> to vector<8x8x32xf32>
    %200 = arith.mulf %195, %199 : vector<8x8x32xf32>
    %cst_183 = arith.constant dense<0.000000e+00> : vector<8x8xf32>
    %201 = vector.multi_reduction <add>, %200, %cst_183 [2] : vector<8x8x32xf32> to vector<8x8xf32>
    %202 = arith.addf %193, %201 : vector<8x8xf32>
    %c1_184 = arith.constant 1 : index
    %c1_185 = arith.constant 1 : index
    %c0_186 = arith.constant 0 : index
    %203 = vector.load %arg20[%c1_184, %c1_185, %c0_186] : memref<10x10x32xbf16, #tpu.memory_space<vmem>>, vector<8x8x32xbf16>
    %204 = arith.extf %203 : vector<8x8x32xbf16> to vector<8x8x32xf32>
    %c1_187 = arith.constant 1 : index
    %c1_188 = arith.constant 1 : index
    %c0_189 = arith.constant 0 : index
    %205 = vector.load %arg11[%c1_187, %c1_188, %c0_189] : memref<3x3x32xf32, #tpu.memory_space<vmem>>, vector<1x1x32xf32>
    %206 = vector.shape_cast %205 : vector<1x1x32xf32> to vector<32xf32>
    %207 = vector.shape_cast %206 : vector<32xf32> to vector<1x1x32xf32>
    %208 = vector.broadcast %207 : vector<1x1x32xf32> to vector<8x8x32xf32>
    %209 = arith.mulf %204, %208 : vector<8x8x32xf32>
    %cst_190 = arith.constant dense<0.000000e+00> : vector<8x8xf32>
    %210 = vector.multi_reduction <add>, %209, %cst_190 [2] : vector<8x8x32xf32> to vector<8x8xf32>
    %211 = arith.addf %202, %210 : vector<8x8xf32>
    %c1_191 = arith.constant 1 : index
    %c2_192 = arith.constant 2 : index
    %c0_193 = arith.constant 0 : index
    %212 = vector.load %arg20[%c1_191, %c2_192, %c0_193] : memref<10x10x32xbf16, #tpu.memory_space<vmem>>, vector<8x8x32xbf16>
    %213 = arith.extf %212 : vector<8x8x32xbf16> to vector<8x8x32xf32>
    %c1_194 = arith.constant 1 : index
    %c2_195 = arith.constant 2 : index
    %c0_196 = arith.constant 0 : index
    %214 = vector.load %arg11[%c1_194, %c2_195, %c0_196] : memref<3x3x32xf32, #tpu.memory_space<vmem>>, vector<1x1x32xf32>
    %215 = vector.shape_cast %214 : vector<1x1x32xf32> to vector<32xf32>
    %216 = vector.shape_cast %215 : vector<32xf32> to vector<1x1x32xf32>
    %217 = vector.broadcast %216 : vector<1x1x32xf32> to vector<8x8x32xf32>
    %218 = arith.mulf %213, %217 : vector<8x8x32xf32>
    %cst_197 = arith.constant dense<0.000000e+00> : vector<8x8xf32>
    %219 = vector.multi_reduction <add>, %218, %cst_197 [2] : vector<8x8x32xf32> to vector<8x8xf32>
    %220 = arith.addf %211, %219 : vector<8x8xf32>
    %c2_198 = arith.constant 2 : index
    %c0_199 = arith.constant 0 : index
    %c0_200 = arith.constant 0 : index
    %221 = vector.load %arg20[%c2_198, %c0_199, %c0_200] : memref<10x10x32xbf16, #tpu.memory_space<vmem>>, vector<8x8x32xbf16>
    %222 = arith.extf %221 : vector<8x8x32xbf16> to vector<8x8x32xf32>
    %c2_201 = arith.constant 2 : index
    %c0_202 = arith.constant 0 : index
    %c0_203 = arith.constant 0 : index
    %223 = vector.load %arg11[%c2_201, %c0_202, %c0_203] : memref<3x3x32xf32, #tpu.memory_space<vmem>>, vector<1x1x32xf32>
    %224 = vector.shape_cast %223 : vector<1x1x32xf32> to vector<32xf32>
    %225 = vector.shape_cast %224 : vector<32xf32> to vector<1x1x32xf32>
    %226 = vector.broadcast %225 : vector<1x1x32xf32> to vector<8x8x32xf32>
    %227 = arith.mulf %222, %226 : vector<8x8x32xf32>
    %cst_204 = arith.constant dense<0.000000e+00> : vector<8x8xf32>
    %228 = vector.multi_reduction <add>, %227, %cst_204 [2] : vector<8x8x32xf32> to vector<8x8xf32>
    %229 = arith.addf %220, %228 : vector<8x8xf32>
    %c2_205 = arith.constant 2 : index
    %c1_206 = arith.constant 1 : index
    %c0_207 = arith.constant 0 : index
    %230 = vector.load %arg20[%c2_205, %c1_206, %c0_207] : memref<10x10x32xbf16, #tpu.memory_space<vmem>>, vector<8x8x32xbf16>
    %231 = arith.extf %230 : vector<8x8x32xbf16> to vector<8x8x32xf32>
    %c2_208 = arith.constant 2 : index
    %c1_209 = arith.constant 1 : index
    %c0_210 = arith.constant 0 : index
    %232 = vector.load %arg11[%c2_208, %c1_209, %c0_210] : memref<3x3x32xf32, #tpu.memory_space<vmem>>, vector<1x1x32xf32>
    %233 = vector.shape_cast %232 : vector<1x1x32xf32> to vector<32xf32>
    %234 = vector.shape_cast %233 : vector<32xf32> to vector<1x1x32xf32>
    %235 = vector.broadcast %234 : vector<1x1x32xf32> to vector<8x8x32xf32>
    %236 = arith.mulf %231, %235 : vector<8x8x32xf32>
    %cst_211 = arith.constant dense<0.000000e+00> : vector<8x8xf32>
    %237 = vector.multi_reduction <add>, %236, %cst_211 [2] : vector<8x8x32xf32> to vector<8x8xf32>
    %238 = arith.addf %229, %237 : vector<8x8xf32>
    %c2_212 = arith.constant 2 : index
    %c2_213 = arith.constant 2 : index
    %c0_214 = arith.constant 0 : index
    %239 = vector.load %arg20[%c2_212, %c2_213, %c0_214] : memref<10x10x32xbf16, #tpu.memory_space<vmem>>, vector<8x8x32xbf16>
    %240 = arith.extf %239 : vector<8x8x32xbf16> to vector<8x8x32xf32>
    %c2_215 = arith.constant 2 : index
    %c2_216 = arith.constant 2 : index
    %c0_217 = arith.constant 0 : index
    %241 = vector.load %arg11[%c2_215, %c2_216, %c0_217] : memref<3x3x32xf32, #tpu.memory_space<vmem>>, vector<1x1x32xf32>
    %242 = vector.shape_cast %241 : vector<1x1x32xf32> to vector<32xf32>
    %243 = vector.shape_cast %242 : vector<32xf32> to vector<1x1x32xf32>
    %244 = vector.broadcast %243 : vector<1x1x32xf32> to vector<8x8x32xf32>
    %245 = arith.mulf %240, %244 : vector<8x8x32xf32>
    %cst_218 = arith.constant dense<0.000000e+00> : vector<8x8xf32>
    %246 = vector.multi_reduction <add>, %245, %cst_218 [2] : vector<8x8x32xf32> to vector<8x8xf32>
    %247 = arith.addf %238, %246 : vector<8x8xf32>
    %c0_219 = arith.constant 0 : index
    %c0_220 = arith.constant 0 : index
    %248 = vector.load %arg12[%c0_219, %c0_220] : memref<1x1xf32, #tpu.memory_space<vmem>>, vector<1x1xf32>
    %249 = vector.broadcast %248 : vector<1x1xf32> to vector<8x8xf32>
    %250 = arith.addf %247, %249 : vector<8x8xf32>
    %251 = arith.negf %250 : vector<8x8xf32>
    %252 = math.exp %251 : vector<8x8xf32>
    %cst_221 = arith.constant 1.000000e+00 : f32
    %253 = vector.broadcast %cst_221 : f32 to vector<8x8xf32>
    %254 = arith.addf %253, %252 : vector<8x8xf32>
    %255 = arith.divf %253, %254 : vector<8x8xf32>
    %c0_222 = arith.constant 0 : index
    %c0_223 = arith.constant 0 : index
    %c0_224 = arith.constant 0 : index
    %256 = vector.load %arg1[%c0_222, %c0_223, %c0_224] : memref<1x72x8xbf16, #tpu.memory_space<vmem>>, vector<1x72x8xbf16>
    %257 = vector.shape_cast %256 : vector<1x72x8xbf16> to vector<72x8xbf16>
    %258 = arith.extf %257 : vector<72x8xbf16> to vector<72x8xf32>
    %c0_225 = arith.constant 0 : index
    %c0_226 = arith.constant 0 : index
    %c0_227 = arith.constant 0 : index
    %259 = vector.load %arg3[%c0_225, %c0_226, %c0_227] : memref<1x72x8xbf16, #tpu.memory_space<vmem>>, vector<1x72x8xbf16>
    %260 = vector.shape_cast %259 : vector<1x72x8xbf16> to vector<72x8xbf16>
    %261 = arith.extf %260 : vector<72x8xbf16> to vector<72x8xf32>
    %262 = arith.mulf %258, %261 : vector<72x8xf32>
    %cst_228 = arith.constant dense<0.000000e+00> : vector<8xf32>
    %263 = vector.multi_reduction <add>, %262, %cst_228 [0] : vector<72x8xf32> to vector<8xf32>
    %264 = vector.shape_cast %263 : vector<8xf32> to vector<1x8xf32>
    %c0_229 = arith.constant 0 : index
    %c0_230 = arith.constant 0 : index
    %265 = vector.load %arg13[%c0_229, %c0_230] : memref<8x2xf32, #tpu.memory_space<vmem>>, vector<8x2xf32>
    %cst_231 = arith.constant dense<0.000000e+00> : vector<1x2xf32>
    %266 = tpu.matmul %264, %265, %cst_231 {dimension_numbers = #tpu.dot_dimension_numbers<[1], [0], [0], [1], [0, 0, 1, 1], [], []>} : vector<1x8xf32>, vector<8x2xf32>, vector<1x2xf32> -> vector<1x2xf32>
    %c0_232 = arith.constant 0 : index
    %c0_233 = arith.constant 0 : index
    %267 = vector.load %arg14[%c0_232, %c0_233] : memref<1x2xf32, #tpu.memory_space<vmem>>, vector<1x2xf32>
    %268 = arith.addf %266, %267 : vector<1x2xf32>
    %cst_234 = arith.constant 0.000000e+00 : f32
    %269 = vector.broadcast %cst_234 : f32 to vector<1x2xf32>
    %270 = arith.maximumf %268, %269 : vector<1x2xf32>
    %c0_235 = arith.constant 0 : index
    %c0_236 = arith.constant 0 : index
    %271 = vector.load %arg15[%c0_235, %c0_236] : memref<2x8xf32, #tpu.memory_space<vmem>>, vector<2x8xf32>
    %cst_237 = arith.constant dense<0.000000e+00> : vector<1x8xf32>
    %272 = tpu.matmul %270, %271, %cst_237 {dimension_numbers = #tpu.dot_dimension_numbers<[1], [0], [0], [1], [0, 0, 1, 1], [], []>} : vector<1x2xf32>, vector<2x8xf32>, vector<1x8xf32> -> vector<1x8xf32>
    %c0_238 = arith.constant 0 : index
    %c0_239 = arith.constant 0 : index
    %273 = vector.load %arg16[%c0_238, %c0_239] : memref<1x8xf32, #tpu.memory_space<vmem>>, vector<1x8xf32>
    %274 = arith.addf %272, %273 : vector<1x8xf32>
    %cst_240 = arith.constant 2.000000e+00 : f32
    %275 = vector.broadcast %cst_240 : f32 to vector<1x8xf32>
    %276 = arith.mulf %275, %274 : vector<1x8xf32>
    %277 = arith.negf %276 : vector<1x8xf32>
    %278 = math.exp %277 : vector<1x8xf32>
    %cst_241 = arith.constant 1.000000e+00 : f32
    %279 = vector.broadcast %cst_241 : f32 to vector<1x8xf32>
    %280 = arith.addf %279, %278 : vector<1x8xf32>
    %281 = arith.divf %279, %280 : vector<1x8xf32>
    %c0_242 = arith.constant 0 : index
    %c0_243 = arith.constant 0 : index
    %c0_244 = arith.constant 0 : index
    %c0_245 = arith.constant 0 : index
    %282 = vector.load %arg4[%c0_242, %c0_243, %c0_244, %c0_245] : memref<1x8x8x8xbf16, #tpu.memory_space<vmem>>, vector<1x8x8x8xbf16>
    %283 = vector.shape_cast %282 : vector<1x8x8x8xbf16> to vector<8x8x8xbf16>
    %284 = arith.truncf %255 : vector<8x8xf32> to vector<8x8xbf16>
    %285 = vector.shape_cast %284 : vector<8x8xbf16> to vector<8x8x1xbf16>
    %286 = vector.broadcast %285 : vector<8x8x1xbf16> to vector<8x8x8xbf16>
    %287 = arith.mulf %283, %286 : vector<8x8x8xbf16>
    %288 = arith.truncf %281 : vector<1x8xf32> to vector<1x8xbf16>
    %289 = vector.shape_cast %288 : vector<1x8xbf16> to vector<1x1x8xbf16>
    %290 = vector.broadcast %289 : vector<1x1x8xbf16> to vector<8x8x8xbf16>
    %291 = arith.mulf %283, %290 : vector<8x8x8xbf16>
    %c0_246 = arith.constant 0 : index
    %c0_247 = arith.constant 0 : index
    %c0_248 = arith.constant 0 : index
    %c0_249 = arith.constant 0 : index
    %292 = vector.load %arg17[%c0_246, %c0_247, %c0_248, %c0_249] : memref<1x8x8x16xbf16, #tpu.memory_space<vmem>>, vector<1x8x8x8xbf16>
    %293 = vector.shape_cast %292 : vector<1x8x8x8xbf16> to vector<8x8x8xbf16>
    %294 = vector.shape_cast %287 : vector<8x8x8xbf16> to vector<1x8x8x8xbf16>
    tpu.vector_store %arg17[%c0_246, %c0_247, %c0_248, %c0_249], %294 {strides = array<i32>} : memref<1x8x8x16xbf16, #tpu.memory_space<vmem>>, vector<1x8x8x8xbf16>,
    %c0_250 = arith.constant 0 : index
    %c0_251 = arith.constant 0 : index
    %c0_252 = arith.constant 0 : index
    %c8_253 = arith.constant 8 : index
    %295 = vector.load %arg17[%c0_250, %c0_251, %c0_252, %c8_253] : memref<1x8x8x16xbf16, #tpu.memory_space<vmem>>, vector<1x8x8x8xbf16>
    %296 = vector.shape_cast %295 : vector<1x8x8x8xbf16> to vector<8x8x8xbf16>
    %297 = vector.shape_cast %291 : vector<8x8x8xbf16> to vector<1x8x8x8xbf16>
    tpu.vector_store %arg17[%c0_250, %c0_251, %c0_252, %c8_253], %297 {strides = array<i32>} : memref<1x8x8x16xbf16, #tpu.memory_space<vmem>>, vector<1x8x8x8xbf16>,
    return
  }
  func.func @transform_0(%arg0: i32) -> (i32, i32, i32) {
    %c0_i32 = arith.constant 0 : i32
    %c0_i32_0 = arith.constant 0 : i32
    %c0_i32_1 = arith.constant 0 : i32
    return %arg0, %c0_i32, %c0_i32_0 : i32, i32, i32
  }
  func.func @transform_1(%arg0: i32) -> (i32, i32, i32) {
    %c0_i32 = arith.constant 0 : i32
    %c0_i32_0 = arith.constant 0 : i32
    %c0_i32_1 = arith.constant 0 : i32
    return %arg0, %c0_i32, %c0_i32_0 : i32, i32, i32
  }
  func.func @transform_2(%arg0: i32) -> (i32, i32, i32) {
    %c0_i32 = arith.constant 0 : i32
    %c0_i32_0 = arith.constant 0 : i32
    %c0_i32_1 = arith.constant 0 : i32
    return %arg0, %c0_i32, %c0_i32_0 : i32, i32, i32
  }
  func.func @transform_3(%arg0: i32) -> (i32, i32, i32, i32) {
    %c0_i32 = arith.constant 0 : i32
    %c0_i32_0 = arith.constant 0 : i32
    %c0_i32_1 = arith.constant 0 : i32
    %c0_i32_2 = arith.constant 0 : i32
    return %arg0, %c0_i32, %c0_i32_0, %c0_i32_1 : i32, i32, i32, i32
  }
  func.func @transform_4(%arg0: i32) -> (i32, i32) {
    %c0_i32 = arith.constant 0 : i32
    %c0_i32_0 = arith.constant 0 : i32
    %c0_i32_1 = arith.constant 0 : i32
    return %c0_i32, %c0_i32_0 : i32, i32
  }
  func.func @transform_5(%arg0: i32) -> (i32, i32) {
    %c0_i32 = arith.constant 0 : i32
    %c0_i32_0 = arith.constant 0 : i32
    %c0_i32_1 = arith.constant 0 : i32
    return %c0_i32, %c0_i32_0 : i32, i32
  }
  func.func @transform_6(%arg0: i32) -> (i32, i32, i32, i32) {
    %c0_i32 = arith.constant 0 : i32
    %c0_i32_0 = arith.constant 0 : i32
    %c0_i32_1 = arith.constant 0 : i32
    %c0_i32_2 = arith.constant 0 : i32
    %c0_i32_3 = arith.constant 0 : i32
    return %c0_i32, %c0_i32_0, %c0_i32_1, %c0_i32_2 : i32, i32, i32, i32
  }
  func.func @transform_7(%arg0: i32) -> (i32, i32) {
    %c0_i32 = arith.constant 0 : i32
    %c0_i32_0 = arith.constant 0 : i32
    %c0_i32_1 = arith.constant 0 : i32
    return %c0_i32, %c0_i32_0 : i32, i32
  }
  func.func @transform_8(%arg0: i32) -> (i32, i32, i32, i32) {
    %c0_i32 = arith.constant 0 : i32
    %c0_i32_0 = arith.constant 0 : i32
    %c0_i32_1 = arith.constant 0 : i32
    %c0_i32_2 = arith.constant 0 : i32
    %c0_i32_3 = arith.constant 0 : i32
    return %c0_i32, %c0_i32_0, %c0_i32_1, %c0_i32_2 : i32, i32, i32, i32
  }
  func.func @transform_9(%arg0: i32) -> (i32, i32) {
    %c0_i32 = arith.constant 0 : i32
    %c0_i32_0 = arith.constant 0 : i32
    %c0_i32_1 = arith.constant 0 : i32
    return %c0_i32, %c0_i32_0 : i32, i32
  }
  func.func @transform_10(%arg0: i32) -> (i32, i32, i32) {
    %c0_i32 = arith.constant 0 : i32
    %c0_i32_0 = arith.constant 0 : i32
    %c0_i32_1 = arith.constant 0 : i32
    %c0_i32_2 = arith.constant 0 : i32
    return %c0_i32, %c0_i32_0, %c0_i32_1 : i32, i32, i32
  }
  func.func @transform_11(%arg0: i32) -> (i32, i32) {
    %c0_i32 = arith.constant 0 : i32
    %c0_i32_0 = arith.constant 0 : i32
    %c0_i32_1 = arith.constant 0 : i32
    return %c0_i32, %c0_i32_0 : i32, i32
  }
  func.func @transform_12(%arg0: i32) -> (i32, i32) {
    %c0_i32 = arith.constant 0 : i32
    %c0_i32_0 = arith.constant 0 : i32
    %c0_i32_1 = arith.constant 0 : i32
    return %c0_i32, %c0_i32_0 : i32, i32
  }
  func.func @transform_13(%arg0: i32) -> (i32, i32) {
    %c0_i32 = arith.constant 0 : i32
    %c0_i32_0 = arith.constant 0 : i32
    %c0_i32_1 = arith.constant 0 : i32
    return %c0_i32, %c0_i32_0 : i32, i32
  }
  func.func @transform_14(%arg0: i32) -> (i32, i32) {
    %c0_i32 = arith.constant 0 : i32
    %c0_i32_0 = arith.constant 0 : i32
    %c0_i32_1 = arith.constant 0 : i32
    return %c0_i32, %c0_i32_0 : i32, i32
  }
  func.func @transform_15(%arg0: i32) -> (i32, i32) {
    %c0_i32 = arith.constant 0 : i32
    %c0_i32_0 = arith.constant 0 : i32
    %c0_i32_1 = arith.constant 0 : i32
    return %c0_i32, %c0_i32_0 : i32, i32
  }
  func.func @transform_16(%arg0: i32) -> (i32, i32, i32, i32) {
    %c0_i32 = arith.constant 0 : i32
    %c0_i32_0 = arith.constant 0 : i32
    %c0_i32_1 = arith.constant 0 : i32
    %c0_i32_2 = arith.constant 0 : i32
    return %arg0, %c0_i32, %c0_i32_0, %c0_i32_1 : i32, i32, i32, i32
  }
}

</mosaic_0001>

<bundles_post_ra>
// kernel: pixel_attention_forward.3
= control target key start
LH: loop header
LB: loop body
LE: loop exit
PB: predicated region body
PF: predicated region fallthrough
CT: control target
= control target key end

     0   :  { %s1368_s12 = smov 0   ;;  %s2018_s0 = inlined_call_operand.vmem [shape: bf16[2,104,16], index: 0, kind: input, shape index: {}]   ;;  %s2019_s1 = inlined_call_operand.vmem [shape: bf16[16,72], index: 1, kind: input, shape index: {}]   ;;  %s2020_s2 = inlined_call_operand.vmem [shape: f32[1,8], index: 2, kind: input, shape index: {}]   ;;  %s2021_s3 = inlined_call_operand.vmem [shape: bf16[2,8,8,8], index: 3, kind: output, shape index: {}]  }
   0x1 LB: > { %s1234_s13 = sadd.s32 4294967295, %s1335_s12   ;;  %p1238_p0 = scmp.ge.s32.totalorder %s1335_s12, 1  ;;  %s1335_s12 = sphi %s1368_s12, %s13_s12  }
   0x2   : > { %p137_p1 = scmp.lt.s32.totalorder %s1335_s12, 3 }
   0x4   : > { %p138_p2 = pnand %p1238_p0, %p137_p1 }
   0x6   : > { %141 = sbr.rel (%p138_p2) target bundleno = 532 (0x214), region = 32 }
   0xd   : > { %v1321_v0 = vld [vmem:[%s2019_s1] sm:$0xff]   ;;  %v1337_v1 = vmov 0.0   ;;  %p161_p3 = scmp.lt.s32.totalorder %s1234_s13, 1  ;;  %vm1338_vm0 = vmmov 0   ;;  %vm226_vm1 = vcmask 130048   ;;  %vm419_vm2 = vcmask 1045504  }
   0xe   : > { %1269 = vmatprep.subr.bf16.mxu0 %v1337_v1  ;;  %1299 = vmatprep.subr.bf16.mxu1 %v1337_v1  ;;  %vm357_vm3 = vcmask 1046528   ;;  %vm524_vm4 = vcmask 1044480   ;;  %vm586_vm5 = vcmask 1043456   ;;  %vm691_vm6 = vcmask 1042432   ;;  %s1339_s20 = smov 120   ;;  %s1340_s21 = smov 104  }
   0xf   : > { %1270 = vmatpush3.bf16.msra.mxu0 %v1321_v0  ;;  %1300 = vmatpush3.bf16.msra.mxu1 %v1321_v0  ;;  %s2056_s13 = smov (!%p161_p3, %s1234_s13), 1  ;;  %vm753_vm7 = vcmask 1041408   ;;  %s1341_s22 = smov 96   ;;  %vm1170_vm8 = vcmask 60416  }
  0x10   : > { %1271 = vmatprep.mubr.msk.bf16.mxu0 %vm1338_vm0, %v1337_v1  ;;  %1287 = vmatprep.mubr.msk.bf16.mxu1 %vm1338_vm0, %v1337_v1  ;;  %s1301_s16 = smul.u32 52, %s2056_s13  ;;  %s1342_s23 = smov 112  }
  0x11   : > { %s1343_s24 = smov 80   ;;  %s1344_s25 = smov 72  }
  0x12   : > { %s165_s19 = scalar_lea.vmem %s2018_s0, %s1301_s16  ;;  %s1345_s26 = smov 88  }
  0x13   : > { %v1322_v2 = vld [vmem:[%s165_s19] sm:$0xff]   ;;  %v1324_v4 = vld [vmem:[%s165_s19 + $0x8] sm:$0xff]   ;;  %v1326_v6 = vld [vmem:[%s165_s19 + $0x10] sm:$0xff]   ;;  %s1346_s27 = smov 64   ;;  %s1260_s30 = sshll.u32 %s2056_s13, 5 }
  0x14   : > { %v1323_v3 = vld [vmem:[%s165_s19 + $0x20] sm:$0xff]   ;;  %1272 = vmatmul.mubr.msk.bf16.vlgmr.msra.gmra.mrb[0].mxu0 %vm226_vm1, %v1322_v2  ;;  %v1325_v5 = vld [vmem:[%s165_s19 + $0x28] sm:$0xff]   ;;  %v1327_v7 = vld [vmem:[%s165_s19 + $0x30] ss:$0 sps:$4 sm:$0xff]   ;;  %s1915_s6 = scalar_lea.vmem %s2021_s3, %s1260_s30 }
  0x15   : > { %1288 = vmatmul.mubr.msk.bf16.vlgmr.msra.gmra.mrb[0].mxu1 %vm226_vm1, %v1323_v3  ;;  %1275 = vmatprep.mubr.msk.bf16.mxu0 %vm1338_vm0, %v1337_v1  ;;  %v1328_v8 = vld [vmem:[%s165_s19 + $0x18] sm:$0xff]  }
  0x16   : > { %1291 = vmatprep.mubr.msk.bf16.mxu1 %vm1338_vm0, %v1337_v1 }
  0x1c   : > { %1276 = vmatmul.mubr.msk.bf16.gmra.mrb[4].mxu0 %vm226_vm1, %v1324_v4 }
  0x1d   : > { %1292 = vmatmul.mubr.msk.bf16.gmra.mrb[4].mxu1 %vm226_vm1, %v1325_v5  ;;  %1279 = vmatprep.mubr.msk.bf16.mxu0 %vm1338_vm0, %v1337_v1 }
  0x1e   : > { %1295 = vmatprep.mubr.msk.bf16.mxu1 %vm1338_vm0, %v1337_v1 }
  0x24   : > { %1280 = vmatmul.mubr.msk.bf16.gmra.mrb[8].mxu0 %vm226_vm1, %v1326_v6 }
  0x25   : > { %1296 = vmatmul.mubr.msk.bf16.gmra.mrb[8].mxu1 %vm226_vm1, %v1327_v7  ;;  %1283 = vmatprep.mubr.msk.bf16.mxu0 %vm1338_vm0, %v1337_v1 }
  0x2c   : > { %1284 = vmatmul.mubr.msk.bf16.gmra.mrb[12].mxu0 %vm226_vm1, %v1328_v8 }
  0xe7   : > { %v1399_v9 = vpop.f32.mrb[0].mxu0 }
  0xe8   : > { %v358_v10 = vrot.slane %v1399_v9, 1  ;;  %v420_v11 = vrot.slane %v1399_v9, 2  ;;  %v1403_v12 = vpop.f32.mrb[0].mxu1  ;;  %v1273_v13 = vpop.f32.mrb[1].mxu0 }
  0xe9   : > { %v1289_v14 = vpop.f32.mrb[1].mxu1  ;;  %v1405_v15 = vpop.f32.mrb[2].mxu0  ;;  %v2028_v16 = vrot.slane %v1403_v12, 2  ;;  %v2027_v17 = vrot.slane %v1403_v12, 3  ;;  %v2026_v18 = vrot.slane %v1403_v12, 1  ;;  %v2025_v19 = vrot.slane %v1403_v12, 4 }
  0xea   : > { %2035 = vst [vmem:[#allocation2_spill] sm:$0xff] %v1405_v15  ;;  %v1411_v20 = vpop.f32.mrb[2].mxu1  ;;  %v1274_v21 = vpop.f32.mrb[3].mxu0  ;;  %v359_v22 = vrot.slane %v1405_v15, 1  ;;  %v421_v23 = vrot.slane %v1405_v15, 2  ;;  %v2024_v24 = vrot.slane %v1403_v12, 5 }
  0xeb   : > { %v2022_v25 = vrot.slane %v1403_v12, 6  ;;  %v1290_v26 = vpop.f32.mrb[3].mxu1  ;;  %v437_v27 = vrot.slane %v1411_v20, 2  ;;  %v540_v28 = vrot.slane %v1411_v20, 3  ;;  %v375_v29 = vrot.slane %v1411_v20, 1 }
  0xec   : > { %v602_v30 = vrot.slane %v1411_v20, 4  ;;  %v360_v31 = vsel %vm357_vm3, %v358_v10, %v359_v22  ;;  %v422_v32 = vsel %vm419_vm2, %v420_v11, %v421_v23  ;;  %v705_v33 = vrot.slane %v1411_v20, 5 }
  0xed   : > { %v767_v34 = vrot.slane %v1411_v20, 6  ;;  %v1428_v35 = vsel %vm419_vm2, %v2028_v16, %v437_v27  ;;  %379 = vrot.lane.b32.xlu0 %v360_v31, %s1339_s20  ;;  %v541_v36 = vsel %vm524_vm4, %v2027_v17, %v540_v28  ;;  %v376_v37 = vsel %vm357_vm3, %v2026_v18, %v375_v29 }
  0xee   : > { %v1440_v38 = vsel %vm586_vm5, %v2025_v19, %v602_v30  ;;  %498 = vrot.lane.b32.xlu1 %v1428_v35, %s1340_s21  ;;  %v1447_v39 = vsel %vm691_vm6, %v2024_v24, %v705_v33  ;;  %v525_v42 = vrot.slane %v1405_v15, 3  ;;  %v587_v43 = vrot.slane %v1405_v15, 4 }
  0xef   : > { %v1452_v40 = vsel %vm753_vm7, %v2022_v25, %v767_v34  ;;  %v1454_v41 = vpop.f32.mrb[4].mxu0 }
  0xf0   : > { %2036 = vst [vmem:[#allocation3_spill] sm:$0xff] %v1454_v41  ;;  %v1458_v44 = vpop.f32.mrb[4].mxu1  ;;  %v1277_v45 = vpop.f32.mrb[5].mxu0  ;;  %v361_v46 = vrot.slane %v1454_v41, 1  ;;  %v423_v47 = vrot.slane %v1454_v41, 2  ;;  %v526_v48 = vrot.slane %v1454_v41, 3 }
  0xf1   : > { %v588_v49 = vrot.slane %v1454_v41, 4  ;;  %395 = vrot.lane.b32.xlu0 %v376_v37, %s1339_s20  ;;  %v1465_v50 = vpop.f32.mrb[6].mxu0  ;;  %v1293_v51 = vpop.f32.mrb[5].mxu1  ;;  %v377_v52 = vrot.slane %v1458_v44, 1  ;;  %v439_v53 = vrot.slane %v1458_v44, 2  ;;  %v604_v54 = vrot.slane %v1458_v44, 4 }
  0xf2   : > { %2037 = vst [vmem:[#allocation4_spill] sm:$0xff] %v1465_v50  ;;  %v542_v55 = vrot.slane %v1458_v44, 3  ;;  %560 = vrot.lane.b32.xlu1 %v541_v36, %s1341_s22  ;;  %v1278_v56 = vpop.f32.mrb[7].mxu0  ;;  %v1472_v57 = vpop.f32.mrb[6].mxu1  ;;  %v1475_v58 = vsel %vm357_vm3, %v359_v22, %v361_v46  ;;  %v1478_v59 = vsel %vm419_vm2, %v421_v23, %v423_v47  ;;  %v1481_v60 = vsel %vm524_vm4, %v525_v42, %v526_v48 }
  0xf3   : > { %v363_v61 = vrot.slane %v1465_v50, 1  ;;  %v1294_v62 = vpop.f32.mrb[7].mxu1  ;;  %v1485_v63 = vsel %vm357_vm3, %v375_v29, %v377_v52  ;;  %v1488_v0 = vsel %vm419_vm2, %v437_v27, %v439_v53  ;;  %v1491_v1 = vsel %vm586_vm5, %v602_v30, %v604_v54 }
  0xf4   : > { %v1494_v2 = vsel %vm524_vm4, %v540_v28, %v542_v55  ;;  %v1500_v4 = vsel %vm586_vm5, %v587_v43, %v588_v49  ;;  %v425_v5 = vrot.slane %v1465_v50, 2  ;;  %v482_v6 = vrot.slane %v1472_v57, 2 }
  0xf5   : > { %v1497_v3 = vsel %vm357_vm3, %v361_v46, %v363_v61  ;;  %441 = vrot.lane.b32.xlu0 %v422_v32, %s1342_s23  ;;  %v707_v7 = vrot.slane %v1458_v44, 5  ;;  %v528_v8 = vrot.slane %v1465_v50, 3  ;;  %v2023_v10 = vrot.slane %v1458_v44, 6 }
  0xf6   : > { %v544_v11 = vrot.slane %v1472_v57, 3  ;;  %663 = vrot.lane.b32.xlu1 %v1440_v38, %s1343_s24  ;;  %v1512_v13 = vsel %vm419_vm2, %v423_v47, %v425_v5  ;;  %v1515_v14 = vsel %vm419_vm2, %v439_v53, %v482_v6  ;;  %v590_v21 = vrot.slane %v1465_v50, 4 }
  0xf7   : > { %v606_v22 = vrot.slane %v1472_v57, 4  ;;  %v1519_v23 = vpop.f32.mrb[8].mxu0  ;;  %v1522_v26 = vsel %vm691_vm6, %v705_v33, %v707_v7  ;;  %v1525_v27 = vsel %vm524_vm4, %v526_v48, %v528_v8  ;;  %v1530_v28 = vsel %vm753_vm7, %v767_v34, %v2023_v10 }
  0xf8   : > { %2038 = vst [vmem:[#allocation5_spill] sm:$0xff] %v1519_v23  ;;  %v1533_v29 = vsel %vm524_vm4, %v542_v55, %v544_v11  ;;  %v1281_v30 = vpop.f32.mrb[9].mxu0  ;;  %v1535_v31 = vpop.f32.mrb[8].mxu1  ;;  %v1538_v32 = vsel %vm586_vm5, %v588_v49, %v590_v21  ;;  %v692_v36 = vrot.slane %v1454_v41, 5  ;;  %v693_v37 = vrot.slane %v1465_v50, 5 }
  0xf9   : > { %v1541_v33 = vsel %vm586_vm5, %v604_v54, %v606_v22  ;;  %457 = vrot.lane.b32.xlu0 %v1428_v35, %s1342_s23  ;;  %v649_v34 = vrot.slane %v1535_v31, 4  ;;  %v711_v42 = vrot.slane %v1535_v31, 5  ;;  %v1550_v45 = vpop.f32.mrb[10].mxu0  ;;  %v754_v46 = vrot.slane %v1454_v41, 6  ;;  %v1297_v47 = vpop.f32.mrb[9].mxu1 }
  0xfa   : > { %2039 = vst [vmem:[#allocation6_spill] sm:$0xff] %v1550_v45  ;;  %725 = vrot.lane.b32.xlu1 %v1447_v39, %s1344_s25  ;;  %v1282_v48 = vpop.f32.mrb[11].mxu0  ;;  %v1556_v49 = vsel %vm691_vm6, %v692_v36, %v693_v37  ;;  %v755_v35 = vrot.slane %v1465_v50, 6  ;;  %v709_v51 = vrot.slane %v1472_v57, 5  ;;  %v427_v52 = vrot.slane %v1519_v23, 2  ;;  %v333_v53 = vpop.f32.mrb[10].mxu1 }
  0xfb   : > { %v365_v54 = vrot.slane %v1519_v23, 1  ;;  %v530_v55 = vrot.slane %v1519_v23, 3  ;;  %v1298_v56 = vpop.f32.mrb[11].mxu1  ;;  %v592_v62 = vrot.slane %v1519_v23, 4  ;;  %v1565_v39 = vsel %vm586_vm5, %v606_v22, %v649_v34 }
  0xfc   : > { %v1568_v6 = vsel %vm753_vm7, %v754_v46, %v755_v35  ;;  %v1571_v11 = vsel %vm691_vm6, %v707_v7, %v709_v51  ;;  %v1574_v30 = vsel %vm419_vm2, %v425_v5, %v427_v52  ;;  %v367_v36 = vrot.slane %v1550_v45, 1 }
  0xfd   : > { %622 = vrot.lane.b32.xlu0 %v1440_v38, %s1345_s26  ;;  %v1580_v47 = vsel %vm357_vm3, %v363_v61, %v365_v54  ;;  %v1583_v22 = vsel %vm524_vm4, %v528_v8, %v530_v55  ;;  %v1586_v34 = vsel %vm586_vm5, %v590_v21, %v592_v62  ;;  %v695_v7 = vrot.slane %v1519_v23, 5 }
  0xfe   : > { %787 = vrot.lane.b32.xlu1 %v1452_v40, %s1346_s27  ;;  %v1592_v5 = vsel %vm357_vm3, %v365_v54, %v367_v36  ;;  %v429_v38 = vrot.slane %v1550_v45, 2  ;;  %v1596_v61 = vsel %vm691_vm6, %v709_v51, %v711_v42  ;;  %v594_v8 = vrot.slane %v1550_v45, 4 }
  0xff   : > { %v1599_v46 = vpop.f32.mrb[12].mxu0  ;;  %v1602_v21 = vsel %vm691_vm6, %v693_v37, %v695_v7  ;;  %v757_v48 = vrot.slane %v1519_v23, 6  ;;  %v697_v53 = vrot.slane %v1550_v45, 5  ;;  %v759_v40 = vrot.slane %v1550_v45, 6 }
 0x100   : > { %2040 = vst [vmem:[#allocation7_spill] sm:$0xff] %v1599_v46  ;;  %v1285_v54 = vpop.f32.mrb[13].mxu0  ;;  %v1608_v56 = vsel %vm419_vm2, %v427_v52, %v429_v38  ;;  %v1611_v42 = vsel %vm586_vm5, %v592_v62, %v594_v8  ;;  %v532_v51 = vrot.slane %v1550_v45, 3  ;;  %v431_v43 = vrot.slane %v1599_v46, 2 }
 0x101   : > { %381 = vrot.lane.b32.xlu0 %v1475_v58, %s1339_s20  ;;  %v1617_v37 = vpop.f32.mrb[14].mxu0  ;;  %v1620_v25 = vsel %vm753_vm7, %v755_v35, %v757_v48  ;;  %v1623_v54 = vsel %vm691_vm6, %v695_v7, %v697_v53  ;;  %v1626_v52 = vsel %vm753_vm7, %v757_v48, %v759_v40  ;;  %v534_v62 = vrot.slane %v1599_v46, 3 }
 0x102   : > { %397 = vrot.lane.b32.xlu1 %v1485_v63, %s1339_s20  ;;  %v1286_v10 = vpop.f32.mrb[15].mxu0  ;;  %v1632_v24 = vsel %vm524_vm4, %v530_v55, %v532_v51  ;;  %v1635_v58 = vsel %vm419_vm2, %v429_v38, %v431_v43  ;;  %v596_v35 = vrot.slane %v1599_v46, 4  ;;  %v369_v7 = vrot.slane %v1599_v46, 1 }
 0x103   : > { %v1640_v19 = vsel %vm524_vm4, %v532_v51, %v534_v62  ;;  %v371_v48 = vrot.slane %v1617_v37, 1  ;;  %v433_v18 = vrot.slane %v1617_v37, 2  ;;  %v699_v63 = vrot.slane %v1599_v46, 5 }
 0x104   : > { %v1646_v10 = vsel %vm586_vm5, %v594_v8, %v596_v35  ;;  %v1649_v55 = vsel %vm357_vm3, %v367_v36, %v369_v7  ;;  %v761_v38 = vrot.slane %v1599_v46, 6  ;;  %v536_v17 = vrot.slane %v1617_v37, 3 }
 0x105   : > { %484 = vrot.lane.b32.xlu0 %v1478_v59, %s1340_s21  ;;  %v1656_v51 = vsel %vm357_vm3, %v369_v7, %v371_v48  ;;  %v1659_v16 = vsel %vm419_vm2, %v431_v43, %v433_v18  ;;  %v1662_v23 = vsel %vm691_vm6, %v697_v53, %v699_v63  ;;  %v2041_v8 = vrot.slane %v1403_v12, 2 }
 0x106   : > { %443 = vrot.lane.b32.xlu1 %v1478_v59, %s1342_s23  ;;  %v1672_v46 = vsel %vm753_vm7, %v759_v40, %v761_v38  ;;  %v2042_v7 = vrot.slane %v1403_v12, 3  ;;  %v2043_v43 = vrot.slane %v1403_v12, 1  ;;  %v598_v50 = vrot.slane %v1617_v37, 4 }
 0x107   : > { %v1667_v36 = vsel %vm419_vm2, %v433_v18, %v2041_v8  ;;  %v1686_v18 = vsel %vm524_vm4, %v534_v62, %v536_v17  ;;  %v701_v59 = vrot.slane %v1617_v37, 5  ;;  %v771_v40 = vrot.slane %v1472_v57, 6 }
 0x108   : > { %v1677_v45 = vsel %vm524_vm4, %v536_v17, %v2042_v7  ;;  %v1682_v53 = vsel %vm357_vm3, %v371_v48, %v2043_v43  ;;  %v763_v8 = vrot.slane %v1617_v37, 6  ;;  %v1692_v41 = vsel %vm586_vm5, %v596_v35, %v598_v50 }
 0x109   : > { %v2044_v7 = vrot.slane %v1403_v12, 4  ;;  %500 = vrot.lane.b32.xlu0 %v1488_v0, %s1340_s21  ;;  %v2045_v17 = vrot.slane %v1403_v12, 5  ;;  %v1707_v57 = vsel %vm691_vm6, %v699_v63, %v701_v59  ;;  %v2046_v48 = vrot.slane %v1458_v44, 6 }
 0x10a   : > { %v2047_v43 = vrot.slane %v1403_v12, 6  ;;  %459 = vrot.lane.b32.xlu1 %v1488_v0, %s1342_s23  ;;  %v1727_v63 = vsel %vm753_vm7, %v761_v38, %v763_v8 }
 0x10b   : > { %v1697_v15 = vsel %vm586_vm5, %v598_v50, %v2044_v7  ;;  %v1704_v62 = vsel %vm691_vm6, %v701_v59, %v2045_v17  ;;  %v1712_v35 = vsel %vm753_vm7, %v2046_v48, %v771_v40  ;;  %v2048_v7 = vrot.slane %v1535_v31, 6 }
 0x10c   : > { %v1717_v50 = vsel %vm753_vm7, %v763_v8, %v2047_v43 }
 0x10d   : > { %v1724_v17 = vsel %vm753_vm7, %v771_v40, %v2048_v7  ;;  %546 = vrot.lane.b32.xlu0 %v1481_v60, %s1341_s22 }
 0x10e   : > { %624 = vrot.lane.b32.xlu1 %v1491_v1, %s1345_s26 }
 0x111   : > { %562 = vrot.lane.b32.xlu0 %v1494_v2, %s1341_s22 }
 0x112   : > { %383 = vrot.lane.b32.xlu1 %v1497_v3, %s1339_s20 }
 0x115   : > { %608 = vrot.lane.b32.xlu0 %v1500_v4, %s1345_s26 }
 0x116   : > { %486 = vrot.lane.b32.xlu1 %v1512_v13, %s1340_s21 }
 0x119   : > { %665 = vrot.lane.b32.xlu0 %v1491_v1, %s1343_s24 }
 0x11a   : > { %502 = vrot.lane.b32.xlu1 %v1515_v14, %s1340_s21 }
 0x11d   : > { %727 = vrot.lane.b32.xlu0 %v1522_v26, %s1344_s25 }
 0x11e   : > { %548 = vrot.lane.b32.xlu1 %v1525_v27, %s1341_s22 }
 0x121   : > { %789 = vrot.lane.b32.xlu0 %v1530_v28, %s1346_s27 }
 0x122   : > { %564 = vrot.lane.b32.xlu1 %v1533_v29, %s1341_s22 }
 0x125   : > { %445 = vrot.lane.b32.xlu0 %v1512_v13, %s1342_s23 }
 0x126   : > { %610 = vrot.lane.b32.xlu1 %v1538_v32, %s1345_s26 }
 0x129   : > { %651 = vrot.lane.b32.xlu0 %v1538_v32, %s1343_s24 }
 0x12a   : > { %626 = vrot.lane.b32.xlu1 %v1541_v33, %s1345_s26 }
 0x12d   : > { %713 = vrot.lane.b32.xlu0 %v1556_v49, %s1344_s25 }
 0x12e   : > { %667 = vrot.lane.b32.xlu1 %v1541_v33, %s1343_s24 }
 0x131   : > { %775 = vrot.lane.b32.xlu0 %v1568_v6, %s1346_s27 }
 0x132   : > { %729 = vrot.lane.b32.xlu1 %v1571_v11, %s1344_s25 }
 0x135   : > { %488 = vrot.lane.b32.xlu0 %v1574_v30, %s1340_s21 }
 0x136   : > { %385 = vrot.lane.b32.xlu1 %v1580_v47, %s1339_s20 }
 0x139   : > { %550 = vrot.lane.b32.xlu0 %v1583_v22, %s1341_s22 }
 0x13a   : > { %447 = vrot.lane.b32.xlu1 %v1574_v30, %s1342_s23 }
 0x13d   : > { %612 = vrot.lane.b32.xlu0 %v1586_v34, %s1345_s26 }
 0x13e   : > { %653 = vrot.lane.b32.xlu1 %v1586_v34, %s1343_s24 }
 0x141   : > { %387 = vrot.lane.b32.xlu0 %v1592_v5, %s1339_s20 }
 0x142   : > { %669 = vrot.lane.b32.xlu1 %v1565_v39, %s1343_s24 }
 0x145   : > { %449 = vrot.lane.b32.xlu0 %v1608_v56, %s1342_s23 }
 0x146   : > { %715 = vrot.lane.b32.xlu1 %v1602_v21, %s1344_s25 }
 0x149   : > { %655 = vrot.lane.b32.xlu0 %v1611_v42, %s1343_s24 }
 0x14a   : > { %731 = vrot.lane.b32.xlu1 %v1596_v61, %s1344_s25 }
 0x14d   : > { %717 = vrot.lane.b32.xlu0 %v1623_v54, %s1344_s25 }
 0x14e   : > { %777 = vrot.lane.b32.xlu1 %v1620_v25, %s1346_s27 }
 0x151   : > { %779 = vrot.lane.b32.xlu0 %v1626_v52, %s1346_s27 }
 0x152   : > { %490 = vrot.lane.b32.xlu1 %v1608_v56, %s1340_s21 }
 0x155   : > { %492 = vrot.lane.b32.xlu0 %v1635_v58, %s1340_s21 }
 0x156   : > { %552 = vrot.lane.b32.xlu1 %v1632_v24, %s1341_s22 }
 0x159   : > { %554 = vrot.lane.b32.xlu0 %v1640_v19, %s1341_s22 }
 0x15a   : > { %614 = vrot.lane.b32.xlu1 %v1611_v42, %s1345_s26 }
 0x15d   : > { %616 = vrot.lane.b32.xlu0 %v1646_v10, %s1345_s26 }
 0x15e   : > { %389 = vrot.lane.b32.xlu1 %v1649_v55, %s1339_s20 }
 0x15f   : > { %v380_v25 = vpop.permute.xlu0 %379 }
 0x160   : > { %v1813_v44 = vpop.permute.xlu1 %498  ;;  %v409_v21 = vadd.f32 %v380_v25, %v1399_v9  ;;  %v1891_v9 = vld [vmem:[%s2020_s2] ss:$0 sm:$0xff] }
 0x161   : > { %391 = vrot.lane.b32.xlu0 %v1656_v51, %s1339_s20 }
 0x162   : > { %451 = vrot.lane.b32.xlu1 %v1635_v58, %s1342_s23 }
 0x163   : > { %v396_v24 = vpop.permute.xlu0 %395 }
 0x164   : > { %v1819_v19 = vpop.permute.xlu1 %560  ;;  %v417_v60 = vadd.f32 %v396_v24, %v1403_v12 }
 0x165   : > { %453 = vrot.lane.b32.xlu0 %v1659_v16, %s1342_s23 }
 0x166   : > { %657 = vrot.lane.b32.xlu1 %v1646_v10, %s1343_s24 }
 0x167   : > { %v442_v0 = vpop.permute.xlu0 %441 }
 0x168   : > { %v1826_v1 = vpop.permute.xlu1 %663  ;;  %v471_v42 = vadd.f32 %v442_v0, %v409_v21 }
 0x169   : > { %496 = vrot.lane.b32.xlu0 %v1667_v36, %s1340_s21 }
 0x16a   : > { %719 = vrot.lane.b32.xlu1 %v1662_v23, %s1344_s25 }
 0x16b   : > { %v458_v2 = vpop.permute.xlu0 %457 }
 0x16c   : > { %v1832_v3 = vpop.permute.xlu1 %725  ;;  %v479_v4 = vadd.f32 %v458_v2, %v417_v60 }
 0x16d   : > { %558 = vrot.lane.b32.xlu0 %v1677_v45, %s1341_s22 }
 0x16e   : > { %781 = vrot.lane.b32.xlu1 %v1672_v46, %s1346_s27 }
 0x16f   : > { %v1838_v12 = vpop.permute.xlu0 %622 }
 0x170   : > { %v1840_v13 = vpop.permute.xlu1 %787 }
 0x171   : > { %618 = vrot.lane.b32.xlu0 %v1692_v41, %s1345_s26 }
 0x172   : > { %393 = vrot.lane.b32.xlu1 %v1682_v53, %s1339_s20 }
 0x173   : > { %v1846_v14 = vpop.permute.xlu0 %381 }
 0x174   : > { %v398_v23 = vpop.permute.xlu1 %397 }
 0x175   : > { %v418_v26 = vadd.f32 %v398_v23, %v1411_v20  ;;  %661 = vrot.lane.b32.xlu0 %v1697_v15, %s1343_s24 }
 0x176   : > { %455 = vrot.lane.b32.xlu1 %v1667_v36, %s1342_s23  ;;  %v1347_v36 = vmov 1983009808  }
 0x177   : > { %v485_v27 = vpop.permute.xlu0 %484  ;;  %v854_v53 = vunpack.c.l.s4 %v1347_v36 }
 0x178   : > { %v1853_v28 = vpop.permute.xlu1 %443  ;;  %v514_v52 = vadd.f32 %v485_v27, %v471_v42  ;;  %v2050_v42 = vld [vmem:[#allocation3_spill] sm:$0xff] }
 0x179   : > { %659 = vrot.lane.b32.xlu0 %v1692_v41, %s1343_s24  ;;  %v855_v48 = vunpack.c.0.s8 %v854_v53 }
 0x17a   : > { %494 = vrot.lane.b32.xlu1 %v1659_v16, %s1340_s21 }
 0x17b   : > { %v501_v29 = vpop.permute.xlu0 %500 }
 0x17c   : > { %v460_v31 = vpop.permute.xlu1 %459  ;;  %v522_v32 = vadd.f32 %v501_v29, %v479_v4 }
 0x17d   : > { %v480_v33 = vadd.f32 %v460_v31, %v418_v26  ;;  %723 = vrot.lane.b32.xlu0 %v1704_v62, %s1344_s25 }
 0x17e   : > { %556 = vrot.lane.b32.xlu1 %v1686_v18, %s1341_s22  ;;  %v856_v18 = vlaneseq }
 0x17f   : > { %v547_v20 = vpop.permute.xlu0 %546 }
 0x180   : > { %v625_v45 = vpop.permute.xlu1 %624  ;;  %v576_v10 = vadd.f32 %v547_v20, %v514_v52 }
 0x181   : > { %721 = vrot.lane.b32.xlu0 %v1707_v57, %s1344_s25 }
 0x182   : > { %620 = vrot.lane.b32.xlu1 %v1697_v15, %s1345_s26 }
 0x183   : > { %v563_v41 = vpop.permute.xlu0 %562 }
 0x184   : > { %v584_v16 = vadd.f32 %v563_v41, %v522_v32  ;;  %v1867_v49 = vpop.permute.xlu1 %383 }
 0x185   : > { %785 = vrot.lane.b32.xlu0 %v1717_v50, %s1346_s27  ;;  %v411_v52 = vadd.f32 %v1867_v49, %v2050_v42 }
 0x186   : > { %791 = vrot.lane.b32.xlu1 %v1712_v35, %s1346_s27  ;;  %v646_v39 = vadd.f32 %v625_v45, %v584_v16  ;;  %v857_v35 = vshrl.u32 %v856_v18, 7 }
 0x187   : > { %v609_v6 = vpop.permute.xlu0 %608 }
 0x188   : > { %v1873_v11 = vpop.permute.xlu1 %486  ;;  %v638_v51 = vadd.f32 %v609_v6, %v576_v10 }
 0x189   : > { %783 = vrot.lane.b32.xlu0 %v1727_v63, %s1346_s27  ;;  %v1895_v63 = vsub.s32 %v855_v48, %v857_v35 }
 0x18a   : > { %793 = vrot.lane.b32.xlu1 %v1724_v17, %s1346_s27 }
 0x18b   : > { %v1879_v15 = vpop.permute.xlu0 %665 }
 0x18c   : > { %v503_v30 = vpop.permute.xlu1 %502 }
 0x18d   : > { %v523_v47 = vadd.f32 %v503_v30, %v480_v33 }
 0x18f   : > { %v1881_v22 = vpop.permute.xlu0 %727 }
 0x190   : > { %v1883_v34 = vpop.permute.xlu1 %548 }
 0x193   : > { %v1885_v5 = vpop.permute.xlu0 %789 }
 0x194   : > { %v565_v61 = vpop.permute.xlu1 %564 }
 0x195   : > { %v585_v46 = vadd.f32 %v565_v61, %v523_v47 }
 0x197   : > { %v446_v56 = vpop.permute.xlu0 %445 }
 0x198   : > { %v611_v54 = vpop.permute.xlu1 %610 }
 0x19b   : > { %v652_v58 = vpop.permute.xlu0 %651 }
 0x19c   : > { %v627_v55 = vpop.permute.xlu1 %626  ;;  %v681_v40 = vadd.f32 %v652_v58, %v638_v51 }
 0x19d   : > { %v647_v38 = vadd.f32 %v627_v55, %v585_v46  ;;  %v473_v55 = vadd.f32 %v446_v56, %v411_v52 }
 0x19f   : > { %v714_v59 = vpop.permute.xlu0 %713 }
 0x1a0   : > { %v668_v8 = vpop.permute.xlu1 %667  ;;  %v743_v57 = vadd.f32 %v714_v59, %v681_v40 }
 0x1a1   : > { %v689_v62 = vadd.f32 %v668_v8, %v646_v39  ;;  %v2049_v39 = vld [vmem:[#allocation2_spill] sm:$0xff] }
 0x1a2   : > { %v410_v6 = vadd.f32 %v1846_v14, %v2049_v39 }
 0x1a3   : > { %v776_v43 = vpop.permute.xlu0 %775 }
 0x1a4   : > { %v805_v50 = vadd.f32 %v776_v43, %v743_v57  ;;  %v730_v7 = vpop.permute.xlu1 %729  ;;  %v472_v46 = vadd.f32 %v1853_v28, %v410_v6 }
 0x1a5   : > { %v1893_v17 = vadd.f32 %v730_v7, %v689_v62 }
 0x1a6   : > { %v822_v25 = vadd.f32 %v1891_v9, %v805_v50  ;;  %v515_v14 = vadd.f32 %v1873_v11, %v472_v46  ;;  %v2051_v46 = vld [vmem:[#allocation4_spill] sm:$0xff] }
 0x1a7   : > { %v489_v24 = vpop.permute.xlu0 %488 }
 0x1a8   : > { %v832_v60 = vmax.f32 %v822_v25, 0.0  ;;  %v1898_v0 = vpop.permute.xlu1 %385  ;;  %v577_v51 = vadd.f32 %v1883_v34, %v515_v14  ;;  %v516_v36 = vadd.f32 %v489_v24, %v473_v55 }
 0x1aa   : > { %v852_v2 = vcombine.high %v832_v60, %v832_v60  ;;  %v859_v4 = vrot.slane %v832_v60, %v1895_v63  ;;  %v639_v53 = vadd.f32 %v611_v54, %v577_v51 }
 0x1ab   : > { %v551_v23 = vpop.permute.xlu0 %550 }
 0x1ac   : > { %v866_v26 = vrot.slane %v852_v2, %v1895_v63  ;;  %v867_v27 = vcombine.high %v859_v4, %v859_v4  ;;  %v1902_v29 = vpop.permute.xlu1 %447  ;;  %v578_v59 = vadd.f32 %v551_v23, %v516_v36 }
 0x1ae   : > { %v868_v31 = vcombine.high %v866_v26, %v866_v26  ;;  %v1018_v32 = vcombine.low %v859_v4, %v867_v27 }
 0x1af   : > { %v613_v33 = vpop.permute.xlu0 %612 }
 0x1b0   : > { %v1019_v20 = vcombine.low %v866_v26, %v868_v31  ;;  %v654_v45 = vpop.permute.xlu1 %653  ;;  %v1026_v41 = vrot.slane %v1018_v32, %v1895_v63  ;;  %v640_v49 = vadd.f32 %v613_v33, %v578_v59 }
 0x1b2   : > { %v1033_v16 = vrot.slane %v1019_v20, %v1895_v63 }
 0x1b3   : > { %v1909_v30 = vpop.permute.xlu0 %387 }
 0x1b4   : > { %v1034_v47 = vcombine.low %v1026_v41, %v1033_v16  ;;  %v670_v61 = vpop.permute.xlu1 %669 }
 0x1b5   : > { %v690_v21 = vadd.f32 %v670_v61, %v647_v38  ;;  %v682_v38 = vadd.f32 %v654_v45, %v639_v53 }
 0x1b6   : > { %v1162_v58 = vpack.c.bf16 %v1034_v47, %v1034_v47 }
 0x1b7   : > { %v1920_v10 = vpop.permute.xlu0 %449 }
 0x1b8   : > { %1171 = vst.msk [vmem:[%s1915_s6] sm:$0xf] %vm1170_vm8, %v1162_v58  ;;  %v716_v28 = vpop.permute.xlu1 %715 }
 0x1b9   : > { %v744_v62 = vadd.f32 %v716_v28, %v682_v38 }
 0x1bb   : > { %v656_v18 = vpop.permute.xlu0 %655 }
 0x1bc   : > { %v732_v40 = vpop.permute.xlu1 %731  ;;  %v683_v11 = vadd.f32 %v656_v18, %v640_v49 }
 0x1bd   : > { %v1925_v8 = vadd.f32 %v732_v40, %v690_v21  ;;  %v412_v21 = vadd.f32 %v1898_v0, %v2051_v46 }
 0x1bf   : > { %v718_v57 = vpop.permute.xlu0 %717  ;;  %v474_v14 = vadd.f32 %v1902_v29, %v412_v21 }
 0x1c0   : > { %v778_v48 = vpop.permute.xlu1 %777  ;;  %v745_v56 = vadd.f32 %v718_v57, %v683_v11 }
 0x1c1   : > { %v806_v35 = vadd.f32 %v778_v48, %v744_v62 }
 0x1c3   : > { %v823_v43 = vadd.f32 %v1891_v9, %v806_v35  ;;  %v780_v50 = vpop.permute.xlu0 %779 }
 0x1c4   : > { %v491_v7 = vpop.permute.xlu1 %490  ;;  %v807_v34 = vadd.f32 %v780_v50, %v745_v56 }
 0x1c5   : > { %v833_v25 = vmax.f32 %v823_v43, 0.0  ;;  %v517_v55 = vadd.f32 %v491_v7, %v474_v14 }
 0x1c6   : > { %v824_v54 = vadd.f32 %v1891_v9, %v807_v34 }
 0x1c7   : > { %v869_v24 = vcombine.high %v833_v25, %v833_v25  ;;  %v876_v60 = vrot.slane %v833_v25, %v1895_v63  ;;  %v1930_v2 = vpop.permute.xlu0 %492 }
 0x1c8   : > { %v834_v4 = vmax.f32 %v824_v54, 0.0  ;;  %v553_v23 = vpop.permute.xlu1 %552 }
 0x1c9   : > { %v883_v26 = vrot.slane %v869_v24, %v1895_v63  ;;  %v884_v27 = vcombine.high %v876_v60, %v876_v60  ;;  %v579_v36 = vadd.f32 %v553_v23, %v517_v55 }
 0x1ca   : > { %v893_v31 = vrot.slane %v834_v4, %v1895_v63  ;;  %v886_v59 = vcombine.high %v834_v4, %v834_v4  ;;  %v2052_v4 = vld [vmem:[#allocation6_spill] sm:$0xff] }
 0x1cb   : > { %v1035_v32 = vcombine.low %v884_v27, %v883_v26  ;;  %v885_v33 = vcombine.high %v883_v26, %v883_v26  ;;  %v1934_v20 = vpop.permute.xlu0 %554 }
 0x1cc   : > { %v615_v45 = vpop.permute.xlu1 %614  ;;  %v900_v0 = vrot.slane %v886_v59, %v1895_v63 }
 0x1cd   : > { %v1036_v41 = vcombine.low %v885_v33, %v893_v31  ;;  %v1043_v16 = vrot.slane %v1035_v32, %v1895_v63  ;;  %v641_v53 = vadd.f32 %v615_v45, %v579_v36 }
 0x1ce   : > { %v901_v35 = vcombine.high %v900_v0, %v900_v0 }
 0x1cf   : > { %v1050_v39 = vrot.slane %v1036_v41, %v1895_v63  ;;  %v1938_v6 = vpop.permute.xlu0 %616  ;;  %v2053_v41 = vld [vmem:[#allocation7_spill] sm:$0xff] }
 0x1d0   : > { %v390_v47 = vpop.permute.xlu1 %389  ;;  %v1052_v25 = vcombine.low %v900_v0, %v901_v35 }
 0x1d1   : > { %v1051_v61 = vcombine.low %v1043_v16, %v1050_v39  ;;  %v414_v23 = vadd.f32 %v390_v47, %v2052_v4 }
 0x1d2   : > { %v1060_v32 = vrot.slane %v1052_v25, %v1895_v63 }
 0x1d3   : > { %v1163_v42 = vpack.c.bf16 %v1051_v61, %v1051_v61  ;;  %v392_v52 = vpop.permute.xlu0 %391  ;;  %v2054_v61 = vld [vmem:[#allocation5_spill] sm:$0xff] }
 0x1d4   : > { %v452_v58 = vpop.permute.xlu1 %451  ;;  %v415_v16 = vadd.f32 %v392_v52, %v2053_v41  ;;  %v413_v46 = vadd.f32 %v1909_v30, %v2054_v61 }
 0x1d5   : > { %1172 = vst.msk [vmem:[%s1915_s6 + $0x4] sm:$0xf] %vm1170_vm8, %v1163_v42  ;;  %v476_v45 = vadd.f32 %v452_v58, %v414_v23 }
 0x1d6   : > { %v475_v55 = vadd.f32 %v1920_v10, %v413_v46 }
 0x1d7   : > { %v454_v28 = vpop.permute.xlu0 %453 }
 0x1d8   : > { %v658_v51 = vpop.permute.xlu1 %657  ;;  %v477_v21 = vadd.f32 %v454_v28, %v415_v16  ;;  %v518_v59 = vadd.f32 %v1930_v2, %v475_v55 }
 0x1d9   : > { %v684_v38 = vadd.f32 %v658_v51, %v641_v53 }
 0x1db   : > { %v497_v18 = vpop.permute.xlu0 %496 }
 0x1dc   : > { %v720_v40 = vpop.permute.xlu1 %719  ;;  %v520_v58 = vadd.f32 %v497_v18, %v477_v21 }
 0x1dd   : > { %v746_v49 = vadd.f32 %v720_v40, %v684_v38 }
 0x1df   : > { %v559_v62 = vpop.permute.xlu0 %558 }
 0x1e0   : > { %v782_v57 = vpop.permute.xlu1 %781 }
 0x1e1   : > { %v808_v11 = vadd.f32 %v782_v57, %v746_v49 }
 0x1e3   : > { %v825_v48 = vadd.f32 %v1891_v9, %v808_v11  ;;  %v619_v29 = vpop.permute.xlu0 %618 }
 0x1e4   : > { %v394_v56 = vpop.permute.xlu1 %393 }
 0x1e5   : > { %v835_v43 = vmax.f32 %v825_v48, 0.0  ;;  %v416_v7 = vadd.f32 %v394_v56, %v1617_v37 }
 0x1e7   : > { %v909_v50 = vrot.slane %v835_v43, %v1895_v63  ;;  %v662_v34 = vpop.permute.xlu0 %661 }
 0x1e8   : > { %v456_v54 = vpop.permute.xlu1 %455 }
 0x1e9   : > { %v917_v24 = vcombine.high %v909_v50, %v909_v50  ;;  %v478_v60 = vadd.f32 %v456_v54, %v416_v7 }
 0x1eb   : > { %v1053_v26 = vcombine.low %v909_v50, %v917_v24  ;;  %v521_v27 = vadd.f32 %v1813_v44, %v478_v60  ;;  %v660_v31 = vpop.permute.xlu0 %659 }
 0x1ec   : > { %v495_v33 = vpop.permute.xlu1 %494 }
 0x1ed   : > { %v1067_v37 = vrot.slane %v1053_v26, %v1895_v63  ;;  %v583_v39 = vadd.f32 %v1819_v19, %v521_v27  ;;  %v519_v44 = vadd.f32 %v495_v33, %v476_v45  ;;  %v582_v19 = vadd.f32 %v559_v62, %v520_v58 }
 0x1ef   : > { %v1068_v47 = vcombine.low %v1060_v32, %v1067_v37  ;;  %v645_v42 = vadd.f32 %v1838_v12, %v583_v39  ;;  %v724_v14 = vpop.permute.xlu0 %723  ;;  %v580_v12 = vadd.f32 %v1934_v20, %v518_v59 }
 0x1f0   : > { %v557_v51 = vpop.permute.xlu1 %556 }
 0x1f1   : > { %v1164_v36 = vpack.c.bf16 %v1068_v47, %v1068_v47  ;;  %v688_v52 = vadd.f32 %v1879_v15, %v645_v42  ;;  %v581_v53 = vadd.f32 %v557_v51, %v519_v44  ;;  %v642_v0 = vadd.f32 %v1938_v6, %v580_v12 }
 0x1f2   : > { %v902_v15 = vcombine.high %v835_v43, %v835_v43 }
 0x1f3   : > { %1173 = vst.msk [vmem:[%s1915_s6 + $0x8] sm:$0xf] %vm1170_vm8, %v1164_v36  ;;  %v750_v30 = vadd.f32 %v1881_v22, %v688_v52  ;;  %v643_v28 = vadd.f32 %v619_v29, %v581_v53  ;;  %v722_v40 = vpop.permute.xlu0 %721  ;;  %v685_v48 = vadd.f32 %v660_v31, %v642_v0 }
 0x1f4   : > { %v621_v38 = vpop.permute.xlu1 %620 }
 0x1f5   : > { %v812_v10 = vadd.f32 %v1885_v5, %v750_v30  ;;  %v686_v49 = vadd.f32 %v662_v34, %v643_v28  ;;  %v644_v18 = vadd.f32 %v621_v38, %v582_v19  ;;  %v1972_v5 = vrot.slane %v902_v15, %v1895_v63 }
 0x1f6   : > { %v747_v50 = vadd.f32 %v722_v40, %v685_v48 }
 0x1f7   : > { %v829_v57 = vadd.f32 %v1891_v9, %v812_v10  ;;  %v748_v2 = vadd.f32 %v724_v14, %v686_v49  ;;  %v687_v11 = vadd.f32 %v1826_v1, %v644_v18  ;;  %v786_v62 = vpop.permute.xlu0 %785  ;;  %v918_v4 = vcombine.high %v1972_v5, %v1972_v5 }
 0x1f8   : > { %v792_v22 = vpop.permute.xlu1 %791 }
 0x1f9   : > { %v839_v29 = vmax.f32 %v829_v57, 0.0  ;;  %v749_v35 = vadd.f32 %v1832_v3, %v687_v11  ;;  %v813_v20 = vadd.f32 %v792_v22, %v1893_v17  ;;  %v810_v56 = vadd.f32 %v786_v62, %v748_v2 }
 0x1fb   : > { %v969_v6 = vcombine.high %v839_v29, %v839_v29  ;;  %v811_v43 = vadd.f32 %v1840_v13, %v749_v35  ;;  %v830_v7 = vadd.f32 %v1891_v9, %v813_v20  ;;  %v784_v34 = vpop.permute.xlu0 %783  ;;  %v827_v1 = vadd.f32 %v1891_v9, %v810_v56 }
 0x1fc   : > { %v794_v25 = vpop.permute.xlu1 %793  ;;  %v809_v54 = vadd.f32 %v784_v34, %v747_v50  ;;  %v976_v44 = vrot.slane %v839_v29, %v1895_v63 }
 0x1fd   : > { %v828_v24 = vadd.f32 %v1891_v9, %v811_v43  ;;  %v983_v3 = vrot.slane %v969_v6, %v1895_v63  ;;  %v840_v17 = vmax.f32 %v830_v7, 0.0  ;;  %v814_v60 = vadd.f32 %v794_v25, %v1925_v8 }
 0x1fe   : > { %v837_v23 = vmax.f32 %v827_v1, 0.0  ;;  %v826_v13 = vadd.f32 %v1891_v9, %v809_v54 }
 0x1ff   : > { %v838_v26 = vmax.f32 %v828_v24, 0.0  ;;  %v984_v27 = vcombine.high %v983_v3, %v983_v3  ;;  %v985_v31 = vcombine.high %v840_v17, %v840_v17  ;;  %v992_v32 = vrot.slane %v840_v17, %v1895_v63 }
 0x200   : > { %v935_v33 = vcombine.high %v837_v23, %v837_v23  ;;  %v942_v45 = vrot.slane %v837_v23, %v1895_v63  ;;  %v831_v41 = vadd.f32 %v1891_v9, %v814_v60  ;;  %v836_v16 = vmax.f32 %v826_v13, 0.0 }
 0x201   : > { %v952_v37 = vcombine.high %v838_v26, %v838_v26  ;;  %v959_v8 = vrot.slane %v838_v26, %v1895_v63  ;;  %v1120_v39 = vcombine.low %v983_v3, %v984_v27  ;;  %v999_v61 = vrot.slane %v985_v31, %v1895_v63 }
 0x202   : > { %v1000_v46 = vcombine.high %v992_v32, %v992_v32  ;;  %v949_v21 = vrot.slane %v935_v33, %v1895_v63  ;;  %v950_v47 = vcombine.high %v942_v45, %v942_v45  ;;  %v841_v42 = vmax.f32 %v831_v41, 0.0 }
 0x203   : > { %v966_v14 = vrot.slane %v952_v37, %v1895_v63  ;;  %v967_v55 = vcombine.high %v959_v8, %v959_v8  ;;  %v1001_v51 = vcombine.high %v999_v61, %v999_v61  ;;  %v919_v30 = vcombine.high %v836_v16, %v836_v16 }
 0x204   : > { %v1121_v58 = vcombine.low %v992_v32, %v1000_v46  ;;  %v951_v9 = vcombine.high %v949_v21, %v949_v21  ;;  %v1086_v36 = vcombine.low %v942_v45, %v950_v47  ;;  %v1002_v52 = vcombine.high %v841_v42, %v841_v42 }
 0x205   : > { %v968_v53 = vcombine.high %v966_v14, %v966_v14  ;;  %v1103_v59 = vcombine.low %v967_v55, %v966_v14  ;;  %v1009_v19 = vrot.slane %v841_v42, %v1895_v63  ;;  %v1128_v28 = vrot.slane %v1120_v39, %v1895_v63 }
 0x206   : > { %v1135_v40 = vrot.slane %v1121_v58, %v1895_v63  ;;  %v1087_v12 = vcombine.low %v949_v21, %v951_v9  ;;  %v1016_v38 = vrot.slane %v1002_v52, %v1895_v63  ;;  %v1094_v49 = vrot.slane %v1086_v36, %v1895_v63 }
 0x207   : > { %v1104_v10 = vcombine.low %v968_v53, %v976_v44  ;;  %v1017_v18 = vcombine.high %v1009_v19, %v1009_v19  ;;  %v1137_v0 = vcombine.low %v1001_v51, %v1009_v19  ;;  %v926_v2 = vrot.slane %v836_v16, %v1895_v63 }
 0x208   : > { %v1136_v15 = vcombine.low %v1128_v28, %v1135_v40  ;;  %v1101_v57 = vrot.slane %v1087_v12, %v1895_v63  ;;  %v933_v11 = vrot.slane %v919_v30, %v1895_v63  ;;  %v1111_v62 = vrot.slane %v1103_v59, %v1895_v63 }
 0x209   : > { %v1118_v48 = vrot.slane %v1104_v10, %v1895_v63  ;;  %v1138_v22 = vcombine.low %v1017_v18, %v1016_v38  ;;  %v934_v20 = vcombine.high %v926_v2, %v926_v2  ;;  %v1069_v56 = vcombine.low %v918_v4, %v926_v2 }
 0x20a   : > { %v1168_v29 = vpack.c.bf16 %v1136_v15, %v1136_v15  ;;  %v1102_v35 = vcombine.low %v1094_v49, %v1101_v57  ;;  %v1145_v50 = vrot.slane %v1137_v0, %v1895_v63 }
 0x20b   : > { %v1119_v5 = vcombine.low %v1111_v62, %v1118_v48  ;;  %v1152_v6 = vrot.slane %v1138_v22, %v1895_v63  ;;  %v1070_v7 = vcombine.low %v934_v20, %v933_v11  ;;  %v1077_v25 = vrot.slane %v1069_v56, %v1895_v63 }
 0x20c   : > { %1177 = vst.msk [vmem:[%s1915_s6 + $0x18] sm:$0xf] %vm1170_vm8, %v1168_v29  ;;  %v1166_v43 = vpack.c.bf16 %v1102_v35, %v1102_v35 }
 0x20d   : > { %v1167_v34 = vpack.c.bf16 %v1119_v5, %v1119_v5  ;;  %v1153_v1 = vcombine.low %v1145_v50, %v1152_v6  ;;  %v1084_v54 = vrot.slane %v1070_v7, %v1895_v63 }
 0x20e   : > { %1175 = vst.msk [vmem:[%s1915_s6 + $0x10] sm:$0xf] %vm1170_vm8, %v1166_v43 }
 0x20f   : > { %1176 = vst.msk [vmem:[%s1915_s6 + $0x14] sm:$0xf] %vm1170_vm8, %v1167_v34  ;;  %v1169_v24 = vpack.c.bf16 %v1153_v1, %v1153_v1  ;;  %v1085_v3 = vcombine.low %v1077_v25, %v1084_v54 }
 0x211   : > { %1178 = vst.msk [vmem:[%s1915_s6 + $0x1c] sm:$0xf] %vm1170_vm8, %v1169_v24  ;;  %v1165_v17 = vpack.c.bf16 %v1085_v3, %v1085_v3 }
 0x213   : > { %1174 = vst.msk [vmem:[%s1915_s6 + $0xc] sm:$0xf] %vm1170_vm8, %v1165_v17 }
 0x214 PF: > { %s13_s12 = sadd.s32 1, %s1335_s12  }
 0x215   : > { %p10_p4 = scmp.ge.s32.totalorder %s13_s12, 4  }
 0x217   :  { %12 = sbr.rel (!%p10_p4) target bundleno = 1 (0x1), region = 62 }

// kernel: pixel_attention_forward.5
= control target key start
LH: loop header
LB: loop body
LE: loop exit
PB: predicated region body
PF: predicated region fallthrough
CT: control target
= control target key end

     0   :  { %s1360_s12 = smov 0   ;;  %s2007_s0 = inlined_call_operand.vmem [shape: bf16[2,104,16], index: 0, kind: input, shape index: {}]   ;;  %s2008_s1 = inlined_call_operand.vmem [shape: bf16[16,72], index: 1, kind: input, shape index: {}]   ;;  %s2009_s2 = inlined_call_operand.vmem [shape: f32[1,8], index: 2, kind: input, shape index: {}]   ;;  %s2010_s3 = inlined_call_operand.vmem [shape: f32[2,8,8,8], index: 3, kind: output, shape index: {}]  }
   0x1 LB: > { %s1226_s13 = sadd.s32 4294967295, %s1327_s12   ;;  %p1230_p0 = scmp.ge.s32.totalorder %s1327_s12, 1  ;;  %s1327_s12 = sphi %s1360_s12, %s13_s12  }
   0x2   : > { %p137_p1 = scmp.lt.s32.totalorder %s1327_s12, 3 }
   0x4   : > { %p138_p2 = pnand %p1230_p0, %p137_p1 }
   0x6   : > { %141 = sbr.rel (%p138_p2) target bundleno = 530 (0x212), region = 32 }
   0xd   : > { %v1313_v0 = vld [vmem:[%s2008_s1] sm:$0xff]   ;;  %v1329_v1 = vmov 0.0   ;;  %p161_p3 = scmp.lt.s32.totalorder %s1226_s13, 1  ;;  %vm1330_vm0 = vmmov 0   ;;  %vm226_vm1 = vcmask 130048   ;;  %vm419_vm2 = vcmask 1045504  }
   0xe   : > { %1261 = vmatprep.subr.bf16.mxu0 %v1329_v1  ;;  %1291 = vmatprep.subr.bf16.mxu1 %v1329_v1  ;;  %vm357_vm3 = vcmask 1046528   ;;  %vm524_vm4 = vcmask 1044480   ;;  %vm586_vm5 = vcmask 1043456   ;;  %vm691_vm6 = vcmask 1042432   ;;  %s1331_s20 = smov 120   ;;  %s1332_s21 = smov 104  }
   0xf   : > { %1262 = vmatpush3.bf16.msra.mxu0 %v1313_v0  ;;  %1292 = vmatpush3.bf16.msra.mxu1 %v1313_v0  ;;  %s2045_s13 = smov (!%p161_p3, %s1226_s13), 1  ;;  %vm753_vm7 = vcmask 1041408   ;;  %s1333_s22 = smov 96   ;;  %vm1162_vm8 = vcmask 64512  }
  0x10   : > { %1263 = vmatprep.mubr.msk.bf16.mxu0 %vm1330_vm0, %v1329_v1  ;;  %1279 = vmatprep.mubr.msk.bf16.mxu1 %vm1330_vm0, %v1329_v1  ;;  %s1293_s16 = smul.u32 52, %s2045_s13  ;;  %s1334_s23 = smov 112  }
  0x11   : > { %s1335_s24 = smov 80   ;;  %s1336_s25 = smov 72  }
  0x12   : > { %s165_s19 = scalar_lea.vmem %s2007_s0, %s1293_s16  ;;  %s1337_s26 = smov 88  }
  0x13   : > { %v1314_v2 = vld [vmem:[%s165_s19] sm:$0xff]   ;;  %v1316_v4 = vld [vmem:[%s165_s19 + $0x8] sm:$0xff]   ;;  %v1318_v6 = vld [vmem:[%s165_s19 + $0x10] sm:$0xff]   ;;  %s1338_s27 = smov 64   ;;  %s1252_s30 = sshll.u32 %s2045_s13, 6 }
  0x14   : > { %v1315_v3 = vld [vmem:[%s165_s19 + $0x20] sm:$0xff]   ;;  %1264 = vmatmul.mubr.msk.bf16.vlgmr.msra.gmra.mrb[0].mxu0 %vm226_vm1, %v1314_v2  ;;  %v1317_v5 = vld [vmem:[%s165_s19 + $0x28] sm:$0xff]   ;;  %v1319_v7 = vld [vmem:[%s165_s19 + $0x30] ss:$0 sps:$4 sm:$0xff]   ;;  %s1902_s6 = scalar_lea.vmem %s2010_s3, %s1252_s30 }
  0x15   : > { %1280 = vmatmul.mubr.msk.bf16.vlgmr.msra.gmra.mrb[0].mxu1 %vm226_vm1, %v1315_v3  ;;  %1267 = vmatprep.mubr.msk.bf16.mxu0 %vm1330_vm0, %v1329_v1  ;;  %v1320_v8 = vld [vmem:[%s165_s19 + $0x18] sm:$0xff]  }
  0x16   : > { %1283 = vmatprep.mubr.msk.bf16.mxu1 %vm1330_vm0, %v1329_v1 }
  0x1c   : > { %1268 = vmatmul.mubr.msk.bf16.gmra.mrb[4].mxu0 %vm226_vm1, %v1316_v4 }
  0x1d   : > { %1284 = vmatmul.mubr.msk.bf16.gmra.mrb[4].mxu1 %vm226_vm1, %v1317_v5  ;;  %1271 = vmatprep.mubr.msk.bf16.mxu0 %vm1330_vm0, %v1329_v1 }
  0x1e   : > { %1287 = vmatprep.mubr.msk.bf16.mxu1 %vm1330_vm0, %v1329_v1 }
  0x24   : > { %1272 = vmatmul.mubr.msk.bf16.gmra.mrb[8].mxu0 %vm226_vm1, %v1318_v6 }
  0x25   : > { %1288 = vmatmul.mubr.msk.bf16.gmra.mrb[8].mxu1 %vm226_vm1, %v1319_v7  ;;  %1275 = vmatprep.mubr.msk.bf16.mxu0 %vm1330_vm0, %v1329_v1 }
  0x2c   : > { %1276 = vmatmul.mubr.msk.bf16.gmra.mrb[12].mxu0 %vm226_vm1, %v1320_v8 }
  0xe7   : > { %v1391_v9 = vpop.f32.mrb[0].mxu0 }
  0xe8   : > { %v358_v10 = vrot.slane %v1391_v9, 1  ;;  %v420_v11 = vrot.slane %v1391_v9, 2  ;;  %v1395_v12 = vpop.f32.mrb[0].mxu1  ;;  %v1265_v13 = vpop.f32.mrb[1].mxu0 }
  0xe9   : > { %v1281_v14 = vpop.f32.mrb[1].mxu1  ;;  %v1397_v15 = vpop.f32.mrb[2].mxu0  ;;  %v2017_v16 = vrot.slane %v1395_v12, 2  ;;  %v2016_v17 = vrot.slane %v1395_v12, 3  ;;  %v2015_v18 = vrot.slane %v1395_v12, 1  ;;  %v2014_v19 = vrot.slane %v1395_v12, 4 }
  0xea   : > { %2024 = vst [vmem:[#allocation2_spill] sm:$0xff] %v1397_v15  ;;  %v1403_v20 = vpop.f32.mrb[2].mxu1  ;;  %v1266_v21 = vpop.f32.mrb[3].mxu0  ;;  %v359_v22 = vrot.slane %v1397_v15, 1  ;;  %v421_v23 = vrot.slane %v1397_v15, 2  ;;  %v2013_v24 = vrot.slane %v1395_v12, 5 }
  0xeb   : > { %v2011_v25 = vrot.slane %v1395_v12, 6  ;;  %v1282_v26 = vpop.f32.mrb[3].mxu1  ;;  %v437_v27 = vrot.slane %v1403_v20, 2  ;;  %v540_v28 = vrot.slane %v1403_v20, 3  ;;  %v375_v29 = vrot.slane %v1403_v20, 1 }
  0xec   : > { %v602_v30 = vrot.slane %v1403_v20, 4  ;;  %v360_v31 = vsel %vm357_vm3, %v358_v10, %v359_v22  ;;  %v422_v32 = vsel %vm419_vm2, %v420_v11, %v421_v23  ;;  %v705_v33 = vrot.slane %v1403_v20, 5 }
  0xed   : > { %v767_v34 = vrot.slane %v1403_v20, 6  ;;  %v1420_v35 = vsel %vm419_vm2, %v2017_v16, %v437_v27  ;;  %379 = vrot.lane.b32.xlu0 %v360_v31, %s1331_s20  ;;  %v541_v36 = vsel %vm524_vm4, %v2016_v17, %v540_v28  ;;  %v376_v37 = vsel %vm357_vm3, %v2015_v18, %v375_v29 }
  0xee   : > { %v1432_v38 = vsel %vm586_vm5, %v2014_v19, %v602_v30  ;;  %498 = vrot.lane.b32.xlu1 %v1420_v35, %s1332_s21  ;;  %v1439_v39 = vsel %vm691_vm6, %v2013_v24, %v705_v33  ;;  %v525_v42 = vrot.slane %v1397_v15, 3  ;;  %v587_v43 = vrot.slane %v1397_v15, 4 }
  0xef   : > { %v1444_v40 = vsel %vm753_vm7, %v2011_v25, %v767_v34  ;;  %v1446_v41 = vpop.f32.mrb[4].mxu0 }
  0xf0   : > { %2025 = vst [vmem:[#allocation3_spill] sm:$0xff] %v1446_v41  ;;  %v1450_v44 = vpop.f32.mrb[4].mxu1  ;;  %v1269_v45 = vpop.f32.mrb[5].mxu0  ;;  %v361_v46 = vrot.slane %v1446_v41, 1  ;;  %v423_v47 = vrot.slane %v1446_v41, 2  ;;  %v526_v48 = vrot.slane %v1446_v41, 3 }
  0xf1   : > { %v588_v49 = vrot.slane %v1446_v41, 4  ;;  %395 = vrot.lane.b32.xlu0 %v376_v37, %s1331_s20  ;;  %v1457_v50 = vpop.f32.mrb[6].mxu0  ;;  %v1285_v51 = vpop.f32.mrb[5].mxu1  ;;  %v377_v52 = vrot.slane %v1450_v44, 1  ;;  %v439_v53 = vrot.slane %v1450_v44, 2  ;;  %v604_v54 = vrot.slane %v1450_v44, 4 }
  0xf2   : > { %2026 = vst [vmem:[#allocation4_spill] sm:$0xff] %v1457_v50  ;;  %v542_v55 = vrot.slane %v1450_v44, 3  ;;  %560 = vrot.lane.b32.xlu1 %v541_v36, %s1333_s22  ;;  %v1270_v56 = vpop.f32.mrb[7].mxu0  ;;  %v1464_v57 = vpop.f32.mrb[6].mxu1  ;;  %v1467_v58 = vsel %vm357_vm3, %v359_v22, %v361_v46  ;;  %v1470_v59 = vsel %vm419_vm2, %v421_v23, %v423_v47  ;;  %v1473_v60 = vsel %vm524_vm4, %v525_v42, %v526_v48 }
  0xf3   : > { %v363_v61 = vrot.slane %v1457_v50, 1  ;;  %v1286_v62 = vpop.f32.mrb[7].mxu1  ;;  %v1477_v63 = vsel %vm357_vm3, %v375_v29, %v377_v52  ;;  %v1480_v0 = vsel %vm419_vm2, %v437_v27, %v439_v53  ;;  %v1483_v1 = vsel %vm586_vm5, %v602_v30, %v604_v54 }
  0xf4   : > { %v1486_v2 = vsel %vm524_vm4, %v540_v28, %v542_v55  ;;  %v1492_v4 = vsel %vm586_vm5, %v587_v43, %v588_v49  ;;  %v425_v5 = vrot.slane %v1457_v50, 2  ;;  %v482_v6 = vrot.slane %v1464_v57, 2 }
  0xf5   : > { %v1489_v3 = vsel %vm357_vm3, %v361_v46, %v363_v61  ;;  %441 = vrot.lane.b32.xlu0 %v422_v32, %s1334_s23  ;;  %v707_v7 = vrot.slane %v1450_v44, 5  ;;  %v528_v8 = vrot.slane %v1457_v50, 3  ;;  %v2012_v10 = vrot.slane %v1450_v44, 6 }
  0xf6   : > { %v544_v11 = vrot.slane %v1464_v57, 3  ;;  %663 = vrot.lane.b32.xlu1 %v1432_v38, %s1335_s24  ;;  %v1504_v13 = vsel %vm419_vm2, %v423_v47, %v425_v5  ;;  %v1507_v14 = vsel %vm419_vm2, %v439_v53, %v482_v6  ;;  %v590_v21 = vrot.slane %v1457_v50, 4 }
  0xf7   : > { %v606_v22 = vrot.slane %v1464_v57, 4  ;;  %v1511_v23 = vpop.f32.mrb[8].mxu0  ;;  %v1514_v26 = vsel %vm691_vm6, %v705_v33, %v707_v7  ;;  %v1517_v27 = vsel %vm524_vm4, %v526_v48, %v528_v8  ;;  %v1522_v28 = vsel %vm753_vm7, %v767_v34, %v2012_v10 }
  0xf8   : > { %2027 = vst [vmem:[#allocation5_spill] sm:$0xff] %v1511_v23  ;;  %v1525_v29 = vsel %vm524_vm4, %v542_v55, %v544_v11  ;;  %v1273_v30 = vpop.f32.mrb[9].mxu0  ;;  %v1527_v31 = vpop.f32.mrb[8].mxu1  ;;  %v1530_v32 = vsel %vm586_vm5, %v588_v49, %v590_v21  ;;  %v692_v36 = vrot.slane %v1446_v41, 5  ;;  %v693_v37 = vrot.slane %v1457_v50, 5 }
  0xf9   : > { %v1533_v33 = vsel %vm586_vm5, %v604_v54, %v606_v22  ;;  %457 = vrot.lane.b32.xlu0 %v1420_v35, %s1334_s23  ;;  %v649_v34 = vrot.slane %v1527_v31, 4  ;;  %v711_v42 = vrot.slane %v1527_v31, 5  ;;  %v1542_v45 = vpop.f32.mrb[10].mxu0  ;;  %v754_v46 = vrot.slane %v1446_v41, 6  ;;  %v1289_v47 = vpop.f32.mrb[9].mxu1 }
  0xfa   : > { %2028 = vst [vmem:[#allocation6_spill] sm:$0xff] %v1542_v45  ;;  %725 = vrot.lane.b32.xlu1 %v1439_v39, %s1336_s25  ;;  %v1274_v48 = vpop.f32.mrb[11].mxu0  ;;  %v1548_v49 = vsel %vm691_vm6, %v692_v36, %v693_v37  ;;  %v755_v35 = vrot.slane %v1457_v50, 6  ;;  %v709_v51 = vrot.slane %v1464_v57, 5  ;;  %v427_v52 = vrot.slane %v1511_v23, 2  ;;  %v333_v53 = vpop.f32.mrb[10].mxu1 }
  0xfb   : > { %v365_v54 = vrot.slane %v1511_v23, 1  ;;  %v530_v55 = vrot.slane %v1511_v23, 3  ;;  %v1290_v56 = vpop.f32.mrb[11].mxu1  ;;  %v592_v62 = vrot.slane %v1511_v23, 4  ;;  %v1557_v39 = vsel %vm586_vm5, %v606_v22, %v649_v34 }
  0xfc   : > { %v1560_v6 = vsel %vm753_vm7, %v754_v46, %v755_v35  ;;  %v1563_v11 = vsel %vm691_vm6, %v707_v7, %v709_v51  ;;  %v1566_v30 = vsel %vm419_vm2, %v425_v5, %v427_v52  ;;  %v367_v36 = vrot.slane %v1542_v45, 1 }
  0xfd   : > { %622 = vrot.lane.b32.xlu0 %v1432_v38, %s1337_s26  ;;  %v1572_v47 = vsel %vm357_vm3, %v363_v61, %v365_v54  ;;  %v1575_v22 = vsel %vm524_vm4, %v528_v8, %v530_v55  ;;  %v1578_v34 = vsel %vm586_vm5, %v590_v21, %v592_v62  ;;  %v695_v7 = vrot.slane %v1511_v23, 5 }
  0xfe   : > { %787 = vrot.lane.b32.xlu1 %v1444_v40, %s1338_s27  ;;  %v1584_v5 = vsel %vm357_vm3, %v365_v54, %v367_v36  ;;  %v429_v38 = vrot.slane %v1542_v45, 2  ;;  %v1588_v61 = vsel %vm691_vm6, %v709_v51, %v711_v42  ;;  %v594_v8 = vrot.slane %v1542_v45, 4 }
  0xff   : > { %v1591_v46 = vpop.f32.mrb[12].mxu0  ;;  %v1594_v21 = vsel %vm691_vm6, %v693_v37, %v695_v7  ;;  %v757_v48 = vrot.slane %v1511_v23, 6  ;;  %v697_v53 = vrot.slane %v1542_v45, 5  ;;  %v759_v40 = vrot.slane %v1542_v45, 6 }
 0x100   : > { %2029 = vst [vmem:[#allocation7_spill] sm:$0xff] %v1591_v46  ;;  %v1277_v54 = vpop.f32.mrb[13].mxu0  ;;  %v1600_v56 = vsel %vm419_vm2, %v427_v52, %v429_v38  ;;  %v1603_v42 = vsel %vm586_vm5, %v592_v62, %v594_v8  ;;  %v532_v51 = vrot.slane %v1542_v45, 3  ;;  %v431_v43 = vrot.slane %v1591_v46, 2 }
 0x101   : > { %381 = vrot.lane.b32.xlu0 %v1467_v58, %s1331_s20  ;;  %v1609_v37 = vpop.f32.mrb[14].mxu0  ;;  %v1612_v25 = vsel %vm753_vm7, %v755_v35, %v757_v48  ;;  %v1615_v54 = vsel %vm691_vm6, %v695_v7, %v697_v53  ;;  %v1618_v52 = vsel %vm753_vm7, %v757_v48, %v759_v40  ;;  %v534_v62 = vrot.slane %v1591_v46, 3 }
 0x102   : > { %397 = vrot.lane.b32.xlu1 %v1477_v63, %s1331_s20  ;;  %v1278_v10 = vpop.f32.mrb[15].mxu0  ;;  %v1624_v24 = vsel %vm524_vm4, %v530_v55, %v532_v51  ;;  %v1627_v58 = vsel %vm419_vm2, %v429_v38, %v431_v43  ;;  %v596_v35 = vrot.slane %v1591_v46, 4  ;;  %v369_v7 = vrot.slane %v1591_v46, 1 }
 0x103   : > { %v1632_v19 = vsel %vm524_vm4, %v532_v51, %v534_v62  ;;  %v371_v48 = vrot.slane %v1609_v37, 1  ;;  %v433_v18 = vrot.slane %v1609_v37, 2  ;;  %v699_v63 = vrot.slane %v1591_v46, 5 }
 0x104   : > { %v1638_v10 = vsel %vm586_vm5, %v594_v8, %v596_v35  ;;  %v1641_v55 = vsel %vm357_vm3, %v367_v36, %v369_v7  ;;  %v761_v38 = vrot.slane %v1591_v46, 6  ;;  %v536_v17 = vrot.slane %v1609_v37, 3 }
 0x105   : > { %484 = vrot.lane.b32.xlu0 %v1470_v59, %s1332_s21  ;;  %v1648_v51 = vsel %vm357_vm3, %v369_v7, %v371_v48  ;;  %v1651_v16 = vsel %vm419_vm2, %v431_v43, %v433_v18  ;;  %v1654_v23 = vsel %vm691_vm6, %v697_v53, %v699_v63  ;;  %v2030_v8 = vrot.slane %v1395_v12, 2 }
 0x106   : > { %443 = vrot.lane.b32.xlu1 %v1470_v59, %s1334_s23  ;;  %v1664_v46 = vsel %vm753_vm7, %v759_v40, %v761_v38  ;;  %v2031_v7 = vrot.slane %v1395_v12, 3  ;;  %v2032_v43 = vrot.slane %v1395_v12, 1  ;;  %v598_v50 = vrot.slane %v1609_v37, 4 }
 0x107   : > { %v1659_v36 = vsel %vm419_vm2, %v433_v18, %v2030_v8  ;;  %v1678_v18 = vsel %vm524_vm4, %v534_v62, %v536_v17  ;;  %v701_v59 = vrot.slane %v1609_v37, 5  ;;  %v771_v40 = vrot.slane %v1464_v57, 6 }
 0x108   : > { %v1669_v45 = vsel %vm524_vm4, %v536_v17, %v2031_v7  ;;  %v1674_v53 = vsel %vm357_vm3, %v371_v48, %v2032_v43  ;;  %v763_v8 = vrot.slane %v1609_v37, 6  ;;  %v1684_v41 = vsel %vm586_vm5, %v596_v35, %v598_v50 }
 0x109   : > { %v2033_v7 = vrot.slane %v1395_v12, 4  ;;  %500 = vrot.lane.b32.xlu0 %v1480_v0, %s1332_s21  ;;  %v2034_v17 = vrot.slane %v1395_v12, 5  ;;  %v1699_v57 = vsel %vm691_vm6, %v699_v63, %v701_v59  ;;  %v2035_v48 = vrot.slane %v1450_v44, 6 }
 0x10a   : > { %v2036_v43 = vrot.slane %v1395_v12, 6  ;;  %459 = vrot.lane.b32.xlu1 %v1480_v0, %s1334_s23  ;;  %v1719_v63 = vsel %vm753_vm7, %v761_v38, %v763_v8 }
 0x10b   : > { %v1689_v15 = vsel %vm586_vm5, %v598_v50, %v2033_v7  ;;  %v1696_v62 = vsel %vm691_vm6, %v701_v59, %v2034_v17  ;;  %v1704_v35 = vsel %vm753_vm7, %v2035_v48, %v771_v40  ;;  %v2037_v7 = vrot.slane %v1527_v31, 6 }
 0x10c   : > { %v1709_v50 = vsel %vm753_vm7, %v763_v8, %v2036_v43 }
 0x10d   : > { %v1716_v17 = vsel %vm753_vm7, %v771_v40, %v2037_v7  ;;  %546 = vrot.lane.b32.xlu0 %v1473_v60, %s1333_s22 }
 0x10e   : > { %624 = vrot.lane.b32.xlu1 %v1483_v1, %s1337_s26 }
 0x111   : > { %562 = vrot.lane.b32.xlu0 %v1486_v2, %s1333_s22 }
 0x112   : > { %383 = vrot.lane.b32.xlu1 %v1489_v3, %s1331_s20 }
 0x115   : > { %608 = vrot.lane.b32.xlu0 %v1492_v4, %s1337_s26 }
 0x116   : > { %486 = vrot.lane.b32.xlu1 %v1504_v13, %s1332_s21 }
 0x119   : > { %665 = vrot.lane.b32.xlu0 %v1483_v1, %s1335_s24 }
 0x11a   : > { %502 = vrot.lane.b32.xlu1 %v1507_v14, %s1332_s21 }
 0x11d   : > { %727 = vrot.lane.b32.xlu0 %v1514_v26, %s1336_s25 }
 0x11e   : > { %548 = vrot.lane.b32.xlu1 %v1517_v27, %s1333_s22 }
 0x121   : > { %789 = vrot.lane.b32.xlu0 %v1522_v28, %s1338_s27 }
 0x122   : > { %564 = vrot.lane.b32.xlu1 %v1525_v29, %s1333_s22 }
 0x125   : > { %445 = vrot.lane.b32.xlu0 %v1504_v13, %s1334_s23 }
 0x126   : > { %610 = vrot.lane.b32.xlu1 %v1530_v32, %s1337_s26 }
 0x129   : > { %651 = vrot.lane.b32.xlu0 %v1530_v32, %s1335_s24 }
 0x12a   : > { %626 = vrot.lane.b32.xlu1 %v1533_v33, %s1337_s26 }
 0x12d   : > { %713 = vrot.lane.b32.xlu0 %v1548_v49, %s1336_s25 }
 0x12e   : > { %667 = vrot.lane.b32.xlu1 %v1533_v33, %s1335_s24 }
 0x131   : > { %775 = vrot.lane.b32.xlu0 %v1560_v6, %s1338_s27 }
 0x132   : > { %729 = vrot.lane.b32.xlu1 %v1563_v11, %s1336_s25 }
 0x135   : > { %488 = vrot.lane.b32.xlu0 %v1566_v30, %s1332_s21 }
 0x136   : > { %385 = vrot.lane.b32.xlu1 %v1572_v47, %s1331_s20 }
 0x139   : > { %550 = vrot.lane.b32.xlu0 %v1575_v22, %s1333_s22 }
 0x13a   : > { %447 = vrot.lane.b32.xlu1 %v1566_v30, %s1334_s23 }
 0x13d   : > { %612 = vrot.lane.b32.xlu0 %v1578_v34, %s1337_s26 }
 0x13e   : > { %653 = vrot.lane.b32.xlu1 %v1578_v34, %s1335_s24 }
 0x141   : > { %387 = vrot.lane.b32.xlu0 %v1584_v5, %s1331_s20 }
 0x142   : > { %669 = vrot.lane.b32.xlu1 %v1557_v39, %s1335_s24 }
 0x145   : > { %449 = vrot.lane.b32.xlu0 %v1600_v56, %s1334_s23 }
 0x146   : > { %715 = vrot.lane.b32.xlu1 %v1594_v21, %s1336_s25 }
 0x149   : > { %655 = vrot.lane.b32.xlu0 %v1603_v42, %s1335_s24 }
 0x14a   : > { %731 = vrot.lane.b32.xlu1 %v1588_v61, %s1336_s25 }
 0x14d   : > { %717 = vrot.lane.b32.xlu0 %v1615_v54, %s1336_s25 }
 0x14e   : > { %777 = vrot.lane.b32.xlu1 %v1612_v25, %s1338_s27 }
 0x151   : > { %779 = vrot.lane.b32.xlu0 %v1618_v52, %s1338_s27 }
 0x152   : > { %490 = vrot.lane.b32.xlu1 %v1600_v56, %s1332_s21 }
 0x155   : > { %492 = vrot.lane.b32.xlu0 %v1627_v58, %s1332_s21 }
 0x156   : > { %552 = vrot.lane.b32.xlu1 %v1624_v24, %s1333_s22 }
 0x159   : > { %554 = vrot.lane.b32.xlu0 %v1632_v19, %s1333_s22 }
 0x15a   : > { %614 = vrot.lane.b32.xlu1 %v1603_v42, %s1337_s26 }
 0x15d   : > { %616 = vrot.lane.b32.xlu0 %v1638_v10, %s1337_s26 }
 0x15e   : > { %389 = vrot.lane.b32.xlu1 %v1641_v55, %s1331_s20 }
 0x15f   : > { %v380_v25 = vpop.permute.xlu0 %379 }
 0x160   : > { %v1805_v44 = vpop.permute.xlu1 %498  ;;  %v409_v21 = vadd.f32 %v380_v25, %v1391_v9  ;;  %v1881_v9 = vld [vmem:[%s2009_s2] ss:$0 sm:$0xff] }
 0x161   : > { %391 = vrot.lane.b32.xlu0 %v1648_v51, %s1331_s20 }
 0x162   : > { %451 = vrot.lane.b32.xlu1 %v1627_v58, %s1334_s23 }
 0x163   : > { %v396_v24 = vpop.permute.xlu0 %395 }
 0x164   : > { %v1811_v19 = vpop.permute.xlu1 %560  ;;  %v417_v60 = vadd.f32 %v396_v24, %v1395_v12 }
 0x165   : > { %453 = vrot.lane.b32.xlu0 %v1651_v16, %s1334_s23 }
 0x166   : > { %657 = vrot.lane.b32.xlu1 %v1638_v10, %s1335_s24 }
 0x167   : > { %v442_v0 = vpop.permute.xlu0 %441 }
 0x168   : > { %v1818_v1 = vpop.permute.xlu1 %663  ;;  %v471_v42 = vadd.f32 %v442_v0, %v409_v21 }
 0x169   : > { %496 = vrot.lane.b32.xlu0 %v1659_v36, %s1332_s21 }
 0x16a   : > { %719 = vrot.lane.b32.xlu1 %v1654_v23, %s1336_s25 }
 0x16b   : > { %v458_v2 = vpop.permute.xlu0 %457 }
 0x16c   : > { %v1824_v3 = vpop.permute.xlu1 %725  ;;  %v479_v4 = vadd.f32 %v458_v2, %v417_v60 }
 0x16d   : > { %558 = vrot.lane.b32.xlu0 %v1669_v45, %s1333_s22 }
 0x16e   : > { %781 = vrot.lane.b32.xlu1 %v1664_v46, %s1338_s27 }
 0x16f   : > { %v1830_v12 = vpop.permute.xlu0 %622 }
 0x170   : > { %v1832_v13 = vpop.permute.xlu1 %787 }
 0x171   : > { %618 = vrot.lane.b32.xlu0 %v1684_v41, %s1337_s26 }
 0x172   : > { %393 = vrot.lane.b32.xlu1 %v1674_v53, %s1331_s20 }
 0x173   : > { %v1838_v14 = vpop.permute.xlu0 %381 }
 0x174   : > { %v398_v23 = vpop.permute.xlu1 %397 }
 0x175   : > { %v418_v26 = vadd.f32 %v398_v23, %v1403_v20  ;;  %661 = vrot.lane.b32.xlu0 %v1689_v15, %s1335_s24 }
 0x176   : > { %455 = vrot.lane.b32.xlu1 %v1659_v36, %s1334_s23  ;;  %v1339_v36 = vmov 1983009808  }
 0x177   : > { %v485_v27 = vpop.permute.xlu0 %484  ;;  %v854_v53 = vunpack.c.l.s4 %v1339_v36 }
 0x178   : > { %v1845_v28 = vpop.permute.xlu1 %443  ;;  %v514_v52 = vadd.f32 %v485_v27, %v471_v42  ;;  %v2039_v42 = vld [vmem:[#allocation3_spill] sm:$0xff] }
 0x179   : > { %659 = vrot.lane.b32.xlu0 %v1684_v41, %s1335_s24  ;;  %v855_v48 = vunpack.c.0.s8 %v854_v53 }
 0x17a   : > { %494 = vrot.lane.b32.xlu1 %v1651_v16, %s1332_s21 }
 0x17b   : > { %v501_v29 = vpop.permute.xlu0 %500 }
 0x17c   : > { %v460_v31 = vpop.permute.xlu1 %459  ;;  %v522_v32 = vadd.f32 %v501_v29, %v479_v4 }
 0x17d   : > { %v480_v33 = vadd.f32 %v460_v31, %v418_v26  ;;  %723 = vrot.lane.b32.xlu0 %v1696_v62, %s1336_s25 }
 0x17e   : > { %556 = vrot.lane.b32.xlu1 %v1678_v18, %s1333_s22  ;;  %v856_v18 = vlaneseq }
 0x17f   : > { %v547_v20 = vpop.permute.xlu0 %546 }
 0x180   : > { %v625_v45 = vpop.permute.xlu1 %624  ;;  %v576_v10 = vadd.f32 %v547_v20, %v514_v52 }
 0x181   : > { %721 = vrot.lane.b32.xlu0 %v1699_v57, %s1336_s25 }
 0x182   : > { %620 = vrot.lane.b32.xlu1 %v1689_v15, %s1337_s26 }
 0x183   : > { %v563_v41 = vpop.permute.xlu0 %562 }
 0x184   : > { %v584_v16 = vadd.f32 %v563_v41, %v522_v32  ;;  %v1859_v49 = vpop.permute.xlu1 %383 }
 0x185   : > { %785 = vrot.lane.b32.xlu0 %v1709_v50, %s1338_s27  ;;  %v411_v52 = vadd.f32 %v1859_v49, %v2039_v42 }
 0x186   : > { %791 = vrot.lane.b32.xlu1 %v1704_v35, %s1338_s27  ;;  %v646_v39 = vadd.f32 %v625_v45, %v584_v16  ;;  %v857_v35 = vshrl.u32 %v856_v18, 7 }
 0x187   : > { %v609_v6 = vpop.permute.xlu0 %608 }
 0x188   : > { %v1865_v11 = vpop.permute.xlu1 %486  ;;  %v638_v51 = vadd.f32 %v609_v6, %v576_v10 }
 0x189   : > { %783 = vrot.lane.b32.xlu0 %v1719_v63, %s1338_s27  ;;  %v1885_v63 = vsub.s32 %v855_v48, %v857_v35 }
 0x18a   : > { %793 = vrot.lane.b32.xlu1 %v1716_v17, %s1338_s27 }
 0x18b   : > { %v1871_v15 = vpop.permute.xlu0 %665 }
 0x18c   : > { %v503_v30 = vpop.permute.xlu1 %502 }
 0x18d   : > { %v523_v47 = vadd.f32 %v503_v30, %v480_v33 }
 0x18f   : > { %v1873_v22 = vpop.permute.xlu0 %727 }
 0x190   : > { %v549_v34 = vpop.permute.xlu1 %548 }
 0x193   : > { %v1875_v5 = vpop.permute.xlu0 %789 }
 0x194   : > { %v565_v61 = vpop.permute.xlu1 %564 }
 0x195   : > { %v585_v46 = vadd.f32 %v565_v61, %v523_v47 }
 0x197   : > { %v446_v56 = vpop.permute.xlu0 %445 }
 0x198   : > { %v611_v54 = vpop.permute.xlu1 %610  ;;  %v473_v10 = vadd.f32 %v446_v56, %v411_v52 }
 0x19b   : > { %v652_v58 = vpop.permute.xlu0 %651 }
 0x19c   : > { %v627_v55 = vpop.permute.xlu1 %626  ;;  %v681_v40 = vadd.f32 %v652_v58, %v638_v51 }
 0x19d   : > { %v647_v38 = vadd.f32 %v627_v55, %v585_v46 }
 0x19f   : > { %v714_v59 = vpop.permute.xlu0 %713 }
 0x1a0   : > { %v668_v8 = vpop.permute.xlu1 %667  ;;  %v743_v57 = vadd.f32 %v714_v59, %v681_v40 }
 0x1a1   : > { %v689_v62 = vadd.f32 %v668_v8, %v646_v39  ;;  %v2038_v39 = vld [vmem:[#allocation2_spill] sm:$0xff] }
 0x1a2   : > { %v410_v6 = vadd.f32 %v1838_v14, %v2038_v39 }
 0x1a3   : > { %v776_v43 = vpop.permute.xlu0 %775 }
 0x1a4   : > { %v805_v50 = vadd.f32 %v776_v43, %v743_v57  ;;  %v730_v7 = vpop.permute.xlu1 %729  ;;  %v472_v46 = vadd.f32 %v1845_v28, %v410_v6 }
 0x1a5   : > { %v1883_v17 = vadd.f32 %v730_v7, %v689_v62 }
 0x1a6   : > { %v822_v25 = vadd.f32 %v1881_v9, %v805_v50  ;;  %v515_v14 = vadd.f32 %v1865_v11, %v472_v46 }
 0x1a7   : > { %v489_v24 = vpop.permute.xlu0 %488 }
 0x1a8   : > { %v832_v60 = vmax.f32 %v822_v25, 0.0  ;;  %v1888_v0 = vpop.permute.xlu1 %385  ;;  %v577_v51 = vadd.f32 %v549_v34, %v515_v14  ;;  %v516_v36 = vadd.f32 %v489_v24, %v473_v10 }
 0x1aa   : > { %v852_v2 = vcombine.high %v832_v60, %v832_v60  ;;  %v859_v4 = vrot.slane %v832_v60, %v1885_v63  ;;  %v639_v53 = vadd.f32 %v611_v54, %v577_v51 }
 0x1ab   : > { %v551_v23 = vpop.permute.xlu0 %550 }
 0x1ac   : > { %v866_v26 = vrot.slane %v852_v2, %v1885_v63  ;;  %v867_v27 = vcombine.high %v859_v4, %v859_v4  ;;  %v1892_v29 = vpop.permute.xlu1 %447  ;;  %v578_v59 = vadd.f32 %v551_v23, %v516_v36 }
 0x1ae   : > { %v868_v31 = vcombine.high %v866_v26, %v866_v26  ;;  %v1018_v32 = vcombine.low %v859_v4, %v867_v27 }
 0x1af   : > { %v613_v33 = vpop.permute.xlu0 %612 }
 0x1b0   : > { %v1019_v20 = vcombine.low %v866_v26, %v868_v31  ;;  %v654_v45 = vpop.permute.xlu1 %653  ;;  %v1026_v41 = vrot.slane %v1018_v32, %v1885_v63 }
 0x1b1   : > { %v682_v8 = vadd.f32 %v654_v45, %v639_v53 }
 0x1b2   : > { %v1033_v16 = vrot.slane %v1019_v20, %v1885_v63 }
 0x1b3   : > { %v1904_v30 = vpop.permute.xlu0 %387 }
 0x1b4   : > { %v1034_v47 = vcombine.low %v1026_v41, %v1033_v16  ;;  %v670_v61 = vpop.permute.xlu1 %669 }
 0x1b5   : > { %v690_v21 = vadd.f32 %v670_v61, %v647_v38  ;;  %v640_v38 = vadd.f32 %v613_v33, %v578_v59  ;;  %v2040_v61 = vld [vmem:[#allocation4_spill] sm:$0xff] }
 0x1b6   : > { %1163 = vst.msk [vmem:[%s1902_s6] sm:$0xff] %vm1162_vm8, %v1034_v47  ;;  %v412_v46 = vadd.f32 %v1888_v0, %v2040_v61 }
 0x1b7   : > { %v1912_v58 = vpop.permute.xlu0 %449 }
 0x1b8   : > { %v716_v55 = vpop.permute.xlu1 %715  ;;  %v474_v52 = vadd.f32 %v1892_v29, %v412_v46 }
 0x1b9   : > { %v744_v62 = vadd.f32 %v716_v55, %v682_v8 }
 0x1bb   : > { %v656_v18 = vpop.permute.xlu0 %655 }
 0x1bc   : > { %v732_v40 = vpop.permute.xlu1 %731  ;;  %v683_v57 = vadd.f32 %v656_v18, %v640_v38 }
 0x1bd   : > { %v1914_v28 = vadd.f32 %v732_v40, %v690_v21 }
 0x1bf   : > { %v718_v49 = vpop.permute.xlu0 %717 }
 0x1c0   : > { %v778_v48 = vpop.permute.xlu1 %777  ;;  %v745_v11 = vadd.f32 %v718_v49, %v683_v57 }
 0x1c1   : > { %v806_v35 = vadd.f32 %v778_v48, %v744_v62 }
 0x1c3   : > { %v823_v43 = vadd.f32 %v1881_v9, %v806_v35  ;;  %v780_v56 = vpop.permute.xlu0 %779 }
 0x1c4   : > { %v491_v50 = vpop.permute.xlu1 %490  ;;  %v807_v34 = vadd.f32 %v780_v56, %v745_v11 }
 0x1c5   : > { %v833_v7 = vmax.f32 %v823_v43, 0.0  ;;  %v517_v14 = vadd.f32 %v491_v50, %v474_v52 }
 0x1c6   : > { %v824_v54 = vadd.f32 %v1881_v9, %v807_v34 }
 0x1c7   : > { %v869_v25 = vcombine.high %v833_v7, %v833_v7  ;;  %v876_v24 = vrot.slane %v833_v7, %v1885_v63  ;;  %v1919_v60 = vpop.permute.xlu0 %492 }
 0x1c8   : > { %v834_v2 = vmax.f32 %v824_v54, 0.0  ;;  %v553_v4 = vpop.permute.xlu1 %552 }
 0x1c9   : > { %v883_v23 = vrot.slane %v869_v25, %v1885_v63  ;;  %v884_v26 = vcombine.high %v876_v24, %v876_v24  ;;  %v579_v51 = vadd.f32 %v553_v4, %v517_v14  ;;  %v2041_v24 = vld [vmem:[#allocation6_spill] sm:$0xff] }
 0x1ca   : > { %v893_v27 = vrot.slane %v834_v2, %v1885_v63  ;;  %v886_v18 = vcombine.high %v834_v2, %v834_v2 }
 0x1cb   : > { %v1035_v31 = vcombine.low %v884_v26, %v883_v23  ;;  %v885_v32 = vcombine.high %v883_v23, %v883_v23  ;;  %v1923_v33 = vpop.permute.xlu0 %554 }
 0x1cc   : > { %v615_v20 = vpop.permute.xlu1 %614  ;;  %v900_v62 = vrot.slane %v886_v18, %v1885_v63 }
 0x1cd   : > { %v1036_v45 = vcombine.low %v885_v32, %v893_v27  ;;  %v1043_v41 = vrot.slane %v1035_v31, %v1885_v63  ;;  %v641_v36 = vadd.f32 %v615_v20, %v579_v51  ;;  %v2042_v20 = vld [vmem:[#allocation7_spill] sm:$0xff] }
 0x1ce   : > { %v901_v35 = vcombine.high %v900_v62, %v900_v62 }
 0x1cf   : > { %v1050_v16 = vrot.slane %v1036_v45, %v1885_v63  ;;  %v1927_v39 = vpop.permute.xlu0 %616 }
 0x1d0   : > { %v390_v6 = vpop.permute.xlu1 %389  ;;  %v1052_v34 = vcombine.low %v900_v62, %v901_v35 }
 0x1d1   : > { %v1051_v47 = vcombine.low %v1043_v41, %v1050_v16  ;;  %v414_v2 = vadd.f32 %v390_v6, %v2041_v24  ;;  %v2043_v16 = vld [vmem:[#allocation5_spill] sm:$0xff] }
 0x1d2   : > { %v1060_v27 = vrot.slane %v1052_v34, %v1885_v63 }
 0x1d3   : > { %1164 = vst.msk [vmem:[%s1902_s6 + $0x8] sm:$0xff] %vm1162_vm8, %v1051_v47  ;;  %v392_v21 = vpop.permute.xlu0 %391  ;;  %v413_v47 = vadd.f32 %v1904_v30, %v2043_v16 }
 0x1d4   : > { %v452_v42 = vpop.permute.xlu1 %451  ;;  %v415_v45 = vadd.f32 %v392_v21, %v2042_v20 }
 0x1d5   : > { %v476_v32 = vadd.f32 %v452_v42, %v414_v2  ;;  %v475_v14 = vadd.f32 %v1912_v58, %v413_v47 }
 0x1d7   : > { %v454_v10 = vpop.permute.xlu0 %453 }
 0x1d8   : > { %v658_v55 = vpop.permute.xlu1 %657  ;;  %v477_v61 = vadd.f32 %v454_v10, %v415_v45 }
 0x1d9   : > { %v684_v40 = vadd.f32 %v658_v55, %v641_v36 }
 0x1db   : > { %v497_v53 = vpop.permute.xlu0 %496 }
 0x1dc   : > { %v720_v59 = vpop.permute.xlu1 %719  ;;  %v520_v51 = vadd.f32 %v497_v53, %v477_v61 }
 0x1dd   : > { %v746_v8 = vadd.f32 %v720_v59, %v684_v40 }
 0x1df   : > { %v559_v38 = vpop.permute.xlu0 %558 }
 0x1e0   : > { %v782_v0 = vpop.permute.xlu1 %781  ;;  %v582_v36 = vadd.f32 %v559_v38, %v520_v51 }
 0x1e1   : > { %v808_v49 = vadd.f32 %v782_v0, %v746_v8 }
 0x1e3   : > { %v825_v57 = vadd.f32 %v1881_v9, %v808_v49  ;;  %v619_v48 = vpop.permute.xlu0 %618 }
 0x1e4   : > { %v394_v29 = vpop.permute.xlu1 %393 }
 0x1e5   : > { %v835_v11 = vmax.f32 %v825_v57, 0.0  ;;  %v416_v56 = vadd.f32 %v394_v29, %v1609_v37 }
 0x1e7   : > { %v909_v43 = vrot.slane %v835_v11, %v1885_v63  ;;  %v662_v50 = vpop.permute.xlu0 %661  ;;  %v902_v62 = vcombine.high %v835_v11, %v835_v11 }
 0x1e8   : > { %v456_v7 = vpop.permute.xlu1 %455 }
 0x1e9   : > { %v917_v54 = vcombine.high %v909_v43, %v909_v43  ;;  %v478_v25 = vadd.f32 %v456_v7, %v416_v56 }
 0x1eb   : > { %v1053_v4 = vcombine.low %v909_v43, %v917_v54  ;;  %v521_v23 = vadd.f32 %v1805_v44, %v478_v25  ;;  %v660_v26 = vpop.permute.xlu0 %659 }
 0x1ec   : > { %v495_v31 = vpop.permute.xlu1 %494 }
 0x1ed   : > { %v1067_v37 = vrot.slane %v1053_v4, %v1885_v63  ;;  %v583_v41 = vadd.f32 %v1811_v19, %v521_v23  ;;  %v519_v44 = vadd.f32 %v495_v31, %v476_v32  ;;  %v518_v19 = vadd.f32 %v1919_v60, %v475_v14 }
 0x1ef   : > { %v1068_v6 = vcombine.low %v1060_v27, %v1067_v37  ;;  %v645_v46 = vadd.f32 %v1830_v12, %v583_v41  ;;  %v724_v52 = vpop.permute.xlu0 %723  ;;  %v580_v12 = vadd.f32 %v1923_v33, %v518_v19 }
 0x1f0   : > { %v557_v55 = vpop.permute.xlu1 %556 }
 0x1f1   : > { %1165 = vst.msk [vmem:[%s1902_s6 + $0x10] sm:$0xff] %vm1162_vm8, %v1068_v6  ;;  %v688_v21 = vadd.f32 %v1871_v15, %v645_v46  ;;  %v581_v42 = vadd.f32 %v557_v55, %v519_v44  ;;  %v642_v53 = vadd.f32 %v1927_v39, %v580_v12 }
 0x1f3   : > { %v750_v30 = vadd.f32 %v1873_v22, %v688_v21  ;;  %v643_v10 = vadd.f32 %v619_v48, %v581_v42  ;;  %v722_v18 = vpop.permute.xlu0 %721  ;;  %v685_v49 = vadd.f32 %v660_v26, %v642_v53 }
 0x1f4   : > { %v621_v59 = vpop.permute.xlu1 %620 }
 0x1f5   : > { %v812_v40 = vadd.f32 %v1875_v5, %v750_v30  ;;  %v686_v58 = vadd.f32 %v662_v50, %v643_v10  ;;  %v644_v8 = vadd.f32 %v621_v59, %v582_v36  ;;  %v1961_v5 = vrot.slane %v902_v62, %v1885_v63 }
 0x1f6   : > { %v747_v29 = vadd.f32 %v722_v18, %v685_v49 }
 0x1f7   : > { %v829_v15 = vadd.f32 %v1881_v9, %v812_v40  ;;  %v748_v0 = vadd.f32 %v724_v52, %v686_v58  ;;  %v687_v60 = vadd.f32 %v1818_v1, %v644_v8  ;;  %v786_v38 = vpop.permute.xlu0 %785  ;;  %v918_v25 = vcombine.high %v1961_v5, %v1961_v5 }
 0x1f8   : > { %v792_v22 = vpop.permute.xlu1 %791 }
 0x1f9   : > { %v839_v57 = vmax.f32 %v829_v15, 0.0  ;;  %v749_v48 = vadd.f32 %v1824_v3, %v687_v60  ;;  %v813_v33 = vadd.f32 %v792_v22, %v1883_v17  ;;  %v810_v35 = vadd.f32 %v786_v38, %v748_v0 }
 0x1fb   : > { %v969_v39 = vcombine.high %v839_v57, %v839_v57  ;;  %v811_v11 = vadd.f32 %v1832_v13, %v749_v48  ;;  %v830_v43 = vadd.f32 %v1881_v9, %v813_v33  ;;  %v784_v56 = vpop.permute.xlu0 %783  ;;  %v827_v1 = vadd.f32 %v1881_v9, %v810_v35 }
 0x1fc   : > { %v794_v50 = vpop.permute.xlu1 %793  ;;  %v809_v34 = vadd.f32 %v784_v56, %v747_v29  ;;  %v976_v46 = vrot.slane %v839_v57, %v1885_v63 }
 0x1fd   : > { %v828_v7 = vadd.f32 %v1881_v9, %v811_v11  ;;  %v983_v3 = vrot.slane %v969_v39, %v1885_v63  ;;  %v840_v17 = vmax.f32 %v830_v43, 0.0  ;;  %v814_v54 = vadd.f32 %v794_v50, %v1914_v28 }
 0x1fe   : > { %v837_v24 = vmax.f32 %v827_v1, 0.0  ;;  %v826_v13 = vadd.f32 %v1881_v9, %v809_v34 }
 0x1ff   : > { %v838_v2 = vmax.f32 %v828_v7, 0.0  ;;  %v984_v4 = vcombine.high %v983_v3, %v983_v3  ;;  %v985_v23 = vcombine.high %v840_v17, %v840_v17  ;;  %v992_v26 = vrot.slane %v840_v17, %v1885_v63 }
 0x200   : > { %v935_v27 = vcombine.high %v837_v24, %v837_v24  ;;  %v942_v31 = vrot.slane %v837_v24, %v1885_v63  ;;  %v831_v32 = vadd.f32 %v1881_v9, %v814_v54  ;;  %v836_v20 = vmax.f32 %v826_v13, 0.0 }
 0x201   : > { %v952_v45 = vcombine.high %v838_v2, %v838_v2  ;;  %v959_v28 = vrot.slane %v838_v2, %v1885_v63  ;;  %v1120_v37 = vcombine.low %v983_v3, %v984_v4  ;;  %v999_v41 = vrot.slane %v985_v23, %v1885_v63 }
 0x202   : > { %v1000_v16 = vcombine.high %v992_v26, %v992_v26  ;;  %v949_v47 = vrot.slane %v935_v27, %v1885_v63  ;;  %v950_v61 = vcombine.high %v942_v31, %v942_v31  ;;  %v841_v6 = vmax.f32 %v831_v32, 0.0 }
 0x203   : > { %v966_v44 = vrot.slane %v952_v45, %v1885_v63  ;;  %v967_v52 = vcombine.high %v959_v28, %v959_v28  ;;  %v1001_v14 = vcombine.high %v999_v41, %v999_v41  ;;  %v919_v30 = vcombine.high %v836_v20, %v836_v20 }
 0x204   : > { %v1121_v55 = vcombine.low %v992_v26, %v1000_v16  ;;  %v951_v9 = vcombine.high %v949_v47, %v949_v47  ;;  %v1086_v51 = vcombine.low %v942_v31, %v950_v61  ;;  %v1002_v21 = vcombine.high %v841_v6, %v841_v6 }
 0x205   : > { %v968_v42 = vcombine.high %v966_v44, %v966_v44  ;;  %v1103_v19 = vcombine.low %v967_v52, %v966_v44  ;;  %v1009_v36 = vrot.slane %v841_v6, %v1885_v63  ;;  %v1128_v10 = vrot.slane %v1120_v37, %v1885_v63 }
 0x206   : > { %v1135_v18 = vrot.slane %v1121_v55, %v1885_v63  ;;  %v1087_v12 = vcombine.low %v949_v47, %v951_v9  ;;  %v1016_v59 = vrot.slane %v1002_v21, %v1885_v63  ;;  %v1094_v58 = vrot.slane %v1086_v51, %v1885_v63 }
 0x207   : > { %v1104_v40 = vcombine.low %v968_v42, %v976_v46  ;;  %v1017_v8 = vcombine.high %v1009_v36, %v1009_v36  ;;  %v1137_v53 = vcombine.low %v1001_v14, %v1009_v36  ;;  %v926_v0 = vrot.slane %v836_v20, %v1885_v63 }
 0x208   : > { %v1136_v62 = vcombine.low %v1128_v10, %v1135_v18  ;;  %v1101_v15 = vrot.slane %v1087_v12, %v1885_v63  ;;  %v933_v60 = vrot.slane %v919_v30, %v1885_v63  ;;  %v1111_v38 = vrot.slane %v1103_v19, %v1885_v63 }
 0x209   : > { %v1118_v49 = vrot.slane %v1104_v40, %v1885_v63  ;;  %v1138_v22 = vcombine.low %v1017_v8, %v1016_v59  ;;  %v934_v48 = vcombine.high %v926_v0, %v926_v0  ;;  %v1069_v33 = vcombine.low %v918_v25, %v926_v0 }
 0x20a   : > { %1169 = vst.msk [vmem:[%s1902_s6 + $0x30] sm:$0xff] %vm1162_vm8, %v1136_v62  ;;  %v1102_v57 = vcombine.low %v1094_v58, %v1101_v15  ;;  %v1145_v5 = vrot.slane %v1137_v53, %v1885_v63 }
 0x20b   : > { %v1119_v35 = vcombine.low %v1111_v38, %v1118_v49  ;;  %v1152_v29 = vrot.slane %v1138_v22, %v1885_v63  ;;  %v1070_v39 = vcombine.low %v934_v48, %v933_v60  ;;  %v1077_v43 = vrot.slane %v1069_v33, %v1885_v63 }
 0x20c   : > { %1167 = vst.msk [vmem:[%s1902_s6 + $0x20] sm:$0xff] %vm1162_vm8, %v1102_v57 }
 0x20d   : > { %1168 = vst.msk [vmem:[%s1902_s6 + $0x28] sm:$0xff] %vm1162_vm8, %v1119_v35  ;;  %v1153_v11 = vcombine.low %v1145_v5, %v1152_v29  ;;  %v1084_v56 = vrot.slane %v1070_v39, %v1885_v63 }
 0x20f   : > { %1170 = vst.msk [vmem:[%s1902_s6 + $0x38] sm:$0xff] %vm1162_vm8, %v1153_v11  ;;  %v1085_v1 = vcombine.low %v1077_v43, %v1084_v56 }
 0x211   : > { %1166 = vst.msk [vmem:[%s1902_s6 + $0x18] sm:$0xff] %vm1162_vm8, %v1085_v1 }
 0x212 PF: > { %s13_s12 = sadd.s32 1, %s1327_s12  }
 0x213   : > { %p10_p4 = scmp.ge.s32.totalorder %s13_s12, 4  }
 0x215   :  { %12 = sbr.rel (!%p10_p4) target bundleno = 1 (0x1), region = 62 }

// kernel: pixel_attention_forward.4
= control target key start
LH: loop header
LB: loop body
LE: loop exit
PB: predicated region body
PF: predicated region fallthrough
CT: control target
= control target key end

     0   :  { %s8791_s23 = smov 0   ;;  %s11273_s0 = inlined_call_operand.vmem [shape: bf16[2,72,8], index: 0, kind: input, shape index: {}]   ;;  %s11274_s1 = inlined_call_operand.vmem [shape: bf16[2,8,128], index: 1, kind: input, shape index: {}]   ;;  %s11275_s2 = inlined_call_operand.vmem [shape: bf16[2,72,8], index: 2, kind: input, shape index: {}]   ;;  %s11276_s3 = inlined_call_operand.vmem [shape: bf16[2,8,8,8], index: 3, kind: input, shape index: {}]   ;;  %s11277_s4 = inlined_call_operand.vmem [shape: bf16[128,288], index: 4, kind: input, shape index: {}]   ;;  %s11278_s5 = inlined_call_operand.vmem [shape: f32[1,32], index: 5, kind: input, shape index: {}]   ;;  %s11279_s6 = inlined_call_operand.vmem [shape: bf16[3,3,32,32], index: 6, kind: input, shape index: {}]   ;;  %s11280_s7 = inlined_call_operand.vmem [shape: f32[1,32], index: 7, kind: input, shape index: {}]   ;;  %s11281_s8 = inlined_call_operand.vmem [shape: bf16[3,3,32,32], index: 8, kind: input, shape index: {}]   ;;  %s11282_s9 = inlined_call_operand.vmem [shape: f32[1,32], index: 9, kind: input, shape index: {}]   ;;  %s11283_s10 = inlined_call_operand.vmem [shape: f32[3,3,32], index: 10, kind: input, shape index: {}]   ;;  %s11284_s11 = inlined_call_operand.<no memory space> [shape: f32[1,1], index: 11, kind: input, shape index: {}]   ;;  %s11285_s12 = inlined_call_operand.vmem [shape: f32[8,2], index: 12, kind: input, shape index: {}]   ;;  %s11286_s13 = inlined_call_operand.vmem [shape: f32[1,2], index: 13, kind: input, shape index: {}]   ;;  %s11287_s14 = inlined_call_operand.vmem [shape: f32[2,8], index: 14, kind: input, shape index: {}]   ;;  %s11288_s15 = inlined_call_operand.vmem [shape: f32[1,8], index: 15, kind: input, shape index: {}]   ;;  %s11289_s16 = inlined_call_operand.vmem [shape: bf16[2,8,8,16], index: 16, kind: output, shape index: {}]  }
   0x1   :  { %11305 = sst [smem:[#allocation23_spill]] %s11273_s0  ;;  %v21_v0 = vstv %s11284_s11 }
   0x2   :  { %22 = vst [vmem:[#allocation5] sm:$0x1] %v21_v0 }
   0x3 LB: > { %s7766_s24 = sadd.s32 4294967295, %s8692_s23   ;;  %p7770_p0 = scmp.ge.s32.totalorder %s8692_s23, 1  ;;  %s8692_s23 = sphi %s8791_s23, %s28_s23  }
   0x4   : > { %p493_p1 = scmp.lt.s32.totalorder %s8692_s23, 3 }
   0x6   : > { %p494_p2 = pnand %p7770_p0, %p493_p1 }
   0x8   : > { %497 = sbr.rel (%p494_p2) target bundleno = 1807 (0x70f), region = 84 }
   0xf   : > { %p557_p3 = scmp.lt.s32.totalorder %s7766_s24, 1  ;;  %v11292_v1 = vmov 0.0   ;;  %vm8695_vm0 = vmmov 0   ;;  %v8573_v2 = vld [vmem:[%s11277_s4 + $0x4] ss:$12 sps:$4 sm:$0xff]   ;;  %vm663_vm1 = vcmask 1043456  }
  0x10   : > { %8264 = vmatprep.subr.bf16.mxu0 %v11292_v1  ;;  %8266 = vmatprep.mubr.msk.bf16.mxu0 %vm8695_vm0, %v11292_v1  ;;  %v8575_v3 = vld [vmem:[%s11277_s4] ss:$12 sps:$4 sm:$0xff]   ;;  %v8577_v4 = vld [vmem:[%s11277_s4 + $0x1c] ss:$12 sps:$4 sm:$0xff]   ;;  %v8579_v5 = vld [vmem:[%s11277_s4 + $0x18] ss:$12 sps:$4 sm:$0xff]  }
  0x11   : > { %s11381_s24 = smov (!%p557_p3, %s7766_s24), 1  ;;  %872 = vmatprep.subr.bf16.mxu1 %v8573_v2  ;;  %s11306_s25 = sld [smem:[#allocation23_spill]]  ;;  %v8581_v7 = vld [vmem:[%s11277_s4 + $0x34] ss:$12 sps:$4 sm:$0xff]   ;;  %vm647_vm2 = vcmask 64512   ;;  %vm1027_vm3 = vcmask 261120  }
  0x12   : > { %s8548_s30 = smul.u32 36, %s11381_s24  ;;  %s7772_s0 = sshll.u32 %s11381_s24, 2  ;;  %873 = vmatpush1.bf16.msra.mxu1 %v8575_v3  ;;  %v8576_v19 = vld [vmem:[%s11277_s4 + $0x8] ss:$12 sps:$4 sm:$0xff]   ;;  %v8580_v49 = vld [vmem:[%s11277_s4 + $0x20] ss:$12 sps:$4 sm:$0xff]  }
  0x13   : > { %s565_s21 = scalar_lea.vmem %s11274_s1, %s7772_s0  ;;  %874 = vmatprep.subr.bf16.mxu1 %v8577_v4  ;;  %v8583_v52 = vld [vmem:[%s11277_s4 + $0x30] ss:$12 sps:$4 sm:$0xff]   ;;  %v8584_v56 = vld [vmem:[%s11277_s4 + $0x38] ss:$12 sps:$4 sm:$0xff]   ;;  %v8587_v59 = vld [vmem:[%s11277_s4 + $0x48] ss:$12 sps:$4 sm:$0xff]  }
  0x14   : > { %s8829_s29 = scalar_lea.vmem %s11275_s2, %s8548_s30  ;;  %v582_v6 = vld [vmem:[%s565_s21] sm:$0xf]  ;;  %v8585_v58 = vld [vmem:[%s11277_s4 + $0x4c] ss:$12 sps:$4 sm:$0xff]   ;;  %v8588_v63 = vld [vmem:[%s11277_s4 + $0x50] ss:$12 sps:$4 sm:$0xff]  }
  0x15   : > { %v665_v8 = vsel %vm663_vm1, %v582_v6, 0  ;;  %v8148_v18 = vld [vmem:[%s8829_s29] sm:$0xff]   ;;  %v8166_v24 = vld [vmem:[%s8829_s29 + $0x8] sm:$0xff]   ;;  %v8167_v25 = vld [vmem:[%s8829_s29 + $0x10] sm:$0xff]   ;;  %vm1074_vm4 = vcmask 1046528   ;;  %vm1116_vm5 = vcmask 1045504  }
  0x16   : > { %8265 = vmatpush3.bf16.msra.mxu0 %v665_v8  ;;  %875 = vmatpush1.bf16.msra.mxu1 %v8579_v5  ;;  %v8168_v26 = vld [vmem:[%s8829_s29 + $0x18] sm:$0xff]   ;;  %v8149_v28 = vunpack.c.l.bf16 %v8148_v18  ;;  %v8150_v29 = vunpack.c.h.bf16 %v8148_v18  ;;  %v8153_v30 = vunpack.c.l.bf16 %v8166_v24  ;;  %v7340_v31 = vld [vmem:[%s8829_s29 + $0x20] sm:$0xf]  ;;  %v8154_v32 = vunpack.c.h.bf16 %v8166_v24  ;;  %v8589_v0 = vld [vmem:[%s11277_s4 + $0x64] ss:$12 sps:$4 sm:$0xff]   ;;  %s8698_s0 = smov 96  }
  0x17   : > { %s8824_s26 = scalar_lea.vmem %s11306_s25, %s8548_s30  ;;  %8286 = vmatprep.subr.bf16.mxu0 %v11292_v1  ;;  %876 = vmatprep.subr.bf16.mxu1 %v8581_v7  ;;  %v8157_v33 = vunpack.c.l.bf16 %v8167_v25  ;;  %v8158_v34 = vunpack.c.h.bf16 %v8167_v25  ;;  %v8161_v35 = vunpack.c.l.bf16 %v8168_v26  ;;  %v8162_v37 = vunpack.c.h.bf16 %v8168_v26  ;;  %v8591_v2 = vld [vmem:[%s11277_s4 + $0x60] ss:$12 sps:$4 sm:$0xff]   ;;  %v8593_v4 = vld [vmem:[%s11277_s4 + $0x7c] ss:$12 sps:$4 sm:$0xff]   ;;  %s8699_s30 = smov 64  }
  0x18   : > { %v8132_v9 = vld [vmem:[%s8824_s26] sm:$0xff]   ;;  %v8163_v10 = vld [vmem:[%s8824_s26 + $0x8] sm:$0xff]   ;;  %v8164_v11 = vld [vmem:[%s8824_s26 + $0x10] sm:$0xff]   ;;  %v7349_v38 = vunpack.c.l.bf16 %v7340_v31  ;;  %vm1638_vm6 = vcmask 1040384   ;;  %vm1639_vm7 = vcmask 1042434   ;;  %vm1641_vm9 = vcmask 1044484  }
  0x19   : > { %v8133_v12 = vunpack.c.l.bf16 %v8132_v9  ;;  %v8134_v13 = vunpack.c.h.bf16 %v8132_v9  ;;  %v8137_v14 = vunpack.c.l.bf16 %v8163_v10  ;;  %v8138_v15 = vunpack.c.h.bf16 %v8163_v10  ;;  %v8165_v16 = vld [vmem:[%s8824_s26 + $0x18] sm:$0xff]   ;;  %v7322_v17 = vld [vmem:[%s8824_s26 + $0x20] sm:$0xf]  ;;  %v8569_v54 = vld [vmem:[%s8824_s26 + $0x8] sm:$0xff]   ;;  %s8119_s17 = sshll.u32 %s11381_s24, 5  ;;  %s8702_s18 = smov 8  }
  0x1a   : > { %v8141_v20 = vunpack.c.l.bf16 %v8164_v11  ;;  %v8142_v21 = vunpack.c.h.bf16 %v8164_v11  ;;  %v8145_v22 = vunpack.c.l.bf16 %v8165_v16  ;;  %v8146_v23 = vunpack.c.h.bf16 %v8165_v16  ;;  %v8568_v36 = vld [vmem:[%s8824_s26] sm:$0xff]   ;;  %877 = vmatpush1.bf16.msra.mxu1 %v8583_v52  ;;  %v8570_v8 = vld [vmem:[%s8824_s26 + $0x10] sm:$0xff]   ;;  %v8571_v16 = vld [vmem:[%s8824_s26 + $0x18] sm:$0xff]   ;;  %s11236_s21 = scalar_lea.vmem %s11289_s16, %s8119_s17 }
  0x1b   : > { %v7331_v27 = vunpack.c.l.bf16 %v7322_v17  ;;  %v7350_v39 = vmul.f32 %v8149_v28, %v8133_v12  ;;  %v7351_v40 = vmul.f32 %v8150_v29, %v8134_v13  ;;  %v7352_v41 = vmul.f32 %v8153_v30, %v8137_v14  ;;  %8267 = vmatmul.mubr.msk.bf16.vlgmr.msra.gmra.mrb[0].mxu0 %vm647_vm2, %v8568_v36  ;;  %878 = vmatprep.subr.bf16.mxu1 %v8585_v58  ;;  %v8592_v9 = vld [vmem:[%s11277_s4 + $0x68] ss:$12 sps:$4 sm:$0xff]   ;;  %v8595_v10 = vld [vmem:[%s11277_s4 + $0x78] ss:$12 sps:$4 sm:$0xff]   ;;  %v8599_v13 = vld [vmem:[%s11277_s4 + $0x90] ss:$12 sps:$4 sm:$0xff]  }
  0x1c   : > { %v7353_v42 = vmul.f32 %v8154_v32, %v8138_v15  ;;  %v7354_v43 = vmul.f32 %v8157_v33, %v8141_v20  ;;  %v7355_v44 = vmul.f32 %v8158_v34, %v8142_v21  ;;  %v7356_v45 = vmul.f32 %v8161_v35, %v8145_v22  ;;  %8270 = vmatprep.mubr.msk.bf16.mxu0 %vm8695_vm0, %v11292_v1  ;;  %v8597_v12 = vld [vmem:[%s11277_s4 + $0x94] ss:$12 sps:$4 sm:$0xff]   ;;  %v8600_v17 = vld [vmem:[%s11277_s4 + $0x98] ss:$12 sps:$4 sm:$0xff]   ;;  %v8604_v21 = vld [vmem:[%s11277_s4 + $0xb0] ss:$12 sps:$4 sm:$0xff]  }
  0x1d   : > { %v7357_v46 = vmul.f32 %v8162_v37, %v8146_v23  ;;  %v8850_v47 = vmul.f32 %v7349_v38, %v7331_v27  ;;  %v7359_v48 = vsel %vm647_vm2, %v7350_v39, 0.0  ;;  %8287 = vmatpush3.bf16.msra.mxu0 %v8576_v19  ;;  %v7360_v50 = vsel %vm647_vm2, %v7351_v40, 0.0  ;;  %v8596_v15 = vld [vmem:[%s11277_s4 + $0x80] ss:$12 sps:$4 sm:$0xff]   ;;  %v8603_v20 = vld [vmem:[%s11277_s4 + $0xa8] ss:$12 sps:$4 sm:$0xff]   ;;  %vm9191_vm8 = vmor %vm1638_vm6, %vm1639_vm7 }
  0x1e   : > { %v7362_v51 = vsel %vm647_vm2, %v7352_v41, 0.0  ;;  %8288 = vmatprep.subr.bf16.mxu0 %v11292_v1  ;;  %v7361_v53 = vadd.f32 %v7360_v50, %v7359_v48  ;;  %v7364_v55 = vsel %vm647_vm2, %v7353_v42, 0.0  ;;  %v7366_v60 = vsel %vm647_vm2, %v7354_v43, 0.0  ;;  %879 = vmatpush1.bf16.msra.mxu1 %v8587_v59  ;;  %v8572_v18 = vld [vmem:[%s8824_s26 + $0x20] ss:$0 sps:$4 sm:$0xff]   ;;  %s8697_s26 = smov 32   ;;  %vm1642_vm13 = vmor %vm9191_vm8, %vm1641_vm9 }
  0x1f   : > { %11307 = vst [vmem:[#allocation6_spill] sm:$0xff] %v8850_v47  ;;  %v7368_v62 = vsel %vm647_vm2, %v7355_v44, 0.0  ;;  %v7370_v5 = vsel %vm647_vm2, %v7356_v45, 0.0  ;;  %880 = vmatprep.subr.bf16.mxu1 %v8589_v0  ;;  %v7372_v7 = vsel %vm647_vm2, %v7357_v46, 0.0  ;;  %v8601_v19 = vld [vmem:[%s11277_s4 + $0xac] ss:$12 sps:$4 sm:$0xff]  }
  0x20   : > { %v7363_v57 = vadd.f32 %v7362_v51, %v7361_v53  ;;  %v11290_v22 = vmov 0   ;;  %vm1424_vm10 = vsmask.f32 1280  ;;  %vm1643_vm11 = vcmask 1046534  }
  0x21   : > { %8289 = vmatpush3.bf16.msra.mxu0 %v8580_v49  ;;  %904 = vmatprep.mubr.bf16.mxu1 %v11290_v22  ;;  %vm1425_vm12 = vsmask.f32 3336  ;;  %vm1427_vm14 = vsmask.f32 5392  ;;  %vm1429_vm15 = vsmask.f32 7448  ;;  %vm9207_vm1 = vmor %vm1642_vm13, %vm1643_vm11 }
  0x22   : > { %8290 = vmatprep.subr.bf16.mxu0 %v11292_v1  ;;  %v7365_v61 = vadd.f32 %v7364_v55, %v7363_v57  ;;  %881 = vmatpush1.bf16.msra.mxu1 %v8591_v2  ;;  %vm9213_vm6 = vmor %vm1424_vm10, %vm1425_vm12  ;;  %vm2272_vm9 = vcmask 257024   ;;  %vm2617_vm10 = vsmask.f32 256  ;;  %vm2618_vm11 = vsmask.f32 1284 }
  0x23   : > { %8271 = vmatmul.mubr.msk.bf16.gmra.mrb[4].mxu0 %vm647_vm2, %v8569_v54  ;;  %882 = vmatprep.subr.bf16.mxu1 %v8593_v4  ;;  %vm9241_vm7 = vmor %vm9213_vm6, %vm1427_vm14  ;;  %2275 = vst.msk [vmem:[#allocation3 + $0x8] sm:$0xf] %vm2272_vm9, %v11290_v22  ;;  %vm2620_vm13 = vsmask.f32 2312  ;;  %vm2624_vm6 = vsmask.f32 4368 }
  0x24   : > { %v7367_v3 = vadd.f32 %v7366_v60, %v7365_v61  ;;  %8274 = vmatprep.mubr.msk.bf16.mxu0 %vm8695_vm0, %v11292_v1  ;;  %8566 = vset.pattern.permute.xlu1 %v11290_v22  ;;  %vm9261_vm8 = vmor %vm9241_vm7, %vm1429_vm15  ;;  %2276 = vst.msk [vmem:[#allocation3 + $0xc] sm:$0xf] %vm2272_vm9, %v11290_v22  ;;  %vm2622_vm15 = vsmask.f32 3340 }
  0x25   : > { %8291 = vmatpush3.bf16.msra.mxu0 %v8584_v56  ;;  %8567 = vset.pattern.permute.xlu0 %v11290_v22  ;;  %2273 = vst.msk [vmem:[#allocation3] sm:$0xf] %vm2272_vm9, %v11290_v22  ;;  %2274 = vst.msk [vmem:[#allocation3 + $0x4] sm:$0xf] %vm2272_vm9, %v11290_v22 }
  0x26   : > { %8292 = vmatprep.subr.bf16.mxu0 %v11292_v1  ;;  %v7369_v6 = vadd.f32 %v7368_v62, %v7367_v3  ;;  %883 = vmatpush1.bf16.msra.mxu1 %v8595_v10  ;;  %2277 = vst.msk [vmem:[#allocation3 + $0x10] sm:$0xf] %vm2272_vm9, %v11290_v22  ;;  %2278 = vst.msk [vmem:[#allocation3 + $0x14] sm:$0xf] %vm2272_vm9, %v11290_v22 }
  0x27   : > { %884 = vmatprep.subr.bf16.mxu1 %v8597_v12  ;;  %2279 = vst.msk [vmem:[#allocation3 + $0x18] sm:$0xf] %vm2272_vm9, %v11290_v22  ;;  %2280 = vst.msk [vmem:[#allocation3 + $0x1c] sm:$0xf] %vm2272_vm9, %v11290_v22 }
  0x28   : > { %v7371_v11 = vadd.f32 %v7370_v5, %v7369_v6  ;;  %6154 = vst.msk [vmem:[#allocation4] sm:$0xf] %vm2272_vm9, %v11290_v22  ;;  %6157 = vst.msk [vmem:[#allocation4 + $0x8] sm:$0xf] %vm2272_vm9, %v11290_v22 }
  0x29   : > { %8293 = vmatpush3.bf16.msra.mxu0 %v8588_v63  ;;  %6159 = vst.msk [vmem:[#allocation4 + $0x10] sm:$0xf] %vm2272_vm9, %v11290_v22  ;;  %6161 = vst.msk [vmem:[#allocation4 + $0x18] sm:$0xf] %vm2272_vm9, %v11290_v22 }
  0x2a   : > { %8294 = vmatprep.subr.bf16.mxu0 %v11292_v1  ;;  %v8910_v14 = vadd.f32 %v7372_v7, %v7371_v11  ;;  %885 = vmatpush1.bf16.msra.mxu1 %v8599_v13  ;;  %6163 = vst.msk [vmem:[#allocation4 + $0x20] sm:$0xf] %vm2272_vm9, %v11290_v22  ;;  %6165 = vst.msk [vmem:[#allocation4 + $0x28] sm:$0xf] %vm2272_vm9, %v11290_v22 }
  0x2b   : > { %8275 = vmatmul.mubr.msk.bf16.gmra.mrb[8].mxu0 %vm647_vm2, %v8570_v8  ;;  %886 = vmatprep.subr.bf16.mxu1 %v8601_v19  ;;  %6167 = vst.msk [vmem:[#allocation4 + $0x30] sm:$0xf] %vm2272_vm9, %v11290_v22  ;;  %6169 = vst.msk [vmem:[#allocation4 + $0x38] sm:$0xf] %vm2272_vm9, %v11290_v22 }
  0x2c   : > { %11308 = vst [vmem:[#allocation7_spill] sm:$0xff] %v8910_v14  ;;  %8278 = vmatprep.mubr.msk.bf16.mxu0 %vm8695_vm0, %v11292_v1  ;;  %6171 = vst.msk [vmem:[#allocation4 + $0x40] sm:$0xf] %vm2272_vm9, %v11290_v22 }
  0x2d   : > { %8295 = vmatpush3.bf16.msra.mxu0 %v8592_v9  ;;  %6173 = vst.msk [vmem:[#allocation4 + $0x48] sm:$0xf] %vm2272_vm9, %v11290_v22  ;;  %vm2619_vm12 = vmor %vm2617_vm10, %vm2618_vm11  ;;  %vm2628_vm10 = vsmask.f32 6424 }
  0x2e   : > { %8296 = vmatprep.subr.bf16.mxu0 %v11292_v1  ;;  %887 = vmatpush1.bf16.msra.mxu1 %v8603_v20  ;;  %vm2621_vm14 = vmor %vm2619_vm12, %vm2620_vm13  ;;  %vm2630_vm12 = vsmask.f32 7452 }
  0x2f   : > { %8330 = vmatprep.subr.bf16.mxu1 %v11292_v1 }
  0x31   : > { %8297 = vmatpush3.bf16.msra.mxu0 %v8596_v15 }
  0x32   : > { %8298 = vmatprep.subr.bf16.mxu0 %v11292_v1 }
  0x33   : > { %8279 = vmatmul.mubr.msk.bf16.gmra.mrb[12].mxu0 %vm647_vm2, %v8571_v16 }
  0x34   : > { %8282 = vmatprep.mubr.msk.bf16.mxu0 %vm8695_vm0, %v11292_v1 }
  0x35   : > { %8299 = vmatpush3.bf16.msra.mxu0 %v8600_v17 }
  0x36   : > { %8300 = vmatprep.subr.bf16.mxu0 %v11292_v1 }
  0x39   : > { %8301 = vmatpush3.bf16.msra.mxu0 %v8604_v21 }
  0x3a   : > { %8322 = vmatprep.subr.bf16.mxu0 %v11292_v1 }
  0x3b   : > { %8283 = vmatmul.mubr.msk.bf16.gmra.mrb[16].mxu0 %vm647_vm2, %v8572_v18 }
  0x3c   : > { %8302 = vmatprep.mubr.msk.bf16.mxu0 %vm8695_vm0, %v11292_v1 }
  0xee   : > { %v701_v23 = vpop.f32.mrb[0].mxu0 }
  0xef   : > { %v8268_v24 = vpop.f32.mrb[1].mxu0 }
  0xf0   : > { %v704_v25 = vpop.f32.mrb[2].mxu0 }
  0xf1   : > { %v739_v26 = vpack.c.bf16 %v704_v25, %v701_v23  ;;  %v8269_v27 = vpop.f32.mrb[3].mxu0 }
  0xf3   : > { %905 = vmatmul.mubr.bf16.vlgmr.msra.gmra.mrb[0].mxu1 %v739_v26  ;;  %8303 = vmatmul.mubr.bf16.vlgmr.msra.gmra.mrb[20].mxu0 %v739_v26 }
  0xf4   : > { %914 = vmatprep.mubr.bf16.mxu1 %v11290_v22  ;;  %8306 = vmatprep.mubr.msk.bf16.mxu0 %vm8695_vm0, %v11292_v1 }
  0xf6   : > { %v709_v28 = vpop.f32.mrb[4].mxu0 }
  0xf7   : > { %v8272_v29 = vpop.f32.mrb[5].mxu0 }
  0xf8   : > { %v712_v30 = vpop.f32.mrb[6].mxu0 }
  0xf9   : > { %v740_v31 = vpack.c.bf16 %v712_v30, %v709_v28  ;;  %v8273_v32 = vpop.f32.mrb[7].mxu0 }
  0xfb   : > { %915 = vmatmul.mubr.bf16.gmra.mrb[4].mxu1 %v740_v31  ;;  %8307 = vmatmul.mubr.bf16.gmra.mrb[24].mxu0 %v740_v31 }
  0xfc   : > { %924 = vmatprep.mubr.bf16.mxu1 %v11290_v22  ;;  %8310 = vmatprep.mubr.msk.bf16.mxu0 %vm8695_vm0, %v11292_v1 }
  0xfe   : > { %v717_v33 = vpop.f32.mrb[8].mxu0 }
  0xff   : > { %v8276_v34 = vpop.f32.mrb[9].mxu0 }
 0x100   : > { %v720_v35 = vpop.f32.mrb[10].mxu0 }
 0x101   : > { %v741_v36 = vpack.c.bf16 %v720_v35, %v717_v33  ;;  %v8277_v37 = vpop.f32.mrb[11].mxu0 }
 0x103   : > { %925 = vmatmul.mubr.bf16.gmra.mrb[8].mxu1 %v741_v36  ;;  %8311 = vmatmul.mubr.bf16.gmra.mrb[28].mxu0 %v741_v36 }
 0x104   : > { %934 = vmatprep.mubr.bf16.mxu1 %v11290_v22  ;;  %8314 = vmatprep.mubr.msk.bf16.mxu0 %vm8695_vm0, %v11292_v1 }
 0x106   : > { %v725_v38 = vpop.f32.mrb[12].mxu0 }
 0x107   : > { %v8280_v39 = vpop.f32.mrb[13].mxu0 }
 0x108   : > { %v728_v40 = vpop.f32.mrb[14].mxu0 }
 0x109   : > { %v742_v41 = vpack.c.bf16 %v728_v40, %v725_v38  ;;  %v8281_v42 = vpop.f32.mrb[15].mxu0 }
 0x10b   : > { %935 = vmatmul.mubr.bf16.gmra.mrb[12].mxu1 %v742_v41  ;;  %8315 = vmatmul.mubr.bf16.gmra.mrb[32].mxu0 %v742_v41 }
 0x10c   : > { %944 = vmatprep.mubr.bf16.mxu1 %v11290_v22  ;;  %8318 = vmatprep.mubr.msk.bf16.mxu0 %vm8695_vm0, %v11292_v1 }
 0x10e   : > { %v733_v43 = vpop.f32.mrb[16].mxu0 }
 0x10f   : > { %v743_v44 = vpack.c.bf16 %v733_v43, %v733_v43  ;;  %v8284_v45 = vpop.f32.mrb[17].mxu0 }
 0x110   : > { %v736_v46 = vpop.f32.mrb[18].mxu0 }
 0x111   : > { %v8285_v48 = vpop.f32.mrb[19].mxu0 }
 0x113   : > { %945 = vmatmul.mubr.bf16.gmra.mrb[16].mxu1 %v743_v44  ;;  %8319 = vmatmul.mubr.bf16.gmra.mrb[36].mxu0 %v743_v44 }
 0x114   : > { %8334 = vmatprep.mubr.msk.bf16.mxu1 %vm8695_vm0, %v11292_v1  ;;  %8326 = vmatprep.mubr.msk.bf16.mxu0 %vm8695_vm0, %v11292_v1 }
 0x1c6   : > { %v8962_v49 = vpop.f32.mrb[0].mxu1  ;;  %v987_v50 = vpop.f32.mrb[20].mxu0 }
 0x1c7   : > { %1025 = vst [vmem:[#allocation2] sm:$0xff] %v8962_v49  ;;  %v908_v51 = vpop.f32.mrb[1].mxu1  ;;  %v8304_v52 = vpop.f32.mrb[21].mxu0 }
 0x1c8   : > { %v8965_v53 = vpop.f32.mrb[2].mxu1  ;;  %v990_v54 = vpop.f32.mrb[22].mxu0 }
 0x1c9   : > { %v912_v55 = vpop.f32.mrb[3].mxu1  ;;  %v8305_v56 = vpop.f32.mrb[23].mxu0  ;;  %1156 = vrot.lane.b32.xlu0 %v8965_v53, %s8697_s26  ;;  %v1076_v57 = vrot.slane %v8965_v53, 1  ;;  %v1118_v2 = vrot.slane %v8965_v53, 2 }
 0x1ca   : > { %1030 = vst [vmem:[#allocation2 + $0x20] sm:$0xff] %v912_v55 }
 0x1ce   : > { %v8970_v58 = vpop.f32.mrb[4].mxu1  ;;  %v995_v59 = vpop.f32.mrb[24].mxu0  ;;  %v1065_v60 = vld [vmem:[#allocation2] sm:$0xfe] }
 0x1cf   : > { %v1112_v61 = vld [vmem:[#allocation2] sm:$0xfc]  ;;  %1034 = vst.msk [vmem:[#allocation2 + $0x40] sm:$0xff] %vm1027_vm3, %v995_v59  ;;  %v8973_v62 = vpop.f32.mrb[5].mxu1  ;;  %v8308_v63 = vpop.f32.mrb[25].mxu0  ;;  %v1075_v0 = vrot.slane %v1065_v60, 1  ;;  %1158 = vrot.lane.b32.xlu1 %v8970_v58, %s8697_s26 }
 0x1d0   : > { %v1120_v3 = vrot.slane %v8970_v58, 2  ;;  %v1078_v4 = vrot.slane %v8970_v58, 1  ;;  %1033 = vst [vmem:[#allocation2 + $0x38] sm:$0xff] %v8973_v62  ;;  %v8981_v5 = vpop.f32.mrb[6].mxu1  ;;  %v998_v6 = vpop.f32.mrb[26].mxu0  ;;  %v1117_v7 = vrot.slane %v1112_v61, 2 }
 0x1d1   : > { %1037 = vst.msk [vmem:[#allocation2 + $0x58] sm:$0xff] %vm1027_vm3, %v998_v6  ;;  %v922_v8 = vpop.f32.mrb[7].mxu1  ;;  %v8309_v9 = vpop.f32.mrb[27].mxu0  ;;  %v1077_v10 = vsel %vm1074_vm4, %v1075_v0, %v1076_v57  ;;  %v1195_v12 = vrot.slane %v8973_v62, 1  ;;  %v1080_v13 = vrot.slane %v8981_v5, 1  ;;  %v1224_v15 = vrot.slane %v8973_v62, 2 }
 0x1d2   : > { %v1121_v11 = vsel %vm1116_vm5, %v1118_v2, %v1120_v3  ;;  %1088 = vrot.lane.b32.xlu0 %v1077_v10, %s8698_s0  ;;  %v8990_v16 = vrot.slane %v922_v8, 1  ;;  %v1226_v17 = vrot.slane %v922_v8, 2  ;;  %v1079_v18 = vsel %vm1074_vm4, %v1076_v57, %v1078_v4  ;;  %v1219_v55 = vld [vmem:[#allocation2 + $0x20] sm:$0xfc] }
 0x1d3   : > { %1132 = vrot.lane.b32.xlu1 %v1121_v11, %s8699_s30  ;;  %v1081_v19 = vsel %vm1074_vm4, %v1078_v4, %v1080_v13  ;;  %v1122_v20 = vrot.slane %v8981_v5, 2  ;;  %v1119_v24 = vsel %vm1116_vm5, %v1117_v7, %v1118_v2  ;;  %v1223_v0 = vrot.slane %v1219_v55, 2 }
 0x1d4   : > { %v1227_v21 = vsel %vm1116_vm5, %v1224_v15, %v1226_v17  ;;  %v9003_v23 = vsel %vm1074_vm4, %v1195_v12, %v8990_v16 }
 0x1d5   : > { %v9007_v25 = vsel %vm1116_vm5, %v1120_v3, %v1122_v20  ;;  %v1225_v9 = vsel %vm1116_vm5, %v1223_v0, %v1224_v15 }
 0x1d6   : > { %v9009_v26 = vpop.f32.mrb[8].mxu1  ;;  %v1003_v27 = vpop.f32.mrb[28].mxu0  ;;  %1130 = vrot.lane.b32.xlu0 %v1119_v24, %s8699_s30 }
 0x1d7   : > { %1040 = vst.msk [vmem:[#allocation2 + $0x70] sm:$0xff] %vm1027_vm3, %v1003_v27  ;;  %v9013_v28 = vpop.f32.mrb[9].mxu1  ;;  %v8312_v29 = vpop.f32.mrb[29].mxu0  ;;  %1264 = vrot.lane.b32.xlu1 %v922_v8, %s8699_s30  ;;  %v1082_v30 = vrot.slane %v9009_v26, 1  ;;  %v1124_v31 = vrot.slane %v9009_v26, 2 }
 0x1d8   : > { %v9018_v32 = vpop.f32.mrb[10].mxu1  ;;  %v1006_v33 = vpop.f32.mrb[30].mxu0  ;;  %v1199_v34 = vrot.slane %v9013_v28, 1  ;;  %v1228_v35 = vrot.slane %v9013_v28, 2  ;;  %v1286_v10 = vld [vmem:[#allocation2 + $0x38] sm:$0xfe] }
 0x1d9   : > { %v932_v36 = vpop.f32.mrb[11].mxu1  ;;  %1043 = vst.msk [vmem:[#allocation2 + $0x88] sm:$0xff] %vm1027_vm3, %v1006_v33  ;;  %v8313_v37 = vpop.f32.mrb[31].mxu0  ;;  %v1083_v38 = vsel %vm1074_vm4, %v1080_v13, %v1082_v30  ;;  %v1125_v39 = vsel %vm1116_vm5, %v1122_v20, %v1124_v31  ;;  %v1084_v40 = vrot.slane %v9018_v32, 1  ;;  %v1126_v41 = vrot.slane %v9018_v32, 2  ;;  %v8605_v29 = vld [vmem:[%s11279_s6 + $0x10] sm:$0xff]  }
 0x1da   : > { %1262 = vrot.lane.b32.xlu0 %v8973_v62, %s8699_s30  ;;  %v1201_v42 = vrot.slane %v932_v36, 1  ;;  %v1230_v43 = vrot.slane %v932_v36, 2  ;;  %v1229_v44 = vsel %vm1116_vm5, %v1226_v17, %v1228_v35  ;;  %v9033_v45 = vsel %vm1074_vm4, %v8990_v16, %v1199_v34  ;;  %8323 = vmatpush3.bf16.msra.mxu0 %v8605_v29 }
 0x1db   : > { %1092 = vrot.lane.b32.xlu1 %v1081_v19, %s8698_s0  ;;  %v1085_v46 = vsel %vm1074_vm4, %v1082_v30, %v1084_v40  ;;  %v1127_v48 = vsel %vm1116_vm5, %v1124_v31, %v1126_v41  ;;  %8324 = vmatprep.subr.bf16.mxu0 %v11292_v1  ;;  %v8607_v30 = vld [vmem:[%s11279_s6 + $0x18] sm:$0xff]  }
 0x1dc   : > { %v9042_v50 = vsel %vm1074_vm4, %v1199_v34, %v1201_v42  ;;  %v1231_v51 = vsel %vm1116_vm5, %v1228_v35, %v1230_v43 }
 0x1de   : > { %v9045_v52 = vpop.f32.mrb[12].mxu1  ;;  %v1011_v54 = vpop.f32.mrb[32].mxu0  ;;  %1160 = vrot.lane.b32.xlu0 %v8981_v5, %s8697_s26  ;;  %8325 = vmatpush3.bf16.msra.mxu0 %v8607_v30 }
 0x1df   : > { %1044 = vst [vmem:[#allocation2 + $0x90] sm:$0xff] %v9045_v52  ;;  %v9050_v56 = vpop.f32.mrb[13].mxu1  ;;  %1046 = vst.msk [vmem:[#allocation2 + $0xa0] sm:$0xff] %vm1027_vm3, %v1011_v54  ;;  %1238 = vrot.lane.b32.xlu1 %v1227_v21, %s8698_s0  ;;  %v8316_v57 = vpop.f32.mrb[33].mxu0  ;;  %v1290_v21 = vrot.slane %v1286_v10, 1  ;;  %8338 = vmatprep.subr.bf16.mxu0 %v11292_v1 }
 0x1e0   : > { %v940_v59 = vpop.f32.mrb[14].mxu1  ;;  %v1014_v60 = vpop.f32.mrb[34].mxu0  ;;  %v9055_v61 = vrot.slane %v9050_v56, 1  ;;  %v1232_v63 = vrot.slane %v9050_v56, 2 }
 0x1e1   : > { %v9058_v2 = vpop.f32.mrb[15].mxu1  ;;  %1049 = vst.msk [vmem:[#allocation2 + $0xb8] sm:$0xff] %vm1027_vm3, %v1014_v60  ;;  %v8317_v3 = vpop.f32.mrb[35].mxu0  ;;  %v1291_v15 = vsel %vm1074_vm4, %v1290_v21, %v8990_v16  ;;  %v8606_v16 = vld [vmem:[%s11279_s6] sm:$0xff]  }
 0x1e2   : > { %1090 = vrot.lane.b32.xlu0 %v1079_v18, %s8698_s0  ;;  %1048 = vst [vmem:[#allocation2 + $0xb0] sm:$0xff] %v9058_v2  ;;  %v9065_v4 = vsel %vm1074_vm4, %v1201_v42, %v9055_v61  ;;  %v1233_v6 = vsel %vm1116_vm5, %v1230_v43, %v1232_v63  ;;  %v1292_v7 = vrot.slane %v9058_v2, 1  ;;  %8331 = vmatpush3.bf16.msra.mxu1 %v8606_v16 }
 0x1e3   : > { %1162 = vrot.lane.b32.xlu1 %v9009_v26, %s8697_s26  ;;  %8332 = vmatprep.subr.bf16.mxu1 %v11292_v1 }
 0x1e4   : > { %v1293_v8 = vsel %vm1074_vm4, %v9055_v61, %v1292_v7 }
 0x1e6   : > { %1236 = vrot.lane.b32.xlu0 %v1225_v9, %s8698_s0  ;;  %v946_v11 = vpop.f32.mrb[16].mxu1  ;;  %v1019_v13 = vpop.f32.mrb[36].mxu0  ;;  %v1113_v31 = vld [vmem:[#allocation2 + $0x90] sm:$0x3] }
 0x1e7   : > { %1094 = vrot.lane.b32.xlu1 %v1083_v38, %s8698_s0  ;;  %v948_v17 = vpop.f32.mrb[17].mxu1  ;;  %1052 = vst.msk [vmem:[#allocation2 + $0xd0] sm:$0xff] %vm1027_vm3, %v1019_v13  ;;  %v8320_v18 = vpop.f32.mrb[37].mxu0  ;;  %v1128_v34 = vrot.slane %v1113_v31, 2 }
 0x1e8   : > { %1051 = vst [vmem:[#allocation2 + $0xc8] sm:$0xff] %v948_v17  ;;  %v950_v19 = vpop.f32.mrb[18].mxu1  ;;  %v1022_v20 = vpop.f32.mrb[38].mxu0 }
 0x1e9   : > { %v951_v24 = vpop.f32.mrb[19].mxu1  ;;  %v8321_v27 = vpop.f32.mrb[39].mxu0  ;;  %v1220_v35 = vld [vmem:[#allocation2 + $0xb0] sm:$0x3]  ;;  %v1129_v37 = vsel %vm1116_vm5, %v1126_v41, %v1128_v34  ;;  %v1321_v19 = vld [vmem:[#allocation2 + $0x58] sm:$0xff] }
 0x1ea   : > { %1134 = vrot.lane.b32.xlu0 %v9007_v25, %s8699_s30  ;;  %v8608_v25 = vld [vmem:[%s11279_s6 + $0x8] sm:$0xff]   ;;  %v1234_v38 = vrot.slane %v1220_v35, 2  ;;  %v1335_v27 = vrot.slane %v1321_v19, 2 }
 0x1eb   : > { %1136 = vrot.lane.b32.xlu1 %v1125_v39, %s8699_s30  ;;  %8333 = vmatpush3.bf16.msra.mxu1 %v8608_v25  ;;  %v1395_v25 = vlaneseq }
 0x1ec   : > { %8346 = vmatprep.subr.bf16.mxu1 %v11292_v1  ;;  %v1235_v42 = vsel %vm1116_vm5, %v1232_v63, %v1234_v38 }
 0x1ee   : > { %1296 = vrot.lane.b32.xlu0 %v1291_v15, %s8697_s26 }
 0x1ef   : > { %1268 = vrot.lane.b32.xlu1 %v932_v36, %s8699_s30  ;;  %v1287_v39 = vld [vmem:[#allocation2 + $0xc8] sm:$0x1] }
 0x1f0   : > { %v1294_v43 = vrot.slane %v1287_v39, 1  ;;  %v9158_v39 = vshrl.u32 %v1395_v25, 7 }
 0x1f2   : > { %1266 = vrot.lane.b32.xlu0 %v9013_v28, %s8699_s30  ;;  %v1066_v28 = vld [vmem:[#allocation2 + $0x90] sm:$0x1]  ;;  %11309 = vst [vmem:[#allocation8_spill] sm:$0xff] %v9158_v39 }
 0x1f3   : > { %1298 = vrot.lane.b32.xlu1 %v9033_v45, %s8697_s26  ;;  %v1086_v33 = vrot.slane %v1066_v28, 1  ;;  %v1322_v28 = vld [vmem:[#allocation2 + $0x70] sm:$0xff] }
 0x1f5   : > { %v1087_v36 = vsel %vm1074_vm4, %v1084_v40, %v1086_v33  ;;  %v1295_v40 = vsel %vm1074_vm4, %v1292_v7, %v1294_v43  ;;  %v1323_v43 = vld [vmem:[#allocation2 + $0x88] sm:$0xff] }
 0x1f6   : > { %1240 = vrot.lane.b32.xlu0 %v1229_v44, %s8698_s0 }
 0x1f7   : > { %1242 = vrot.lane.b32.xlu1 %v1231_v51, %s8698_s0  ;;  %v1180_v51 = vld [vmem:[#allocation2 + $0x20] sm:$0xfe] }
 0x1f8   : > { %v1194_v55 = vrot.slane %v1180_v51, 1 }
 0x1fa   : > { %1300 = vrot.lane.b32.xlu0 %v9042_v50, %s8697_s26  ;;  %v1196_v63 = vsel %vm1074_vm4, %v1194_v55, %v1195_v12  ;;  %v1320_v12 = vld [vmem:[#allocation2 + $0x40] sm:$0xfc] }
 0x1fb   : > { %1302 = vrot.lane.b32.xlu1 %v9065_v4, %s8697_s26  ;;  %v1334_v33 = vrot.slane %v1320_v12, 2 }
 0x1fe   : > { %1096 = vrot.lane.b32.xlu0 %v1085_v46, %s8698_s0 }
 0x1ff   : > { %1138 = vrot.lane.b32.xlu1 %v1127_v48, %s8699_s30 }
 0x202   : > { %1164 = vrot.lane.b32.xlu0 %v9018_v32, %s8697_s26 }
 0x203   : > { %1244 = vrot.lane.b32.xlu1 %v1233_v6, %s8698_s0 }
 0x206   : > { %1270 = vrot.lane.b32.xlu0 %v9050_v56, %s8699_s30 }
 0x207   : > { %1304 = vrot.lane.b32.xlu1 %v1293_v8, %s8697_s26 }
 0x20a   : > { %1098 = vrot.lane.b32.xlu0 %v1087_v36, %s8698_s0  ;;  %v1337_v36 = vrot.slane %v1322_v28, 2 }
 0x20b   : > { %1140 = vrot.lane.b32.xlu1 %v1129_v37, %s8699_s30 }
 0x20c   : > { %v1338_v55 = vsel %vm1116_vm5, %v1335_v27, %v1337_v36 }
 0x20e   : > { %1166 = vrot.lane.b32.xlu0 %v9045_v52, %s8697_s26 }
 0x20f   : > { %1246 = vrot.lane.b32.xlu1 %v1235_v42, %s8698_s0 }
 0x212   : > { %1272 = vrot.lane.b32.xlu0 %v9058_v2, %s8699_s30  ;;  %s11213_s30 = scalar_lea.vmem %s11276_s3, %s8119_s17 }
 0x213   : > { %1306 = vrot.lane.b32.xlu1 %v1295_v40, %s8697_s26 }
 0x23b   : > { %v1157_v41 = vpop.permute.xlu0 %1156 }
 0x241   : > { %v1159_v44 = vpop.permute.xlu1 %1158 }
 0x244   : > { %v1089_v46 = vpop.permute.xlu0 %1088 }
 0x245   : > { %v1133_v48 = vpop.permute.xlu1 %1132  ;;  %v1106_v52 = vadd.f32 %v1089_v46, %v8962_v49  ;;  %v1324_v46 = vld [vmem:[#allocation2 + $0xa0] sm:$0xff] }
 0x248   : > { %v1131_v54 = vpop.permute.xlu0 %1130 }
 0x249   : > { %v1148_v56 = vadd.f32 %v1131_v54, %v1106_v52  ;;  %v1265_v57 = vpop.permute.xlu1 %1264  ;;  %v9161_v52 = vld [vmem:[#allocation2 + $0xb8] sm:$0xff] }
 0x24b   : > { %v1174_v59 = vadd.f32 %v1157_v41, %v1148_v56  ;;  %v1339_v56 = vrot.slane %v1323_v43, 2 }
 0x24c   : > { %v1263_v60 = vpop.permute.xlu0 %1262 }
 0x24d   : > { %v1093_v0 = vpop.permute.xlu1 %1092  ;;  %v1213_v2 = vadd.f32 %v1196_v63, %v1174_v59 }
 0x24e   : > { %v1108_v62 = vadd.f32 %v1093_v0, %v8970_v58  ;;  %v9155_v58 = vld [vmem:[%s11278_s5] ss:$0 sm:$0xff]  ;;  %v1341_v0 = vrot.slane %v1324_v46, 2 }
 0x250   : > { %v1161_v3 = vpop.permute.xlu0 %1160 }
 0x251   : > { %v1239_v6 = vpop.permute.xlu1 %1238 }
 0x254   : > { %v1091_v7 = vpop.permute.xlu0 %1090 }
 0x255   : > { %v1107_v8 = vadd.f32 %v1091_v7, %v8965_v53  ;;  %v1163_v9 = vpop.permute.xlu1 %1162  ;;  %v8700_v53 = vmov 1983009808  }
 0x256   : > { %v1393_v16 = vunpack.c.l.s4 %v8700_v53 }
 0x257   : > { %v1149_v10 = vadd.f32 %v1133_v48, %v1107_v8 }
 0x258   : > { %v1237_v49 = vpop.permute.xlu0 %1236  ;;  %v1394_v38 = vunpack.c.0.s8 %v1393_v16 }
 0x259   : > { %v1175_v11 = vadd.f32 %v1159_v44, %v1149_v10  ;;  %v1095_v13 = vpop.permute.xlu1 %1094  ;;  %v1254_v18 = vadd.f32 %v1237_v49, %v1213_v2  ;;  %v9174_v10 = vld [vmem:[#allocation2 + $0xb0] sm:$0x1] }
 0x25a   : > { %v1109_v24 = vadd.f32 %v1095_v13, %v8981_v5  ;;  %v1336_v5 = vsel %vm1116_vm5, %v1334_v33, %v1335_v27  ;;  %v9165_v59 = vsub.s32 %v1394_v38, %v9158_v39  ;;  %v1205_v12 = vrot.slane %v9174_v10, 1 }
 0x25b   : > { %v1214_v17 = vadd.f32 %v9003_v23, %v1175_v11  ;;  %v1280_v29 = vadd.f32 %v1263_v60, %v1254_v18 }
 0x25c   : > { %v1135_v20 = vpop.permute.xlu0 %1134  ;;  %11310 = vst [vmem:[#allocation9_spill] sm:$0xff] %v9165_v59 }
 0x25d   : > { %v1137_v21 = vpop.permute.xlu1 %1136  ;;  %v1150_v15 = vadd.f32 %v1135_v20, %v1108_v62  ;;  %v1255_v30 = vadd.f32 %v1239_v6, %v1214_v17  ;;  %v1343_v6 = vrot.slane %v9161_v52, 2  ;;  %v1340_v17 = vsel %vm1116_vm5, %v1337_v36, %v1339_v56 }
 0x25e   : > { %v1151_v23 = vadd.f32 %v1137_v21, %v1109_v24 }
 0x25f   : > { %v1176_v37 = vadd.f32 %v1161_v3, %v1150_v15  ;;  %v1281_v44 = vadd.f32 %v1265_v57, %v1255_v30  ;;  %v9185_v62 = vsel %vm1116_vm5, %v1341_v0, %v1343_v6 }
 0x260   : > { %v1297_v31 = vpop.permute.xlu0 %1296  ;;  %v1177_v40 = vadd.f32 %v1163_v9, %v1151_v23 }
 0x261   : > { %v1314_v34 = vadd.f32 %v1297_v31, %v1280_v29  ;;  %v1269_v35 = vpop.permute.xlu1 %1268  ;;  %v1215_v63 = vadd.f32 %v9033_v45, %v1176_v37 }
 0x262   : > { %v1216_v3 = vadd.f32 %v9042_v50, %v1177_v40  ;;  %v1342_v50 = vsel %vm1116_vm5, %v1339_v56, %v1341_v0 }
 0x263   : > { %v1353_v42 = vadd.f32 %v1336_v5, %v1314_v34 }
 0x264   : > { %v1267_v41 = vpop.permute.xlu0 %1266 }
 0x265   : > { %v1366_v48 = vadd.f32 %v9155_v58, %v1353_v42  ;;  %v1299_v51 = vpop.permute.xlu1 %1298 }
 0x266   : > { %v1315_v54 = vadd.f32 %v1299_v51, %v1281_v44  ;;  %v8619_v51 = vld [vmem:[%s11279_s6 + $0x68] sm:$0xff]  }
 0x267   : > { %v9167_v60 = vmax.f32 %v1366_v48, 0.0 }
 0x268   : > { %v1241_v2 = vpop.permute.xlu0 %1240  ;;  %v1354_v57 = vadd.f32 %v1338_v55, %v1315_v54 }
 0x269   : > { %v1378_v7 = vpack.c.bf16 %v9167_v60, %v9167_v60  ;;  %v1256_v8 = vadd.f32 %v1241_v2, %v1215_v63  ;;  %v1243_v9 = vpop.permute.xlu1 %1242 }
 0x26a   : > { %v1367_v49 = vadd.f32 %v9155_v58, %v1354_v57  ;;  %v1257_v11 = vadd.f32 %v1243_v9, %v1216_v3 }
 0x26b   : > { %v1398_v45 = vrot.slane %v1378_v7, %v9165_v59  ;;  %v1282_v13 = vadd.f32 %v1267_v41, %v1256_v8 }
 0x26c   : > { %v9180_v18 = vmax.f32 %v1367_v49, 0.0  ;;  %v1301_v19 = vpop.permute.xlu0 %1300  ;;  %v1283_v20 = vadd.f32 %v1269_v35, %v1257_v11 }
 0x26d   : > { %v9188_v21 = vcombine.high %v1398_v45, %v1398_v45  ;;  %v1432_v24 = vshrl.u32 %v1398_v45, 16  ;;  %v1435_v27 = vshll.u32 %v1398_v45, 16  ;;  %v1303_v15 = vpop.permute.xlu1 %1302  ;;  %v1316_v25 = vadd.f32 %v1301_v19, %v1282_v13 }
 0x26e   : > { %v1379_v53 = vpack.c.bf16 %v9180_v18, %v9180_v18  ;;  %v7820_v16 = vpack.c.bf16 %v9180_v18, %v9167_v60  ;;  %v1317_v28 = vadd.f32 %v1303_v15, %v1283_v20  ;;  %v7825_v5 = vrot.slane %v1398_v45, 9 }
 0x26f   : > { %v1434_v30 = vrot.slane %v1432_v24, 6  ;;  %v1437_v31 = vrot.slane %v1435_v27, 7  ;;  %v1355_v23 = vadd.f32 %v1340_v17, %v1316_v25  ;;  %v1647_v38 = vrot.slane %v9188_v21, 7 }
 0x270   : > { %v1406_v33 = vrot.slane %v1379_v53, %v9165_v59  ;;  %v1097_v34 = vpop.permute.xlu0 %1096  ;;  %v1356_v35 = vadd.f32 %v1342_v50, %v1317_v28  ;;  %v1441_v8 = vshll.u32 %v9188_v21, 16 }
 0x271   : > { %v1110_v36 = vadd.f32 %v1097_v34, %v9009_v26  ;;  %v1139_v37 = vpop.permute.xlu1 %1138  ;;  %v1438_v41 = vor.u32 %v1437_v31, %v1434_v30  ;;  %v1368_v44 = vadd.f32 %v9155_v58, %v1355_v23  ;;  %v9224_v49 = vsel %vm9207_vm1, %v7825_v5, %v1647_v38 }
 0x272   : > { %v1407_v42 = vcombine.high %v1406_v33, %v1406_v33  ;;  %v1446_v43 = vshrl.u32 %v1406_v33, 16  ;;  %v1449_v40 = vshll.u32 %v1406_v33, 16  ;;  %v1369_v46 = vadd.f32 %v9155_v58, %v1356_v35 }
 0x273   : > { %v1152_v48 = vadd.f32 %v1139_v37, %v1110_v36  ;;  %v7826_v55 = vrot.slane %v1406_v33, 9  ;;  %v9217_v2 = vmax.f32 %v1368_v44, 0.0  ;;  %v1439_v20 = vrot.slane %v1438_v41, 2 }
 0x274   : > { %v1448_v26 = vrot.slane %v1446_v43, 6  ;;  %v1451_v54 = vrot.slane %v1449_v40, 7  ;;  %v1165_v56 = vpop.permute.xlu0 %1164  ;;  %v1651_v63 = vrot.slane %v1407_v42, 7  ;;  %v1455_v0 = vshll.u32 %v1407_v42, 16 }
 0x275   : > { %v9219_v57 = vmax.f32 %v1369_v46, 0.0  ;;  %v1178_v3 = vadd.f32 %v1165_v56, %v1152_v48  ;;  %v1245_v7 = vpop.permute.xlu1 %1244  ;;  %v1380_v45 = vpack.c.bf16 %v9217_v2, %v9217_v2  ;;  %v7840_v13 = vpack.c.bf16 %v9217_v2, %v9180_v18 }
 0x276   : > { %v1452_v9 = vor.u32 %v1451_v54, %v1448_v26  ;;  %v9228_v11 = vsel %vm9207_vm1, %v7826_v55, %v1651_v63  ;;  %v1457_v29 = vrot.slane %v1455_v0, 7  ;;  %v1443_v31 = vrot.slane %v1441_v8, 7  ;;  %v8610_v0 = vld [vmem:[%s11279_s6 + $0x38] sm:$0xff]  }
 0x277   : > { %v1381_v17 = vpack.c.bf16 %v9219_v57, %v9219_v57  ;;  %v7821_v50 = vpack.c.bf16 %v9219_v57, %v9217_v2  ;;  %v1217_v27 = vadd.f32 %v9065_v4, %v1178_v3  ;;  %v1666_v15 = vcombine.low %v9224_v49, %v9228_v11 }
 0x278   : > { %v1453_v21 = vrot.slane %v1452_v9, 2  ;;  %v1271_v24 = vpop.permute.xlu0 %1270  ;;  %v1414_v53 = vrot.slane %v1380_v45, %v9165_v59  ;;  %v1573_v33 = vrot.slane %v7820_v16, %v9165_v59  ;;  %v1206_v4 = vsel %vm1074_vm4, %v9055_v61, %v1205_v12  ;;  %v8609_v16 = vld [vmem:[%s11279_s6 + $0x30] sm:$0xff]  }
 0x279   : > { %v1422_v25 = vrot.slane %v1381_v17, %v9165_v59  ;;  %v9251_v28 = vrot.slane %v7821_v50, %v9165_v59  ;;  %v1305_v30 = vpop.permute.xlu1 %1304  ;;  %v1258_v23 = vadd.f32 %v1245_v7, %v1217_v27  ;;  %v1444_v46 = vsel %vm9261_vm8, %v1439_v20, %v1443_v31 }
 0x27a   : > { %v1415_v35 = vcombine.high %v1414_v53, %v1414_v53  ;;  %v1460_v5 = vshrl.u32 %v1414_v53, 16  ;;  %v1463_v36 = vshll.u32 %v1414_v53, 16  ;;  %v9270_v10 = vsel %vm9261_vm8, %v1453_v21, %v1457_v29 }
 0x27b   : > { %v1423_v37 = vcombine.high %v1422_v25, %v1422_v25  ;;  %v1474_v61 = vshrl.u32 %v1422_v25, 16  ;;  %v1477_v12 = vshll.u32 %v1422_v25, 16  ;;  %v1581_v38 = vcombine.low %v1573_v33, %v9251_v28 }
 0x27c   : > { %v1099_v42 = vpop.permute.xlu0 %1098  ;;  %v1462_v43 = vrot.slane %v1460_v5, 6  ;;  %v1465_v40 = vrot.slane %v1463_v36, 7  ;;  %v1469_v41 = vshll.u32 %v1415_v35, 16  ;;  %v7827_v60 = vrot.slane %v1414_v53, 9 }
 0x27d   : > { %v1141_v44 = vpop.permute.xlu1 %1140  ;;  %v1476_v48 = vrot.slane %v1474_v61, 6  ;;  %v1479_v26 = vrot.slane %v1477_v12, 7  ;;  %v1483_v54 = vshll.u32 %v1423_v37, 16  ;;  %v1111_v55 = vadd.f32 %v1099_v42, %v9018_v32  ;;  %8335 = vmatmul.mubr.msk.bf16.vlgmr.msra.gmra.mrb[20].mxu1 %vm1027_vm3, %v1581_v38 }
 0x27e   : > { %v1466_v56 = vor.u32 %v1465_v40, %v1462_v43  ;;  %v1284_v63 = vadd.f32 %v1271_v24, %v1258_v23  ;;  %8347 = vmatpush3.bf16.msra.mxu1 %v8609_v16  ;;  %v1492_v3 = vcombine.low %v1444_v46, %v9270_v10  ;;  %8350 = vmatprep.mubr.msk.bf16.mxu1 %vm8695_vm0, %v11292_v1  ;;  %v7828_v8 = vrot.slane %v1422_v25, 9  ;;  %v8611_v46 = vld [vmem:[%s11279_s6 + $0x20] sm:$0xff]  }
 0x27f   : > { %v1480_v7 = vor.u32 %v1479_v26, %v1476_v48  ;;  %v1153_v45 = vadd.f32 %v1141_v44, %v1111_v55  ;;  %8348 = vmatprep.subr.bf16.mxu1 %v11292_v1  ;;  %v1655_v32 = vrot.slane %v1415_v35, 7  ;;  %v1471_v50 = vrot.slane %v1469_v41, 7  ;;  %v1326_v35 = vld [vmem:[#allocation2 + $0xd0] sm:$0x3] }
 0x280   : > { %v1167_v9 = vpop.permute.xlu0 %1166  ;;  %v1467_v17 = vrot.slane %v1466_v56, 2  ;;  %v1318_v19 = vadd.f32 %v1305_v30, %v1284_v63  ;;  %v1659_v20 = vrot.slane %v1423_v37, 7  ;;  %v1485_v24 = vrot.slane %v1483_v54, 7 }
 0x281   : > { %v1481_v21 = vrot.slane %v1480_v7, 2  ;;  %v1179_v27 = vadd.f32 %v1167_v9, %v1153_v45  ;;  %v9286_v29 = vsel %vm9207_vm1, %v7827_v60, %v1655_v32  ;;  %v1247_v31 = vpop.permute.xlu1 %1246  ;;  %v1345_v43 = vrot.slane %v1326_v35, 2 }
 0x282   : > { %v1357_v53 = vadd.f32 %v9185_v62, %v1318_v19  ;;  %8349 = vmatpush3.bf16.msra.mxu1 %v8610_v0  ;;  %v9291_v25 = vsel %vm9261_vm8, %v1467_v17, %v1471_v50  ;;  %v9295_v33 = vsel %vm9207_vm1, %v7828_v8, %v1659_v20  ;;  %v1933_v30 = vcombine.low %v9228_v11, %v9286_v29  ;;  %v8615_v19 = vld [vmem:[%s11279_s6 + $0x40] sm:$0xff]  }
 0x283   : > { %v1218_v23 = vadd.f32 %v1206_v4, %v1179_v27  ;;  %v9301_v5 = vsel %vm9261_vm8, %v1481_v21, %v1485_v24  ;;  %8362 = vmatprep.subr.bf16.mxu1 %v11292_v1  ;;  %v1667_v62 = vcombine.low %v9286_v29, %v9295_v33  ;;  %v1849_v36 = vcombine.low %v9270_v10, %v9291_v25  ;;  %v8620_v10 = vld [vmem:[%s11279_s6 + $0x78] sm:$0xff]  }
 0x284   : > { %v1370_v16 = vadd.f32 %v9155_v58, %v1357_v53  ;;  %v1493_v37 = vcombine.low %v9291_v25, %v9301_v5  ;;  %v1674_v4 = vrot.slane %v1666_v15, %v9165_v59  ;;  %v1273_v42 = vpop.permute.xlu0 %1272  ;;  %v1500_v40 = vrot.slane %v1492_v3, %v9165_v59  ;;  %v8613_v3 = vld [vmem:[%s11279_s6 + $0x28] sm:$0xff]  }
 0x285   : > { %v1259_v61 = vadd.f32 %v1247_v31, %v1218_v23  ;;  %v9316_v12 = vrot.slane %v1667_v62, %v9165_v59  ;;  %v1307_v26 = vpop.permute.xlu1 %1306  ;;  %v1346_v63 = vsel %vm1116_vm5, %v1343_v6, %v1345_v43  ;;  %v1755_v0 = vrot.slane %v7840_v13, %v9165_v59  ;;  %v8612_v6 = vld [vmem:[%s11279_s6 + $0x50] sm:$0xff]  }
 0x286   : > { %v1376_v38 = vmax.f32 %v1370_v16, 0.0  ;;  %v9320_v41 = vrot.slane %v1493_v37, %v9165_v59  ;;  %v8616_v37 = vld [vmem:[%s11279_s6 + $0x48] sm:$0xff]   ;;  %v8618_v43 = vld [vmem:[%s11279_s6 + $0x70] sm:$0xff]  }
 0x287   : > { %v1285_v44 = vadd.f32 %v1273_v42, %v1259_v61  ;;  %v1682_v48 = vcombine.low %v1674_v4, %v9316_v12 }
 0x288   : > { %v1382_v49 = vpack.c.bf16 %v1376_v38, %v1376_v38  ;;  %v7841_v15 = vpack.c.bf16 %v1376_v38, %v9219_v57  ;;  %v1508_v54 = vcombine.low %v1500_v40, %v9320_v41 }
 0x289   : > { %v1319_v55 = vadd.f32 %v1307_v26, %v1285_v44 }
 0x28a   : > { %v1762_v56 = vrot.slane %v7841_v15, %v9165_v59  ;;  %v1828_v60 = vrot.slane %v1382_v49, %v9165_v59  ;;  %8327 = vmatmul.mubr.msk.bf16.vlgmr.msra.gmra.mrb[40].mxu0 %vm1027_vm3, %v1508_v54  ;;  %v1857_v15 = vrot.slane %v1849_v36, %v9165_v59 }
 0x28b   : > { %v1358_v57 = vadd.f32 %v1346_v63, %v1319_v55  ;;  %8339 = vmatpush3.bf16.msra.mxu0 %v8611_v46  ;;  %8342 = vmatprep.mubr.msk.bf16.mxu0 %vm8695_vm0, %v11292_v1 }
 0x28c   : > { %v1829_v7 = vcombine.high %v1828_v60, %v1828_v60  ;;  %v1831_v52 = vshrl.u32 %v1828_v60, 16  ;;  %v1834_v8 = vshll.u32 %v1828_v60, 16  ;;  %8340 = vmatprep.subr.bf16.mxu0 %v11292_v1  ;;  %v7852_v18 = vrot.slane %v1828_v60, 9 }
 0x28d   : > { %v1371_v2 = vadd.f32 %v9155_v58, %v1358_v57  ;;  %v1763_v13 = vcombine.low %v1755_v0, %v1762_v56  ;;  %v8614_v58 = vld [vmem:[%s11279_s6 + $0x58] sm:$0xff]  }
 0x28e   : > { %v1833_v9 = vrot.slane %v1831_v52, 6  ;;  %v1836_v45 = vrot.slane %v1834_v8, 7  ;;  %v1926_v32 = vrot.slane %v1829_v7, 7  ;;  %v1840_v17 = vshll.u32 %v1829_v7, 16  ;;  %v8621_v7 = vld [vmem:[%s11279_s6 + $0x80] sm:$0xff]   ;;  %v8624_v52 = vld [vmem:[%s11281_s8 + $0x10] sm:$0xff]  }
 0x28f   : > { %v1377_v50 = vmax.f32 %v1371_v2, 0.0  ;;  %8351 = vmatmul.mubr.msk.bf16.vlgmr.msra.gmra.mrb[24].mxu1 %vm1027_vm3, %v1763_v13  ;;  %8341 = vmatpush3.bf16.msra.mxu0 %v8613_v3  ;;  %v8625_v8 = vld [vmem:[%s11281_s8 + $0x8] sm:$0xff]  }
 0x290   : > { %8363 = vmatpush3.bf16.msra.mxu1 %v8612_v6  ;;  %8354 = vmatprep.subr.bf16.mxu0 %v11292_v1  ;;  %v1927_v20 = vsel %vm9207_vm1, %v7852_v18, %v1926_v32  ;;  %v1837_v21 = vor.u32 %v1836_v45, %v1833_v9  ;;  %v1842_v23 = vrot.slane %v1840_v17, 7  ;;  %v8626_v6 = vld [vmem:[%s11281_s8 + $0x18] sm:$0xff]  }
 0x291   : > { %v1383_v24 = vpack.c.bf16 %v1377_v50, %v1377_v50  ;;  %v7864_v27 = vpack.c.bf16 %v1377_v50, %v1376_v38  ;;  %8364 = vmatprep.subr.bf16.mxu1 %v11292_v1  ;;  %8366 = vmatprep.mubr.msk.bf16.mxu1 %vm8695_vm0, %v11292_v1  ;;  %v1934_v53 = vcombine.low %v9295_v33, %v1927_v20 }
 0x292   : > { %8343 = vmatmul.mubr.msk.bf16.vlgmr.msra.gmra.mrb[44].mxu0 %vm1027_vm3, %v1682_v48  ;;  %v1838_v31 = vrot.slane %v1837_v21, 2  ;;  %v1941_v33 = vrot.slane %v1933_v30, %v9165_v59 }
 0x293   : > { %v2021_v35 = vrot.slane %v7864_v27, %v9165_v59  ;;  %v2087_v62 = vrot.slane %v1383_v24, %v9165_v59  ;;  %8355 = vmatpush3.bf16.msra.mxu0 %v8615_v19  ;;  %v1948_v16 = vrot.slane %v1934_v53, %v9165_v59  ;;  %8358 = vmatprep.mubr.msk.bf16.mxu0 %vm8695_vm0, %v11292_v1 }
 0x294   : > { %8365 = vmatpush3.bf16.msra.mxu1 %v8614_v58  ;;  %8356 = vmatprep.subr.bf16.mxu0 %v11292_v1  ;;  %v1843_v61 = vsel %vm9261_vm8, %v1838_v31, %v1842_v23  ;;  %v8701_v31 = vmov 1966171168  }
 0x295   : > { %v2088_v4 = vcombine.high %v2087_v62, %v2087_v62  ;;  %v2090_v38 = vshrl.u32 %v2087_v62, 16  ;;  %v2093_v42 = vshll.u32 %v2087_v62, 16  ;;  %8378 = vmatprep.subr.bf16.mxu1 %v11292_v1  ;;  %v7875_v40 = vrot.slane %v2087_v62, 9 }
 0x296   : > { %v1949_v44 = vcombine.low %v1941_v33, %v1948_v16  ;;  %v1850_v46 = vcombine.low %v9301_v5, %v1843_v61  ;;  %v2022_v11 = vcombine.low %v9251_v28, %v2021_v35  ;;  %v8617_v28 = vld [vmem:[%s11279_s6 + $0x60] sm:$0xff]   ;;  %v2328_v23 = vunpack.c.l.s4 %v8701_v31 }
 0x297   : > { %v2092_v29 = vrot.slane %v2090_v38, 6  ;;  %v2095_v30 = vrot.slane %v2093_v42, 7  ;;  %v2099_v48 = vshll.u32 %v2088_v4, 16  ;;  %v2177_v49 = vrot.slane %v2088_v4, 7  ;;  %8357 = vmatpush3.bf16.msra.mxu0 %v8616_v37 }
 0x298   : > { %8367 = vmatmul.mubr.msk.bf16.vlgmr.msra.gmra.mrb[28].mxu1 %vm1027_vm3, %v1949_v44  ;;  %8370 = vmatprep.subr.bf16.mxu0 %v11292_v1  ;;  %v1864_v26 = vrot.slane %v1850_v46, %v9165_v59  ;;  %v2329_v4 = vunpack.c.0.s8 %v2328_v23  ;;  %v7894_v42 = vld.sshfl [vmem:[#allocation3] sm:$0x33 pattern:$0x75316420] }
 0x299   : > { %v2096_v54 = vor.u32 %v2095_v30, %v2092_v29  ;;  %8379 = vmatpush3.bf16.msra.mxu1 %v8618_v43  ;;  %8382 = vmatprep.mubr.msk.bf16.mxu1 %vm8695_vm0, %v11292_v1  ;;  %v2178_v5 = vsel %vm9207_vm1, %v7875_v40, %v2177_v49  ;;  %v2101_v56 = vrot.slane %v2099_v48, 7  ;;  %v2480_v46 = vcombine.high %v7894_v42, %v7894_v42  ;;  %vm2623_vm1 = vmor %vm2621_vm14, %vm2622_vm15  ;;  %v7888_v48 = vld.sshfl [vmem:[#allocation3] sm:$0x13 pattern:$0x75316420] }
 0x29a   : > { %v1865_v55 = vcombine.low %v1857_v15, %v1864_v26  ;;  %8380 = vmatprep.subr.bf16.mxu1 %v11292_v1  ;;  %v2184_v25 = vcombine.low %v1927_v20, %v2178_v5  ;;  %v7895_v26 = vld.sshfl [vmem:[#allocation3 + $0x4] sm:$0x33 pattern:$0x75316420]  ;;  %vm2625_vm7 = vmor %vm2623_vm1, %vm2624_vm6  ;;  %vm2302_vm14 = vcmask 256001   ;;  %vm6155_vm15 = vcmask 253952  }
 0x29b   : > { %v2097_v36 = vrot.slane %v2096_v54, 2  ;;  %vm6457_vm1 = vcmask 254976   ;;  %vm6311_vm6 = vcmask 261121  }
 0x29c   : > { %8359 = vmatmul.mubr.msk.bf16.vlgmr.msra.gmra.mrb[48].mxu0 %vm1027_vm3, %v1865_v55  ;;  %v2191_v60 = vrot.slane %v2184_v25, %v9165_v59 }
 0x29d   : > { %8371 = vmatpush3.bf16.msra.mxu0 %v8617_v28  ;;  %8374 = vmatprep.mubr.msk.bf16.mxu0 %vm8695_vm0, %v11292_v1  ;;  %v2102_v63 = vsel %vm9261_vm8, %v2097_v36, %v2101_v56  ;;  %vm2626_vm8 = vsmask.f32 5396  ;;  %v7889_v36 = vld.sshfl [vmem:[#allocation3 + $0x4] sm:$0x13 pattern:$0x75316420]  ;;  %v2326_v56 = vcombine.high %v7888_v48, %v7888_v48 }
 0x29e   : > { %8372 = vmatprep.subr.bf16.mxu0 %v11292_v1  ;;  %8381 = vmatpush3.bf16.msra.mxu1 %v8620_v10  ;;  %v2108_v0 = vcombine.low %v1843_v61, %v2102_v63  ;;  %v2192_v57 = vcombine.low %v9316_v12, %v2191_v60  ;;  %v8622_v12 = vld [vmem:[%s11279_s6 + $0x88] sm:$0xff]   ;;  %vm2627_vm9 = vmor %vm2625_vm7, %vm2626_vm8  ;;  %vm7464_vm7 = vcmask 1041408   ;;  %vm7460_vm8 = vcmask 15360  }
 0x29f   : > { %8394 = vmatprep.subr.bf16.mxu1 %v11292_v1  ;;  %vm9504_vm11 = vmor %vm2627_vm9, %vm2628_vm10 }
 0x2a0   : > { %v2115_v3 = vrot.slane %v2108_v0, %v9165_v59  ;;  %vm9512_vm13 = vmor %vm9504_vm11, %vm2630_vm12 }
 0x2a1   : > { %8373 = vmatpush3.bf16.msra.mxu0 %v8619_v51  ;;  %v2504_v51 = vcombine.high %v7895_v26, %v7895_v26 }
 0x2a2   : > { %8386 = vmatprep.subr.bf16.mxu0 %v11292_v1  ;;  %v2116_v34 = vcombine.low %v9320_v41, %v2115_v3  ;;  %v8623_v41 = vld [vmem:[%s11281_s8] sm:$0xff]   ;;  %v2349_v3 = vcombine.high %v7889_v36, %v7889_v36 }
 0x2a4   : > { %8375 = vmatmul.mubr.msk.bf16.vlgmr.msra.gmra.mrb[52].mxu0 %vm1027_vm3, %v2022_v11  ;;  %8383 = vmatmul.mubr.msk.bf16.vlgmr.msra.gmra.mrb[32].mxu1 %vm1027_vm3, %v2116_v34  ;;  %v9487_v11 = vsub.s32 %v2329_v4, %v9158_v39 }
 0x2a5   : > { %8387 = vmatpush3.bf16.msra.mxu0 %v8621_v7  ;;  %8390 = vmatprep.mubr.msk.bf16.mxu0 %vm8695_vm0, %v11292_v1 }
 0x2a6   : > { %8388 = vmatprep.subr.bf16.mxu0 %v11292_v1  ;;  %8398 = vmatprep.mubr.msk.bf16.mxu1 %vm8695_vm0, %v11292_v1  ;;  %v2487_v54 = vrot.slane %v7894_v42, %v9487_v11  ;;  %v2494_v5 = vrot.slane %v2480_v46, %v9487_v11  ;;  %v9492_v60 = vrot.slane %v7888_v48, %v9487_v11 }
 0x2a7   : > { %8395 = vmatpush3.bf16.msra.mxu1 %v8624_v52  ;;  %v2340_v34 = vrot.slane %v2326_v56, %v9487_v11  ;;  %v2511_v52 = vrot.slane %v7895_v26, %v9487_v11  ;;  %v9518_v4 = vrot.slane %v2349_v3, %v9487_v11 }
 0x2a8   : > { %8396 = vmatprep.subr.bf16.mxu1 %v11292_v1  ;;  %v2495_v0 = vcombine.high %v2487_v54, %v2487_v54  ;;  %v2496_v7 = vcombine.high %v2494_v5, %v2494_v5 }
 0x2a9   : > { %8389 = vmatpush3.bf16.msra.mxu0 %v8622_v12  ;;  %v2341_v12 = vcombine.high %v9492_v60, %v9492_v60  ;;  %v2519_v42 = vcombine.high %v2511_v52, %v2511_v52 }
 0x2aa   : > { %8410 = vmatprep.subr.bf16.mxu0 %v11292_v1 }
 0x2ab   : > { %8397 = vmatpush3.bf16.msra.mxu1 %v8626_v6  ;;  %v2674_v56 = vshrl.u32 %v2519_v42, 16 }
 0x2ac   : > { %8391 = vmatmul.mubr.msk.bf16.vlgmr.msra.gmra.mrb[56].mxu0 %vm1027_vm3, %v2192_v57  ;;  %8426 = vmatprep.subr.bf16.mxu1 %v11292_v1  ;;  %v7932_v57 = vld.sshfl [vmem:[#allocation3] sm:$0x32 pattern:$0x75316420] }
 0x2ad   : > { %8414 = vmatprep.mubr.msk.bf16.mxu0 %vm8695_vm0, %v11292_v1  ;;  %8411 = vmatpush3.bf16.msra.mxu0 %v8623_v41  ;;  %v9498_v41 = vrot.slane %v7889_v36, %v9487_v11  ;;  %v2671_v36 = vshll.u32 %v2519_v42, 16 }
 0x2ae   : > { %8412 = vmatprep.subr.bf16.mxu0 %v11292_v1 }
 0x2af   : > { %v2978_v46 = vcombine.low %v2341_v12, %v9498_v41 }
 0x2b1   : > { %8413 = vmatpush3.bf16.msra.mxu0 %v8625_v8 }
 0x2b2   : > { %8442 = vmatprep.subr.bf16.mxu0 %v11292_v1 }
 0x350   : > { %v1631_v18 = vpop.f32.mrb[20].mxu1 }
 0x351   : > { %v8336_v2 = vpop.f32.mrb[21].mxu1 }
 0x352   : > { %v1634_v13 = vpop.f32.mrb[22].mxu1 }
 0x353   : > { %v8337_v9 = vpop.f32.mrb[23].mxu1 }
 0x354   : > { %v3186_v9 = vcombine.high %v7932_v57, %v7932_v57 }
 0x35d   : > { %v1558_v45 = vpop.f32.mrb[40].mxu0 }
 0x35e   : > { %v1632_v32 = vadd.f32 %v1631_v18, %v1558_v45  ;;  %v8328_v17 = vpop.f32.mrb[41].mxu0  ;;  %v9502_v18 = vrot.slane %v2504_v51, %v9487_v11 }
 0x35f   : > { %v1561_v50 = vpop.f32.mrb[42].mxu0 }
 0x360   : > { %v1635_v19 = vadd.f32 %v1634_v13, %v1561_v50  ;;  %v8329_v58 = vpop.f32.mrb[43].mxu0  ;;  %v2633_v13 = vshrl.u32 %v2487_v54, 16  ;;  %v2638_v50 = vshll.u32 %v2494_v5, 16  ;;  %v2663_v31 = vshll.u32 %v9502_v18, 16 }
 0x361   : > { %v2646_v58 = vshll.u32 %v2495_v0, 16 }
 0x362   : > { %v1813_v20 = vpop.f32.mrb[24].mxu1  ;;  %v2640_v48 = vsel %vm9512_vm13, %v2633_v13, %v2638_v50 }
 0x363   : > { %v8352_v21 = vpop.f32.mrb[25].mxu1 }
 0x364   : > { %v1816_v24 = vpop.f32.mrb[26].mxu1 }
 0x365   : > { %v8353_v27 = vpop.f32.mrb[27].mxu1  ;;  %v1732_v53 = vpop.f32.mrb[44].mxu0 }
 0x366   : > { %v1739_v35 = vadd.f32 %v1732_v53, %v1632_v32  ;;  %v8344_v62 = vpop.f32.mrb[45].mxu0  ;;  %v2654_v27 = vshll.u32 %v2496_v7, 16  ;;  %v2658_v53 = vshrl.u32 %v2511_v52, 16 }
 0x367   : > { %v1735_v16 = vpop.f32.mrb[46].mxu0  ;;  %v7955_v7 = vld.sshfl [vmem:[#allocation3 + $0x18] sm:$0x13 pattern:$0x75316420] }
 0x368   : > { %v1740_v37 = vadd.f32 %v1735_v16, %v1635_v19  ;;  %v8345_v33 = vpop.f32.mrb[47].mxu0  ;;  %v1820_v61 = vadd.f32 %v1813_v20, %v1739_v35  ;;  %v2641_v19 = vshrl.u32 %v2494_v5, 16  ;;  %v9539_v54 = vsel %vm9512_vm13, %v2658_v53, %v2663_v31  ;;  %v7970_v5 = vld.sshfl [vmem:[#allocation3 + $0x18] sm:$0x33 pattern:$0x75316420] }
 0x369   : > { %v7933_v33 = vld.sshfl [vmem:[#allocation3 + $0x4] sm:$0x32 pattern:$0x75316420]  ;;  %v9557_v50 = vrot.slane %v7955_v7, %v9487_v11  ;;  %v4020_v31 = vrot.slane %v7970_v5, %v9487_v11 }
 0x36a   : > { %v1821_v38 = vadd.f32 %v1816_v24, %v1740_v37  ;;  %v2649_v24 = vshrl.u32 %v2495_v0, 16 }
 0x36b   : > { %v1999_v43 = vpop.f32.mrb[28].mxu1 }
 0x36c   : > { %v8368_v40 = vpop.f32.mrb[29].mxu1  ;;  %v2656_v26 = vsel %vm9512_vm13, %v2649_v24, %v2654_v27 }
 0x36d   : > { %v2002_v44 = vpop.f32.mrb[30].mxu1  ;;  %v2788_v52 = vcombine.low %v2656_v26, %v9539_v54  ;;  %v4028_v26 = vcombine.high %v4020_v31, %v4020_v31 }
 0x36e   : > { %v8369_v29 = vpop.f32.mrb[31].mxu1 }
 0x36f   : > { %v1915_v30 = vpop.f32.mrb[48].mxu0  ;;  %v2520_v29 = vcombine.high %v9502_v18, %v9502_v18  ;;  %v2804_v53 = vrot.slane %v2788_v52, %v9487_v11  ;;  %v4169_v52 = vshll.u32 %v4028_v26, 16 }
 0x370   : > { %v1922_v49 = vadd.f32 %v1915_v30, %v1820_v61  ;;  %v8360_v15 = vpop.f32.mrb[49].mxu0  ;;  %v3193_v61 = vrot.slane %v7932_v57, %v9487_v11  ;;  %v2994_v57 = vrot.slane %v2978_v46, %v9487_v11 }
 0x371   : > { %v1918_v28 = vpop.f32.mrb[50].mxu0  ;;  %v2648_v15 = vsel %vm9512_vm13, %v2641_v19, %v2646_v58  ;;  %v2679_v3 = vshll.u32 %v2520_v29, 16  ;;  %v3658_v19 = vcombine.high %v7955_v7, %v7955_v7  ;;  %v4156_v7 = vshrl.u32 %v4020_v31, 16 }
 0x372   : > { %v1923_v55 = vadd.f32 %v1918_v28, %v1821_v38  ;;  %v8361_v10 = vpop.f32.mrb[51].mxu0  ;;  %v2006_v25 = vadd.f32 %v1999_v43, %v1922_v49  ;;  %v9522_v38 = vcombine.high %v9498_v41, %v9498_v41  ;;  %v3200_v43 = vrot.slane %v3186_v9, %v9487_v11 }
 0x373   : > { %v3210_v49 = vcombine.high %v7933_v33, %v7933_v33  ;;  %v3201_v28 = vcombine.high %v3193_v61, %v3193_v61  ;;  %v7883_v10 = vld [vmem:[%s11280_s7] ss:$0 sm:$0xff]  ;;  %v2787_v12 = vcombine.low %v2640_v48, %v2648_v15  ;;  %v9563_v24 = vsel %vm9512_vm13, %v2674_v56, %v2679_v3  ;;  %v8003_v15 = vld.sshfl [vmem:[#allocation3 + $0x18] sm:$0x32 pattern:$0x75316420] }
 0x374   : > { %v2007_v63 = vadd.f32 %v2002_v44, %v1923_v55  ;;  %v2977_v44 = vcombine.low %v9492_v60, %v2340_v34  ;;  %v2979_v30 = vcombine.low %v9518_v4, %v9522_v38  ;;  %v3202_v60 = vcombine.high %v3200_v43, %v3200_v43 }
 0x375   : > { %v2797_v27 = vrot.slane %v2787_v12, %v9487_v11  ;;  %v9572_v42 = vrot.slane %v3658_v19, %v9487_v11  ;;  %v3679_v56 = vcombine.low %v9498_v41, %v9518_v4  ;;  %v4519_v3 = vcombine.high %v8003_v15, %v8003_v15 }
 0x376   : > { %v2987_v0 = vrot.slane %v2977_v44, %v9487_v11  ;;  %v9552_v9 = vrot.slane %v2979_v30, %v9487_v11  ;;  %v9632_v31 = vrot.slane %v8003_v15, %v9487_v11 }
 0x377   : > { %v2072_v8 = vpop.f32.mrb[52].mxu0  ;;  %v2166_v6 = vpop.f32.mrb[32].mxu1 }
 0x378   : > { %v2079_v45 = vadd.f32 %v2072_v8, %v2006_v25  ;;  %v8376_v32 = vpop.f32.mrb[53].mxu0  ;;  %v8384_v17 = vpop.f32.mrb[33].mxu1  ;;  %v2666_v25 = vshrl.u32 %v9502_v18, 16  ;;  %v9549_v8 = vrot.slane %v3210_v49, %v9487_v11  ;;  %v9578_v48 = vcombine.low %v2987_v0, %v2994_v57 }
 0x379   : > { %v2075_v20 = vpop.f32.mrb[54].mxu0  ;;  %v2169_v21 = vpop.f32.mrb[34].mxu1  ;;  %v3217_v32 = vrot.slane %v7933_v33, %v9487_v11 }
 0x37a   : > { %v2080_v23 = vadd.f32 %v2075_v20, %v2007_v63  ;;  %v2173_v35 = vadd.f32 %v2166_v6, %v2079_v45  ;;  %v8377_v62 = vpop.f32.mrb[55].mxu0  ;;  %v8385_v16 = vpop.f32.mrb[35].mxu1  ;;  %v4013_v6 = vcombine.high %v7970_v5, %v7970_v5  ;;  %v3328_v45 = vcombine.low %v3200_v43, %v3201_v28 }
 0x37b   : > { %v3329_v17 = vcombine.low %v3202_v60, %v9549_v8  ;;  %v9576_v43 = vcombine.high %v9557_v50, %v9557_v50  ;;  %v7942_v60 = vcombine.high %v3217_v32, %v9549_v8 }
 0x37c   : > { %v2174_v40 = vadd.f32 %v2169_v21, %v2080_v23  ;;  %v2673_v21 = vsel %vm9512_vm13, %v2666_v25, %v2671_v36  ;;  %v4027_v23 = vrot.slane %v4013_v6, %v9487_v11  ;;  %v3338_v33 = vrot.slane %v3328_v45, %v9487_v11 }
 0x37d   : > { %v3345_v61 = vrot.slane %v3329_v17, %v9487_v11  ;;  %v2789_v49 = vcombine.low %v2673_v21, %v9563_v24  ;;  %v3777_v25 = vcombine.low %v9572_v42, %v9576_v43  ;;  %v2819_v36 = vcombine.low %v2797_v27, %v2804_v53 }
 0x37e   : > { %v4029_v28 = vcombine.high %v4027_v23, %v4027_v23  ;;  %v4185_v57 = vcombine.low %v9539_v54, %v2673_v21  ;;  %v4164_v12 = vshrl.u32 %v4027_v23, 16  ;;  %v4172_v6 = vshrl.u32 %v4028_v26, 16 }
 0x37f   : > { %v2242_v55 = vpop.f32.mrb[56].mxu0  ;;  %v9599_v4 = vrot.slane %v3777_v25, %v9487_v11  ;;  %v9605_v54 = vrot.slane %v2819_v36, %v9487_v11  ;;  %v9611_v45 = vrot.slane %v7942_v60, %v9487_v11 }
 0x380   : > { %v2249_v51 = vadd.f32 %v2242_v55, %v2173_v35  ;;  %v8392_v63 = vpop.f32.mrb[57].mxu0  ;;  %v9625_v27 = vrot.slane %v4185_v57, %v9487_v11 }
 0x381   : > { %v2245_v34 = vpop.f32.mrb[58].mxu0 }
 0x382   : > { %v2258_v18 = vadd.f32 %v7883_v10, %v2249_v51  ;;  %v2250_v2 = vadd.f32 %v2245_v34, %v2174_v40  ;;  %v8393_v13 = vpop.f32.mrb[59].mxu0  ;;  %v4414_v40 = vcombine.high %v3217_v32, %v3217_v32  ;;  %v9587_v51 = vcombine.low %v3338_v33, %v3345_v61 }
 0x383   : > { %v4161_v34 = vshll.u32 %v4027_v23, 16  ;;  %v9608_v13 = vrot.slane %v3679_v56, %v9487_v11  ;;  %v9636_v23 = vsel %vm9512_vm13, %v4164_v12, %v4169_v52 }
 0x384   : > { %v2260_v58 = vmax.f32 %v2258_v18, 0.0  ;;  %v2259_v20 = vadd.f32 %v7883_v10, %v2250_v2  ;;  %v9592_v0 = vcombine.low %v9549_v8, %v4414_v40  ;;  %v4177_v18 = vshll.u32 %v4029_v28, 16 }
 0x385   : > { %v9602_v2 = vrot.slane %v2789_v49, %v9487_v11  ;;  %v9629_v53 = vsel %vm9512_vm13, %v4156_v7, %v4161_v34 }
 0x386   : > { %v2264_v35 = vcombine.high %v2260_v58, %v2260_v58  ;;  %v8121_v62 = vpack.c.bf16 %v2260_v58, %v2260_v58  ;;  %v2261_v16 = vmax.f32 %v2259_v20, 0.0  ;;  %v9620_v58 = vrot.slane %v4519_v3, %v9487_v11  ;;  %v9622_v20 = vld.sshfl [vmem:[#allocation3 + $0x1c] sm:$0x33 pattern:$0x75316420] }
 0x387   : > { %v9645_v61 = vsel %vm9512_vm13, %v4172_v6, %v4177_v18 }
 0x388   : > { %v8122_v44 = vpack.c.bf16 %v2264_v35, %v2264_v35  ;;  %v2293_v46 = vrot.slane %v8121_v62, 7  ;;  %v2265_v29 = vcombine.high %v2261_v16, %v2261_v16  ;;  %v8123_v30 = vpack.c.bf16 %v2261_v16, %v2261_v16 }
 0x38a   : > { %v2294_v5 = vrot.slane %v8122_v44, 7  ;;  %2303 = vst.msk [vmem:[#allocation3 + $0x8] sm:$0x6] %vm2302_vm14, %v2293_v46  ;;  %v8124_v55 = vpack.c.bf16 %v2265_v29, %v2265_v29  ;;  %v2295_v10 = vrot.slane %v8123_v30, 7  ;;  %v9652_v30 = vrot.slane %v9622_v20, %v9487_v11 }
 0x38c   : > { %2304 = vst.msk [vmem:[#allocation3 + $0xc] sm:$0x6] %vm2302_vm14, %v2294_v5  ;;  %v2296_v63 = vrot.slane %v8124_v55, 7  ;;  %2305 = vst.msk [vmem:[#allocation3 + $0x10] sm:$0x6] %vm2302_vm14, %v2295_v10 }
 0x38e   : > { %2306 = vst.msk [vmem:[#allocation3 + $0x14] sm:$0x6] %vm2302_vm14, %v2296_v63 }
 0x391   : > { %v7890_v21 = vld.sshfl [vmem:[#allocation3 + $0x8] sm:$0x13 pattern:$0x75316420] }
 0x392   : > { %v2372_v35 = vcombine.high %v7890_v21, %v7890_v21  ;;  %v9639_v62 = vrot.slane %v7890_v21, %v9487_v11  ;;  %v7896_v16 = vld.sshfl [vmem:[#allocation3 + $0x8] sm:$0x33 pattern:$0x75316420] }
 0x393   : > { %v2528_v40 = vcombine.high %v7896_v16, %v7896_v16  ;;  %v2535_v44 = vrot.slane %v7896_v16, %v9487_v11  ;;  %v7891_v46 = vld.sshfl [vmem:[#allocation3 + $0xc] sm:$0x13 pattern:$0x75316420] }
 0x394   : > { %v9655_v49 = vrot.slane %v2372_v35, %v9487_v11  ;;  %v7892_v15 = vld.sshfl [vmem:[#allocation3 + $0x10] sm:$0x13 pattern:$0x75316420]  ;;  %v9659_v26 = vcombine.high %v9639_v62, %v9639_v62  ;;  %v2395_v28 = vcombine.high %v7891_v46, %v7891_v46  ;;  %v9662_v5 = vrot.slane %v7891_v46, %v9487_v11 }
 0x395   : > { %v2542_v55 = vrot.slane %v2528_v40, %v9487_v11  ;;  %v9665_v10 = vcombine.high %v2535_v44, %v2535_v44  ;;  %v2683_v25 = vshrl.u32 %v2535_v44, 16  ;;  %v9667_v36 = vld.sshfl [vmem:[#allocation3 + $0x14] sm:$0x13 pattern:$0x75316420]  ;;  %v2418_v56 = vcombine.high %v7892_v15, %v7892_v15 }
 0x396   : > { %v2980_v60 = vcombine.low %v9639_v62, %v9655_v49  ;;  %v9672_v63 = vrot.slane %v2395_v28, %v9487_v11  ;;  %v9676_v57 = vcombine.high %v9662_v5, %v9662_v5  ;;  %v9679_v3 = vrot.slane %v7892_v15, %v9487_v11  ;;  %v7897_v16 = vld.sshfl [vmem:[#allocation3 + $0xc] sm:$0x33 pattern:$0x75316420] }
 0x397   : > { %v2688_v7 = vshll.u32 %v2542_v55, 16  ;;  %v2691_v34 = vshrl.u32 %v2542_v55, 16  ;;  %v2696_v12 = vshll.u32 %v9665_v10, 16  ;;  %v9683_v52 = vrot.slane %v2418_v56, %v9487_v11 }
 0x398   : > { %v3008_v6 = vrot.slane %v2980_v60, %v9487_v11  ;;  %v9688_v18 = vcombine.high %v9679_v3, %v9679_v3  ;;  %v9692_v21 = vrot.slane %v9667_v36, %v9487_v11  ;;  %v3026_v35 = vcombine.low %v9659_v26, %v9662_v5  ;;  %v7899_v29 = vld.sshfl [vmem:[#allocation3 + $0x14] sm:$0x33 pattern:$0x75316420] }
 0x399   : > { %v9698_v40 = vsel %vm9512_vm13, %v2683_v25, %v2688_v7  ;;  %v9702_v44 = vsel %vm9512_vm13, %v2691_v34, %v2696_v12  ;;  %v3027_v46 = vcombine.low %v9672_v63, %v9676_v57  ;;  %v3028_v15 = vcombine.low %v9679_v3, %v9683_v52  ;;  %v7898_v7 = vld.sshfl [vmem:[#allocation3 + $0x10] sm:$0x33 pattern:$0x75316420] }
 0x39a   : > { %v3010_v28 = vcombine.low %v9552_v9, %v3008_v6  ;;  %v2790_v56 = vcombine.low %v9698_v40, %v9702_v44  ;;  %v3029_v60 = vcombine.low %v9688_v18, %v9692_v21  ;;  %v3036_v25 = vrot.slane %v3026_v35, %v9487_v11 }
 0x39b   : > { %v3043_v34 = vrot.slane %v3027_v46, %v9487_v11  ;;  %v3050_v12 = vrot.slane %v3028_v15, %v9487_v11  ;;  %v2544_v33 = vcombine.high %v2542_v55, %v2542_v55  ;;  %v2552_v19 = vcombine.high %v7897_v16, %v7897_v16  ;;  %v8629_v55 = vld [vmem:[%s11281_s8 + $0x30] sm:$0xff]  }
 0x39c   : > { %v3024_v22 = vrot.slane %v3010_v28, %v9487_v11  ;;  %v2818_v32 = vrot.slane %v2790_v56, %v9487_v11  ;;  %v3057_v9 = vrot.slane %v3029_v60, %v9487_v11  ;;  %v2559_v6 = vrot.slane %v7897_v16, %v9487_v11 }
 0x39d   : > { %v3058_v17 = vcombine.low %v3036_v25, %v3043_v34  ;;  %v2566_v1 = vrot.slane %v2552_v19, %v9487_v11  ;;  %v2576_v35 = vcombine.high %v7898_v7, %v7898_v7  ;;  %v2583_v41 = vrot.slane %v7898_v7, %v9487_v11 }
 0x39e   : > { %v11325_v46 = vrot.slane %v9578_v48, %v9487_v11  ;;  %v2820_v28 = vcombine.low %v9602_v2, %v2818_v32  ;;  %v3059_v56 = vcombine.low %v3050_v12, %v3057_v9  ;;  %v2567_v60 = vcombine.high %v2559_v6, %v2559_v6 }
 0x39f   : > { %v3066_v16 = vrot.slane %v3058_v17, %v9487_v11  ;;  %v2568_v25 = vcombine.high %v2566_v1, %v2566_v1  ;;  %v2590_v19 = vrot.slane %v2576_v35, %v9487_v11  ;;  %v2591_v34 = vcombine.high %v2583_v41, %v2583_v41 }
 0x3a0   : > { %v3025_v15 = vcombine.low %v11325_v46, %v3024_v22  ;;  %v2834_v7 = vrot.slane %v2820_v28, %v9487_v11  ;;  %v3073_v39 = vrot.slane %v3059_v56, %v9487_v11  ;;  %v2600_v59 = vcombine.high %v7899_v29, %v7899_v29  ;;  %v8627_v22 = vld [vmem:[%s11281_s8 + $0x20] sm:$0xff]   ;;  %v8630_v28 = vld [vmem:[%s11281_s8 + $0x38] sm:$0xff]  }
 0x3a1   : > { %v2607_v48 = vrot.slane %v7899_v29, %v9487_v11  ;;  %v11326_v2 = vmov 0.0   ;;  %v2592_v32 = vcombine.high %v2590_v19, %v2590_v19  ;;  %v2699_v17 = vshrl.u32 %v9665_v10, 16 }
 0x3a2   : > { %8415 = vmatmul.mubr.msk.bf16.vlgmr.msra.gmra.mrb[60].mxu0 %vm1027_vm3, %v3025_v15  ;;  %v2704_v12 = vshll.u32 %v2544_v33, 16  ;;  %v2708_v9 = vshrl.u32 %v2559_v6, 16  ;;  %v2835_v35 = vcombine.low %v9605_v54, %v2834_v7  ;;  %v3074_v46 = vcombine.low %v3066_v16, %v3073_v39 }
 0x3a3   : > { %8418 = vmatprep.mubr.msk.bf16.mxu0 %vm8695_vm0, %v11326_v2  ;;  %8443 = vmatpush3.bf16.msra.mxu0 %v8629_v55  ;;  %v9743_v15 = vrot.slane %v2600_v59, %v9487_v11  ;;  %v2713_v29 = vshll.u32 %v2566_v1, 16  ;;  %v2716_v33 = vshrl.u32 %v2566_v1, 16  ;;  %v2721_v10 = vshll.u32 %v2567_v60, 16 }
 0x3a4   : > { %8444 = vmatprep.subr.bf16.mxu0 %v11326_v2  ;;  %v9751_v56 = vsel %vm9512_vm13, %v2699_v17, %v2704_v12  ;;  %v2724_v6 = vshrl.u32 %v2567_v60, 16  ;;  %8399 = vmatmul.mubr.msk.bf16.vlgmr.msra.gmra.mrb[36].mxu1 %vm1027_vm3, %v2835_v35  ;;  %v2729_v59 = vshll.u32 %v2568_v25, 16  ;;  %v2733_v54 = vshrl.u32 %v2583_v41, 16  ;;  %v8628_v17 = vld [vmem:[%s11281_s8 + $0x28] sm:$0xff]  }
 0x3a5   : > { %v9756_v39 = vsel %vm9512_vm13, %v2708_v9, %v2713_v29  ;;  %v2738_v55 = vshll.u32 %v2590_v19, 16  ;;  %8427 = vmatpush3.bf16.msra.mxu1 %v8627_v22  ;;  %8402 = vmatprep.mubr.msk.bf16.mxu1 %vm8695_vm0, %v11326_v2  ;;  %v9762_v16 = vsel %vm9512_vm13, %v2716_v33, %v2721_v10  ;;  %v2741_v1 = vshrl.u32 %v2590_v19, 16 }
 0x3a6   : > { %v2746_v7 = vshll.u32 %v2591_v34, 16  ;;  %v2749_v60 = vshrl.u32 %v2591_v34, 16  ;;  %v9769_v25 = vsel %vm9512_vm13, %v2724_v6, %v2729_v59  ;;  %v2754_v22 = vshll.u32 %v2592_v32, 16  ;;  %8428 = vmatprep.subr.bf16.mxu1 %v11326_v2 }
 0x3a7   : > { %v9773_v41 = vsel %vm9512_vm13, %v2733_v54, %v2738_v55  ;;  %v2758_v12 = vshrl.u32 %v2607_v48, 16  ;;  %8445 = vmatpush3.bf16.msra.mxu0 %v8630_v28  ;;  %v2763_v34 = vshll.u32 %v9743_v15, 16  ;;  %v2836_v9 = vcombine.low %v9751_v56, %v9756_v39 }
 0x3a8   : > { %v9778_v19 = vsel %vm9512_vm13, %v2741_v1, %v2746_v7  ;;  %v2837_v35 = vcombine.low %v9762_v16, %v9769_v25  ;;  %8474 = vmatprep.subr.bf16.mxu0 %v11326_v2  ;;  %v9789_v32 = vsel %vm9512_vm13, %v2749_v60, %v2754_v22  ;;  %v2441_v28 = vcombine.high %v9667_v36, %v9667_v36 }
 0x3a9   : > { %v2838_v29 = vcombine.low %v9773_v41, %v9778_v19  ;;  %v2456_v33 = vcombine.high %v9692_v21, %v9692_v21  ;;  %v9799_v10 = vsel %vm9512_vm13, %v2758_v12, %v2763_v34  ;;  %v2846_v6 = vrot.slane %v2836_v9, %v9487_v11  ;;  %8429 = vmatpush3.bf16.msra.mxu1 %v8628_v17  ;;  %v7934_v9 = vld.sshfl [vmem:[#allocation3 + $0x8] sm:$0x32 pattern:$0x75316420] }
 0x3aa   : > { %8419 = vmatmul.mubr.msk.bf16.gmra.mrb[64].mxu0 %vm1027_vm3, %v3074_v46  ;;  %v9803_v46 = vrot.slane %v2837_v35, %v9487_v11  ;;  %v2839_v59 = vcombine.low %v9789_v32, %v9799_v10  ;;  %v2455_v36 = vrot.slane %v2441_v28, %v9487_v11  ;;  %v2615_v54 = vcombine.high %v2607_v48, %v2607_v48 }
 0x3ab   : > { %8422 = vmatprep.mubr.msk.bf16.mxu0 %vm8695_vm0, %v11326_v2  ;;  %v2766_v55 = vshrl.u32 %v9743_v15, 16  ;;  %8458 = vmatprep.subr.bf16.mxu1 %v11326_v2  ;;  %v2616_v7 = vcombine.high %v9743_v15, %v9743_v15  ;;  %v3680_v60 = vcombine.low %v9522_v38, %v9639_v62  ;;  %v3681_v17 = vcombine.low %v9655_v49, %v9659_v26 }
 0x3ac   : > { %v2868_v1 = vcombine.low %v2846_v6, %v9803_v46  ;;  %v9820_v22 = vrot.slane %v2838_v29, %v9487_v11  ;;  %v2867_v48 = vrot.slane %v2839_v59, %v9487_v11  ;;  %v3075_v12 = vcombine.low %v2455_v36, %v2456_v33 }
 0x3ad   : > { %v2771_v34 = vshll.u32 %v2615_v54, 16  ;;  %v2774_v35 = vshrl.u32 %v2615_v54, 16  ;;  %v2779_v28 = vshll.u32 %v2616_v7, 16  ;;  %v3682_v6 = vcombine.low %v9662_v5, %v9672_v63 }
 0x3ae   : > { %v3696_v15 = vrot.slane %v3680_v60, %v9487_v11  ;;  %v2869_v38 = vcombine.low %v9820_v22, %v2867_v48  ;;  %v2876_v62 = vrot.slane %v2868_v1, %v9487_v11  ;;  %v3082_v49 = vrot.slane %v3075_v12, %v9487_v11 }
 0x3af   : > { %v11327_v26 = vcombine.high %v9622_v20, %v9622_v20  ;;  %v9837_v59 = vsel %vm9512_vm13, %v2774_v35, %v2779_v28  ;;  %v3703_v5 = vrot.slane %v3681_v17, %v9487_v11  ;;  %v3710_v63 = vrot.slane %v3682_v6, %v9487_v11 }
 0x3b0   : > { %v3234_v54 = vcombine.high %v7934_v9, %v7934_v9  ;;  %v2883_v7 = vrot.slane %v2869_v38, %v9487_v11  ;;  %v3089_v1 = vrot.slane %v3082_v49, %v9487_v11  ;;  %v3711_v60 = vcombine.low %v9608_v13, %v3696_v15 }
 0x3b1   : > { %v9833_v29 = vrot.slane %v11327_v26, %v9487_v11  ;;  %v9845_v48 = vrot.slane %v7934_v9, %v9487_v11  ;;  %v9849_v20 = vsel %vm9512_vm13, %v2766_v55, %v2771_v34  ;;  %v3712_v12 = vcombine.low %v3703_v5, %v3710_v63  ;;  %v7935_v34 = vld.sshfl [vmem:[#allocation3 + $0xc] sm:$0x32 pattern:$0x75316420] }
 0x3b2   : > { %v9852_v35 = vrot.slane %v3234_v54, %v9487_v11  ;;  %v3728_v17 = vcombine.low %v9676_v57, %v9679_v3  ;;  %v2884_v28 = vcombine.low %v2876_v62, %v2883_v7  ;;  %8423 = vmatmul.mubr.msk.bf16.gmra.mrb[68].mxu0 %vm1027_vm3, %v3089_v1  ;;  %v2885_v13 = vcombine.low %v9849_v20, %v9837_v59  ;;  %v7936_v3 = vld.sshfl [vmem:[#allocation3 + $0x10] sm:$0x32 pattern:$0x75316420] }
 0x3b3   : > { %v3249_v9 = vcombine.high %v9845_v48, %v9845_v48  ;;  %v3729_v55 = vcombine.low %v9683_v52, %v9688_v18  ;;  %8446 = vmatprep.mubr.msk.bf16.mxu0 %vm8695_vm0, %v11326_v2  ;;  %v3730_v6 = vcombine.low %v9692_v21, %v2455_v36  ;;  %v3731_v57 = vcombine.low %v2456_v33, %v9557_v50  ;;  %v7937_v26 = vld.sshfl [vmem:[#allocation3 + $0x14] sm:$0x32 pattern:$0x75316420] }
 0x3b4   : > { %v5368_v15 = vshrl.u32 %v9652_v30, 16  ;;  %v5373_v38 = vshll.u32 %v9833_v29, 16  ;;  %8403 = vmatmul.mubr.msk.bf16.gmra.mrb[40].mxu1 %vm1027_vm3, %v2884_v28  ;;  %v3719_v62 = vrot.slane %v3711_v60, %v9487_v11  ;;  %v3726_v49 = vrot.slane %v3712_v12, %v9487_v11  ;;  %v8633_v28 = vld [vmem:[%s11281_s8 + $0x50] sm:$0xff]  }
 0x3b5   : > { %v3331_v52 = vcombine.low %v9852_v35, %v3249_v9  ;;  %v3738_v18 = vrot.slane %v3728_v17, %v9487_v11  ;;  %8406 = vmatprep.mubr.msk.bf16.mxu1 %vm8695_vm0, %v11326_v2  ;;  %v3745_v21 = vrot.slane %v3729_v55, %v9487_v11  ;;  %v3752_v33 = vrot.slane %v3730_v6, %v9487_v11 }
 0x3b6   : > { %v3759_v36 = vrot.slane %v3731_v57, %v9487_v11  ;;  %v3258_v5 = vcombine.high %v7935_v34, %v7935_v34  ;;  %v2892_v63 = vrot.slane %v2885_v13, %v9487_v11  ;;  %v3250_v7 = vcombine.high %v9852_v35, %v9852_v35 }
 0x3b7   : > { %v3359_v54 = vrot.slane %v3331_v52, %v9487_v11  ;;  %v3282_v1 = vcombine.high %v7936_v3, %v7936_v3  ;;  %v9887_v12 = vrot.slane %v7936_v3, %v9487_v11  ;;  %v3306_v17 = vcombine.high %v7937_v26, %v7937_v26 }
 0x3b8   : > { %v9884_v60 = vrot.slane %v3258_v5, %v9487_v11  ;;  %v5375_v13 = vsel %vm9512_vm13, %v5368_v15, %v5373_v38  ;;  %v3727_v9 = vcombine.low %v3719_v62, %v3726_v49  ;;  %v3761_v55 = vcombine.low %v3752_v33, %v3759_v36  ;;  %v8634_v62 = vld [vmem:[%s11281_s8 + $0x58] sm:$0xff]  }
 0x3b9   : > { %v3265_v6 = vrot.slane %v7935_v34, %v9487_v11  ;;  %v9896_v57 = vrot.slane %v3282_v1, %v9487_v11  ;;  %v3361_v52 = vcombine.low %v9611_v45, %v3359_v54  ;;  %v3760_v5 = vcombine.low %v3738_v18, %v3745_v21  ;;  %v9924_v54 = vld.sshfl [vmem:[#allocation3 + $0x1c] sm:$0x13 pattern:$0x75316420] }
 0x3ba   : > { %v3297_v3 = vcombine.high %v9887_v12, %v9887_v12  ;;  %v9902_v14 = vrot.slane %v3306_v17, %v9487_v11  ;;  %v2899_v47 = vrot.slane %v2892_v63, %v9487_v11  ;;  %8447 = vmatmul.mubr.msk.bf16.vlgmr.msra.gmra.mrb[72].mxu0 %vm1027_vm3, %v3727_v9  ;;  %v3377_v34 = vcombine.low %v3250_v7, %v9884_v60 }
 0x3bb   : > { %v3298_v15 = vcombine.high %v9896_v57, %v9896_v57  ;;  %v7943_v38 = vcombine.high %v3265_v6, %v9884_v60  ;;  %8450 = vmatprep.mubr.msk.bf16.mxu0 %vm8695_vm0, %v11326_v2  ;;  %8475 = vmatpush3.bf16.msra.mxu0 %v8633_v28  ;;  %v5448_v49 = vcombine.low %v9629_v53, %v9636_v23 }
 0x3bc   : > { %v3379_v45 = vcombine.low %v9896_v57, %v3297_v3  ;;  %v5449_v18 = vcombine.low %v9645_v61, %v5375_v13  ;;  %8407 = vmatmul.mubr.msk.bf16.gmra.mrb[44].mxu1 %vm1027_vm3, %v2899_v47  ;;  %v3775_v21 = vrot.slane %v3761_v55, %v9487_v11  ;;  %v4462_v36 = vcombine.high %v3265_v6, %v3265_v6 }
 0x3bd   : > { %v3380_v33 = vcombine.low %v3298_v15, %v9902_v14  ;;  %v8010_v63 = vcombine.high %v9632_v31, %v9620_v58  ;;  %8430 = vmatprep.mubr.msk.bf16.mxu1 %vm8695_vm0, %v11326_v2  ;;  %v3375_v7 = vrot.slane %v3361_v52, %v9487_v11  ;;  %v3768_v1 = vrot.slane %v3760_v5, %v9487_v11 }
 0x3be   : > { %8476 = vmatprep.subr.bf16.mxu0 %v11326_v2  ;;  %v4283_v47 = vcombine.low %v9636_v23, %v9645_v61  ;;  %v3387_v17 = vrot.slane %v3377_v34, %v9487_v11  ;;  %v9935_v28 = vrot.slane %v7943_v38, %v9487_v11  ;;  %v9938_v13 = vrot.slane %v3379_v45, %v9487_v11  ;;  %v8631_v34 = vld [vmem:[%s11281_s8 + $0x40] sm:$0xff]  }
 0x3bf   : > { %v9941_v9 = vrot.slane %v3380_v33, %v9487_v11  ;;  %8477 = vmatpush3.bf16.msra.mxu0 %v8634_v62  ;;  %v11328_v55 = vcombine.high %v9549_v8, %v9549_v8  ;;  %v9948_v52 = vrot.slane %v5448_v49, %v9487_v11  ;;  %v9951_v23 = vrot.slane %v5449_v18, %v9487_v11 }
 0x3c0   : > { %v9955_v61 = vrot.slane %v9924_v54, %v9487_v11  ;;  %v3776_v5 = vcombine.low %v3768_v1, %v3775_v21  ;;  %v9960_v15 = vrot.slane %v7937_v26, %v9487_v11  ;;  %v4544_v8 = vcombine.low %v9884_v60, %v4462_v36  ;;  %8506 = vmatprep.subr.bf16.mxu0 %v11326_v2 }
 0x3c1   : > { %v4542_v6 = vcombine.low %v11328_v55, %v9852_v35  ;;  %v3410_v3 = vcombine.low %v9938_v13, %v9941_v9  ;;  %v8008_v38 = vcombine.high %v9845_v48, %v9852_v35  ;;  %v9970_v45 = vrot.slane %v8010_v63, %v9487_v11 }
 0x3c2   : > { %v9973_v62 = vrot.slane %v4283_v47, %v9487_v11  ;;  %v11329_v49 = vrot.slane %v9587_v51, %v9487_v11  ;;  %8451 = vmatmul.mubr.msk.bf16.gmra.mrb[76].mxu0 %vm1027_vm3, %v3776_v5  ;;  %v3409_v21 = vcombine.low %v3387_v17, %v9935_v28  ;;  %v4187_v48 = vcombine.low %v9702_v44, %v9751_v56 }
 0x3c3   : > { %v4188_v35 = vcombine.low %v9756_v39, %v9762_v16  ;;  %8454 = vmatprep.mubr.msk.bf16.mxu0 %vm8695_vm0, %v11326_v2  ;;  %v4558_v33 = vrot.slane %v4542_v6, %v9487_v11  ;;  %v4186_v36 = vcombine.low %v9563_v24, %v9698_v40  ;;  %v4511_v51 = vcombine.high %v9902_v14, %v9902_v14  ;;  %v8632_v24 = vld [vmem:[%s11281_s8 + $0x48] sm:$0xff]  }
 0x3c4   : > { %v3376_v18 = vcombine.low %v11329_v49, %v3375_v7  ;;  %v5479_v63 = vcombine.low %v9948_v52, %v9951_v23  ;;  %v3424_v44 = vrot.slane %v3410_v3, %v9487_v11  ;;  %v4572_v56 = vrot.slane %v4544_v8, %v9487_v11  ;;  %v8031_v3 = vld.sshfl [vmem:[#allocation3 + $0x8] sm:$0x33 pattern:$0x75316420] }
 0x3c5   : > { %v4463_v16 = vcombine.high %v9884_v60, %v9884_v60  ;;  %v4510_v7 = vcombine.high %v9960_v15, %v9960_v15  ;;  %v4565_v40 = vrot.slane %v8008_v38, %v9487_v11  ;;  %v4653_v1 = vrot.slane %v9970_v45, %v9487_v11 }
 0x3c6   : > { %8431 = vmatmul.mubr.msk.bf16.vlgmr.msra.gmra.mrb[48].mxu1 %vm1027_vm3, %v3376_v18  ;;  %v4297_v47 = vrot.slane %v9973_v62, %v9487_v11  ;;  %v3417_v17 = vrot.slane %v3409_v21, %v9487_v11  ;;  %v4209_v55 = vrot.slane %v4187_v48, %v9487_v11  ;;  %v4216_v6 = vrot.slane %v4188_v35, %v9487_v11 }
 0x3c7   : > { %8459 = vmatpush3.bf16.msra.mxu1 %v8631_v34  ;;  %8434 = vmatprep.mubr.msk.bf16.mxu1 %vm8695_vm0, %v11326_v2  ;;  %v4593_v5 = vcombine.low %v4511_v51, %v9620_v58  ;;  %v11330_v8 = vmov 0   ;;  %v7944_v34 = vcombine.high %v9960_v15, %v9902_v14  ;;  %v11331_v38 = vrot.slane %v9592_v0, %v9487_v11 }
 0x3c8   : > { %8460 = vmatprep.subr.bf16.mxu1 %v11326_v2  ;;  %6156 = vst.msk [vmem:[#allocation4 + $0x4] sm:$0x1] %vm6155_vm15, %v11330_v8  ;;  %6158 = vst.msk [vmem:[#allocation4 + $0xc] sm:$0x1] %vm6155_vm15, %v11330_v8  ;;  %v4202_v18 = vrot.slane %v4186_v36, %v9487_v11  ;;  %v10045_v21 = vcombine.high %v9652_v30, %v9652_v30  ;;  %v3425_v48 = vcombine.low %v3417_v17, %v3424_v44 }
 0x3c9   : > { %6160 = vst.msk [vmem:[#allocation4 + $0x14] sm:$0x1] %vm6155_vm15, %v11330_v8  ;;  %6162 = vst.msk [vmem:[#allocation4 + $0x1c] sm:$0x1] %vm6155_vm15, %v11330_v8  ;;  %v4573_v49 = vcombine.low %v11331_v38, %v4558_v33  ;;  %v4574_v35 = vcombine.low %v4565_v40, %v4572_v56  ;;  %v4590_v51 = vcombine.low %v4463_v16, %v9896_v57 }
 0x3ca   : > { %6164 = vst.msk [vmem:[#allocation4 + $0x24] sm:$0x1] %vm6155_vm15, %v11330_v8  ;;  %6166 = vst.msk [vmem:[#allocation4 + $0x2c] sm:$0x1] %vm6155_vm15, %v11330_v8  ;;  %v4592_v26 = vcombine.low %v9902_v14, %v4510_v7  ;;  %v8009_v15 = vcombine.high %v9887_v12, %v9896_v57  ;;  %v4234_v0 = vcombine.low %v9769_v25, %v9773_v41 }
 0x3cb   : > { %6168 = vst.msk [vmem:[#allocation4 + $0x34] sm:$0x1] %vm6155_vm15, %v11330_v8  ;;  %6170 = vst.msk [vmem:[#allocation4 + $0x3c] sm:$0x1] %vm6155_vm15, %v11330_v8  ;;  %8461 = vmatpush3.bf16.msra.mxu1 %v8632_v24  ;;  %v4235_v33 = vcombine.low %v9778_v19, %v9789_v32  ;;  %v5105_v36 = vcombine.high %v8031_v3, %v8031_v3  ;;  %v11332_v30 = vrot.slane %v9599_v4, %v9487_v11 }
 0x3cc   : > { %6172 = vst.msk [vmem:[#allocation4 + $0x44] sm:$0x1] %vm6155_vm15, %v11330_v8  ;;  %6174 = vst.msk [vmem:[#allocation4 + $0x4c] sm:$0x1] %vm6155_vm15, %v11330_v8  ;;  %8490 = vmatprep.subr.bf16.mxu1 %v11326_v2  ;;  %v4218_v44 = vcombine.low %v4209_v55, %v4216_v6  ;;  %v4621_v14 = vrot.slane %v4593_v5, %v9487_v11  ;;  %v4237_v12 = vcombine.low %v9837_v59, %v9629_v53 }
 0x3cd   : > { %8455 = vmatmul.mubr.msk.bf16.gmra.mrb[80].mxu0 %vm1027_vm3, %v11332_v30  ;;  %v10064_v57 = vrot.slane %v7944_v34, %v9487_v11  ;;  %v4217_v25 = vcombine.low %v9625_v27, %v4202_v18  ;;  %v10070_v4 = vrot.slane %v8031_v3, %v9487_v11  ;;  %v10073_v41 = vrot.slane %v5105_v36, %v9487_v11  ;;  %v8016_v18 = vld.sshfl [vmem:[#allocation3 + $0x8] sm:$0x13 pattern:$0x75316420] }
 0x3ce   : > { %8478 = vmatprep.mubr.msk.bf16.mxu0 %vm8695_vm0, %v11326_v2  ;;  %8435 = vmatmul.mubr.msk.bf16.gmra.mrb[52].mxu1 %vm1027_vm3, %v3425_v48  ;;  %v4588_v19 = vrot.slane %v4574_v35, %v9487_v11  ;;  %v4600_v53 = vrot.slane %v4590_v51, %v9487_v11  ;;  %v4614_v59 = vrot.slane %v4592_v26, %v9487_v11  ;;  %v5376_v6 = vshrl.u32 %v9833_v29, 16  ;;  %v10105_v48 = vld [vmem:[#allocation4] ss:$8 sps:$4 sm:$0xff]  }
 0x3cf   : > { %v4236_v56 = vcombine.low %v9799_v10, %v9849_v20  ;;  %8438 = vmatprep.mubr.msk.bf16.mxu1 %vm8695_vm0, %v11326_v2  ;;  %v4581_v27 = vrot.slane %v4573_v49, %v9487_v11  ;;  %v4244_v16 = vrot.slane %v4234_v0, %v9487_v11  ;;  %v4251_v7 = vrot.slane %v4235_v33, %v9487_v11  ;;  %v8637_v20 = vld [vmem:[%s11281_s8 + $0x70] sm:$0xff]  }
 0x3d0   : > { %v5121_v24 = vcombine.high %v10073_v41, %v10073_v41  ;;  %v10089_v40 = vrot.slane %v4218_v44, %v9487_v11  ;;  %v4607_v26 = vrot.slane %v8009_v15, %v9487_v11  ;;  %v4623_v17 = vcombine.low %v4614_v59, %v4621_v14  ;;  %v8017_v15 = vld.sshfl [vmem:[#allocation3 + $0xc] sm:$0x13 pattern:$0x75316420] }
 0x3d1   : > { %v4265_v10 = vrot.slane %v4237_v12, %v9487_v11  ;;  %v5120_v55 = vcombine.high %v10070_v4, %v10070_v4  ;;  %v5381_v5 = vshll.u32 %v10045_v21, 16  ;;  %v5384_v3 = vshrl.u32 %v10045_v21, 16  ;;  %v8034_v14 = vld.sshfl [vmem:[#allocation3 + $0x14] sm:$0x33 pattern:$0x75316420] }
 0x3d2   : > { %v4589_v8 = vcombine.low %v4581_v27, %v4588_v19  ;;  %v10102_v34 = vrot.slane %v4217_v25, %v9487_v11  ;;  %v4622_v38 = vcombine.low %v4600_v53, %v4607_v26  ;;  %v4258_v49 = vrot.slane %v4236_v56, %v9487_v11  ;;  %v8638_v12 = vld [vmem:[%s11281_s8 + $0x78] sm:$0xff]  }
 0x3d3   : > { %v4266_v35 = vcombine.low %v4244_v16, %v4251_v7  ;;  %v5264_v51 = vshll.u32 %v5121_v24, 16  ;;  %v5241_v0 = vcombine.high %v9833_v29, %v9833_v29  ;;  %v3440_v33 = vrot.slane %v10064_v57, %v9487_v11 }
 0x3d4   : > { %v4233_v36 = vcombine.low %v10102_v34, %v10089_v40  ;;  %v4637_v30 = vrot.slane %v4623_v17, %v9487_v11  ;;  %v4267_v44 = vcombine.low %v4258_v49, %v4265_v10  ;;  %v5248_v25 = vshll.u32 %v10073_v41, 16 }
 0x3d5   : > { %8479 = vmatmul.mubr.msk.bf16.vlgmr.msra.gmra.mrb[84].mxu0 %vm1027_vm3, %v4589_v8  ;;  %v5251_v19 = vshrl.u32 %v10073_v41, 16  ;;  %v5256_v53 = vshll.u32 %v5120_v55, 16  ;;  %v5259_v59 = vshrl.u32 %v5120_v55, 16  ;;  %v4630_v56 = vrot.slane %v4622_v38, %v9487_v11 }
 0x3d6   : > { %8482 = vmatprep.mubr.msk.bf16.mxu0 %vm8695_vm0, %v11326_v2  ;;  %8507 = vmatpush3.bf16.msra.mxu0 %v8637_v20  ;;  %v5430_v27 = vcombine.low %v9803_v46, %v9820_v22  ;;  %v4755_v16 = vcombine.high %v8016_v18, %v8016_v18  ;;  %v6221_v7 = vunpack.c.l.bf16 %v10105_v48  ;;  %v10131_v24 = vrot.slane %v4266_v35, %v9487_v11  ;;  %v8018_v46 = vld.sshfl [vmem:[#allocation3 + $0x10] sm:$0x13 pattern:$0x75316420]  ;;  %v8635_v35 = vld [vmem:[%s11281_s8 + $0x60] sm:$0xff]  }
 0x3d7   : > { %8439 = vmatmul.mubr.msk.bf16.gmra.mrb[56].mxu1 %vm1027_vm3, %v3440_v33  ;;  %8508 = vmatprep.subr.bf16.mxu0 %v11326_v2  ;;  %v5243_v41 = vshrl.u32 %v10070_v4, 16  ;;  %v5266_v40 = vsel %vm9512_vm13, %v5259_v59, %v5264_v51  ;;  %v10137_v26 = vrot.slane %v8016_v18, %v9487_v11  ;;  %v10140_v17 = vrot.slane %v4267_v44, %v9487_v11 }
 0x3d8   : > { %8462 = vmatprep.mubr.msk.bf16.mxu1 %vm8695_vm0, %v11326_v2  ;;  %v4778_v22 = vcombine.high %v8017_v15, %v8017_v15  ;;  %v5177_v10 = vcombine.high %v8034_v14, %v8034_v14  ;;  %v5184_v20 = vrot.slane %v8034_v14, %v9487_v11  ;;  %v4638_v55 = vcombine.low %v4630_v56, %v4637_v30  ;;  %v10166_v56 = vld [vmem:[#allocation4 + $0x4] sm:$0x1] }
 0x3d9   : > { %v5250_v8 = vsel %vm9512_vm13, %v5243_v41, %v5248_v25  ;;  %v5258_v4 = vsel %vm9512_vm13, %v5251_v19, %v5256_v53  ;;  %v5398_v34 = vcombine.low %v5266_v40, %v9756_v39  ;;  %v10149_v38 = vrot.slane %v5430_v27, %v9487_v11  ;;  %v8064_v41 = vld.sshfl [vmem:[#allocation3 + $0x8] sm:$0x32 pattern:$0x75316420]  ;;  %v8636_v40 = vld [vmem:[%s11281_s8 + $0x68] sm:$0xff]  }
 0x3da   : > { %8509 = vmatpush3.bf16.msra.mxu0 %v8638_v12  ;;  %v5191_v49 = vrot.slane %v5177_v10, %v9487_v11  ;;  %v5192_v18 = vcombine.high %v5184_v20, %v5184_v20  ;;  %v4769_v51 = vrot.slane %v4755_v16, %v9487_v11  ;;  %v4770_v33 = vcombine.high %v10137_v26, %v10137_v26 }
 0x3db   : > { %8538 = vmatprep.subr.mxu0 %v11326_v2  ;;  %v4785_v30 = vrot.slane %v8017_v15, %v9487_v11  ;;  %v4801_v39 = vcombine.high %v8018_v46, %v8018_v46  ;;  %v4282_v44 = vcombine.low %v10131_v24, %v10140_v17  ;;  %v5397_v14 = vcombine.low %v5250_v8, %v5258_v4  ;;  %v8019_v4 = vld.sshfl [vmem:[#allocation3 + $0x14] sm:$0x13 pattern:$0x75316420] }
 0x3dc   : > { %v4792_v12 = vrot.slane %v4778_v22, %v9487_v11  ;;  %v5193_v25 = vcombine.high %v5191_v49, %v5191_v49  ;;  %v5323_v19 = vshll.u32 %v5191_v49, 16  ;;  %v5326_v53 = vshrl.u32 %v5191_v49, 16 }
 0x3dd   : > { %8483 = vmatmul.mubr.msk.bf16.gmra.mrb[88].mxu0 %vm1027_vm3, %v4638_v55  ;;  %v5331_v59 = vshll.u32 %v5192_v18, 16  ;;  %v5414_v15 = vrot.slane %v5398_v34, %v9487_v11  ;;  %v10171_v27 = vrot.slane %v8018_v46, %v9487_v11  ;;  %v5334_v16 = vshrl.u32 %v5192_v18, 16 }
 0x3de   : > { %8486 = vmatprep.mubr.msk.bf16.mxu0 %vm8695_vm0, %v11326_v2  ;;  %v5339_v24 = vshll.u32 %v5193_v25, 16  ;;  %v4793_v17 = vcombine.high %v4785_v30, %v4785_v30  ;;  %v4815_v22 = vrot.slane %v4801_v39, %v9487_v11  ;;  %v5318_v10 = vshrl.u32 %v5184_v20, 16 }
 0x3df   : > { %8463 = vmatmul.mubr.msk.bf16.vlgmr.msra.gmra.mrb[60].mxu1 %vm1027_vm3, %v4233_v36  ;;  %v4891_v36 = vcombine.low %v10137_v26, %v4769_v51  ;;  %v5407_v46 = vrot.slane %v5397_v14, %v9487_v11  ;;  %v10182_v55 = vcombine.low %v4770_v33, %v4785_v30  ;;  %v6282_v34 = vunpack.c.l.bf16 %v10166_v56  ;;  %v10194_v30 = vld [vmem:[#allocation4 + $0xc] sm:$0x1] }
 0x3e0   : > { %8491 = vmatpush3.bf16.msra.mxu1 %v8635_v35  ;;  %8466 = vmatprep.mubr.msk.bf16.mxu1 %vm8695_vm0, %v11326_v2  ;;  %v5341_v8 = vsel %vm9512_vm13, %v5334_v16, %v5339_v24  ;;  %v5325_v49 = vsel %vm9512_vm13, %v5318_v10, %v5323_v19  ;;  %v5333_v18 = vsel %vm9512_vm13, %v5326_v53, %v5331_v59  ;;  %v10201_v53 = vld [vmem:[%s11283_s10] ss:$0 sm:$0xff]  ;;  %v10206_v59 = vld [vmem:[%s11283_s10 + $0x1] ss:$0 sm:$0xff]  ;;  %v6283_v24 = vunpack.c.l.bf16 %v10194_v30  ;;  %v10238_v10 = vld [vmem:[#allocation4 + $0x14] sm:$0x1] }
 0x3e1   : > { %8492 = vmatprep.subr.bf16.mxu1 %v11326_v2  ;;  %v5611_v26 = vcombine.high %v8064_v41, %v8064_v41  ;;  %v5429_v20 = vcombine.low %v5407_v46, %v5414_v15  ;;  %v5447_v35 = vcombine.low %v5333_v18, %v5341_v8  ;;  %v5618_v51 = vrot.slane %v8064_v41, %v9487_v11 }
 0x3e2   : > { %v5786_v33 = vcombine.low %v9935_v28, %v9938_v13  ;;  %v4893_v39 = vcombine.low %v4792_v12, %v4793_v17  ;;  %v4894_v14 = vcombine.low %v10171_v27, %v4815_v22  ;;  %v4824_v25 = vcombine.high %v8019_v4, %v8019_v4 }
 0x3e3   : > { %v5625_v19 = vrot.slane %v5611_v26, %v9487_v11  ;;  %v5446_v28 = vcombine.low %v9789_v32, %v5325_v49  ;;  %v4831_v13 = vrot.slane %v8019_v4, %v9487_v11  ;;  %v5389_v12 = vshll.u32 %v5241_v0, 16 }
 0x3e4   : > { %8493 = vmatpush3.bf16.msra.mxu1 %v8636_v40  ;;  %v5626_v15 = vcombine.high %v5618_v51, %v5618_v51  ;;  %v4901_v16 = vrot.slane %v4891_v36, %v9487_v11  ;;  %v4908_v45 = vrot.slane %v10182_v55, %v9487_v11  ;;  %v5463_v32 = vrot.slane %v5447_v35, %v9487_v11 }
 0x3e5   : > { %8487 = vmatmul.mubr.msk.bf16.gmra.mrb[92].mxu0 %vm1027_vm3, %v4653_v1  ;;  %8522 = vmatprep.subr.bf16.mxu1 %v11326_v2  ;;  %v5627_v1 = vcombine.high %v5625_v19, %v5625_v19  ;;  %v6234_v0 = vmul.f32 %v10201_v53, %v6221_v7  ;;  %v6296_v40 = vmul.f32 %v10206_v59, %v6282_v34 }
 0x3e6   : > { %8510 = vmatprep.mubr.msk.bf16.mxu0 %vm8695_vm0, %v11326_v2  ;;  %v5753_v41 = vcombine.low %v5625_v19, %v5626_v15  ;;  %v5437_v17 = vrot.slane %v5429_v20, %v9487_v11  ;;  %v4915_v22 = vrot.slane %v4893_v39, %v9487_v11  ;;  %v5456_v46 = vrot.slane %v5446_v28, %v9487_v11  ;;  %v10260_v19 = vld [vmem:[#allocation4 + $0x1c] sm:$0x1] }
 0x3e7   : > { %8467 = vmatmul.mubr.msk.bf16.gmra.mrb[64].mxu1 %vm1027_vm3, %v4282_v44  ;;  %v4922_v44 = vrot.slane %v4894_v14, %v9487_v11  ;;  %v5754_v36 = vcombine.low %v5627_v1, %v9884_v60  ;;  %v4838_v55 = vrot.slane %v4824_v25, %v9487_v11  ;;  %v4839_v8 = vcombine.high %v4831_v13, %v4831_v13 }
 0x3e8   : > { %8470 = vmatprep.mubr.msk.bf16.mxu1 %vm8695_vm0, %v11326_v2  ;;  %v6242_v4 = vsel %vm1027_vm3, %v6234_v0, 0.0  ;;  %v5445_v49 = vcombine.low %v5437_v17, %v10149_v38  ;;  %v4816_v18 = vcombine.high %v10171_v27, %v10171_v27  ;;  %v5763_v26 = vrot.slane %v5753_v41, %v9487_v11  ;;  %v8639_v17 = vld [vmem:[%s11281_s8 + $0x80] sm:$0xff]  }
 0x3e9   : > { %v5770_v20 = vrot.slane %v5754_v36, %v9487_v11  ;;  %6243 = vadd.xlane.f32.xlu0 %v6242_v4  ;;  %v5478_v60 = vcombine.low %v5456_v46, %v5463_v32  ;;  %v6315_v35 = vsel %vm6155_vm15, %v6296_v40, 0.0  ;;  %v6298_v51 = vmul.f32 %v10206_v59, %v6283_v24 }
 0x3ea   : > { %v6284_v39 = vunpack.c.l.bf16 %v10238_v10  ;;  %v5493_v38 = vrot.slane %v5479_v63, %v9487_v11  ;;  %v4943_v27 = vcombine.low %v9576_v43, %v9955_v61  ;;  %v5800_v25 = vrot.slane %v5786_v33, %v9487_v11 }
 0x3eb   : > { %v5785_v14 = vcombine.low %v5763_v26, %v5770_v20  ;;  %v4924_v28 = vcombine.low %v4915_v22, %v4922_v44  ;;  %v4941_v15 = vcombine.low %v4838_v55, %v4839_v8  ;;  %v5383_v52 = vsel %vm9512_vm13, %v5376_v6, %v5381_v5  ;;  %v10311_v22 = vld [vmem:[#allocation4 + $0x2c] sm:$0x1]  ;;  %v10331_v26 = vld [vmem:[#allocation4 + $0x34] sm:$0x1] }
 0x3ec   : > { %v5391_v43 = vsel %vm9512_vm13, %v5384_v3, %v5389_v12  ;;  %v4923_v23 = vcombine.low %v4901_v16, %v4908_v45  ;;  %v4940_v63 = vcombine.low %v4816_v18, %v4831_v13  ;;  %v5486_v29 = vrot.slane %v5478_v60, %v9487_v11 }
 0x3ed   : > { %8511 = vmatmul.mubr.msk.bf16.vlgmr.msra.gmra.mrb[96].mxu0 %vm1027_vm3, %v5445_v49  ;;  %v5793_v33 = vrot.slane %v5785_v14, %v9487_v11  ;;  %6316 = vadd.xlane.f32.xlu0 %v6315_v35  ;;  %v6321_v21 = vsel %vm6155_vm15, %v6298_v51, 0.0  ;;  %v6300_v37 = vmul.f32 %v10206_v59, %v6284_v39  ;;  %v6285_v6 = vunpack.c.l.bf16 %v10260_v19  ;;  %v8069_v51 = vld.sshfl [vmem:[#allocation3 + $0x1c] sm:$0x32 pattern:$0x75316420] }
 0x3ee   : > { %8514 = vmatprep.mubr.msk.bf16.mxu0 %vm8695_vm0, %v11326_v2  ;;  %v11333_v5 = vcombine.low %v9557_v50, %v9572_v42  ;;  %v4938_v13 = vrot.slane %v4924_v28, %v9487_v11  ;;  %v4957_v12 = vrot.slane %v4941_v15, %v9487_v11  ;;  %v4971_v16 = vrot.slane %v4943_v27, %v9487_v11  ;;  %v10342_v28 = vld [vmem:[#allocation4 + $0x3c] sm:$0x1] }
 0x3ef   : > { %8471 = vmatmul.mubr.msk.bf16.gmra.mrb[68].mxu1 %vm1027_vm3, %v4297_v47  ;;  %v10292_v3 = vcombine.low %v5793_v33, %v5800_v25  ;;  %v10294_v47 = vld [vmem:[#allocation4 + $0x24] sm:$0x1]  ;;  %v5495_v45 = vcombine.low %v5383_v52, %v5391_v43  ;;  %v4931_v1 = vrot.slane %v4923_v23, %v9487_v11  ;;  %v4950_v32 = vrot.slane %v4940_v63, %v9487_v11 }
 0x3f0   : > { %8494 = vmatprep.mubr.msk.bf16.mxu1 %vm8695_vm0, %v11326_v2  ;;  %v4964_v62 = vrot.slane %v11333_v5, %v9487_v11  ;;  %v4870_v41 = vcombine.high %v9924_v54, %v9924_v54  ;;  %v5494_v50 = vcombine.low %v5486_v29, %v5493_v38  ;;  %v6327_v42 = vsel %vm6155_vm15, %v6300_v37, 0.0 }
 0x3f1   : > { %6322 = vadd.xlane.f32.xlu0 %v6321_v21  ;;  %v6302_v0 = vmul.f32 %v10206_v59, %v6285_v6  ;;  %v6286_v40 = vunpack.c.l.bf16 %v10294_v47  ;;  %v4939_v44 = vcombine.low %v4931_v1, %v4938_v13  ;;  %v4972_v54 = vcombine.low %v4950_v32, %v4957_v12  ;;  %v10367_v12 = vld [vmem:[%s11283_s10 + $0x2] ss:$0 sm:$0xff] }
 0x3f2   : > { %v4973_v36 = vcombine.low %v4964_v62, %v4971_v16  ;;  %v5502_v46 = vrot.slane %v5495_v45, %v9487_v11  ;;  %v4885_v55 = vcombine.high %v9955_v61, %v9955_v61  ;;  %v4884_v8 = vrot.slane %v4870_v41, %v9487_v11  ;;  %v8640_v61 = vld [vmem:[%s11281_s8 + $0x88] sm:$0xff]  }
 0x3f3   : > { %v6333_v4 = vsel %vm6155_vm15, %v6302_v0, 0.0  ;;  %v6304_v49 = vmul.f32 %v10206_v59, %v6286_v40  ;;  %v6287_v18 = vunpack.c.l.bf16 %v10311_v22  ;;  %v4980_v20 = vrot.slane %v4972_v54, %v9487_v11 }
 0x3f4   : > { %v4987_v60 = vrot.slane %v4973_v36, %v9487_v11  ;;  %v5509_v35 = vrot.slane %v5502_v46, %v9487_v11  ;;  %v4989_v38 = vcombine.low %v4884_v8, %v4885_v55  ;;  %v6288_v25 = vunpack.c.l.bf16 %v10331_v26  ;;  %v7382_v8 = vld [vmem:[%s11285_s12] sm:$0xff] }
 0x3f5   : > { %8515 = vmatmul.mubr.msk.bf16.gmra.mrb[100].mxu0 %vm1027_vm3, %v5494_v50  ;;  %6328 = vadd.xlane.f32.xlu0 %v6327_v42  ;;  %v6339_v27 = vsel %vm6155_vm15, %v6304_v49, 0.0  ;;  %v6306_v14 = vmul.f32 %v10206_v59, %v6287_v18  ;;  %v5731_v52 = vcombine.high %v8069_v51, %v8069_v51  ;;  %v6289_v33 = vunpack.c.l.bf16 %v10342_v28  ;;  %v10431_v49 = vld [vmem:[#allocation4 + $0xc] sm:$0x1]  ;;  %v11335_v28 = vld [vmem:[#allocation7_spill] sm:$0xff] }
 0x3f6   : > { %8518 = vmatprep.mubr.msk.bf16.mxu0 %vm8695_vm0, %v11326_v2  ;;  %v4988_v15 = vcombine.low %v4980_v20, %v4987_v60  ;;  %v4996_v43 = vrot.slane %v4989_v38, %v9487_v11  ;;  %v6308_v63 = vmul.f32 %v10206_v59, %v6288_v25  ;;  %v5722_v29 = vcombine.high %v9632_v31, %v9632_v31  ;;  %v10442_v20 = vld [vmem:[%s11283_s10 + $0x5] ss:$0 sm:$0xff]  ;;  %v10444_v60 = vld [vmem:[#allocation4 + $0x14] sm:$0x1] }
 0x3f7   : > { %8495 = vmatmul.mubr.msk.bf16.vlgmr.msra.gmra.mrb[72].mxu1 %vm1027_vm3, %v4939_v44  ;;  %v6345_v23 = vsel %vm6155_vm15, %v6306_v14, 0.0  ;;  %v5723_v21 = vcombine.high %v9620_v58, %v9620_v58  ;;  %v5745_v37 = vrot.slane %v5731_v52, %v9487_v11  ;;  %v6310_v13 = vmul.f32 %v10206_v59, %v6289_v33  ;;  %8539 = vmatpush3.msra.mxu0 %v7382_v8 }
 0x3f8   : > { %8523 = vmatpush3.bf16.msra.mxu1 %v8639_v17  ;;  %8498 = vmatprep.mubr.msk.bf16.mxu1 %vm8695_vm0, %v11326_v2  ;;  %v5003_v5 = vrot.slane %v4996_v43, %v9487_v11  ;;  %v6351_v62 = vsel %vm6155_vm15, %v6308_v63, 0.0  ;;  %v5804_v16 = vcombine.low %v9620_v58, %v5722_v29  ;;  %v6438_v1 = vmul.f32 %v10367_v12, %v6282_v34  ;;  %v10461_v63 = vld [vmem:[#allocation4 + $0x24] sm:$0x1] }
 0x3f9   : > { %8524 = vmatprep.subr.bf16.mxu1 %v11326_v2  ;;  %6334 = vadd.xlane.f32.xlu0 %v6333_v4  ;;  %v5805_v31 = vcombine.low %v5723_v21, %v5745_v37  ;;  %v6357_v45 = vsel %vm6155_vm15, %v6310_v13, 0.0  ;;  %v6440_v50 = vmul.f32 %v10367_v12, %v6283_v24  ;;  %v5834_v56 = vcombine.low %v9941_v9, %v10064_v57  ;;  %v10429_v4 = vld [vmem:[%s11283_s10 + $0x4] ss:$0 sm:$0xff] }
 0x3fa   : > { %v5826_v32 = vrot.slane %v5804_v16, %v9487_v11  ;;  %v6458_v58 = vsel %vm6457_vm1, %v6438_v1, 0.0  ;;  %v5738_v34 = vrot.slane %v8069_v51, %v9487_v11  ;;  %v6442_v17 = vmul.f32 %v10367_v12, %v6284_v39  ;;  %8543 = vmatprep.subr.mxu0 %v11326_v2  ;;  %v10468_v13 = vld [vmem:[#allocation4 + $0x2c] sm:$0x1] }
 0x3fb   : > { %v5833_v41 = vrot.slane %v5805_v31, %v9487_v11  ;;  %v6464_v0 = vsel %vm6457_vm1, %v6440_v50, 0.0  ;;  %v5842_v30 = vrot.slane %v5834_v56, %v9487_v11  ;;  %v6446_v54 = vmul.f32 %v10367_v12, %v6286_v40  ;;  %v10418_v40 = vld [vmem:[#allocation4 + $0x8] ss:$56 sps:$4 sm:$0xff]   ;;  %v10477_v50 = vld [vmem:[#allocation4 + $0x34] sm:$0x1] }
 0x3fc   : > { %8525 = vmatpush3.bf16.msra.mxu1 %v8640_v61  ;;  %v8076_v57 = vcombine.high %v5738_v34, %v5745_v37  ;;  %v6470_v24 = vsel %vm6457_vm1, %v6442_v17, 0.0  ;;  %v6448_v36 = vmul.f32 %v10367_v12, %v6287_v18  ;;  %v6450_v47 = vmul.f32 %v10367_v12, %v6288_v25  ;;  %v10453_v25 = vld [vmem:[#allocation4 + $0x1c] sm:$0x1] }
 0x3fd   : > { %8519 = vmatmul.mubr.msk.bf16.gmra.mrb[104].mxu0 %vm1027_vm3, %v5509_v35  ;;  %6340 = vadd.xlane.f32.xlu0 %v6339_v27  ;;  %v5835_v42 = vcombine.low %v5826_v32, %v5833_v41  ;;  %v6452_v55 = vmul.f32 %v10367_v12, %v6289_v33  ;;  %v6575_v22 = vunpack.c.h.bf16 %v10418_v40  ;;  %v6630_v26 = vunpack.c.l.bf16 %v10431_v49  ;;  %v11334_v35 = vld [vmem:[#allocation6_spill] sm:$0xff] }
 0x3fe   : > { %8540 = vmatprep.mubr.msk.f32.mxu0 %vm8695_vm0, %v11326_v2  ;;  %v5858_v10 = vrot.slane %v8076_v57, %v9487_v11  ;;  %v6488_v46 = vsel %vm6457_vm1, %v6448_v36, 0.0  ;;  %v7374_v51 = vsel %vm647_vm2, %v11334_v35, 0.0  ;;  %v6631_v14 = vunpack.c.l.bf16 %v10444_v60 }
 0x3ff   : > { %8499 = vmatmul.mubr.msk.bf16.gmra.mrb[76].mxu1 %vm1027_vm3, %v4988_v15  ;;  %v5849_v9 = vrot.slane %v5835_v42, %v9487_v11  ;;  %v6500_v18 = vsel %vm6457_vm1, %v6452_v55, 0.0  ;;  %v6589_v61 = vmul.f32 %v10429_v4, %v6575_v22  ;;  %v6644_v27 = vmul.f32 %v10442_v20, %v6630_v26 }
 0x400   : > { %8502 = vmatprep.mubr.msk.bf16.mxu1 %vm8695_vm0, %v11326_v2  ;;  %v5865_v19 = vrot.slane %v5858_v10, %v9487_v11  ;;  %v6494_v11 = vsel %vm6457_vm1, %v6450_v47, 0.0  ;;  %v7375_v15 = vadd.f32 %v7374_v51, %v11335_v28  ;;  %v6646_v43 = vmul.f32 %v10442_v20, %v6631_v14  ;;  %v10508_v47 = vld [vmem:[%s11283_s10 + $0x6] ss:$0 sm:$0xff] }
 0x401   : > { %6346 = vadd.xlane.f32.xlu0 %v6345_v23  ;;  %v5850_v44 = vcombine.low %v5842_v30, %v5849_v9  ;;  %v6611_v38 = vsel %vm1027_vm3, %v6589_v61, 0.0  ;;  %v6662_v52 = vsel %vm6155_vm15, %v6644_v27, 0.0  ;;  %v6632_v23 = vunpack.c.l.bf16 %v10453_v25  ;;  %v10489_v30 = vld [vmem:[#allocation4 + $0x3c] sm:$0x1] }
 0x402   : > { %v7376_v33 = vrot.slane %v7375_v15, 4  ;;  %v6633_v21 = vunpack.c.l.bf16 %v10461_v63  ;;  %v6668_v37 = vsel %vm6155_vm15, %v6646_v43, 0.0  ;;  %v6222_v31 = vunpack.c.h.bf16 %v10105_v48 }
 0x403   : > { %v6634_v32 = vunpack.c.l.bf16 %v10468_v13  ;;  %v6635_v17 = vunpack.c.l.bf16 %v10477_v50  ;;  %v6785_v61 = vmul.f32 %v10508_v47, %v6630_v26  ;;  %v6568_v35 = vunpack.c.l.bf16 %v10418_v40 }
 0x404   : > { %v7377_v29 = vadd.f32 %v7376_v33, %v7375_v15  ;;  %v6297_v57 = vmul.f32 %v10206_v59, %v6222_v31  ;;  %v6789_v15 = vmul.f32 %v10508_v47, %v6632_v23  ;;  %v6657_v60 = vmul.f32 %v10442_v20, %v6575_v22 }
 0x405   : > { %6352 = vadd.xlane.f32.xlu0 %v6351_v62  ;;  %v6654_v48 = vmul.f32 %v10442_v20, %v6635_v17  ;;  %v6803_v27 = vsel %vm6457_vm1, %v6785_v61, 0.0  ;;  %v6643_v49 = vmul.f32 %v10442_v20, %v6568_v35  ;;  %v6793_v40 = vmul.f32 %v10508_v47, %v6634_v32 }
 0x406   : > { %v7378_v62 = vrot.slane %v7377_v29, 2  ;;  %v6815_v33 = vsel %vm6457_vm1, %v6789_v15, 0.0  ;;  %v6701_v25 = vsel %vm6311_vm6, %v6657_v60, 0.0  ;;  %v10613_v15 = vld [vmem:[#allocation4 + $0x4c] sm:$0x1] }
 0x407   : > { %8503 = vmatmul.mubr.msk.bf16.gmra.mrb[80].mxu1 %vm1027_vm3, %v5003_v5  ;;  %v6648_v5 = vmul.f32 %v10442_v20, %v6632_v23  ;;  %v6827_v63 = vsel %vm6457_vm1, %v6793_v40, 0.0 }
 0x408   : > { %8526 = vmatprep.mubr.msk.bf16.mxu1 %vm8695_vm0, %v11326_v2  ;;  %v7379_v16 = vadd.f32 %v7378_v62, %v7377_v29  ;;  %v6791_v29 = vmul.f32 %v10508_v47, %v6633_v21 }
 0x409   : > { %6358 = vadd.xlane.f32.xlu0 %v6357_v45  ;;  %v6650_v45 = vmul.f32 %v10442_v20, %v6633_v21  ;;  %v6674_v1 = vsel %vm6155_vm15, %v6648_v5, 0.0  ;;  %v6795_v21 = vmul.f32 %v10508_v47, %v6635_v17  ;;  %v10575_v17 = vld [vmem:[#allocation4 + $0x2c] sm:$0x1] }
 0x40a   : > { %v7380_v41 = vrot.slane %v7379_v16, 1 }
 0x40b   : > { %v6680_v34 = vsel %vm6155_vm15, %v6650_v45, 0.0  ;;  %v6833_v5 = vsel %vm6457_vm1, %v6795_v21, 0.0 }
 0x40c   : > { %v7381_v56 = vadd.f32 %v7380_v41, %v7379_v16  ;;  %v10551_v16 = vld [vmem:[#allocation4 + $0x14] sm:$0x1] }
 0x40d   : > { %6459 = vadd.xlane.f32.xlu0 %v6458_v58  ;;  %v6235_v58 = vmul.f32 %v10201_v53, %v6222_v31  ;;  %v6295_v53 = vmul.f32 %v10206_v59, %v6221_v7  ;;  %v6636_v7 = vunpack.c.l.bf16 %v10489_v30  ;;  %v6974_v45 = vunpack.c.l.bf16 %v10551_v16 }
 0x40e   : > { %8541 = vmatmul.mubr.msk.f32.vlgmr.msra.gmra.mrb[108].mxu0 %vm647_vm2, %v7381_v56  ;;  %v10568_v56 = vld [vmem:[#allocation4 + $0x24] sm:$0x1]  ;;  %vm6206_vm2 = vcmask 257025  }
 0x40f   : > { %8527 = vmatmul.mubr.msk.bf16.vlgmr.msra.gmra.mrb[84].mxu1 %vm1027_vm3, %v10292_v3  ;;  %v6444_v3 = vmul.f32 %v10367_v12, %v6285_v6  ;;  %v6482_v6 = vsel %vm6457_vm1, %v6446_v54, 0.0  ;;  %v6245_v42 = vsel %vm1027_vm3, %v6235_v58, 0.0  ;;  %8545 = vmatprep.mubr.msk.f32.mxu0 %vm8695_vm0, %v11326_v2  ;;  %v6312_v9 = vsel %vm6311_vm6, %v6295_v53, 0.0 }
 0x410   : > { %8530 = vmatprep.mubr.msk.bf16.mxu1 %vm8695_vm0, %v11326_v2  ;;  %6246 = vadd.xlane.f32.xlu1 %v6245_v42  ;;  %v6656_v10 = vmul.f32 %v10442_v20, %v6636_v7  ;;  %v6797_v62 = vmul.f32 %v10508_v47, %v6636_v7 }
 0x411   : > { %6465 = vadd.xlane.f32.xlu0 %v6464_v0  ;;  %v6476_v39 = vsel %vm6457_vm1, %v6444_v3, 0.0  ;;  %v6652_v0 = vmul.f32 %v10442_v20, %v6634_v32  ;;  %v6318_v3 = vsel %vm6311_vm6, %v6297_v57, 0.0  ;;  %v10561_v32 = vld [vmem:[#allocation4 + $0x1c] sm:$0x1]  ;;  %v10582_v57 = vld [vmem:[#allocation4 + $0x34] sm:$0x1] }
 0x412   : > { %v6839_v13 = vsel %vm6457_vm1, %v6797_v62, 0.0  ;;  %v6975_v50 = vunpack.c.l.bf16 %v10561_v32 }
 0x414   : > { %6313 = vadd.xlane.f32.xlu1 %v6312_v9  ;;  %v6977_v9 = vunpack.c.l.bf16 %v10575_v17 }
 0x415   : > { %6471 = vadd.xlane.f32.xlu0 %v6470_v24  ;;  %v6686_v24 = vsel %vm6155_vm15, %v6652_v0, 0.0  ;;  %v6976_v0 = vunpack.c.l.bf16 %v10568_v56 }
 0x417   : > { %8531 = vmatmul.mubr.msk.bf16.gmra.mrb[88].mxu1 %vm1027_vm3, %v5850_v44  ;;  %v6629_v44 = vld [vmem:[#allocation4 + $0x44] sm:$0x1] }
 0x418   : > { %8534 = vmatprep.mubr.msk.bf16.mxu1 %vm8695_vm0, %v11326_v2  ;;  %6319 = vadd.xlane.f32.xlu1 %v6318_v3  ;;  %v6692_v2 = vsel %vm6155_vm15, %v6654_v48, 0.0  ;;  %v6637_v59 = vunpack.c.l.bf16 %v6629_v44  ;;  %vm6453_vm0 = vcmask 261122  }
 0x419   : > { %6477 = vadd.xlane.f32.xlu0 %v6476_v39  ;;  %v6416_v39 = vld [vmem:[#allocation4] sm:$0xe] }
 0x41a   : > { %v6424_v54 = vunpack.c.l.bf16 %v6416_v39  ;;  %v6658_v36 = vmul.f32 %v10442_v20, %v6637_v59  ;;  %v6799_v31 = vmul.f32 %v10508_v47, %v6637_v59  ;;  %v10591_v59 = vld [vmem:[#allocation4 + $0x3c] sm:$0x1] }
 0x41c   : > { %v6845_v41 = vsel %vm6457_vm1, %v6799_v31, 0.0  ;;  %v10633_v31 = vld [vmem:[%s11283_s10 + $0x8] ss:$0 sm:$0xff] }
 0x41d   : > { %6483 = vadd.xlane.f32.xlu0 %v6482_v6  ;;  %v6698_v6 = vsel %vm6155_vm15, %v6656_v10, 0.0 }
 0x41f   : > { %8535 = vmatmul.mubr.msk.bf16.gmra.mrb[92].mxu1 %vm1027_vm3, %v5865_v19  ;;  %v6417_v19 = vld [vmem:[#allocation4 + $0x8] sm:$0xe] }
 0x421   : > { %6489 = vadd.xlane.f32.xlu0 %v6488_v46  ;;  %v6425_v46 = vunpack.c.l.bf16 %v6417_v19 }
 0x423   : > { %v6439_v55 = vmul.f32 %v10367_v12, %v6425_v46 }
 0x425   : > { %6495 = vadd.xlane.f32.xlu0 %v6494_v11  ;;  %v6437_v11 = vmul.f32 %v10367_v12, %v6424_v54  ;;  %v6461_v51 = vsel %vm6453_vm0, %v6439_v55, 0.0  ;;  %v6787_v12 = vmul.f32 %v10508_v47, %v6631_v14  ;;  %v6763_v14 = vld [vmem:[#allocation4 + $0x8] sm:$0xe]  ;;  %v6979_v55 = vunpack.c.l.bf16 %v10591_v59 }
 0x426   : > { %v6771_v43 = vunpack.c.l.bf16 %v6763_v14 }
 0x427   : > { %v6454_v8 = vsel %vm6453_vm0, %v6437_v11, 0.0  ;;  %v6809_v26 = vsel %vm6457_vm1, %v6787_v12, 0.0 }
 0x428   : > { %6455 = vadd.xlane.f32.xlu1 %v6454_v8  ;;  %v6784_v23 = vmul.f32 %v10508_v47, %v6771_v43 }
 0x429   : > { %6501 = vadd.xlane.f32.xlu0 %v6500_v18  ;;  %v6704_v18 = vsel %vm6155_vm15, %v6658_v36, 0.0 }
 0x42a   : > { %v6800_v22 = vsel %vm6453_vm0, %v6784_v23, 0.0 }
 0x42c   : > { %6462 = vadd.xlane.f32.xlu1 %v6461_v51 }
 0x42d   : > { %6612 = vadd.xlane.f32.xlu0 %v6611_v38  ;;  %v6582_v38 = vmul.f32 %v10429_v4, %v6568_v35 }
 0x42f   : > { %v6590_v28 = vsel %vm1027_vm3, %v6582_v38, 0.0 }
 0x430   : > { %6591 = vadd.xlane.f32.xlu1 %v6590_v28 }
 0x431   : > { %6663 = vadd.xlane.f32.xlu0 %v6662_v52  ;;  %v6659_v52 = vsel %vm6311_vm6, %v6643_v49, 0.0 }
 0x434   : > { %6660 = vadd.xlane.f32.xlu1 %v6659_v52 }
 0x435   : > { %6669 = vadd.xlane.f32.xlu0 %v6668_v37  ;;  %v6821_v37 = vsel %vm6457_vm1, %v6791_v29, 0.0  ;;  %v6770_v29 = vld [vmem:[#allocation4 + $0x40] sm:$0xe] }
 0x436   : > { %v6778_v23 = vunpack.c.l.bf16 %v6770_v29 }
 0x438   : > { %6702 = vadd.xlane.f32.xlu1 %v6701_v25  ;;  %v6911_v25 = vld [vmem:[#allocation4 + $0x40] ss:$8 sps:$4 sm:$0xff]   ;;  %v6798_v40 = vmul.f32 %v10508_v47, %v6778_v23 }
 0x439   : > { %6675 = vadd.xlane.f32.xlu0 %v6674_v1  ;;  %v10559_v1 = vld [vmem:[%s11283_s10 + $0x9] ss:$0 sm:$0xff] }
 0x43a   : > { %v6988_v58 = vmul.f32 %v10559_v1, %v6974_v45  ;;  %v6992_v30 = vmul.f32 %v10559_v1, %v6976_v0  ;;  %v6994_v44 = vmul.f32 %v10559_v1, %v6977_v9  ;;  %v6998_v28 = vmul.f32 %v10559_v1, %v6979_v55 }
 0x43c   : > { %6801 = vadd.xlane.f32.xlu1 %v6800_v22  ;;  %v7006_v42 = vsel %vm6155_vm15, %v6988_v58, 0.0  ;;  %v7018_v3 = vsel %vm6155_vm15, %v6992_v30, 0.0  ;;  %v7024_v46 = vsel %vm6155_vm15, %v6994_v44, 0.0  ;;  %v7036_v14 = vsel %vm6155_vm15, %v6998_v28, 0.0 }
 0x43d   : > { %6681 = vadd.xlane.f32.xlu0 %v6680_v34  ;;  %v6990_v34 = vmul.f32 %v10559_v1, %v6975_v50 }
 0x43f   : > { %v7012_v53 = vsel %vm6155_vm15, %v6990_v34, 0.0 }
 0x441   : > { %6687 = vadd.xlane.f32.xlu0 %v6686_v24 }
 0x445   : > { %6693 = vadd.xlane.f32.xlu0 %v6692_v2  ;;  %v6978_v2 = vunpack.c.l.bf16 %v10582_v57 }
 0x447   : > { %v6996_v11 = vmul.f32 %v10559_v1, %v6978_v2 }
 0x449   : > { %6699 = vadd.xlane.f32.xlu0 %v6698_v6  ;;  %v7030_v12 = vsel %vm6155_vm15, %v6996_v11, 0.0 }
 0x44d   : > { %6705 = vadd.xlane.f32.xlu0 %v6704_v18  ;;  %v10602_v18 = vld [vmem:[#allocation4 + $0x44] sm:$0x1] }
 0x44e   : > { %v11300_v49 = vunpack.c.l.bf16 %v10602_v18 }
 0x450   : > { %v7000_v43 = vmul.f32 %v10559_v1, %v11300_v49 }
 0x451   : > { %6804 = vadd.xlane.f32.xlu0 %v6803_v27 }
 0x455   : > { %6810 = vadd.xlane.f32.xlu0 %v6809_v26 }
 0x459   : > { %6816 = vadd.xlane.f32.xlu0 %v6815_v33  ;;  %v11298_v33 = vunpack.c.l.bf16 %v10613_v15 }
 0x45b   : > { %v7002_v21 = vmul.f32 %v10559_v1, %v11298_v33 }
 0x45d   : > { %6822 = vadd.xlane.f32.xlu0 %v6821_v37  ;;  %v6918_v37 = vunpack.c.l.bf16 %v6911_v25  ;;  %v7048_v44 = vsel %vm6155_vm15, %v7002_v21, 0.0 }
 0x45f   : > { %v6999_v62 = vmul.f32 %v10559_v1, %v6918_v37 }
 0x461   : > { %6828 = vadd.xlane.f32.xlu0 %v6827_v63  ;;  %v7042_v63 = vsel %vm6155_vm15, %v7000_v43, 0.0 }
 0x465   : > { %6834 = vadd.xlane.f32.xlu0 %v6833_v5  ;;  %v6919_v5 = vunpack.c.h.bf16 %v6911_v25 }
 0x467   : > { %v7001_v30 = vmul.f32 %v10559_v1, %v6919_v5 }
 0x469   : > { %6840 = vadd.xlane.f32.xlu0 %v6839_v13 }
 0x46d   : > { %6846 = vadd.xlane.f32.xlu0 %v6845_v41  ;;  %v6842_v41 = vsel %vm6453_vm0, %v6798_v40, 0.0 }
 0x46e   : > { %6843 = vadd.xlane.f32.xlu1 %v6842_v41 }
 0x471   : > { %7007 = vadd.xlane.f32.xlu0 %v7006_v42 }
 0x475   : > { %v3145_v24 = vpop.f32.mrb[60].mxu0  ;;  %7013 = vadd.xlane.f32.xlu0 %v7012_v53  ;;  %v7039_v53 = vsel %vm6311_vm6, %v6999_v62, 0.0 }
 0x476   : > { %v8416_v48 = vpop.f32.mrb[61].mxu0  ;;  %v10584_v7 = vpop.xlane.xlu0 %6243  ;;  %7040 = vadd.xlane.f32.xlu1 %v7039_v53 }
 0x477   : > { %v3148_v10 = vpop.f32.mrb[62].mxu0  ;;  %v2955_v54 = vpop.f32.mrb[36].mxu1 }
 0x478   : > { %v8417_v39 = vpop.f32.mrb[63].mxu0  ;;  %v10593_v19 = vadd.f32 %v3145_v24, %v2955_v54  ;;  %v8400_v6 = vpop.f32.mrb[37].mxu1 }
 0x479   : > { %7019 = vadd.xlane.f32.xlu0 %v7018_v3  ;;  %v2958_v8 = vpop.f32.mrb[38].mxu1  ;;  %v7113_v39 = vld [vmem:[#allocation4 + $0x40] sm:$0xe] }
 0x47a   : > { %v10595_v36 = vpop.xlane.xlu0 %6316  ;;  %v10604_v61 = vadd.f32 %v3148_v10, %v2958_v8  ;;  %v8401_v35 = vpop.f32.mrb[39].mxu1  ;;  %v6933_v10 = vmul.f32 %v10633_v31, %v6919_v5 }
 0x47b   : > { %v7045_v35 = vsel %vm6311_vm6, %v7001_v30, 0.0 }
 0x47c   : > { %7046 = vadd.xlane.f32.xlu1 %v7045_v35 }
 0x47d   : > { %v3153_v51 = vpop.f32.mrb[64].mxu0  ;;  %7025 = vadd.xlane.f32.xlu0 %v7024_v46  ;;  %v10647_v46 = vld [vmem:[%s11283_s10 + $0xa] ss:$0 sm:$0xff] }
 0x47e   : > { %v8420_v38 = vpop.f32.mrb[65].mxu0  ;;  %v10606_v27 = vpop.xlane.xlu0 %6322  ;;  %v7129_v28 = vmul.f32 %v10647_v46, %v6974_v45  ;;  %v7131_v16 = vmul.f32 %v10647_v46, %v6975_v50  ;;  %v7135_v56 = vmul.f32 %v10647_v46, %v6977_v9 }
 0x47f   : > { %v3156_v26 = vpop.f32.mrb[66].mxu0  ;;  %v7121_v38 = vunpack.c.l.bf16 %v7113_v39 }
 0x480   : > { %v8421_v52 = vpop.f32.mrb[67].mxu0  ;;  %v7147_v21 = vsel %vm6457_vm1, %v7129_v28, 0.0 }
 0x481   : > { %7031 = vadd.xlane.f32.xlu0 %v7030_v12  ;;  %v6955_v12 = vsel %vm1027_vm3, %v6933_v10, 0.0  ;;  %v7140_v23 = vmul.f32 %v10647_v46, %v7121_v38 }
 0x482   : > { %v10615_v60 = vpop.xlane.xlu0 %6328 }
 0x483   : > { %v7180_v41 = vsel %vm6453_vm0, %v7140_v23, 0.0 }
 0x485   : > { %7037 = vadd.xlane.f32.xlu0 %v7036_v14  ;;  %v3161_v13 = vpop.f32.mrb[68].mxu0 }
 0x486   : > { %v10623_v22 = vpop.xlane.xlu0 %6334  ;;  %v8424_v58 = vpop.f32.mrb[69].mxu0 }
 0x487   : > { %v2963_v42 = vpop.f32.mrb[40].mxu1  ;;  %v3164_v34 = vpop.f32.mrb[70].mxu0  ;;  %v7153_v58 = vsel %vm6457_vm1, %v7131_v16, 0.0 }
 0x488   : > { %v10638_v24 = vadd.f32 %v3153_v51, %v2963_v42  ;;  %v8404_v48 = vpop.f32.mrb[41].mxu1  ;;  %v8425_v3 = vpop.f32.mrb[71].mxu0  ;;  %v6932_v51 = vmul.f32 %v10633_v31, %v6918_v37 }
 0x489   : > { %7043 = vadd.xlane.f32.xlu0 %v7042_v63  ;;  %v2966_v54 = vpop.f32.mrb[42].mxu1 }
 0x48a   : > { %v10642_v6 = vpop.xlane.xlu0 %6340  ;;  %v10649_v11 = vadd.f32 %v3156_v26, %v2966_v54  ;;  %v8405_v8 = vpop.f32.mrb[43].mxu1  ;;  %v6952_v25 = vsel %vm1027_vm3, %v6932_v51, 0.0  ;;  %v7165_v51 = vsel %vm6457_vm1, %v7135_v56, 0.0 }
 0x48b   : > { %6953 = vadd.xlane.f32.xlu1 %v6952_v25 }
 0x48d   : > { %7049 = vadd.xlane.f32.xlu0 %v7048_v44  ;;  %v3847_v52 = vpop.f32.mrb[72].mxu0 }
 0x48e   : > { %v10657_v14 = vpop.xlane.xlu0 %6346  ;;  %v8448_v43 = vpop.f32.mrb[73].mxu0 }
 0x48f   : > { %v2971_v26 = vpop.f32.mrb[44].mxu1  ;;  %v3850_v29 = vpop.f32.mrb[74].mxu0  ;;  %7181 = vadd.xlane.f32.xlu1 %v7180_v41 }
 0x490   : > { %v3162_v37 = vadd.f32 %v3161_v13, %v2971_v26  ;;  %v8408_v40 = vpop.f32.mrb[45].mxu1  ;;  %v8449_v63 = vpop.f32.mrb[75].mxu0  ;;  %v7133_v13 = vmul.f32 %v10647_v46, %v6976_v0 }
 0x491   : > { %6956 = vadd.xlane.f32.xlu0 %v6955_v12  ;;  %v2974_v45 = vpop.f32.mrb[46].mxu1 }
 0x492   : > { %v10665_v5 = vpop.xlane.xlu0 %6352  ;;  %v8409_v62 = vpop.f32.mrb[47].mxu1  ;;  %v7159_v44 = vsel %vm6457_vm1, %v7133_v13, 0.0 }
 0x495   : > { %7148 = vadd.xlane.f32.xlu0 %v7147_v21  ;;  %v3855_v42 = vpop.f32.mrb[76].mxu0 }
 0x496   : > { %v10672_v34 = vpop.xlane.xlu0 %6358  ;;  %v8452_v32 = vpop.f32.mrb[77].mxu0 }
 0x497   : > { %v3858_v53 = vpop.f32.mrb[78].mxu0 }
 0x498   : > { %v8453_v3 = vpop.f32.mrb[79].mxu0 }
 0x499   : > { %v3496_v50 = vpop.f32.mrb[48].mxu1  ;;  %7154 = vadd.xlane.f32.xlu0 %v7153_v58 }
 0x49a   : > { %v3518_v30 = vadd.f32 %v3496_v50, %v10593_v19  ;;  %v8432_v48 = vpop.f32.mrb[49].mxu1  ;;  %v10679_v0 = vpop.xlane.xlu0 %6459  ;;  %v7137_v19 = vmul.f32 %v10647_v46, %v6978_v2 }
 0x49b   : > { %v3499_v10 = vpop.f32.mrb[50].mxu1 }
 0x49c   : > { %v3519_v39 = vadd.f32 %v3499_v10, %v10604_v61  ;;  %v8433_v54 = vpop.f32.mrb[51].mxu1  ;;  %v3869_v8 = vadd.f32 %v3847_v52, %v3518_v30  ;;  %v7171_v52 = vsel %vm6457_vm1, %v7137_v19, 0.0 }
 0x49d   : > { %7160 = vadd.xlane.f32.xlu0 %v7159_v44 }
 0x49e   : > { %v3870_v35 = vadd.f32 %v3850_v29, %v3519_v39  ;;  %v10686_v17 = vpop.xlane.xlu0 %6465  ;;  %v7139_v29 = vmul.f32 %v10647_v46, %v6979_v55 }
 0x4a0   : > { %v3863_v38 = vpop.f32.mrb[80].mxu0  ;;  %v7177_v63 = vsel %vm6457_vm1, %v7139_v29, 0.0 }
 0x4a1   : > { %v8456_v12 = vpop.f32.mrb[81].mxu0  ;;  %v3504_v9 = vpop.f32.mrb[52].mxu1  ;;  %7166 = vadd.xlane.f32.xlu0 %v7165_v51 }
 0x4a2   : > { %v3866_v28 = vpop.f32.mrb[82].mxu0  ;;  %v3520_v43 = vadd.f32 %v3504_v9, %v10638_v24  ;;  %v8436_v61 = vpop.f32.mrb[53].mxu1 }
 0x4a3   : > { %v8457_v26 = vpop.f32.mrb[83].mxu0  ;;  %v3507_v57 = vpop.f32.mrb[54].mxu1 }
 0x4a4   : > { %v3521_v2 = vadd.f32 %v3507_v57, %v10649_v11  ;;  %v8437_v25 = vpop.f32.mrb[55].mxu1  ;;  %v3871_v23 = vadd.f32 %v3855_v42, %v3520_v43  ;;  %v10695_v24 = vpop.xlane.xlu0 %6471 }
 0x4a5   : > { %7172 = vadd.xlane.f32.xlu0 %v7171_v52 }
 0x4a6   : > { %v3872_v40 = vadd.f32 %v3858_v53, %v3521_v2 }
 0x4a8   : > { %v4709_v21 = vpop.f32.mrb[84].mxu0  ;;  %v10697_v42 = vpop.xlane.xlu0 %6477 }
 0x4a9   : > { %v8480_v16 = vpop.f32.mrb[85].mxu0  ;;  %7178 = vadd.xlane.f32.xlu0 %v7177_v63 }
 0x4aa   : > { %v3512_v45 = vpop.f32.mrb[56].mxu1  ;;  %v4712_v62 = vpop.f32.mrb[86].mxu0 }
 0x4ab   : > { %v3522_v41 = vadd.f32 %v3512_v45, %v3162_v37  ;;  %v8440_v59 = vpop.f32.mrb[57].mxu1  ;;  %v8481_v58 = vpop.f32.mrb[87].mxu0 }
 0x4ac   : > { %v3515_v55 = vpop.f32.mrb[58].mxu1  ;;  %v10699_v12 = vpop.xlane.xlu0 %6483 }
 0x4ad   : > { %v3873_v13 = vadd.f32 %v3863_v38, %v3522_v41  ;;  %v8441_v32 = vpop.f32.mrb[59].mxu1 }
 0x4b0   : > { %v4717_v11 = vpop.f32.mrb[88].mxu0 }
 0x4b1   : > { %v8484_v50 = vpop.f32.mrb[89].mxu0 }
 0x4b2   : > { %v4353_v53 = vpop.f32.mrb[60].mxu1  ;;  %v4720_v30 = vpop.f32.mrb[90].mxu0 }
 0x4b3   : > { %v4375_v48 = vadd.f32 %v4353_v53, %v3869_v8  ;;  %v8464_v3 = vpop.f32.mrb[61].mxu1  ;;  %v8485_v44 = vpop.f32.mrb[91].mxu0 }
 0x4b4   : > { %v4356_v56 = vpop.f32.mrb[62].mxu1 }
 0x4b5   : > { %v4376_v10 = vadd.f32 %v4356_v56, %v3870_v35  ;;  %v8465_v39 = vpop.f32.mrb[63].mxu1  ;;  %v4731_v54 = vadd.f32 %v4709_v21, %v4375_v48  ;;  %v10701_v35 = vpop.xlane.xlu0 %6489 }
 0x4b7   : > { %v4732_v51 = vadd.f32 %v4712_v62, %v4376_v10 }
 0x4b8   : > { %v4725_v37 = vpop.f32.mrb[92].mxu0 }
 0x4b9   : > { %v8488_v19 = vpop.f32.mrb[93].mxu0  ;;  %v10703_v32 = vpop.xlane.xlu0 %6495 }
 0x4ba   : > { %v4361_v38 = vpop.f32.mrb[64].mxu1  ;;  %v4728_v9 = vpop.f32.mrb[94].mxu0 }
 0x4bb   : > { %v4377_v28 = vadd.f32 %v4361_v38, %v3871_v23  ;;  %v8468_v43 = vpop.f32.mrb[65].mxu1  ;;  %v8489_v61 = vpop.f32.mrb[95].mxu0 }
 0x4bc   : > { %v4364_v26 = vpop.f32.mrb[66].mxu1 }
 0x4bd   : > { %v4378_v52 = vadd.f32 %v4364_v26, %v3872_v40  ;;  %v8469_v29 = vpop.f32.mrb[67].mxu1  ;;  %v4733_v8 = vadd.f32 %v4717_v11, %v4377_v28  ;;  %v10705_v39 = vpop.xlane.xlu0 %6501 }
 0x4bf   : > { %v4734_v57 = vadd.f32 %v4720_v30, %v4378_v52 }
 0x4c0   : > { %v5565_v2 = vpop.f32.mrb[96].mxu0 }
 0x4c1   : > { %v8512_v25 = vpop.f32.mrb[97].mxu0  ;;  %v10707_v29 = vpop.xlane.xlu0 %6612 }
 0x4c2   : > { %v4369_v63 = vpop.f32.mrb[68].mxu1  ;;  %v5568_v21 = vpop.f32.mrb[98].mxu0  ;;  %11336 = vst [vmem:[#allocation6_spill] sm:$0xff] %v10707_v29 }
 0x4c3   : > { %v4379_v16 = vadd.f32 %v4369_v63, %v3873_v13  ;;  %v8472_v45 = vpop.f32.mrb[69].mxu1  ;;  %v8513_v62 = vpop.f32.mrb[99].mxu0 }
 0x4c4   : > { %v4372_v41 = vpop.f32.mrb[70].mxu1 }
 0x4c5   : > { %v4735_v59 = vadd.f32 %v4725_v37, %v4379_v16  ;;  %v8473_v58 = vpop.f32.mrb[71].mxu1  ;;  %v10709_v16 = vpop.xlane.xlu0 %6663 }
 0x4c8   : > { %v5573_v23 = vpop.f32.mrb[100].mxu0 }
 0x4c9   : > { %v8516_v55 = vpop.f32.mrb[101].mxu0  ;;  %v10714_v58 = vpop.xlane.xlu0 %6669 }
 0x4ca   : > { %v5059_v40 = vpop.f32.mrb[72].mxu1  ;;  %v5576_v50 = vpop.f32.mrb[102].mxu0 }
 0x4cb   : > { %v5081_v11 = vadd.f32 %v5059_v40, %v4731_v54  ;;  %v8496_v53 = vpop.f32.mrb[73].mxu1  ;;  %v8517_v30 = vpop.f32.mrb[103].mxu0 }
 0x4cc   : > { %v5062_v48 = vpop.f32.mrb[74].mxu1 }
 0x4cd   : > { %v5082_v3 = vadd.f32 %v5062_v48, %v4732_v51  ;;  %v8497_v44 = vpop.f32.mrb[75].mxu1  ;;  %v5587_v56 = vadd.f32 %v5565_v2, %v5081_v11  ;;  %v10716_v30 = vpop.xlane.xlu0 %6675 }
 0x4cf   : > { %v5588_v10 = vadd.f32 %v5568_v21, %v5082_v3  ;;  %v11337_v3 = vld [vmem:[#allocation9_spill] sm:$0xff] }
 0x4d0   : > { %v5581_v13 = vpop.f32.mrb[104].mxu0 }
 0x4d1   : > { %v8520_v19 = vpop.f32.mrb[105].mxu0 }
 0x4d2   : > { %v5067_v37 = vpop.f32.mrb[76].mxu1  ;;  %v5584_v38 = vpop.f32.mrb[106].mxu0 }
 0x4d3   : > { %v5083_v9 = vadd.f32 %v5067_v37, %v4733_v8  ;;  %v8500_v28 = vpop.f32.mrb[77].mxu1  ;;  %v8521_v43 = vpop.f32.mrb[107].mxu0  ;;  %v8082_v8 = vld [vmem:[%s11282_s9] ss:$0 sm:$0xff] }
 0x4d4   : > { %v5070_v61 = vpop.f32.mrb[78].mxu1 }
 0x4d5   : > { %v5084_v26 = vadd.f32 %v5070_v61, %v4734_v57  ;;  %v8501_v52 = vpop.f32.mrb[79].mxu1  ;;  %v5589_v54 = vadd.f32 %v5573_v23, %v5083_v9 }
 0x4d7   : > { %v5590_v25 = vadd.f32 %v5576_v50, %v5084_v26 }
 0x4da   : > { %v5075_v51 = vpop.f32.mrb[80].mxu1 }
 0x4db   : > { %v5085_v63 = vadd.f32 %v5075_v51, %v4735_v59  ;;  %v8504_v2 = vpop.f32.mrb[81].mxu1 }
 0x4dc   : > { %v5078_v21 = vpop.f32.mrb[82].mxu1 }
 0x4dd   : > { %v5591_v45 = vadd.f32 %v5581_v13, %v5085_v63  ;;  %v8505_v62 = vpop.f32.mrb[83].mxu1 }
 0x4de   : > { %v10722_v62 = vpop.xlane.xlu0 %6681 }
 0x4e2   : > { %v5921_v41 = vpop.f32.mrb[84].mxu1 }
 0x4e3   : > { %v5943_v57 = vadd.f32 %v5921_v41, %v5587_v56  ;;  %v8528_v23 = vpop.f32.mrb[85].mxu1 }
 0x4e4   : > { %v5924_v55 = vpop.f32.mrb[86].mxu1 }
 0x4e5   : > { %v5955_v40 = vadd.f32 %v8082_v8, %v5943_v57  ;;  %v5944_v50 = vadd.f32 %v5924_v55, %v5588_v10  ;;  %v8529_v11 = vpop.f32.mrb[87].mxu1 }
 0x4e7   : > { %v5960_v59 = vmax.f32 %v5955_v40, 0.0  ;;  %v5956_v53 = vadd.f32 %v8082_v8, %v5944_v50 }
 0x4e9   : > { %v5970_v48 = vcombine.high %v5960_v59, %v5960_v59  ;;  %v5977_v44 = vrot.slane %v5960_v59, %v11337_v3  ;;  %v5961_v13 = vmax.f32 %v5956_v53, 0.0 }
 0x4ea   : > { %v5929_v19 = vpop.f32.mrb[88].mxu1 }
 0x4eb   : > { %v5984_v37 = vrot.slane %v5970_v48, %v11337_v3  ;;  %v5985_v38 = vcombine.high %v5977_v44, %v5977_v44  ;;  %v5987_v9 = vcombine.high %v5961_v13, %v5961_v13  ;;  %v5994_v56 = vrot.slane %v5961_v13, %v11337_v3  ;;  %v8532_v28 = vpop.f32.mrb[89].mxu1  ;;  %v10728_v48 = vpop.xlane.xlu1 %6246 }
 0x4ec   : > { %v5945_v43 = vadd.f32 %v5929_v19, %v5589_v54  ;;  %v5932_v61 = vpop.f32.mrb[90].mxu1 }
 0x4ed   : > { %v6046_v10 = vcombine.low %v5977_v44, %v5985_v38  ;;  %v5986_v26 = vcombine.high %v5984_v37, %v5984_v37  ;;  %v6001_v52 = vrot.slane %v5987_v9, %v11337_v3  ;;  %v8533_v51 = vpop.f32.mrb[91].mxu1  ;;  %v6002_v63 = vcombine.high %v5994_v56, %v5994_v56 }
 0x4ee   : > { %v5957_v2 = vadd.f32 %v8082_v8, %v5945_v43  ;;  %v5946_v21 = vadd.f32 %v5932_v61, %v5590_v25  ;;  %v6060_v57 = vrot.slane %v5984_v37, %v11337_v3 }
 0x4ef   : > { %v6053_v41 = vrot.slane %v6046_v10, %v11337_v3  ;;  %v6003_v23 = vcombine.high %v6001_v52, %v6001_v52  ;;  %v6062_v55 = vcombine.low %v5986_v26, %v5994_v56  ;;  %v6076_v59 = vrot.slane %v6002_v63, %v11337_v3 }
 0x4f0   : > { %v5962_v40 = vmax.f32 %v5957_v2, 0.0  ;;  %v5958_v50 = vadd.f32 %v8082_v8, %v5946_v21 }
 0x4f1   : > { %v6061_v54 = vcombine.low %v6053_v41, %v6060_v57  ;;  %v6069_v11 = vrot.slane %v6062_v55, %v11337_v3  ;;  %v6078_v53 = vcombine.low %v6001_v52, %v6003_v23  ;;  %v10734_v52 = vpop.xlane.xlu0 %6687 }
 0x4f2   : > { %v6004_v25 = vcombine.high %v5962_v40, %v5962_v40  ;;  %v6011_v44 = vrot.slane %v5962_v40, %v11337_v3  ;;  %v5963_v13 = vmax.f32 %v5958_v50, 0.0  ;;  %v5937_v19 = vpop.f32.mrb[92].mxu1 }
 0x4f3   : > { %v8125_v38 = vpack.c.bf16 %v6061_v54, %v6061_v54  ;;  %v6077_v37 = vcombine.low %v6069_v11, %v6076_v59  ;;  %v6085_v9 = vrot.slane %v6078_v53, %v11337_v3  ;;  %v5947_v56 = vadd.f32 %v5937_v19, %v5591_v45  ;;  %v8536_v28 = vpop.f32.mrb[93].mxu1  ;;  %v10739_v59 = vpop.xlane.xlu1 %6313 }
 0x4f4   : > { %v6018_v43 = vrot.slane %v6004_v25, %v11337_v3  ;;  %v6019_v61 = vcombine.high %v6011_v44, %v6011_v44  ;;  %v6092_v10 = vrot.slane %v6011_v44, %v11337_v3  ;;  %v6021_v26 = vcombine.high %v5963_v13, %v5963_v13  ;;  %v5940_v51 = vpop.f32.mrb[94].mxu1 }
 0x4f5   : > { %v6193_v63 = vrot.slane %v8125_v38, 7  ;;  %v8126_v2 = vpack.c.bf16 %v6077_v37, %v6077_v37  ;;  %v6028_v21 = vrot.slane %v5963_v13, %v11337_v3  ;;  %v5959_v41 = vadd.f32 %v8082_v8, %v5947_v56  ;;  %v8537_v57 = vpop.f32.mrb[95].mxu1 }
 0x4f6   : > { %v6020_v23 = vcombine.high %v6018_v43, %v6018_v43  ;;  %v6093_v55 = vcombine.low %v6085_v9, %v6092_v10  ;;  %v6094_v40 = vcombine.low %v6019_v61, %v6018_v43  ;;  %v6035_v45 = vrot.slane %v6021_v26, %v11337_v3  ;;  %v10745_v9 = vpop.xlane.xlu0 %6693 }
 0x4f7   : > { %6207 = vst.msk [vmem:[#allocation4 + $0x10] sm:$0xe] %vm6206_vm2, %v6193_v63  ;;  %v6194_v50 = vrot.slane %v8126_v2, 7  ;;  %v6036_v54 = vcombine.high %v6028_v21, %v6028_v21  ;;  %v5964_v11 = vmax.f32 %v5959_v41, 0.0  ;;  %v10752_v2 = vpop.xlane.xlu1 %6319 }
 0x4f8   : > { %v6101_v53 = vrot.slane %v6094_v40, %v11337_v3  ;;  %v6108_v25 = vrot.slane %v6020_v23, %v11337_v3  ;;  %v8127_v44 = vpack.c.bf16 %v6093_v55, %v6093_v55  ;;  %v6037_v13 = vcombine.high %v6035_v45, %v6035_v45 }
 0x4f9   : > { %6208 = vst.msk [vmem:[#allocation4 + $0x18] sm:$0xe] %vm6206_vm2, %v6194_v50  ;;  %v6110_v8 = vcombine.low %v6028_v21, %v6036_v54  ;;  %v6044_v19 = vrot.slane %v5964_v11, %v11337_v3  ;;  %v6124_v28 = vrot.slane %v6035_v45, %v11337_v3 }
 0x4fa   : > { %v6109_v38 = vcombine.low %v6101_v53, %v6108_v25  ;;  %v6195_v37 = vrot.slane %v8127_v44, 7  ;;  %v10759_v50 = vpop.xlane.xlu0 %6699  ;;  %v10767_v44 = vld [vmem:[%s11283_s10 + $0x1] ss:$0 sm:$0xff] }
 0x4fb   : > { %v6117_v56 = vrot.slane %v6110_v8, %v11337_v3  ;;  %v6045_v43 = vcombine.high %v6044_v19, %v6044_v19  ;;  %v6126_v61 = vcombine.low %v6037_v13, %v6044_v19  ;;  %11338 = vst [vmem:[#allocation7_spill] sm:$0xff] %v10759_v50  ;;  %v10773_v13 = vld [vmem:[%s11283_s10] ss:$0 sm:$0xff] }
 0x4fc   : > { %v8128_v10 = vpack.c.bf16 %v6109_v38, %v6109_v38  ;;  %6209 = vst.msk [vmem:[#allocation4 + $0x20] sm:$0xe] %vm6206_vm2, %v6195_v37  ;;  %v10776_v38 = vpop.xlane.xlu1 %6455  ;;  %v10781_v37 = vld [vmem:[%s11283_s10 + $0x2] ss:$0 sm:$0xff] }
 0x4fd   : > { %v6125_v26 = vcombine.low %v6117_v56, %v6124_v28  ;;  %v6133_v51 = vrot.slane %v6126_v61, %v11337_v3  ;;  %v6140_v63 = vrot.slane %v6045_v43, %v11337_v3 }
 0x4fe   : > { %v6196_v21 = vrot.slane %v8128_v10, 7  ;;  %v6418_v41 = vld [vmem:[#allocation4 + $0x10] sm:$0xe] }
 0x4ff   : > { %v8129_v57 = vpack.c.bf16 %v6125_v26, %v6125_v26  ;;  %v6141_v23 = vcombine.low %v6133_v51, %v6140_v63  ;;  %v6426_v40 = vunpack.c.l.bf16 %v6418_v41  ;;  %v6764_v26 = vld [vmem:[#allocation4 + $0x10] sm:$0xe]  ;;  %v10789_v51 = vpop.xlane.xlu0 %6705 }
 0x500   : > { %6210 = vst.msk [vmem:[#allocation4 + $0x28] sm:$0xe] %vm6206_vm2, %v6196_v21  ;;  %v10755_v55 = vld [vmem:[#allocation4 + $0x10] ss:$8 sps:$4 sm:$0xff]   ;;  %v6772_v63 = vunpack.c.l.bf16 %v6764_v26 }
 0x501   : > { %v10757_v45 = vld [vmem:[#allocation4 + $0x10] ss:$8 sps:$4 sm:$0xff]   ;;  %v6197_v54 = vrot.slane %v8129_v57, 7  ;;  %v8130_v11 = vpack.c.bf16 %v6141_v23, %v6141_v23  ;;  %v6223_v53 = vunpack.c.l.bf16 %v10755_v55  ;;  %v6441_v56 = vmul.f32 %v10781_v37, %v6426_v40 }
 0x502   : > { %v6569_v3 = vunpack.c.l.bf16 %v10757_v45  ;;  %v6224_v10 = vunpack.c.h.bf16 %v10755_v55  ;;  %v11297_v21 = vunpack.c.h.bf16 %v10757_v45 }
 0x503   : > { %6211 = vst.msk [vmem:[#allocation4 + $0x30] sm:$0xe] %vm6206_vm2, %v6197_v54  ;;  %v6198_v25 = vrot.slane %v8130_v11, 7  ;;  %v6299_v8 = vmul.f32 %v10767_v44, %v6223_v53  ;;  %v6236_v19 = vmul.f32 %v10773_v13, %v6223_v53  ;;  %v6467_v41 = vsel %vm6453_vm0, %v6441_v56, 0.0  ;;  %v10798_v54 = vpop.xlane.xlu1 %6462  ;;  %v10800_v11 = vld [vmem:[#allocation4 + $0x10] ss:$16 sps:$4 sm:$0xff]  }
 0x504   : > { %v6583_v61 = vmul.f32 %v10429_v4, %v6569_v3  ;;  %v6645_v23 = vmul.f32 %v10442_v20, %v6569_v3  ;;  %v6237_v40 = vmul.f32 %v10773_v13, %v6224_v10  ;;  %v6786_v53 = vmul.f32 %v10508_v47, %v6772_v63 }
 0x505   : > { %6212 = vst.msk [vmem:[#allocation4 + $0x38] sm:$0xe] %vm6206_vm2, %v6198_v25  ;;  %v6324_v28 = vsel %vm6311_vm6, %v6299_v8, 0.0  ;;  %v6248_v43 = vsel %vm1027_vm3, %v6236_v19, 0.0  ;;  %v6927_v25 = vmul.f32 %v10633_v31, %v11297_v21  ;;  %v10806_v8 = vpop.xlane.xlu0 %6804  ;;  %v6912_v19 = vunpack.c.l.bf16 %v10800_v11 }
 0x506   : > { %6325 = vadd.xlane.f32.xlu1 %v6324_v28  ;;  %6249 = vadd.xlane.f32.xlu0 %v6248_v43  ;;  %v6593_v57 = vsel %vm1027_vm3, %v6583_v61, 0.0  ;;  %v6665_v20 = vsel %vm6311_vm6, %v6645_v23, 0.0  ;;  %v6251_v3 = vsel %vm1027_vm3, %v6237_v40, 0.0  ;;  %v11299_v56 = vunpack.c.h.bf16 %v10800_v11  ;;  %v7453_v43 = vpop.f32.mrb[108].mxu0  ;;  %v7107_v40 = vld [vmem:[#allocation4 + $0x10] sm:$0xe] }
 0x507   : > { %v10814_v47 = vpop.xlane.xlu1 %6591  ;;  %v8542_v61 = vpop.f32.mrb[109].mxu0  ;;  %v6806_v26 = vsel %vm6453_vm0, %v6786_v53, 0.0  ;;  %v6937_v63 = vsel %vm1027_vm3, %v6927_v25, 0.0  ;;  %v6926_v53 = vmul.f32 %v10633_v31, %v6912_v19  ;;  %v7115_v25 = vunpack.c.l.bf16 %v7107_v40 }
 0x508   : > { %v6377_v61 = vrot.slane %v10595_v36, 1  ;;  %v6376_v21 = vrot.slane %v10739_v59, 1  ;;  %v6520_v36 = vrot.slane %v10679_v0, 2 }
 0x50a   : > { %6468 = vadd.xlane.f32.xlu1 %v6467_v41  ;;  %6594 = vadd.xlane.f32.xlu0 %v6593_v57  ;;  %v10812_v28 = vld [vmem:[#allocation4 + $0x28] ss:$8 sps:$4 sm:$0xff]   ;;  %v6987_v41 = vmul.f32 %v10559_v1, %v6912_v19  ;;  %v6585_v57 = vmul.f32 %v10429_v4, %v11299_v56  ;;  %v7128_v19 = vmul.f32 %v10647_v46, %v7115_v25 }
 0x50b   : > { %v11301_v23 = vunpack.c.l.bf16 %v10812_v28  ;;  %v6661_v56 = vpop.xlane.xlu1 %6660  ;;  %v6378_v59 = vsel %vm1074_vm4, %v6376_v21, %v6377_v61 }
 0x50c   : > { %v7003_v33 = vsel %vm6311_vm6, %v6987_v41, 0.0  ;;  %v6599_v4 = vsel %vm1027_vm3, %v6585_v57, 0.0  ;;  %v6519_v41 = vrot.slane %v10776_v38, 2  ;;  %v6934_v57 = vsel %vm1027_vm3, %v6926_v53, 0.0  ;;  %v7383_v53 = vld [vmem:[%s11286_s13] sm:$0x1] }
 0x50d   : > { %v6408_v0 = vadd.f32 %v6378_v59, %v10584_v7  ;;  %v6301_v38 = vmul.f32 %v10767_v44, %v6224_v10  ;;  %v10863_v7 = vld [vmem:[%s11283_s10 + $0x4] ss:$0 sm:$0xff]  ;;  %v10869_v10 = vld [vmem:[#allocation4 + $0x18] ss:$8 sps:$4 sm:$0xff]  }
 0x50e   : > { %6666 = vadd.xlane.f32.xlu1 %v6665_v20  ;;  %6252 = vadd.xlane.f32.xlu0 %v6251_v3  ;;  %v10823_v20 = vld [vmem:[#allocation4 + $0x28] ss:$16 sps:$4 sm:$0xff]   ;;  %v10825_v3 = vpop.xlane.xlu0 %6810  ;;  %v6521_v61 = vsel %vm1116_vm5, %v6519_v41, %v6520_v36  ;;  %v6723_v41 = vrot.slane %v6661_v56, 1  ;;  %v6570_v55 = vunpack.c.l.bf16 %v10869_v10  ;;  %v11341_v56 = vunpack.c.l.bf16 %v10602_v18 }
 0x50f   : > { %v10849_v25 = vpop.xlane.xlu1 %6702  ;;  %v6551_v59 = vadd.f32 %v6521_v61, %v6408_v0  ;;  %v6865_v0 = vrot.slane %v10806_v8, 2 }
 0x510   : > { %11339 = vst [vmem:[#allocation9_spill] sm:$0xff] %v10849_v25 }
 0x512   : > { %6807 = vadd.xlane.f32.xlu1 %v6806_v26  ;;  %6938 = vadd.xlane.f32.xlu0 %v6937_v63  ;;  %v6239_v26 = vmul.f32 %v10773_v13, %v11301_v23  ;;  %v11302_v63 = vunpack.c.l.bf16 %v10823_v20  ;;  %v10838_v40 = vpop.xlane.xlu0 %6816 }
 0x513   : > { %v6802_v29 = vpop.xlane.xlu1 %6801 }
 0x514   : > { %v6257_v49 = vsel %vm1027_vm3, %v6239_v26, 0.0  ;;  %v6929_v23 = vmul.f32 %v10633_v31, %v11302_v63  ;;  %v7144_v26 = vsel %vm6453_vm0, %v7128_v19, 0.0  ;;  %v6724_v19 = vrot.slane %v10709_v16, 1  ;;  %v10884_v16 = vld [vmem:[#allocation4 + $0x20] ss:$24 sps:$4 sm:$0xff]  }
 0x515   : > { %v6330_v63 = vsel %vm6311_vm6, %v6301_v38, 0.0  ;;  %v11304_v18 = vunpack.c.h.bf16 %v10884_v16 }
 0x516   : > { %7004 = vadd.xlane.f32.xlu1 %v7003_v33  ;;  %6600 = vadd.xlane.f32.xlu0 %v6599_v4  ;;  %v11303_v33 = vunpack.c.h.bf16 %v10812_v28  ;;  %v6419_v4 = vld [vmem:[#allocation4 + $0x18] sm:$0xe]  ;;  %v10871_v36 = vpop.xlane.xlu0 %6822  ;;  %v6725_v61 = vsel %vm1074_vm4, %v6723_v41, %v6724_v19 }
 0x517   : > { %v6427_v21 = vunpack.c.l.bf16 %v6419_v4  ;;  %v7454_v4 = vadd.f32 %v7453_v43, %v7383_v53  ;;  %v7141_v43 = vmul.f32 %v10647_v46, %v11341_v56  ;;  %v6864_v53 = vrot.slane %v6802_v29, 2  ;;  %v10904_v29 = vld [vmem:[%s11283_s10 + $0x5] ss:$0 sm:$0xff] }
 0x519   : > { %v7457_v25 = vmax.f32 %v7454_v4, 0.0  ;;  %v7183_v8 = vsel %vm6457_vm1, %v7141_v43, 0.0 }
 0x51a   : > { %6935 = vadd.xlane.f32.xlu1 %v6934_v57  ;;  %6258 = vadd.xlane.f32.xlu0 %v6257_v49  ;;  %v6943_v57 = vsel %vm1027_vm3, %v6929_v23, 0.0  ;;  %v6587_v49 = vmul.f32 %v10863_v7, %v11303_v33  ;;  %v7458_v23 = vld [vmem:[%s11287_s14] sm:$0x3]  ;;  %v6443_v33 = vmul.f32 %v10781_v37, %v6427_v21  ;;  %v10890_v38 = vpop.xlane.xlu0 %6828  ;;  %v6614_v21 = vadd.f32 %v10814_v47, %v6551_v59 }
 0x51b   : > { %8544 = vmatpush3.msk.msra.mxu0 %vm7464_vm7, %v7458_v23  ;;  %v6584_v23 = vmul.f32 %v10863_v7, %v6570_v55 }
 0x51c   : > { %8546 = vmatmul.mubr.msk.f32.vlgmr.msra.gmra.mrb[110].mxu0 %vm7460_vm8, %v7457_v25  ;;  %v6765_v25 = vld [vmem:[#allocation4 + $0x18] sm:$0xe]  ;;  %v6755_v4 = vadd.f32 %v6725_v61, %v6614_v21 }
 0x51d   : > { %v6596_v47 = vsel %vm1027_vm3, %v6584_v23, 0.0  ;;  %v6773_v19 = vunpack.c.l.bf16 %v6765_v25  ;;  %v7108_v61 = vld [vmem:[#allocation4 + $0x18] sm:$0xe] }
 0x51e   : > { %7145 = vadd.xlane.f32.xlu1 %v7144_v26  ;;  %6944 = vadd.xlane.f32.xlu0 %v6943_v57  ;;  %v6605_v26 = vsel %vm1027_vm3, %v6587_v49, 0.0  ;;  %v11340_v57 = vunpack.c.h.bf16 %v10823_v20  ;;  %v6473_v49 = vsel %vm6453_vm0, %v6443_v33, 0.0  ;;  %v6931_v33 = vmul.f32 %v10633_v31, %v11304_v18  ;;  %v10910_v59 = vpop.xlane.xlu0 %6834 }
 0x51f   : > { %v7116_v25 = vunpack.c.l.bf16 %v7108_v61 }
 0x520   : > { %v6241_v50 = vmul.f32 %v10773_v13, %v11340_v57  ;;  %v11342_v57 = vunpack.c.l.bf16 %v10613_v15 }
 0x522   : > { %6331 = vadd.xlane.f32.xlu1 %v6330_v63  ;;  %6606 = vadd.xlane.f32.xlu0 %v6605_v26  ;;  %v6263_v63 = vsel %vm1027_vm3, %v6241_v50, 0.0  ;;  %v6866_v26 = vsel %vm1116_vm5, %v6864_v53, %v6865_v0  ;;  %v6647_v50 = vmul.f32 %v10904_v29, %v6570_v55  ;;  %v7143_v56 = vmul.f32 %v10647_v46, %v11342_v57  ;;  %v10922_v55 = vld [vmem:[%s11283_s10 + $0x6] ss:$0 sm:$0xff] }
 0x523   : > { %v10912_v41 = vadd.f32 %v6866_v26, %v6755_v4  ;;  %v6949_v0 = vsel %vm1027_vm3, %v6931_v33, 0.0  ;;  %v6788_v21 = vmul.f32 %v10922_v55, %v6773_v19  ;;  %v7130_v4 = vmul.f32 %v10647_v46, %v7116_v25 }
 0x524   : > { %v6671_v43 = vsel %vm6311_vm6, %v6647_v50, 0.0  ;;  %v7189_v53 = vsel %vm6457_vm1, %v7143_v56, 0.0  ;;  %v6225_v26 = vunpack.c.h.bf16 %v10869_v10 }
 0x525   : > { %v6812_v15 = vsel %vm6453_vm0, %v6788_v21, 0.0  ;;  %v7150_v50 = vsel %vm6453_vm0, %v7130_v4, 0.0  ;;  %v6914_v4 = vunpack.c.l.bf16 %v10884_v16 }
 0x526   : > { %6474 = vadd.xlane.f32.xlu1 %v6473_v49  ;;  %6264 = vadd.xlane.f32.xlu0 %v6263_v63  ;;  %v10926_v49 = vpop.xlane.xlu0 %6840  ;;  %v11344_v63 = vunpack.c.h.bf16 %v10757_v45  ;;  %v6238_v33 = vmul.f32 %v10773_v13, %v6225_v26  ;;  %v6420_v45 = vld [vmem:[#allocation4 + $0x20] sm:$0xe]  ;;  %v6303_v57 = vmul.f32 %v10767_v44, %v6225_v26 }
 0x527   : > { %11343 = vst [vmem:[#allocation10_spill] sm:$0xff] %v10926_v49  ;;  %v6428_v56 = vunpack.c.l.bf16 %v6420_v45 }
 0x528   : > { %v6989_v23 = vmul.f32 %v10559_v1, %v11344_v63  ;;  %v6254_v1 = vsel %vm1027_vm3, %v6238_v33, 0.0  ;;  %v7109_v33 = vld [vmem:[#allocation4 + $0x20] sm:$0xe] }
 0x529   : > { %v6445_v10 = vmul.f32 %v10781_v37, %v6428_v56  ;;  %v7117_v56 = vunpack.c.l.bf16 %v7109_v33 }
 0x52a   : > { %6597 = vadd.xlane.f32.xlu1 %v6596_v47  ;;  %7184 = vadd.xlane.f32.xlu0 %v7183_v8  ;;  %v7009_v8 = vsel %vm6311_vm6, %v6989_v23, 0.0  ;;  %v10935_v47 = vpop.xlane.xlu0 %6846 }
 0x52b   : > { %v6479_v61 = vsel %vm6453_vm0, %v6445_v10, 0.0 }
 0x52e   : > { %6672 = vadd.xlane.f32.xlu1 %v6671_v43  ;;  %6950 = vadd.xlane.f32.xlu0 %v6949_v0  ;;  %v10939_v19 = vpop.xlane.xlu0 %7007  ;;  %v6336_v43 = vsel %vm6311_vm6, %v6303_v57, 0.0  ;;  %v6766_v0 = vld [vmem:[#allocation4 + $0x20] sm:$0xe]  ;;  %v6928_v57 = vmul.f32 %v10633_v31, %v6914_v4 }
 0x52f   : > { %v6774_v63 = vunpack.c.l.bf16 %v6766_v0  ;;  %v7132_v0 = vmul.f32 %v10647_v46, %v7117_v56  ;;  %v6767_v56 = vld [vmem:[#allocation4 + $0x28] sm:$0xe] }
 0x530   : > { %v6940_v10 = vsel %vm1027_vm3, %v6928_v57, 0.0 }
 0x532   : > { %6813 = vadd.xlane.f32.xlu1 %v6812_v15  ;;  %7190 = vadd.xlane.f32.xlu0 %v7189_v53  ;;  %v10945_v21 = vpop.xlane.xlu0 %7013  ;;  %v11345_v53 = vunpack.c.h.bf16 %v10800_v11 }
 0x534   : > { %v6649_v15 = vmul.f32 %v10904_v29, %v11345_v53  ;;  %v7156_v53 = vsel %vm6453_vm0, %v7132_v0, 0.0 }
 0x536   : > { %7010 = vadd.xlane.f32.xlu1 %v7009_v8  ;;  %v10951_v23 = vpop.xlane.xlu0 %7019  ;;  %v6677_v25 = vsel %vm6311_vm6, %v6649_v15, 0.0  ;;  %v6790_v8 = vmul.f32 %v10922_v55, %v6774_v63  ;;  %v11346_v15 = vunpack.c.l.bf16 %v10812_v28 }
 0x538   : > { %v6818_v26 = vsel %vm6453_vm0, %v6790_v8, 0.0  ;;  %v6305_v63 = vmul.f32 %v10767_v44, %v11346_v15  ;;  %v6564_v8 = vld [vmem:[#allocation4 + $0x28] ss:$8 sps:$4 sm:$0xff]  }
 0x53a   : > { %7151 = vadd.xlane.f32.xlu1 %v7150_v50  ;;  %v10960_v50 = vld [vmem:[%s11283_s10 + $0x9] ss:$0 sm:$0xff]  ;;  %v10963_v45 = vpop.xlane.xlu0 %7025 }
 0x53b   : > { %v6991_v11 = vmul.f32 %v10960_v50, %v6914_v4  ;;  %v6342_v4 = vsel %vm6311_vm6, %v6305_v63, 0.0 }
 0x53e   : > { %6255 = vadd.xlane.f32.xlu1 %v6254_v1  ;;  %v7015_v1 = vsel %vm6311_vm6, %v6991_v11, 0.0  ;;  %v6572_v11 = vunpack.c.l.bf16 %v6564_v8 }
 0x540   : > { %v6586_v57 = vmul.f32 %v10863_v7, %v6572_v11  ;;  %v6651_v0 = vmul.f32 %v10904_v29, %v6572_v11 }
 0x542   : > { %6337 = vadd.xlane.f32.xlu1 %v6336_v43  ;;  %v10967_v43 = vpop.xlane.xlu0 %7031  ;;  %v6683_v15 = vsel %vm6311_vm6, %v6651_v0, 0.0 }
 0x546   : > { %6480 = vadd.xlane.f32.xlu1 %v6479_v61  ;;  %v6421_v61 = vld [vmem:[#allocation4 + $0x28] sm:$0xe]  ;;  %v10975_v31 = vpop.xlane.xlu0 %7037 }
 0x547   : > { %11347 = vst [vmem:[#allocation11_spill] sm:$0xff] %v10975_v31  ;;  %v11001_v31 = vpop.xlane.xlu1 %6843 }
 0x548   : > { %11353 = vst [vmem:[#allocation16_spill] sm:$0xff] %v11001_v31 }
 0x54a   : > { %6678 = vadd.xlane.f32.xlu1 %v6677_v25  ;;  %v6429_v25 = vunpack.c.l.bf16 %v6421_v61  ;;  %v10979_v33 = vpop.xlane.xlu0 %7043  ;;  %v6775_v61 = vunpack.c.l.bf16 %v6767_v56 }
 0x54b   : > { %11348 = vst [vmem:[#allocation12_spill] sm:$0xff] %v10979_v33 }
 0x54c   : > { %v6792_v63 = vmul.f32 %v10922_v55, %v6775_v61 }
 0x54e   : > { %6819 = vadd.xlane.f32.xlu1 %v6818_v26  ;;  %v6447_v26 = vmul.f32 %v10781_v37, %v6429_v25  ;;  %v7110_v25 = vld [vmem:[#allocation4 + $0x28] sm:$0xe] }
 0x54f   : > { %v7118_v18 = vunpack.c.l.bf16 %v7110_v25 }
 0x551   : > { %v7134_v56 = vmul.f32 %v10647_v46, %v7118_v18  ;;  %v11007_v46 = vpop.xlane.xlu1 %7040 }
 0x552   : > { %7016 = vadd.xlane.f32.xlu1 %v7015_v1  ;;  %v6485_v1 = vsel %vm6453_vm0, %v6447_v26, 0.0  ;;  %v6824_v26 = vsel %vm6453_vm0, %v6792_v63, 0.0  ;;  %v6422_v63 = vld [vmem:[#allocation4 + $0x30] sm:$0xe]  ;;  %11354 = vst [vmem:[#allocation17_spill] sm:$0xff] %v11007_v46 }
 0x553   : > { %v7162_v61 = vsel %vm6453_vm0, %v7134_v56, 0.0  ;;  %v11355_v56 = vunpack.c.h.bf16 %v10812_v28 }
 0x556   : > { %6941 = vadd.xlane.f32.xlu1 %v6940_v10  ;;  %v6602_v10 = vsel %vm1027_vm3, %v6586_v57, 0.0 }
 0x55a   : > { %7157 = vadd.xlane.f32.xlu1 %v7156_v53  ;;  %v10985_v53 = vpop.xlane.xlu0 %7049 }
 0x55b   : > { %11349 = vst [vmem:[#allocation13_spill] sm:$0xff] %v10985_v53 }
 0x55e   : > { %6343 = vadd.xlane.f32.xlu1 %v6342_v4  ;;  %v10989_v4 = vpop.xlane.xlu0 %6956 }
 0x55f   : > { %11350 = vst [vmem:[#allocation14_spill] sm:$0xff] %v10989_v4  ;;  %v6379_v4 = vrot.slane %v10752_v2, 1 }
 0x562   : > { %6486 = vadd.xlane.f32.xlu1 %v6485_v1  ;;  %v11351_v1 = vunpack.c.l.bf16 %v10823_v20  ;;  %v10997_v0 = vpop.xlane.xlu0 %7148 }
 0x563   : > { %11352 = vst [vmem:[#allocation15_spill] sm:$0xff] %v10997_v0  ;;  %v7114_v0 = vld [vmem:[#allocation4 + $0x48] sm:$0xe] }
 0x564   : > { %v6993_v57 = vmul.f32 %v10960_v50, %v11351_v1  ;;  %v6430_v1 = vunpack.c.l.bf16 %v6422_v63  ;;  %v11019_v63 = vld [vmem:[#allocation4 + $0x30] ss:$8 sps:$4 sm:$0xff]  }
 0x566   : > { %6603 = vadd.xlane.f32.xlu1 %v6602_v10  ;;  %v7021_v11 = vsel %vm6311_vm6, %v6993_v57, 0.0  ;;  %v6227_v10 = vunpack.c.h.bf16 %v6564_v8  ;;  %v11003_v33 = vpop.xlane.xlu0 %7154  ;;  %v6449_v8 = vmul.f32 %v10781_v37, %v6430_v1  ;;  %v6768_v57 = vld [vmem:[#allocation4 + $0x30] sm:$0xe] }
 0x56a   : > { %6684 = vadd.xlane.f32.xlu1 %v6683_v15  ;;  %v6240_v15 = vmul.f32 %v10773_v13, %v6227_v10  ;;  %v11011_v13 = vpop.xlane.xlu0 %7160 }
 0x56c   : > { %v6260_v25 = vsel %vm1027_vm3, %v6240_v15, 0.0  ;;  %v11017_v15 = vpop.xlane.xlu1 %7046 }
 0x56d   : > { %11356 = vst [vmem:[#allocation18_spill] sm:$0xff] %v11017_v15 }
 0x56e   : > { %6825 = vadd.xlane.f32.xlu1 %v6824_v26  ;;  %v6307_v26 = vmul.f32 %v10767_v44, %v6227_v10  ;;  %v6776_v10 = vunpack.c.l.bf16 %v6768_v57 }
 0x570   : > { %v6348_v18 = vsel %vm6311_vm6, %v6307_v26, 0.0  ;;  %v6794_v1 = vmul.f32 %v10922_v55, %v6776_v10 }
 0x572   : > { %7022 = vadd.xlane.f32.xlu1 %v7021_v11  ;;  %v6491_v11 = vsel %vm6453_vm0, %v6449_v8, 0.0  ;;  %v11026_v8 = vpop.xlane.xlu1 %6953  ;;  %v6830_v28 = vsel %vm6453_vm0, %v6794_v1, 0.0 }
 0x573   : > { %11357 = vst [vmem:[#allocation19_spill] sm:$0xff] %v11026_v8  ;;  %v7122_v8 = vunpack.c.l.bf16 %v7114_v0 }
 0x576   : > { %7163 = vadd.xlane.f32.xlu1 %v7162_v61  ;;  %v6653_v61 = vmul.f32 %v10904_v29, %v11355_v56  ;;  %v11033_v49 = vpop.xlane.xlu1 %7181 }
 0x577   : > { %11359 = vst [vmem:[#allocation21_spill] sm:$0xff] %v11033_v49  ;;  %v6380_v49 = vrot.slane %v10606_v27, 1 }
 0x578   : > { %v6689_v26 = vsel %vm6311_vm6, %v6653_v61, 0.0  ;;  %v8684_v61 = vld [vmem:[%s11283_s10 + $0x8] ss:$0 sm:$0xff] }
 0x57a   : > { %6261 = vadd.xlane.f32.xlu1 %v6260_v25  ;;  %v11021_v25 = vpop.xlane.xlu0 %7166 }
 0x57e   : > { %6349 = vadd.xlane.f32.xlu1 %v6348_v18  ;;  %v6916_v18 = vunpack.c.l.bf16 %v11019_v63  ;;  %v11030_v57 = vpop.xlane.xlu0 %7172 }
 0x57f   : > { %11358 = vst [vmem:[#allocation20_spill] sm:$0xff] %v11030_v57  ;;  %v11044_v57 = vld [vmem:[%s11283_s10 + $0xa] ss:$0 sm:$0xff] }
 0x580   : > { %v6995_v56 = vmul.f32 %v10960_v50, %v6916_v18  ;;  %v6930_v10 = vmul.f32 %v8684_v61, %v6916_v18  ;;  %v7142_v0 = vmul.f32 %v11044_v57, %v7122_v8  ;;  %v6522_v61 = vrot.slane %v10798_v54, 2 }
 0x581   : > { %v11361_v8 = vunpack.c.h.bf16 %v10823_v20  ;;  %v6868_v20 = vrot.slane %v10825_v3, 2 }
 0x582   : > { %6492 = vadd.xlane.f32.xlu1 %v6491_v11  ;;  %v7111_v11 = vld [vmem:[#allocation4 + $0x30] sm:$0xe]  ;;  %v7027_v46 = vsel %vm6311_vm6, %v6995_v56, 0.0  ;;  %v11038_v1 = vpop.xlane.xlu0 %7178  ;;  %v7186_v2 = vsel %vm6453_vm0, %v7142_v0, 0.0 }
 0x583   : > { %11360 = vst [vmem:[#allocation22_spill] sm:$0xff] %v11038_v1  ;;  %v6423_v1 = vld [vmem:[#allocation4 + $0x38] sm:$0xe] }
 0x584   : > { %v6431_v15 = vunpack.c.l.bf16 %v6423_v1 }
 0x586   : > { %6690 = vadd.xlane.f32.xlu1 %v6689_v26  ;;  %v7119_v26 = vunpack.c.l.bf16 %v7111_v11  ;;  %v6523_v11 = vrot.slane %v10686_v17, 2  ;;  %v6727_v17 = vrot.slane %v10714_v58, 1  ;;  %v6451_v0 = vmul.f32 %v10781_v37, %v6431_v15 }
 0x588   : > { %v7136_v56 = vmul.f32 %v11044_v57, %v7119_v26  ;;  %v6381_v26 = vsel %vm1074_vm4, %v6379_v4, %v6380_v49  ;;  %v6524_v54 = vsel %vm1116_vm5, %v6522_v61, %v6523_v11  ;;  %v6497_v61 = vsel %vm6453_vm0, %v6451_v0, 0.0 }
 0x58a   : > { %6831 = vadd.xlane.f32.xlu1 %v6830_v28  ;;  %v6946_v28 = vsel %vm1027_vm3, %v6930_v10, 0.0 }
 0x58e   : > { %7028 = vadd.xlane.f32.xlu1 %v7027_v46  ;;  %v7168_v46 = vsel %vm6453_vm0, %v7136_v56, 0.0  ;;  %v6309_v56 = vmul.f32 %v10767_v44, %v11361_v8  ;;  %v6769_v8 = vld [vmem:[#allocation4 + $0x38] sm:$0xe] }
 0x590   : > { %v6354_v31 = vsel %vm6311_vm6, %v6309_v56, 0.0  ;;  %v6777_v56 = vunpack.c.l.bf16 %v6769_v8 }
 0x592   : > { %6947 = vadd.xlane.f32.xlu1 %v6946_v28  ;;  %v6409_v28 = vadd.f32 %v6381_v26, %v10728_v48  ;;  %v6574_v48 = vunpack.c.h.bf16 %v11019_v63  ;;  %v7068_v63 = vrot.slane %v10939_v19, 1  ;;  %v7112_v19 = vld [vmem:[#allocation4 + $0x38] sm:$0xe] }
 0x593   : > { %v11049_v18 = vpop.xlane.xlu1 %6325  ;;  %v11055_v10 = vpop.xlane.xlu0 %6249 }
 0x594   : > { %v6552_v4 = vadd.f32 %v6524_v54, %v6409_v28 }
 0x596   : > { %7169 = vadd.xlane.f32.xlu1 %v7168_v46 }
 0x597   : > { %v11058_v27 = vpop.xlane.xlu1 %6468  ;;  %v6595_v53 = vpop.xlane.xlu0 %6594 }
 0x598   : > { %v6615_v1 = vadd.f32 %v6595_v53, %v6552_v4  ;;  %v6655_v53 = vmul.f32 %v10904_v29, %v6574_v48  ;;  %v11362_v29 = vunpack.c.h.bf16 %v10884_v16  ;;  %v6526_v16 = vrot.slane %v10695_v24, 2 }
 0x59a   : > { %7187 = vadd.xlane.f32.xlu1 %v7186_v2  ;;  %v6588_v2 = vmul.f32 %v10863_v7, %v6574_v48  ;;  %v6997_v48 = vmul.f32 %v10960_v50, %v11362_v29  ;;  %v7212_v29 = vrot.slane %v11003_v33, 2  ;;  %v6529_v33 = vrot.slane %v10697_v42, 2 }
 0x59b   : > { %v6667_v46 = vpop.xlane.xlu1 %6666  ;;  %v6733_v42 = vrot.slane %v10722_v62, 1 }
 0x59c   : > { %v6726_v49 = vrot.slane %v6667_v46, 1  ;;  %v6695_v46 = vsel %vm6311_vm6, %v6655_v53, 0.0 }
 0x59e   : > { %6355 = vadd.xlane.f32.xlu1 %v6354_v31  ;;  %v6728_v44 = vsel %vm1074_vm4, %v6726_v49, %v6727_v17  ;;  %v6608_v31 = vsel %vm1027_vm3, %v6588_v2, 0.0  ;;  %v6796_v49 = vmul.f32 %v10922_v55, %v6777_v56  ;;  %v6382_v55 = vrot.slane %v11049_v18, 1 }
 0x59f   : > { %v6808_v58 = vpop.xlane.xlu1 %6807  ;;  %v6756_v11 = vadd.f32 %v6728_v44, %v6615_v1  ;;  %v7120_v44 = vunpack.c.l.bf16 %v7112_v19  ;;  %v7033_v1 = vsel %vm6311_vm6, %v6997_v48, 0.0  ;;  %vm7625_vm3 = vcmask 60416  }
 0x5a0   : > { %v6867_v26 = vrot.slane %v6808_v58, 2 }
 0x5a1   : > { %v7138_v58 = vmul.f32 %v11044_v57, %v7120_v44 }
 0x5a2   : > { %v6869_v28 = vsel %vm1116_vm5, %v6867_v26, %v6868_v20  ;;  %6498 = vadd.xlane.f32.xlu1 %v6497_v61  ;;  %v6836_v20 = vsel %vm6453_vm0, %v6796_v49, 0.0  ;;  %v6525_v61 = vrot.slane %v11058_v27, 2  ;;  %v6871_v27 = vrot.slane %v10838_v40, 2 }
 0x5a3   : > { %v6897_v37 = vadd.f32 %v6869_v28, %v6756_v11  ;;  %v7005_v15 = vpop.xlane.xlu1 %7004  ;;  %v6383_v11 = vrot.slane %v10615_v60, 1  ;;  %v7174_v2 = vsel %vm6453_vm0, %v7138_v58, 0.0 }
 0x5a4   : > { %v7067_v3 = vrot.slane %v7005_v15, 1  ;;  %v6527_v8 = vsel %vm1116_vm5, %v6525_v61, %v6526_v16  ;;  %v6386_v61 = vrot.slane %v10623_v22, 1 }
 0x5a5   : > { %v6384_v50 = vsel %vm1074_vm4, %v6382_v55, %v6383_v11 }
 0x5a6   : > { %6609 = vadd.xlane.f32.xlu1 %v6608_v31  ;;  %v7069_v7 = vsel %vm1074_vm4, %v7067_v3, %v7068_v63  ;;  %v6410_v57 = vadd.f32 %v6384_v50, %v11055_v10  ;;  %v6730_v63 = vrot.slane %v10716_v30, 1  ;;  %v6253_v31 = vpop.xlane.xlu0 %6252 }
 0x5a7   : > { %v6936_v17 = vpop.xlane.xlu1 %6935 }
 0x5a8   : > { %v6958_v54 = vadd.f32 %v6936_v17, %v10912_v41  ;;  %v6553_v15 = vadd.f32 %v6527_v8, %v6410_v57 }
 0x5aa   : > { %v11082_v4 = vadd.f32 %v7069_v7, %v6958_v54  ;;  %6696 = vadd.xlane.f32.xlu1 %v6695_v46  ;;  %v7071_v54 = vrot.slane %v10945_v21, 1  ;;  %v6939_v49 = vpop.xlane.xlu0 %6938 }
 0x5ab   : > { %v11084_v0 = vpop.xlane.xlu1 %7145  ;;  %v6959_v30 = vadd.f32 %v6939_v49, %v6897_v37  ;;  %v6389_v37 = vrot.slane %v10642_v6, 1 }
 0x5ae   : > { %6837 = vadd.xlane.f32.xlu1 %v6836_v20  ;;  %v8104_v20 = vld [vmem:[#allocation5] ss:$0 sm:$0xff] }
 0x5af   : > { %v6332_v41 = vpop.xlane.xlu1 %6331 }
 0x5b0   : > { %v6385_v11 = vrot.slane %v6332_v41, 1  ;;  %v6532_v41 = vrot.slane %v10699_v12, 2  ;;  %v7074_v12 = vrot.slane %v10951_v23, 1  ;;  %v6392_v23 = vrot.slane %v10657_v14, 1 }
 0x5b2   : > { %7034 = vadd.xlane.f32.xlu1 %v7033_v1  ;;  %v6387_v50 = vsel %vm1074_vm4, %v6385_v11, %v6386_v61 }
 0x5b3   : > { %v6475_v26 = vpop.xlane.xlu1 %6474 }
 0x5b6   : > { %7175 = vadd.xlane.f32.xlu1 %v7174_v2  ;;  %v6528_v2 = vrot.slane %v6475_v26, 2 }
 0x5b7   : > { %v6598_v28 = vpop.xlane.xlu1 %6597 }
 0x5b8   : > { %v6616_v60 = vadd.f32 %v6598_v28, %v6553_v15  ;;  %v6530_v8 = vsel %vm1116_vm5, %v6528_v2, %v6529_v33  ;;  %v6411_v15 = vadd.f32 %v6387_v50, %v6253_v31  ;;  %v6874_v31 = vrot.slane %v10871_v36, 2 }
 0x5ba   : > { %v6554_v22 = vadd.f32 %v6530_v8, %v6411_v15 }
 0x5bb   : > { %v6673_v18 = vpop.xlane.xlu1 %6672 }
 0x5bc   : > { %v6729_v3 = vrot.slane %v6673_v18, 1 }
 0x5be   : > { %v6731_v53 = vsel %vm1074_vm4, %v6729_v3, %v6730_v63 }
 0x5bf   : > { %v6814_v24 = vpop.xlane.xlu1 %6813  ;;  %v6757_v56 = vadd.f32 %v6731_v53, %v6616_v60 }
 0x5c0   : > { %v6870_v17 = vrot.slane %v6814_v24, 2 }
 0x5c2   : > { %v6872_v7 = vsel %vm1116_vm5, %v6870_v17, %v6871_v27  ;;  %v6601_v27 = vpop.xlane.xlu0 %6600 }
 0x5c3   : > { %v7011_v46 = vpop.xlane.xlu1 %7010  ;;  %v6898_v10 = vadd.f32 %v6872_v7, %v6757_v56  ;;  %v6617_v24 = vadd.f32 %v6601_v27, %v6554_v22 }
 0x5c4   : > { %v7070_v19 = vrot.slane %v7011_v46, 1 }
 0x5c6   : > { %v7072_v40 = vsel %vm1074_vm4, %v7070_v19, %v7071_v54 }
 0x5c7   : > { %v7100_v48 = vadd.f32 %v7072_v40, %v6959_v30  ;;  %v7152_v44 = vpop.xlane.xlu1 %7151  ;;  %7255 = vperm.xlu1 %8566, %v8104_v20   ;;  %v7215_v40 = vrot.slane %v11011_v13, 2 }
 0x5c8   : > { %v7211_v1 = vrot.slane %v7152_v44, 2 }
 0x5ca   : > { %v7213_v58 = vsel %vm1116_vm5, %v7211_v1, %v7212_v29 }
 0x5cb   : > { %v11108_v55 = vadd.f32 %v7213_v58, %v7100_v48  ;;  %v6256_v21 = vpop.xlane.xlu1 %6255 }
 0x5cf   : > { %v6338_v16 = vpop.xlane.xlu1 %6337 }
 0x5d0   : > { %v6388_v28 = vrot.slane %v6338_v16, 1  ;;  %v6535_v16 = vrot.slane %v10701_v35, 2  ;;  %v6877_v35 = vrot.slane %v10890_v38, 2 }
 0x5d2   : > { %v6390_v57 = vsel %vm1074_vm4, %v6388_v28, %v6389_v37  ;;  %v6259_v37 = vpop.xlane.xlu0 %6258 }
 0x5d3   : > { %v6481_v18 = vpop.xlane.xlu1 %6480  ;;  %v6412_v63 = vadd.f32 %v6390_v57, %v6256_v21 }
 0x5d4   : > { %v6531_v3 = vrot.slane %v6481_v18, 2 }
 0x5d6   : > { %v6533_v26 = vsel %vm1116_vm5, %v6531_v3, %v6532_v41 }
 0x5d7   : > { %v6679_v60 = vpop.xlane.xlu1 %6678  ;;  %v6555_v6 = vadd.f32 %v6533_v26, %v6412_v63  ;;  %v6736_v63 = vrot.slane %v10734_v52, 1 }
 0x5d8   : > { %v6732_v53 = vrot.slane %v6679_v60, 1 }
 0x5da   : > { %v6734_v56 = vsel %vm1074_vm4, %v6732_v53, %v6733_v42  ;;  %v7077_v53 = vrot.slane %v10963_v45, 1  ;;  %v6739_v45 = vrot.slane %v10745_v9, 1 }
 0x5db   : > { %v6758_v17 = vadd.f32 %v6734_v56, %v6617_v24  ;;  %v6820_v54 = vpop.xlane.xlu1 %6819 }
 0x5dc   : > { %v6873_v7 = vrot.slane %v6820_v54, 2 }
 0x5de   : > { %v6875_v46 = vsel %vm1116_vm5, %v6873_v7, %v6874_v31 }
 0x5df   : > { %v6899_v49 = vadd.f32 %v6875_v46, %v6758_v17  ;;  %v7017_v19 = vpop.xlane.xlu1 %7016  ;;  %v7218_v17 = vrot.slane %v11021_v25, 2 }
 0x5e0   : > { %v7073_v20 = vrot.slane %v7017_v19, 1 }
 0x5e2   : > { %v7075_v30 = vsel %vm1074_vm4, %v7073_v20, %v7074_v12 }
 0x5e3   : > { %v6942_v62 = vpop.xlane.xlu1 %6941 }
 0x5e4   : > { %v6960_v29 = vadd.f32 %v6942_v62, %v6898_v10 }
 0x5e6   : > { %v7101_v48 = vadd.f32 %v7075_v30, %v6960_v29 }
 0x5e7   : > { %v7158_v44 = vpop.xlane.xlu1 %7157 }
 0x5e8   : > { %v7214_v1 = vrot.slane %v7158_v44, 2  ;;  %v6880_v44 = vrot.slane %v10910_v59, 2 }
 0x5ea   : > { %v7216_v58 = vsel %vm1116_vm5, %v7214_v1, %v7215_v40 }
 0x5eb   : > { %v11126_v36 = vadd.f32 %v7216_v58, %v7101_v48  ;;  %v6344_v21 = vpop.xlane.xlu1 %6343 }
 0x5ec   : > { %v6391_v11 = vrot.slane %v6344_v21, 1 }
 0x5ee   : > { %v6393_v61 = vsel %vm1074_vm4, %v6391_v11, %v6392_v23 }
 0x5ef   : > { %v6487_v2 = vpop.xlane.xlu1 %6486  ;;  %v6413_v33 = vadd.f32 %v6393_v61, %v6259_v37  ;;  %v7534_v57 = vpop.f32.mrb[110].mxu0  ;;  %v7080_v61 = vrot.slane %v10967_v43, 1 }
 0x5f0   : > { %v6534_v10 = vrot.slane %v6487_v2, 2  ;;  %v8547_v18 = vpop.f32.mrb[111].mxu0 }
 0x5f2   : > { %v6536_v13 = vsel %vm1116_vm5, %v6534_v10, %v6535_v16 }
 0x5f3   : > { %v6556_v50 = vadd.f32 %v6536_v13, %v6413_v33  ;;  %v6604_v28 = vpop.xlane.xlu1 %6603  ;;  %v7459_v13 = vld [vmem:[%s11288_s15] sm:$0x1] }
 0x5f4   : > { %v6618_v8 = vadd.f32 %v6604_v28, %v6555_v6  ;;  %v6945_v6 = vpop.xlane.xlu0 %6944 }
 0x5f5   : > { %v6961_v56 = vadd.f32 %v6945_v6, %v6899_v49 }
 0x5f7   : > { %v6685_v15 = vpop.xlane.xlu1 %6684 }
 0x5f8   : > { %v6735_v14 = vrot.slane %v6685_v15, 1  ;;  %v6607_v62 = vpop.xlane.xlu0 %6606  ;;  %v7535_v15 = vadd.f32 %v7534_v57, %v7459_v13  ;;  %v11371_v13 = vld [vmem:[#allocation12_spill] sm:$0xff] }
 0x5f9   : > { %v6619_v49 = vadd.f32 %v6607_v62, %v6556_v50  ;;  %v6398_v50 = vrot.slane %v10672_v34, 1 }
 0x5fa   : > { %v6737_v41 = vsel %vm1074_vm4, %v6735_v14, %v6736_v63  ;;  %v6395_v63 = vrot.slane %v10665_v5, 1  ;;  %v6541_v14 = vrot.slane %v10705_v39, 2  ;;  %v8116_v57 = vmul.f32 -2.0, %v7535_v15  ;;  %v11364_v39 = vld [vmem:[#allocation16_spill] sm:$0xff]  ;;  %v11373_v15 = vld [vmem:[#allocation15_spill] sm:$0xff] }
 0x5fb   : > { %v6826_v3 = vpop.xlane.xlu1 %6825  ;;  %v6759_v22 = vadd.f32 %v6737_v41, %v6618_v8  ;;  %v6886_v5 = vrot.slane %v10935_v47, 2  ;;  %v11368_v47 = vld [vmem:[#allocation18_spill] sm:$0xff] }
 0x5fc   : > { %v6876_v26 = vrot.slane %v6826_v3, 2  ;;  %v6265_v41 = vpop.xlane.xlu0 %6264 }
 0x5fe   : > { %v6878_v60 = vsel %vm1116_vm5, %v6876_v26, %v6877_v35  ;;  %v6538_v35 = vrot.slane %v10703_v32, 2  ;;  %v6745_v26 = vrot.slane %v10789_v51, 1 }
 0x5ff   : > { %v7023_v42 = vpop.xlane.xlu1 %7022  ;;  %v6900_v27 = vadd.f32 %v6878_v60, %v6759_v22 }
 0x600   : > { %v7076_v24 = vrot.slane %v7023_v42, 1  ;;  %v11363_v42 = vld [vmem:[#allocation9_spill] sm:$0xff] }
 0x601   : > { %v6744_v34 = vrot.slane %v11363_v42, 1  ;;  %v11375_v42 = vld [vmem:[#allocation19_spill] sm:$0xff] }
 0x602   : > { %v7078_v52 = vsel %vm1074_vm4, %v7076_v24, %v7077_v53 }
 0x603   : > { %v7102_v54 = vadd.f32 %v7078_v52, %v6961_v56  ;;  %v7164_v31 = vpop.xlane.xlu1 %7163  ;;  %v6885_v56 = vrot.slane %v11364_v39, 2  ;;  %v11365_v52 = vld [vmem:[#allocation6_spill] sm:$0xff]  ;;  %v6746_v51 = vsel %vm1074_vm4, %v6744_v34, %v6745_v26 }
 0x604   : > { %v7217_v7 = vrot.slane %v7164_v31, 2  ;;  %v7540_v31 = vmul.f32 1.442695, %v8116_v57  ;;  %v11376_v57 = vld [vmem:[#allocation20_spill] sm:$0xff] }
 0x606   : > { %v7219_v12 = vsel %vm1116_vm5, %v7217_v7, %v7218_v17  ;;  %v11366_v7 = vld [vmem:[#allocation7_spill] sm:$0xff]  ;;  %8641 = vpow2.f32 %v7540_v31 }
 0x607   : > { %v11140_v38 = vadd.f32 %v7219_v12, %v7102_v54  ;;  %v6262_v46 = vpop.xlane.xlu1 %6261  ;;  %v6742_v12 = vrot.slane %v11366_v7, 1 }
 0x60b   : > { %v6350_v19 = vpop.xlane.xlu1 %6349 }
 0x60c   : > { %v6394_v8 = vrot.slane %v6350_v19, 1 }
 0x60f   : > { %v6493_v20 = vpop.xlane.xlu1 %6492 }
 0x610   : > { %v6537_v3 = vrot.slane %v6493_v20, 2 }
 0x612   : > { %v6539_v17 = vsel %vm1116_vm5, %v6537_v3, %v6538_v35  ;;  %v11374_v3 = vld [vmem:[#allocation11_spill] sm:$0xff] }
 0x613   : > { %v6691_v30 = vpop.xlane.xlu1 %6690 }
 0x614   : > { %v6738_v29 = vrot.slane %v6691_v30, 1 }
 0x616   : > { %v6740_v25 = vsel %vm1074_vm4, %v6738_v29, %v6739_v45  ;;  %v11367_v45 = vld [vmem:[#allocation13_spill] sm:$0xff]  ;;  %v6887_v29 = vsel %vm1116_vm5, %v6885_v56, %v6886_v5 }
 0x617   : > { %v6760_v40 = vadd.f32 %v6740_v25, %v6619_v49  ;;  %v6832_v48 = vpop.xlane.xlu1 %6831  ;;  %v7089_v62 = vrot.slane %v11367_v45, 1  ;;  %v7088_v49 = vrot.slane %v11368_v47, 1 }
 0x618   : > { %v6879_v1 = vrot.slane %v6832_v48, 2 }
 0x61a   : > { %v6881_v58 = vsel %vm1116_vm5, %v6879_v1, %v6880_v44  ;;  %v7185_v44 = vpop.xlane.xlu0 %7184  ;;  %v11369_v1 = vld [vmem:[#allocation14_spill] sm:$0xff] }
 0x61b   : > { %v11146_v21 = vadd.f32 %v6881_v58, %v6760_v40  ;;  %v7029_v23 = vpop.xlane.xlu1 %7028  ;;  %v7227_v31 = vrot.slane %v7185_v44, 2 }
 0x61c   : > { %v7079_v11 = vrot.slane %v7029_v23, 1 }
 0x61e   : > { %v7081_v16 = vsel %vm1074_vm4, %v7079_v11, %v7080_v61  ;;  %v11370_v61 = vld [vmem:[#allocation10_spill] sm:$0xff]  ;;  %v6951_v35 = vpop.xlane.xlu0 %6950 }
 0x61f   : > { %v6948_v2 = vpop.xlane.xlu1 %6947 }
 0x620   : > { %v6962_v9 = vadd.f32 %v6948_v2, %v6900_v27  ;;  %v6396_v27 = vsel %vm1074_vm4, %v6394_v8, %v6395_v63  ;;  %v6883_v2 = vrot.slane %v11370_v61, 2  ;;  %v7208_v63 = vrot.slane %v11084_v0, 2 }
 0x621   : > { %v6414_v54 = vadd.f32 %v6396_v27, %v6262_v46  ;;  %v6963_v27 = vadd.f32 %v6951_v35, %v11146_v21 }
 0x622   : > { %v11150_v37 = vadd.f32 %v7081_v16, %v6962_v9  ;;  %v7090_v9 = vsel %vm1074_vm4, %v7088_v49, %v7089_v62 }
 0x623   : > { %v11152_v10 = vpop.xlane.xlu1 %7169  ;;  %v6557_v20 = vadd.f32 %v6539_v17, %v6414_v54  ;;  %v8642_v17 = vpop.eup %8641 }
 0x624   : > { %v7220_v26 = vrot.slane %v11152_v10, 2 }
 0x627   : > { %v11154_v33 = vpop.xlane.xlu1 %7187 }
 0x62b   : > { %v6356_v59 = vpop.xlane.xlu1 %6355 }
 0x62c   : > { %v6397_v28 = vrot.slane %v6356_v59, 1 }
 0x62e   : > { %v6399_v43 = vsel %vm1074_vm4, %v6397_v28, %v6398_v50  ;;  %v7086_v50 = vrot.slane %v11371_v13, 1  ;;  %v11372_v28 = vld [vmem:[#allocation17_spill] sm:$0xff] }
 0x62f   : > { %v6499_v18 = vpop.xlane.xlu1 %6498  ;;  %v6415_v60 = vadd.f32 %v6399_v43, %v6265_v41  ;;  %v7085_v8 = vrot.slane %v11372_v28, 1 }
 0x630   : > { %v6540_v22 = vrot.slane %v6499_v18, 2  ;;  %v7209_v18 = vrot.slane %v11373_v15, 2 }
 0x632   : > { %v6542_v53 = vsel %vm1116_vm5, %v6540_v22, %v6541_v14  ;;  %v7083_v22 = vrot.slane %v11374_v3, 1  ;;  %v7210_v0 = vsel %vm1116_vm5, %v7208_v63, %v7209_v18 }
 0x633   : > { %v6558_v6 = vadd.f32 %v6542_v53, %v6415_v60  ;;  %v6610_v24 = vpop.xlane.xlu1 %6609  ;;  %v7087_v53 = vsel %vm1074_vm4, %v7085_v8, %v7086_v50 }
 0x634   : > { %v6620_v48 = vadd.f32 %v6610_v24, %v6557_v20 }
 0x635   : > { %v6621_v32 = vadd.f32 %v11365_v52, %v6558_v6  ;;  %v7221_v6 = vrot.slane %v11376_v57, 2  ;;  %v11377_v52 = vld [vmem:[#allocation22_spill] sm:$0xff] }
 0x637   : > { %v6762_v19 = vadd.f32 %v6746_v51, %v6621_v32  ;;  %v6697_v30 = vpop.xlane.xlu1 %6696  ;;  %v7224_v32 = vrot.slane %v11377_v52, 2  ;;  %v7222_v10 = vsel %vm1116_vm5, %v7220_v26, %v7221_v6  ;;  %v7240_v51 = vadd.f32 %v7210_v0, %v11082_v4 }
 0x638   : > { %v6741_v25 = vrot.slane %v6697_v30, 1  ;;  %v7244_v7 = vadd.f32 %v7222_v10, %v11150_v37 }
 0x639   : > { %v6903_v40 = vadd.f32 %v6887_v29, %v6762_v19  ;;  %v7542_v19 = vadd.f32 1.0, %v8642_v17  ;;  %v11378_v29 = vld [vmem:[#allocation21_spill] sm:$0xff] }
 0x63a   : > { %v6743_v46 = vsel %vm1074_vm4, %v6741_v25, %v6742_v12  ;;  %v7226_v47 = vrot.slane %v11378_v29, 2 }
 0x63b   : > { %v6965_v58 = vadd.f32 %v11369_v1, %v6903_v40  ;;  %v6761_v23 = vadd.f32 %v6743_v46, %v6620_v48  ;;  %v6838_v11 = vpop.xlane.xlu1 %6837  ;;  %8643 = vrcp.f32 %v7542_v19  ;;  %v7191_v46 = vpop.xlane.xlu0 %7190 }
 0x63c   : > { %v6882_v16 = vrot.slane %v6838_v11, 2  ;;  %v7228_v44 = vsel %vm1116_vm5, %v7226_v47, %v7227_v31  ;;  %v7550_v31 = vld [vmem:[%s11213_s30 + $0x14] sm:$0xf] }
 0x63d   : > { %v7106_v59 = vadd.f32 %v7090_v9, %v6965_v58  ;;  %v7230_v58 = vrot.slane %v7191_v46, 2 }
 0x63e   : > { %v6884_v43 = vsel %vm1116_vm5, %v6882_v16, %v6883_v2 }
 0x63f   : > { %v6902_v14 = vadd.f32 %v6884_v43, %v6761_v23  ;;  %v7035_v41 = vpop.xlane.xlu1 %7034 }
 0x640   : > { %v7082_v60 = vrot.slane %v7035_v41, 1 }
 0x641   : > { %v6964_v34 = vadd.f32 %v11375_v42, %v6902_v14 }
 0x642   : > { %v7084_v24 = vsel %vm1074_vm4, %v7082_v60, %v7083_v22  ;;  %v11379_v22 = vld [vmem:[#allocation8_spill] sm:$0xff]  ;;  %vm7666_vm4 = vcmask 126016  }
 0x643   : > { %v7105_v5 = vadd.f32 %v7087_v53, %v6964_v34  ;;  %v7104_v39 = vadd.f32 %v7084_v24, %v6963_v27  ;;  %v7176_v56 = vpop.xlane.xlu1 %7175  ;;  %v7615_v35 = vsub.s32 0, %v11379_v22  ;;  %v7546_v24 = vld [vmem:[%s11213_s30 + $0x4] sm:$0xf] }
 0x644   : > { %v7223_v54 = vrot.slane %v7176_v56, 2 }
 0x645   : > { %v7246_v1 = vadd.f32 %v7228_v44, %v7105_v5  ;;  %v8644_v16 = vpop.eup %8643 }
 0x646   : > { %v7225_v21 = vsel %vm1116_vm5, %v7223_v54, %v7224_v32  ;;  %v7609_v14 = vpack.c.bf16 %v8644_v16, %v8644_v16  ;;  %v7548_v32 = vld [vmem:[%s11213_s30 + $0xc] sm:$0xf] }
 0x647   : > { %v7256_v12 = vpop.permute.xlu1 %7255  ;;  %v7245_v49 = vadd.f32 %v7225_v21, %v7104_v39 }
 0x648   : > { %v7259_v20 = vadd.f32 %v7256_v12, %v11108_v55  ;;  %v7258_v30 = vadd.f32 %v7256_v12, %v7240_v51  ;;  %v7260_v45 = vadd.f32 %v7256_v12, %v11126_v36  ;;  %v7261_v62 = vadd.f32 %v7256_v12, %v11140_v38 }
 0x649   : > { %v7262_v48 = vadd.f32 %v7256_v12, %v7244_v7  ;;  %v7263_v36 = vadd.f32 %v7256_v12, %v7245_v49  ;;  %v7229_v38 = vrot.slane %v11154_v33, 2  ;;  %v7264_v23 = vadd.f32 %v7256_v12, %v7246_v1  ;;  %v7551_v1 = vld [vmem:[%s11213_s30 + $0x18] sm:$0xf] }
 0x64a   : > { %v8106_v25 = vmul.f32 -1.442695, %v7259_v20  ;;  %v8105_v40 = vmul.f32 -1.442695, %v7258_v30  ;;  %v8107_v4 = vmul.f32 -1.442695, %v7260_v45  ;;  %v7611_v3 = vpack.i.b16 %v7609_v14, %v7609_v14 }
 0x64b   : > { %v8108_v37 = vmul.f32 -1.442695, %v7261_v62  ;;  %v8109_v55 = vmul.f32 -1.442695, %v7262_v48  ;;  %v8110_v11 = vmul.f32 -1.442695, %v7263_v36  ;;  %v7231_v61 = vsel %vm1116_vm5, %v7229_v38, %v7230_v58 }
 0x64c   : > { %8645 = vpow2.f32 %v8106_v25  ;;  %v8111_v2 = vmul.f32 -1.442695, %v7264_v23  ;;  %v7247_v9 = vadd.f32 %v7231_v61, %v7106_v59  ;;  %v7616_v27 = vrot.slane %v7611_v3, %v7615_v35  ;;  %v7552_v20 = vld [vmem:[%s11213_s30 + $0x1c] sm:$0xf]  ;;  %v7545_v25 = vld [vmem:[%s11213_s30] sm:$0xf] }
 0x64d   : > { %8647 = vpow2.f32 %v8105_v40  ;;  %v7547_v48 = vld [vmem:[%s11213_s30 + $0x8] sm:$0xf] }
 0x64e   : > { %8649 = vpow2.f32 %v8107_v4  ;;  %v7265_v50 = vadd.f32 %v7256_v12, %v7247_v9  ;;  %v7618_v56 = vmul.bf16 %v7616_v27, %v7546_v24  ;;  %v7620_v51 = vmul.bf16 %v7616_v27, %v7548_v32 }
 0x64f   : > { %8651 = vpow2.f32 %v8108_v37  ;;  %v7622_v12 = vmul.bf16 %v7616_v27, %v7550_v31  ;;  %v7624_v45 = vmul.bf16 %v7616_v27, %v7552_v20  ;;  %v7617_v4 = vmul.bf16 %v7616_v27, %v7545_v25  ;;  %v7549_v37 = vld [vmem:[%s11213_s30 + $0x10] sm:$0xf] }
 0x650   : > { %8653 = vpow2.f32 %v8109_v55  ;;  %v8112_v63 = vmul.f32 -1.442695, %v7265_v50  ;;  %v7619_v44 = vmul.bf16 %v7616_v27, %v7547_v48  ;;  %v7621_v46 = vmul.bf16 %v7616_v27, %v7549_v37 }
 0x651   : > { %8655 = vpow2.f32 %v8110_v11  ;;  %v7623_v55 = vmul.bf16 %v7616_v27, %v7551_v1 }
 0x652   : > { %8657 = vpow2.f32 %v8111_v2 }
 0x656   : > { %v8646_v13 = vpop.eup %8645 }
 0x657   : > { %v8648_v28 = vpop.eup %8647  ;;  %v7291_v8 = vadd.f32 1.0, %v8646_v13 }
 0x658   : > { %v8650_v43 = vpop.eup %8649  ;;  %v7290_v15 = vadd.f32 1.0, %v8648_v28 }
 0x659   : > { %v8652_v33 = vpop.eup %8651  ;;  %8659 = vrcp.f32 %v7291_v8  ;;  %v7292_v18 = vadd.f32 1.0, %v8650_v43 }
 0x65a   : > { %8661 = vrcp.f32 %v7290_v15  ;;  %v7293_v41 = vadd.f32 1.0, %v8652_v33  ;;  %v8654_v59 = vpop.eup %8653 }
 0x65b   : > { %8663 = vrcp.f32 %v7292_v18  ;;  %v7294_v26 = vadd.f32 1.0, %v8654_v59  ;;  %v8656_v60 = vpop.eup %8655 }
 0x65c   : > { %8665 = vpow2.f32 %v8112_v63  ;;  %v8658_v42 = vpop.eup %8657  ;;  %v7295_v53 = vadd.f32 1.0, %v8656_v60 }
 0x65d   : > { %8667 = vrcp.f32 %v7293_v41  ;;  %v7296_v39 = vadd.f32 1.0, %v8658_v42 }
 0x65e   : > { %8669 = vrcp.f32 %v7294_v26 }
 0x65f   : > { %8671 = vrcp.f32 %v7295_v53 }
 0x660   : > { %8673 = vrcp.f32 %v7296_v39 }
 0x663   : > { %v8660_v34 = vpop.eup %8659 }
 0x664   : > { %v8662_v57 = vpop.eup %8661  ;;  %v7554_v6 = vpack.c.bf16 %v8660_v34, %v8660_v34 }
 0x665   : > { %v8664_v0 = vpop.eup %8663  ;;  %v7553_v5 = vpack.c.bf16 %v8662_v57, %v8662_v57 }
 0x666   : > { %7568 = vperm.xlu1 %8566, %v7554_v6   ;;  %v8666_v17 = vpop.eup %8665  ;;  %v7555_v52 = vpack.c.bf16 %v8664_v0, %v8664_v0 }
 0x667   : > { %7563 = vperm.xlu0 %8567, %v7553_v5   ;;  %v8668_v10 = vpop.eup %8667  ;;  %v7297_v54 = vadd.f32 1.0, %v8666_v17 }
 0x668   : > { %v7556_v21 = vpack.c.bf16 %v8668_v10, %v8668_v10  ;;  %v8670_v7 = vpop.eup %8669 }
 0x669   : > { %8675 = vrcp.f32 %v7297_v54  ;;  %v7557_v19 = vpack.c.bf16 %v8670_v7, %v8670_v7  ;;  %v8672_v30 = vpop.eup %8671 }
 0x66a   : > { %7573 = vperm.xlu1 %8566, %v7555_v52   ;;  %v7558_v62 = vpack.c.bf16 %v8672_v30, %v8672_v30  ;;  %v8674_v29 = vpop.eup %8673 }
 0x66b   : > { %7644 = vrot.lane.b32.xlu0 %v7618_v56, %s8702_s18  ;;  %v7559_v47 = vpack.c.bf16 %v8674_v29, %v8674_v29 }
 0x66e   : > { %7578 = vperm.xlu1 %8566, %v7556_v21  }
 0x66f   : > { %7648 = vrot.lane.b32.xlu0 %v7620_v51, %s8702_s18 }
 0x672   : > { %7583 = vperm.xlu1 %8566, %v7557_v19  }
 0x673   : > { %7652 = vrot.lane.b32.xlu0 %v7622_v12, %s8702_s18  ;;  %v8676_v49 = vpop.eup %8675 }
 0x674   : > { %v7560_v40 = vpack.c.bf16 %v8676_v49, %v8676_v49 }
 0x676   : > { %7588 = vperm.xlu1 %8566, %v7558_v62  }
 0x677   : > { %7656 = vrot.lane.b32.xlu0 %v7624_v45, %s8702_s18 }
 0x67a   : > { %7593 = vperm.xlu1 %8566, %v7559_v47  }
 0x67e   : > { %7598 = vperm.xlu1 %8566, %v7560_v40  }
 0x682   : > { %7642 = vrot.lane.b32.xlu1 %v7617_v4, %s8702_s18 }
 0x686   : > { %7646 = vrot.lane.b32.xlu1 %v7619_v44, %s8702_s18 }
 0x68a   : > { %7650 = vrot.lane.b32.xlu1 %v7621_v46, %s8702_s18 }
 0x68e   : > { %7654 = vrot.lane.b32.xlu1 %v7623_v55, %s8702_s18 }
 0x6e5   : > { %v7569_v36 = vpop.permute.xlu1 %7568 }
 0x6e6   : > { %v7602_v38 = vmul.bf16 %v7569_v36, %v7546_v24  ;;  %v7564_v58 = vpop.permute.xlu0 %7563 }
 0x6e7   : > { %v7601_v23 = vmul.bf16 %v7564_v58, %v7545_v25 }
 0x6e8   : > { %7627 = vst.msk [vmem:[%s11236_s21 + $0x4] sm:$0xf] %vm7625_vm3, %v7602_v38 }
 0x6e9   : > { %7626 = vst.msk [vmem:[%s11236_s21] sm:$0xf] %vm7625_vm3, %v7601_v23  ;;  %v7574_v11 = vpop.permute.xlu1 %7573 }
 0x6ea   : > { %v7603_v61 = vmul.bf16 %v7574_v11, %v7547_v48  ;;  %v7645_v2 = vpop.permute.xlu0 %7644 }
 0x6eb   : > { %7668 = vst.msk [vmem:[%s11236_s21 + $0x4] sm:$0xf] %vm7666_vm4, %v7645_v2 }
 0x6ec   : > { %7628 = vst.msk [vmem:[%s11236_s21 + $0x8] sm:$0xf] %vm7625_vm3, %v7603_v61 }
 0x6ed   : > { %v7579_v9 = vpop.permute.xlu1 %7578 }
 0x6ee   : > { %v7604_v16 = vmul.bf16 %v7579_v9, %v7548_v32  ;;  %v7649_v13 = vpop.permute.xlu0 %7648 }
 0x6f0   : > { %7629 = vst.msk [vmem:[%s11236_s21 + $0xc] sm:$0xf] %vm7625_vm3, %v7604_v16 }
 0x6f1   : > { %v7584_v50 = vpop.permute.xlu1 %7583  ;;  %7670 = vst.msk [vmem:[%s11236_s21 + $0xc] sm:$0xf] %vm7666_vm4, %v7649_v13 }
 0x6f2   : > { %v7605_v28 = vmul.bf16 %v7584_v50, %v7549_v37  ;;  %v7653_v15 = vpop.permute.xlu0 %7652 }
 0x6f4   : > { %7630 = vst.msk [vmem:[%s11236_s21 + $0x10] sm:$0xf] %vm7625_vm3, %v7605_v28 }
 0x6f5   : > { %v7589_v8 = vpop.permute.xlu1 %7588 }
 0x6f6   : > { %v7606_v43 = vmul.bf16 %v7589_v8, %v7550_v31  ;;  %v7657_v41 = vpop.permute.xlu0 %7656 }
 0x6f8   : > { %7631 = vst.msk [vmem:[%s11236_s21 + $0x14] sm:$0xf] %vm7625_vm3, %v7606_v43 }
 0x6f9   : > { %v7594_v33 = vpop.permute.xlu1 %7593  ;;  %7672 = vst.msk [vmem:[%s11236_s21 + $0x14] sm:$0xf] %vm7666_vm4, %v7653_v15 }
 0x6fa   : > { %v7607_v18 = vmul.bf16 %v7594_v33, %v7551_v1 }
 0x6fc   : > { %7632 = vst.msk [vmem:[%s11236_s21 + $0x18] sm:$0xf] %vm7625_vm3, %v7607_v18 }
 0x6fd   : > { %v7599_v63 = vpop.permute.xlu1 %7598 }
 0x6fe   : > { %v7608_v14 = vmul.bf16 %v7599_v63, %v7552_v20 }
 0x700   : > { %7633 = vst.msk [vmem:[%s11236_s21 + $0x1c] sm:$0xf] %vm7625_vm3, %v7608_v14 }
 0x701   : > { %7674 = vst.msk [vmem:[%s11236_s21 + $0x1c] sm:$0xf] %vm7666_vm4, %v7657_v41  ;;  %v7643_v59 = vpop.permute.xlu1 %7642 }
 0x702   : > { %7667 = vst.msk [vmem:[%s11236_s21] sm:$0xf] %vm7666_vm4, %v7643_v59 }
 0x705   : > { %v7647_v3 = vpop.permute.xlu1 %7646 }
 0x706   : > { %7669 = vst.msk [vmem:[%s11236_s21 + $0x8] sm:$0xf] %vm7666_vm4, %v7647_v3 }
 0x709   : > { %v7651_v22 = vpop.permute.xlu1 %7650 }
 0x70a   : > { %7671 = vst.msk [vmem:[%s11236_s21 + $0x10] sm:$0xf] %vm7666_vm4, %v7651_v22 }
 0x70d   : > { %v7655_v35 = vpop.permute.xlu1 %7654 }
 0x70e   : > { %7673 = vst.msk [vmem:[%s11236_s21 + $0x18] sm:$0xf] %vm7666_vm4, %v7655_v35 }
 0x70f PF: > { %s28_s23 = sadd.s32 1, %s8692_s23  }
 0x710   : > { %p25_p4 = scmp.ge.s32.totalorder %s28_s23, 4  }
 0x712   :  { %27 = sbr.rel (!%p25_p4) target bundleno = 3 (0x3), region = 145 }

</bundles_post_ra>
